<compile_context>
chip_gen: v6e
topology: v6e:2x2x1
jax: 0.10.0
libtpu: 0.0.40
codegen_flags: <defaults>
</compile_context>

<pallas_src>
import math

import jax
import jax.numpy as jnp
from jax.experimental import pallas as pl
from jax.experimental.pallas import tpu as pltpu


def _round_up(x, m):
    return ((x + m - 1) // m) * m


# ----------------------------------------------------------------------------
# Static layer configuration (order == order weights are packed / applied)
# ----------------------------------------------------------------------------
def _encoder_conv_specs(in_channels, num_hiddens, num_residual_layers,
                        num_residual_hiddens):
    specs = [
        dict(k=3, stride=1, pad=1, c_in=in_channels, c_out=num_hiddens),   # _conv_1
        dict(k=3, stride=1, pad=1, c_in=num_hiddens, c_out=num_hiddens),   # _conv_2
    ]
    for _ in range(4):                                                     # 4 DownscaleBlocks
        specs.append(dict(k=4, stride=2, pad=2, c_in=num_hiddens, c_out=num_hiddens))  # _conv_3
        specs.append(dict(k=3, stride=1, pad=1, c_in=num_hiddens, c_out=num_hiddens))  # _conv_4
        specs.append(dict(k=3, stride=1, pad=1, c_in=num_hiddens, c_out=num_hiddens))  # _conv_5
    for _ in range(num_residual_layers):                                   # ResidualStack
        specs.append(dict(k=3, stride=1, pad=1,
                          c_in=num_hiddens, c_out=num_residual_hiddens))   # res conv_1
        specs.append(dict(k=1, stride=1, pad=0,
                          c_in=num_residual_hiddens, c_out=num_hiddens))   # res conv_2
    return specs


def _layer_geometry(specs, length):
    """Per-layer lengths + scratch sizing maxima (all static)."""
    geom = []
    l = length
    lp_max, rb_max = 8, 8
    for s in specs:
        l_pad = l + 2 * s["pad"]
        l_out = (l_pad - s["k"]) // s["stride"] + 1
        lp = _round_up(l_pad, 8)          # per-element row pitch in xin scratch
        rb = _round_up(l_out, 8)          # per-element row pitch in im2col scratch
        geom.append(dict(l_in=l, l_pad=l_pad, l_out=l_out, lp=lp, rb=rb))
        lp_max, rb_max = max(lp_max, lp), max(rb_max, rb)
        l = l_out
    return geom, lp_max, rb_max, l


# ----------------------------------------------------------------------------
# Fused mega-kernel
# ----------------------------------------------------------------------------
def _make_encoder_kernel(specs, geom, w_offsets, nb, num_residual_layers):
    n_conv = len(specs)

    def kernel(x_ref, w_ref, b_ref, out_ref, xin_ref, col_ref):
        # Hygiene: filler rows between l_out and the 8-row pitch enter the
        # matmul (their outputs are never read back); keep them finite.
        col_ref[...] = jnp.zeros(col_ref.shape, col_ref.dtype)

        state = {"i": 0}

        def conv(xs, in_relu=False, out_relu=False):
            """One Conv1d over all nb batch elements with ONE MXU matmul."""
            i = state["i"]
            state["i"] += 1
            s, g = specs[i], geom[i]
            k, stride, pad = s["k"], s["stride"], s["pad"]
            c_in, c_out = s["c_in"], s["c_out"]
            l, l_out = g["l_in"], g["l_out"]
            LP, RB = g["lp"], g["rb"]
            kc = k * c_in

            # -- stage the zero-padded inputs (per batch element) -------------
            for bi in range(nb):
                row0 = bi * LP
                xb = xs[bi]
                if in_relu:
                    xb = jnp.maximum(xb, 0.0)
                if pad > 0:
                    z = jnp.zeros((pad, c_in), jnp.float32)
                    xin_ref[pl.ds(row0, pad), 0:c_in] = z
                    xin_ref[pl.ds(row0 + pad + l, pad), 0:c_in] = z
                xin_ref[pl.ds(row0 + pad, l), 0:c_in] = xb

            # -- build the lane-dense im2col matrix ---------------------------
            # row (bi, j), lanes [kk*c_in:(kk+1)*c_in) = xpad[bi, stride*j + kk, :]
            for bi in range(nb):
                src0, dst0 = bi * LP, bi * RB
                for kk in range(k):
                    if stride == 1:
                        v = xin_ref[pl.ds(src0 + kk, l_out), 0:c_in]
                    else:  # strided gather: only the needed output rows
                        v = xin_ref[pl.ds(src0 + kk, l_out, stride=stride), 0:c_in]
                    col_ref[pl.ds(dst0, l_out), kk * c_in:(kk + 1) * c_in] = v

            # -- ONE matmul per conv (contraction dim = k*c_in = 96/128) ------
            rows = nb * RB
            w = w_ref[pl.ds(w_offsets[i], kc), 0:c_out].astype(jnp.float32)
            cols = col_ref[pl.ds(0, rows), 0:kc]
            y = jnp.dot(cols, w, preferred_element_type=jnp.float32)
            y = y + b_ref[i:i + 1, 0:c_out]
            if out_relu:
                y = jnp.maximum(y, 0.0)
            return [y[bi * RB: bi * RB + l_out, :] for bi in range(nb)]

        def add(a, b):
            return [aa + bb for aa, bb in zip(a, b)]

        x = [x_ref[bi] for bi in range(nb)]                 # (L0, C_in) each

        # x_conv_1 = relu(conv_1(inputs)); x = relu(conv_2(x_conv_1)) + x_conv_1
        x1 = conv(x, out_relu=True)
        x = add(conv(x1, out_relu=True), x1)
        # 4 DownscaleBlocks
        for _ in range(4):
            x3 = conv(x, out_relu=True)                     # relu(conv_3(x)) k4 s2 p2
            x4 = add(conv(x3, out_relu=True), x3)           # relu(conv_4(.)) + x3
            x = add(conv(x4, out_relu=True), x4)            # relu(conv_5(.)) + x4
        # ResidualStack + encoder-level skip: x = relu(stack(x)) + x
        x_pre = x
        for _ in range(num_residual_layers):
            h = conv(x, in_relu=True)                       # conv_r1(relu(x))
            x = add(conv(h, in_relu=True), x)               # x + conv_r2(relu(h))
        for bi in range(nb):
            out_ref[bi] = (jnp.maximum(x[bi], 0.0) + x_pre[bi]).astype(out_ref.dtype)

        assert state["i"] == n_conv

    return kernel


# ----------------------------------------------------------------------------
# Parameter init (PyTorch default Conv1d init; weights packed for the kernel)
# ----------------------------------------------------------------------------
def init_encoder_params(key, in_channels, num_hiddens, num_residual_layers,
                        num_residual_hiddens):
    specs = _encoder_conv_specs(in_channels, num_hiddens, num_residual_layers,
                                num_residual_hiddens)
    keys = jax.random.split(key, 2 * len(specs))
    convs = []
    for i, s in enumerate(specs):
        bound = 1.0 / math.sqrt(s["c_in"] * s["k"])
        w = jax.random.uniform(keys[2 * i], (s["k"], s["c_in"], s["c_out"]),
                               jnp.float32, -bound, bound)
        # The kernel stores weights in bf16 (MXU-native). Round once here so
        # the pure-JAX reference uses bit-identical weights.
        w = w.astype(jnp.bfloat16).astype(jnp.float32)
        b = jax.random.uniform(keys[2 * i + 1], (s["c_out"],),
                               jnp.float32, -bound, bound)
        convs.append((w, b))

    n_conv = len(specs)
    c_out_max = max(s["c_out"] for s in specs)

    # Pack all weights (reshaped to (k*c_in, c_out)) into ONE array with
    # 16-aligned row offsets (bf16 sublane packing) and all biases into one
    # (n_conv, c_out_max) array -> 3 kernel inputs instead of 37.
    w_offsets, rows = [], 0
    for s in specs:
        w_offsets.append(rows)
        rows += _round_up(s["k"] * s["c_in"], 16)
    w_packed = jnp.zeros((_round_up(rows, 16), c_out_max), jnp.float32)
    b_packed = jnp.zeros((n_conv, c_out_max), jnp.float32)
    for i, (s, (w, b)) in enumerate(zip(specs, convs)):
        kc = s["k"] * s["c_in"]
        w_packed = w_packed.at[w_offsets[i]:w_offsets[i] + kc,
                               0:s["c_out"]].set(w.reshape(kc, s["c_out"]))
        b_packed = b_packed.at[i, 0:s["c_out"]].set(b)

    return {"specs": specs, "convs": convs,
            "w_packed": w_packed.astype(jnp.bfloat16),
            "b_packed": b_packed,
            "w_offsets": tuple(w_offsets)}


# ----------------------------------------------------------------------------
# Forward pass (one pallas_call; only layout plumbing outside the kernel)
# ----------------------------------------------------------------------------
def _default_batch_split(n):
    """2 grid steps (one per TensorCore) on v7x-class chips; otherwise fold
    the whole batch into a single grid step (v5e / v6e have 1 TC)."""
    try:
        kind = jax.devices()[0].device_kind.lower()
    except Exception:
        kind = ""
    if (("v7" in kind) or ("tpu7" in kind)) and n >= 2 and n % 2 == 0:
        return 2
    return 1


def convolutional_encoder_forward(params, inputs_ncl, batch_split=None):
    specs = params["specs"]
    num_residual_layers = (len(specs) - 14) // 2   # 14 = conv_1, conv_2 + 4 blocks * 3

    n, c_in, length = inputs_ncl.shape
    assert c_in == specs[0]["c_in"]

    g = batch_split if batch_split is not None else _default_batch_split(n)
    if g < 1 or n % g != 0:
        g = 1
    nb = n // g                                    # batch elements per grid step

    geom, lp_max, rb_max, l_final = _layer_geometry(specs, length)
    c_in_max = max(s["c_in"] for s in specs)
    kc_pad = _round_up(max(s["k"] * s["c_in"] for s in specs), 128)
    c_final = specs[-1]["c_out"]

    x_nlc = jnp.transpose(inputs_ncl, (0, 2, 1)).astype(jnp.float32)
    w_packed, b_packed = params["w_packed"], params["b_packed"]

    kernel = _make_encoder_kernel(specs, geom, params["w_offsets"], nb,
                                  num_residual_layers)

    out_nlc = pl.pallas_call(
        kernel,
        out_shape=jax.ShapeDtypeStruct((n, l_final, c_final), jnp.float32),
        grid=(g,),
        in_specs=[
            pl.BlockSpec((nb, length, c_in), lambda i: (i, 0, 0)),
            pl.BlockSpec(w_packed.shape, lambda i: (0, 0)),
            pl.BlockSpec(b_packed.shape, lambda i: (0, 0)),
        ],
        out_specs=pl.BlockSpec((nb, l_final, c_final), lambda i: (i, 0, 0)),
        scratch_shapes=[
            pltpu.VMEM((nb * lp_max, c_in_max), jnp.float32),   # padded-input staging
            pltpu.VMEM((nb * rb_max, kc_pad), jnp.float32),     # lane-dense im2col
        ],
        compiler_params=pltpu.CompilerParams(
            dimension_semantics=("parallel",)),
    )(x_nlc, w_packed, b_packed)

    # Back to PyTorch NCL layout, then flatten(x, 1) -- pure layout plumbing.
    x_ncl = jnp.transpose(out_nlc, (0, 2, 1))
    o = x_ncl.reshape(n, -1)
    return o, x_ncl.shape


# ----------------------------------------------------------------------------
# Pure-JAX reference (numerical sanity check only)
# ----------------------------------------------------------------------------
def _conv1d_ref(x, w, b, stride, pad):
    """Conv1d on NLC input; w: (K, C_in, C_out), b: (C_out,)."""
    _, l, _ = x.shape
    k, _, c_out = w.shape
    xp = jnp.pad(x, ((0, 0), (pad, pad), (0, 0)))
    l_out = (l + 2 * pad - k) // stride + 1
    acc = jnp.zeros((x.shape[0], l_out, c_out), jnp.float32)
    for kk in range(k):
        xs = xp[:, kk:kk + stride * (l_out - 1) + 1:stride, :]
        acc = acc + jnp.einsum("nlc,co->nlo", xs, w[kk],
                               precision=jax.lax.Precision.HIGHEST)
    return acc + b[None, None, :]


def _reference_forward(params, inputs_ncl):
    specs, convs = params["specs"], params["convs"]
    num_residual_layers = (len(specs) - 14) // 2
    x = jnp.transpose(inputs_ncl, (0, 2, 1)).astype(jnp.float32)
    idx = [0]

    def conv(x, in_relu=False, out_relu=False):
        s = specs[idx[0]]
        w, b = convs[idx[0]]
        idx[0] += 1
        if in_relu:
            x = jnp.maximum(x, 0.0)
        y = _conv1d_ref(x, w, b, s["stride"], s["pad"])
        return jnp.maximum(y, 0.0) if out_relu else y

    x1 = conv(x, out_relu=True)
    x = conv(x1, out_relu=True) + x1
    for _ in range(4):
        x3 = conv(x, out_relu=True)
        x4 = conv(x3, out_relu=True) + x3
        x = conv(x4, out_relu=True) + x4
    x_pre = x
    for _ in range(num_residual_layers):
        h = conv(x, in_relu=True)
        x = conv(h, in_relu=True) + x
    x = jnp.maximum(x, 0.0) + x_pre
    x_ncl = jnp.transpose(x, (0, 2, 1))
    return x_ncl.reshape(x_ncl.shape[0], -1), x_ncl.shape


# ----------------------------------------------------------------------------
if __name__ == "__main__":
    batch = 2
    in_channels = 4
    num_hiddens = 32
    latent_dim = 8                     # unused in forward (matches the module)
    num_residual_layers = 2
    num_residual_hiddens = 16
    length = 96                        # 4 stride-2 downscales: 96 -> 49 -> 25 -> 13 -> 7

    key = jax.random.PRNGKey(0)
    k_params, k_x = jax.random.split(key)
    params = init_encoder_params(k_params, in_channels, num_hiddens,
                                 num_residual_layers, num_residual_hiddens)
    x = jax.random.normal(k_x, (batch, in_channels, length), jnp.float32)

    o, shape = convolutional_encoder_forward(params, x)
    o = jax.block_until_ready(o)

    assert shape == (batch, num_hiddens, 7), shape
    assert o.shape == (batch, num_hiddens * 7), o.shape

    # Numerical sanity check against a plain-JAX reference (same bf16-rounded
    # weights; only MXU DEFAULT-vs-HIGHEST dot precision differs).
    o_ref, shape_ref = _reference_forward(params, x)
    assert shape_ref == shape, (shape_ref, shape)
    rel_err = float(jnp.linalg.norm(o - o_ref) / (jnp.linalg.norm(o_ref) + 1e-9))
    assert rel_err < 3e-2, f"relative error vs reference too large: {rel_err}"

    print("KERNEL_OK")
</pallas_src>

<mosaic_0001>
module attributes {stable_mosaic.version = 11 : i64} {
  func.func @kernel(%arg0: i32, %arg1: memref<2x96x4xf32, #tpu.memory_space<vmem>>, %arg2: memref<1616x32xbf16, #tpu.memory_space<vmem>>, %arg3: memref<18x32xf32, #tpu.memory_space<vmem>>, %arg4: memref<2x7x32xf32, #tpu.memory_space<vmem>>, %arg5: memref<208x32xf32, #tpu.memory_space<vmem>>, %arg6: memref<192x128xf32, #tpu.memory_space<vmem>>) attributes {dimension_semantics = [#tpu.dimension_semantics<parallel>], iteration_bounds = array<i64: 1>, scalar_prefetch = 0 : i64, scratch_operands = 2 : i64, tpu.core_type = #tpu.core_type<tc>, window_params = [{transform_indices = @transform_0, window_bounds = array<i64: 2, 96, 4>}, {pipeline_mode = #tpu.pipeline_mode<synchronous>, transform_indices = @transform_1, window_bounds = array<i64: 1616, 32>}, {pipeline_mode = #tpu.pipeline_mode<synchronous>, transform_indices = @transform_2, window_bounds = array<i64: 18, 32>}, {transform_indices = @transform_3, window_bounds = array<i64: 2, 7, 32>}]} {
    %cst = arith.constant 0.000000e+00 : f32
    %0 = vector.broadcast %cst : f32 to vector<192x128xf32>
    %c0 = arith.constant 0 : index
    %c0_0 = arith.constant 0 : index
    %1 = vector.load %arg6[%c0, %c0_0] : memref<192x128xf32, #tpu.memory_space<vmem>>, vector<192x128xf32>
    tpu.vector_store %arg6[%c0, %c0_0], %0 {strides = array<i32>} : memref<192x128xf32, #tpu.memory_space<vmem>>, vector<192x128xf32>,
    %c0_1 = arith.constant 0 : index
    %c0_2 = arith.constant 0 : index
    %c0_3 = arith.constant 0 : index
    %2 = vector.load %arg1[%c0_1, %c0_2, %c0_3] : memref<2x96x4xf32, #tpu.memory_space<vmem>>, vector<1x96x4xf32>
    %3 = vector.shape_cast %2 : vector<1x96x4xf32> to vector<96x4xf32>
    %c1 = arith.constant 1 : index
    %c0_4 = arith.constant 0 : index
    %c0_5 = arith.constant 0 : index
    %4 = vector.load %arg1[%c1, %c0_4, %c0_5] : memref<2x96x4xf32, #tpu.memory_space<vmem>>, vector<1x96x4xf32>
    %5 = vector.shape_cast %4 : vector<1x96x4xf32> to vector<96x4xf32>
    %cst_6 = arith.constant 0.000000e+00 : f32
    %6 = vector.broadcast %cst_6 : f32 to vector<1x4xf32>
    %c0_7 = arith.constant 0 : index
    %c0_8 = arith.constant 0 : index
    %7 = vector.load %arg5[%c0_7, %c0_8] : memref<208x32xf32, #tpu.memory_space<vmem>>, vector<1x4xf32>
    tpu.vector_store %arg5[%c0_7, %c0_8], %6 {strides = array<i32>} : memref<208x32xf32, #tpu.memory_space<vmem>>, vector<1x4xf32>,
    %c97 = arith.constant 97 : index
    %c0_9 = arith.constant 0 : index
    %8 = vector.load %arg5[%c97, %c0_9] : memref<208x32xf32, #tpu.memory_space<vmem>>, vector<1x4xf32>
    tpu.vector_store %arg5[%c97, %c0_9], %6 {strides = array<i32>} : memref<208x32xf32, #tpu.memory_space<vmem>>, vector<1x4xf32>,
    %c1_10 = arith.constant 1 : index
    %c0_11 = arith.constant 0 : index
    %9 = vector.load %arg5[%c1_10, %c0_11] : memref<208x32xf32, #tpu.memory_space<vmem>>, vector<96x4xf32>
    tpu.vector_store %arg5[%c1_10, %c0_11], %3 {strides = array<i32>} : memref<208x32xf32, #tpu.memory_space<vmem>>, vector<96x4xf32>,
    %cst_12 = arith.constant 0.000000e+00 : f32
    %10 = vector.broadcast %cst_12 : f32 to vector<1x4xf32>
    %c104 = arith.constant 104 : index
    %c0_13 = arith.constant 0 : index
    %11 = vector.load %arg5[%c104, %c0_13] : memref<208x32xf32, #tpu.memory_space<vmem>>, vector<1x4xf32>
    tpu.vector_store %arg5[%c104, %c0_13], %10 {strides = array<i32>} : memref<208x32xf32, #tpu.memory_space<vmem>>, vector<1x4xf32>,
    %c201 = arith.constant 201 : index
    %c0_14 = arith.constant 0 : index
    %12 = vector.load %arg5[%c201, %c0_14] : memref<208x32xf32, #tpu.memory_space<vmem>>, vector<1x4xf32>
    tpu.vector_store %arg5[%c201, %c0_14], %10 {strides = array<i32>} : memref<208x32xf32, #tpu.memory_space<vmem>>, vector<1x4xf32>,
    %c105 = arith.constant 105 : index
    %c0_15 = arith.constant 0 : index
    %13 = vector.load %arg5[%c105, %c0_15] : memref<208x32xf32, #tpu.memory_space<vmem>>, vector<96x4xf32>
    tpu.vector_store %arg5[%c105, %c0_15], %5 {strides = array<i32>} : memref<208x32xf32, #tpu.memory_space<vmem>>, vector<96x4xf32>,
    %c0_16 = arith.constant 0 : index
    %c0_17 = arith.constant 0 : index
    %14 = vector.load %arg5[%c0_16, %c0_17] : memref<208x32xf32, #tpu.memory_space<vmem>>, vector<96x4xf32>
    %c0_18 = arith.constant 0 : index
    %c0_19 = arith.constant 0 : index
    %15 = vector.load %arg6[%c0_18, %c0_19] : memref<192x128xf32, #tpu.memory_space<vmem>>, vector<96x4xf32>
    tpu.vector_store %arg6[%c0_18, %c0_19], %14 {strides = array<i32>} : memref<192x128xf32, #tpu.memory_space<vmem>>, vector<96x4xf32>,
    %c1_20 = arith.constant 1 : index
    %c0_21 = arith.constant 0 : index
    %16 = vector.load %arg5[%c1_20, %c0_21] : memref<208x32xf32, #tpu.memory_space<vmem>>, vector<96x4xf32>
    %c0_22 = arith.constant 0 : index
    %c4 = arith.constant 4 : index
    %17 = vector.load %arg6[%c0_22, %c4] : memref<192x128xf32, #tpu.memory_space<vmem>>, vector<96x4xf32>
    tpu.vector_store %arg6[%c0_22, %c4], %16 {strides = array<i32>} : memref<192x128xf32, #tpu.memory_space<vmem>>, vector<96x4xf32>,
    %c2 = arith.constant 2 : index
    %c0_23 = arith.constant 0 : index
    %18 = vector.load %arg5[%c2, %c0_23] : memref<208x32xf32, #tpu.memory_space<vmem>>, vector<96x4xf32>
    %c0_24 = arith.constant 0 : index
    %c8 = arith.constant 8 : index
    %19 = vector.load %arg6[%c0_24, %c8] : memref<192x128xf32, #tpu.memory_space<vmem>>, vector<96x4xf32>
    tpu.vector_store %arg6[%c0_24, %c8], %18 {strides = array<i32>} : memref<192x128xf32, #tpu.memory_space<vmem>>, vector<96x4xf32>,
    %c104_25 = arith.constant 104 : index
    %c0_26 = arith.constant 0 : index
    %20 = vector.load %arg5[%c104_25, %c0_26] : memref<208x32xf32, #tpu.memory_space<vmem>>, vector<96x4xf32>
    %c96 = arith.constant 96 : index
    %c0_27 = arith.constant 0 : index
    %21 = vector.load %arg6[%c96, %c0_27] : memref<192x128xf32, #tpu.memory_space<vmem>>, vector<96x4xf32>
    tpu.vector_store %arg6[%c96, %c0_27], %20 {strides = array<i32>} : memref<192x128xf32, #tpu.memory_space<vmem>>, vector<96x4xf32>,
    %c105_28 = arith.constant 105 : index
    %c0_29 = arith.constant 0 : index
    %22 = vector.load %arg5[%c105_28, %c0_29] : memref<208x32xf32, #tpu.memory_space<vmem>>, vector<96x4xf32>
    %c96_30 = arith.constant 96 : index
    %c4_31 = arith.constant 4 : index
    %23 = vector.load %arg6[%c96_30, %c4_31] : memref<192x128xf32, #tpu.memory_space<vmem>>, vector<96x4xf32>
    tpu.vector_store %arg6[%c96_30, %c4_31], %22 {strides = array<i32>} : memref<192x128xf32, #tpu.memory_space<vmem>>, vector<96x4xf32>,
    %c106 = arith.constant 106 : index
    %c0_32 = arith.constant 0 : index
    %24 = vector.load %arg5[%c106, %c0_32] : memref<208x32xf32, #tpu.memory_space<vmem>>, vector<96x4xf32>
    %c96_33 = arith.constant 96 : index
    %c8_34 = arith.constant 8 : index
    %25 = vector.load %arg6[%c96_33, %c8_34] : memref<192x128xf32, #tpu.memory_space<vmem>>, vector<96x4xf32>
    tpu.vector_store %arg6[%c96_33, %c8_34], %24 {strides = array<i32>} : memref<192x128xf32, #tpu.memory_space<vmem>>, vector<96x4xf32>,
    %c0_35 = arith.constant 0 : index
    %c0_36 = arith.constant 0 : index
    %26 = vector.load %arg2[%c0_35, %c0_36] : memref<1616x32xbf16, #tpu.memory_space<vmem>>, vector<12x32xbf16>
    %27 = arith.extf %26 : vector<12x32xbf16> to vector<12x32xf32>
    %c0_37 = arith.constant 0 : index
    %c0_38 = arith.constant 0 : index
    %28 = vector.load %arg6[%c0_37, %c0_38] : memref<192x128xf32, #tpu.memory_space<vmem>>, vector<192x12xf32>
    %cst_39 = arith.constant dense<0.000000e+00> : vector<192x32xf32>
    %29 = tpu.matmul %28, %27, %cst_39 {dimension_numbers = #tpu.dot_dimension_numbers<[1], [0], [0], [1], [0, 0, 1, 1], [], []>} : vector<192x12xf32>, vector<12x32xf32>, vector<192x32xf32> -> vector<192x32xf32>
    %c0_40 = arith.constant 0 : index
    %c0_41 = arith.constant 0 : index
    %30 = vector.load %arg3[%c0_40, %c0_41] : memref<18x32xf32, #tpu.memory_space<vmem>>, vector<1x32xf32>
    %31 = vector.broadcast %30 : vector<1x32xf32> to vector<192x32xf32>
    %32 = arith.addf %29, %31 : vector<192x32xf32>
    %cst_42 = arith.constant 0.000000e+00 : f32
    %33 = vector.broadcast %cst_42 : f32 to vector<192x32xf32>
    %34 = arith.maximumf %32, %33 : vector<192x32xf32>
    %35 = vector.extract_strided_slice %34 {offsets = [0, 0], sizes = [96, 32], strides = [1, 1]} : vector<192x32xf32> to vector<96x32xf32>
    %36 = vector.extract_strided_slice %34 {offsets = [96, 0], sizes = [96, 32], strides = [1, 1]} : vector<192x32xf32> to vector<96x32xf32>
    %cst_43 = arith.constant 0.000000e+00 : f32
    %37 = vector.broadcast %cst_43 : f32 to vector<1x32xf32>
    %c0_44 = arith.constant 0 : index
    %c0_45 = arith.constant 0 : index
    %38 = vector.load %arg5[%c0_44, %c0_45] : memref<208x32xf32, #tpu.memory_space<vmem>>, vector<1x32xf32>
    tpu.vector_store %arg5[%c0_44, %c0_45], %37 {strides = array<i32>} : memref<208x32xf32, #tpu.memory_space<vmem>>, vector<1x32xf32>,
    %c97_46 = arith.constant 97 : index
    %c0_47 = arith.constant 0 : index
    %39 = vector.load %arg5[%c97_46, %c0_47] : memref<208x32xf32, #tpu.memory_space<vmem>>, vector<1x32xf32>
    tpu.vector_store %arg5[%c97_46, %c0_47], %37 {strides = array<i32>} : memref<208x32xf32, #tpu.memory_space<vmem>>, vector<1x32xf32>,
    %c1_48 = arith.constant 1 : index
    %c0_49 = arith.constant 0 : index
    %40 = vector.load %arg5[%c1_48, %c0_49] : memref<208x32xf32, #tpu.memory_space<vmem>>, vector<96x32xf32>
    tpu.vector_store %arg5[%c1_48, %c0_49], %35 {strides = array<i32>} : memref<208x32xf32, #tpu.memory_space<vmem>>, vector<96x32xf32>,
    %cst_50 = arith.constant 0.000000e+00 : f32
    %41 = vector.broadcast %cst_50 : f32 to vector<1x32xf32>
    %c104_51 = arith.constant 104 : index
    %c0_52 = arith.constant 0 : index
    %42 = vector.load %arg5[%c104_51, %c0_52] : memref<208x32xf32, #tpu.memory_space<vmem>>, vector<1x32xf32>
    tpu.vector_store %arg5[%c104_51, %c0_52], %41 {strides = array<i32>} : memref<208x32xf32, #tpu.memory_space<vmem>>, vector<1x32xf32>,
    %c201_53 = arith.constant 201 : index
    %c0_54 = arith.constant 0 : index
    %43 = vector.load %arg5[%c201_53, %c0_54] : memref<208x32xf32, #tpu.memory_space<vmem>>, vector<1x32xf32>
    tpu.vector_store %arg5[%c201_53, %c0_54], %41 {strides = array<i32>} : memref<208x32xf32, #tpu.memory_space<vmem>>, vector<1x32xf32>,
    %c105_55 = arith.constant 105 : index
    %c0_56 = arith.constant 0 : index
    %44 = vector.load %arg5[%c105_55, %c0_56] : memref<208x32xf32, #tpu.memory_space<vmem>>, vector<96x32xf32>
    tpu.vector_store %arg5[%c105_55, %c0_56], %36 {strides = array<i32>} : memref<208x32xf32, #tpu.memory_space<vmem>>, vector<96x32xf32>,
    %c0_57 = arith.constant 0 : index
    %c0_58 = arith.constant 0 : index
    %45 = vector.load %arg5[%c0_57, %c0_58] : memref<208x32xf32, #tpu.memory_space<vmem>>, vector<96x32xf32>
    %c0_59 = arith.constant 0 : index
    %c0_60 = arith.constant 0 : index
    %46 = vector.load %arg6[%c0_59, %c0_60] : memref<192x128xf32, #tpu.memory_space<vmem>>, vector<96x32xf32>
    tpu.vector_store %arg6[%c0_59, %c0_60], %45 {strides = array<i32>} : memref<192x128xf32, #tpu.memory_space<vmem>>, vector<96x32xf32>,
    %c1_61 = arith.constant 1 : index
    %c0_62 = arith.constant 0 : index
    %47 = vector.load %arg5[%c1_61, %c0_62] : memref<208x32xf32, #tpu.memory_space<vmem>>, vector<96x32xf32>
    %c0_63 = arith.constant 0 : index
    %c32 = arith.constant 32 : index
    %48 = vector.load %arg6[%c0_63, %c32] : memref<192x128xf32, #tpu.memory_space<vmem>>, vector<96x32xf32>
    tpu.vector_store %arg6[%c0_63, %c32], %47 {strides = array<i32>} : memref<192x128xf32, #tpu.memory_space<vmem>>, vector<96x32xf32>,
    %c2_64 = arith.constant 2 : index
    %c0_65 = arith.constant 0 : index
    %49 = vector.load %arg5[%c2_64, %c0_65] : memref<208x32xf32, #tpu.memory_space<vmem>>, vector<96x32xf32>
    %c0_66 = arith.constant 0 : index
    %c64 = arith.constant 64 : index
    %50 = vector.load %arg6[%c0_66, %c64] : memref<192x128xf32, #tpu.memory_space<vmem>>, vector<96x32xf32>
    tpu.vector_store %arg6[%c0_66, %c64], %49 {strides = array<i32>} : memref<192x128xf32, #tpu.memory_space<vmem>>, vector<96x32xf32>,
    %c104_67 = arith.constant 104 : index
    %c0_68 = arith.constant 0 : index
    %51 = vector.load %arg5[%c104_67, %c0_68] : memref<208x32xf32, #tpu.memory_space<vmem>>, vector<96x32xf32>
    %c96_69 = arith.constant 96 : index
    %c0_70 = arith.constant 0 : index
    %52 = vector.load %arg6[%c96_69, %c0_70] : memref<192x128xf32, #tpu.memory_space<vmem>>, vector<96x32xf32>
    tpu.vector_store %arg6[%c96_69, %c0_70], %51 {strides = array<i32>} : memref<192x128xf32, #tpu.memory_space<vmem>>, vector<96x32xf32>,
    %c105_71 = arith.constant 105 : index
    %c0_72 = arith.constant 0 : index
    %53 = vector.load %arg5[%c105_71, %c0_72] : memref<208x32xf32, #tpu.memory_space<vmem>>, vector<96x32xf32>
    %c96_73 = arith.constant 96 : index
    %c32_74 = arith.constant 32 : index
    %54 = vector.load %arg6[%c96_73, %c32_74] : memref<192x128xf32, #tpu.memory_space<vmem>>, vector<96x32xf32>
    tpu.vector_store %arg6[%c96_73, %c32_74], %53 {strides = array<i32>} : memref<192x128xf32, #tpu.memory_space<vmem>>, vector<96x32xf32>,
    %c106_75 = arith.constant 106 : index
    %c0_76 = arith.constant 0 : index
    %55 = vector.load %arg5[%c106_75, %c0_76] : memref<208x32xf32, #tpu.memory_space<vmem>>, vector<96x32xf32>
    %c96_77 = arith.constant 96 : index
    %c64_78 = arith.constant 64 : index
    %56 = vector.load %arg6[%c96_77, %c64_78] : memref<192x128xf32, #tpu.memory_space<vmem>>, vector<96x32xf32>
    tpu.vector_store %arg6[%c96_77, %c64_78], %55 {strides = array<i32>} : memref<192x128xf32, #tpu.memory_space<vmem>>, vector<96x32xf32>,
    %c16 = arith.constant 16 : index
    %c0_79 = arith.constant 0 : index
    %57 = vector.load %arg2[%c16, %c0_79] : memref<1616x32xbf16, #tpu.memory_space<vmem>>, vector<96x32xbf16>
    %58 = arith.extf %57 : vector<96x32xbf16> to vector<96x32xf32>
    %c0_80 = arith.constant 0 : index
    %c0_81 = arith.constant 0 : index
    %59 = vector.load %arg6[%c0_80, %c0_81] : memref<192x128xf32, #tpu.memory_space<vmem>>, vector<192x96xf32>
    %cst_82 = arith.constant dense<0.000000e+00> : vector<192x32xf32>
    %60 = tpu.matmul %59, %58, %cst_82 {dimension_numbers = #tpu.dot_dimension_numbers<[1], [0], [0], [1], [0, 0, 1, 1], [], []>} : vector<192x96xf32>, vector<96x32xf32>, vector<192x32xf32> -> vector<192x32xf32>
    %c1_83 = arith.constant 1 : index
    %c0_84 = arith.constant 0 : index
    %61 = vector.load %arg3[%c1_83, %c0_84] : memref<18x32xf32, #tpu.memory_space<vmem>>, vector<1x32xf32>
    %62 = vector.broadcast %61 : vector<1x32xf32> to vector<192x32xf32>
    %63 = arith.addf %60, %62 : vector<192x32xf32>
    %cst_85 = arith.constant 0.000000e+00 : f32
    %64 = vector.broadcast %cst_85 : f32 to vector<192x32xf32>
    %65 = arith.maximumf %63, %64 : vector<192x32xf32>
    %66 = vector.extract_strided_slice %65 {offsets = [0, 0], sizes = [96, 32], strides = [1, 1]} : vector<192x32xf32> to vector<96x32xf32>
    %67 = vector.extract_strided_slice %65 {offsets = [96, 0], sizes = [96, 32], strides = [1, 1]} : vector<192x32xf32> to vector<96x32xf32>
    %68 = arith.addf %66, %35 : vector<96x32xf32>
    %69 = arith.addf %67, %36 : vector<96x32xf32>
    %cst_86 = arith.constant 0.000000e+00 : f32
    %70 = vector.broadcast %cst_86 : f32 to vector<2x32xf32>
    %c0_87 = arith.constant 0 : index
    %c0_88 = arith.constant 0 : index
    %71 = vector.load %arg5[%c0_87, %c0_88] : memref<208x32xf32, #tpu.memory_space<vmem>>, vector<2x32xf32>
    tpu.vector_store %arg5[%c0_87, %c0_88], %70 {strides = array<i32>} : memref<208x32xf32, #tpu.memory_space<vmem>>, vector<2x32xf32>,
    %c98 = arith.constant 98 : index
    %c0_89 = arith.constant 0 : index
    %72 = vector.load %arg5[%c98, %c0_89] : memref<208x32xf32, #tpu.memory_space<vmem>>, vector<2x32xf32>
    tpu.vector_store %arg5[%c98, %c0_89], %70 {strides = array<i32>} : memref<208x32xf32, #tpu.memory_space<vmem>>, vector<2x32xf32>,
    %c2_90 = arith.constant 2 : index
    %c0_91 = arith.constant 0 : index
    %73 = vector.load %arg5[%c2_90, %c0_91] : memref<208x32xf32, #tpu.memory_space<vmem>>, vector<96x32xf32>
    tpu.vector_store %arg5[%c2_90, %c0_91], %68 {strides = array<i32>} : memref<208x32xf32, #tpu.memory_space<vmem>>, vector<96x32xf32>,
    %cst_92 = arith.constant 0.000000e+00 : f32
    %74 = vector.broadcast %cst_92 : f32 to vector<2x32xf32>
    %c104_93 = arith.constant 104 : index
    %c0_94 = arith.constant 0 : index
    %75 = vector.load %arg5[%c104_93, %c0_94] : memref<208x32xf32, #tpu.memory_space<vmem>>, vector<2x32xf32>
    tpu.vector_store %arg5[%c104_93, %c0_94], %74 {strides = array<i32>} : memref<208x32xf32, #tpu.memory_space<vmem>>, vector<2x32xf32>,
    %c202 = arith.constant 202 : index
    %c0_95 = arith.constant 0 : index
    %76 = vector.load %arg5[%c202, %c0_95] : memref<208x32xf32, #tpu.memory_space<vmem>>, vector<2x32xf32>
    tpu.vector_store %arg5[%c202, %c0_95], %74 {strides = array<i32>} : memref<208x32xf32, #tpu.memory_space<vmem>>, vector<2x32xf32>,
    %c106_96 = arith.constant 106 : index
    %c0_97 = arith.constant 0 : index
    %77 = vector.load %arg5[%c106_96, %c0_97] : memref<208x32xf32, #tpu.memory_space<vmem>>, vector<96x32xf32>
    tpu.vector_store %arg5[%c106_96, %c0_97], %69 {strides = array<i32>} : memref<208x32xf32, #tpu.memory_space<vmem>>, vector<96x32xf32>,
    %c0_98 = arith.constant 0 : index
    %c0_99 = arith.constant 0 : index
    %78 = tpu.strided_load %arg5[%c0_98, %c0_99] {strides = array<i32: 2, 1>} : memref<208x32xf32, #tpu.memory_space<vmem>>, vector<49x32xf32>
    %c0_100 = arith.constant 0 : index
    %c0_101 = arith.constant 0 : index
    %79 = vector.load %arg6[%c0_100, %c0_101] : memref<192x128xf32, #tpu.memory_space<vmem>>, vector<49x32xf32>
    tpu.vector_store %arg6[%c0_100, %c0_101], %78 {strides = array<i32>} : memref<192x128xf32, #tpu.memory_space<vmem>>, vector<49x32xf32>,
    %c1_102 = arith.constant 1 : index
    %c0_103 = arith.constant 0 : index
    %80 = tpu.strided_load %arg5[%c1_102, %c0_103] {strides = array<i32: 2, 1>} : memref<208x32xf32, #tpu.memory_space<vmem>>, vector<49x32xf32>
    %c0_104 = arith.constant 0 : index
    %c32_105 = arith.constant 32 : index
    %81 = vector.load %arg6[%c0_104, %c32_105] : memref<192x128xf32, #tpu.memory_space<vmem>>, vector<49x32xf32>
    tpu.vector_store %arg6[%c0_104, %c32_105], %80 {strides = array<i32>} : memref<192x128xf32, #tpu.memory_space<vmem>>, vector<49x32xf32>,
    %c2_106 = arith.constant 2 : index
    %c0_107 = arith.constant 0 : index
    %82 = tpu.strided_load %arg5[%c2_106, %c0_107] {strides = array<i32: 2, 1>} : memref<208x32xf32, #tpu.memory_space<vmem>>, vector<49x32xf32>
    %c0_108 = arith.constant 0 : index
    %c64_109 = arith.constant 64 : index
    %83 = vector.load %arg6[%c0_108, %c64_109] : memref<192x128xf32, #tpu.memory_space<vmem>>, vector<49x32xf32>
    tpu.vector_store %arg6[%c0_108, %c64_109], %82 {strides = array<i32>} : memref<192x128xf32, #tpu.memory_space<vmem>>, vector<49x32xf32>,
    %c3 = arith.constant 3 : index
    %c0_110 = arith.constant 0 : index
    %84 = tpu.strided_load %arg5[%c3, %c0_110] {strides = array<i32: 2, 1>} : memref<208x32xf32, #tpu.memory_space<vmem>>, vector<49x32xf32>
    %c0_111 = arith.constant 0 : index
    %c96_112 = arith.constant 96 : index
    %85 = vector.load %arg6[%c0_111, %c96_112] : memref<192x128xf32, #tpu.memory_space<vmem>>, vector<49x32xf32>
    tpu.vector_store %arg6[%c0_111, %c96_112], %84 {strides = array<i32>} : memref<192x128xf32, #tpu.memory_space<vmem>>, vector<49x32xf32>,
    %c104_113 = arith.constant 104 : index
    %c0_114 = arith.constant 0 : index
    %86 = tpu.strided_load %arg5[%c104_113, %c0_114] {strides = array<i32: 2, 1>} : memref<208x32xf32, #tpu.memory_space<vmem>>, vector<49x32xf32>
    %c56 = arith.constant 56 : index
    %c0_115 = arith.constant 0 : index
    %87 = vector.load %arg6[%c56, %c0_115] : memref<192x128xf32, #tpu.memory_space<vmem>>, vector<49x32xf32>
    tpu.vector_store %arg6[%c56, %c0_115], %86 {strides = array<i32>} : memref<192x128xf32, #tpu.memory_space<vmem>>, vector<49x32xf32>,
    %c105_116 = arith.constant 105 : index
    %c0_117 = arith.constant 0 : index
    %88 = tpu.strided_load %arg5[%c105_116, %c0_117] {strides = array<i32: 2, 1>} : memref<208x32xf32, #tpu.memory_space<vmem>>, vector<49x32xf32>
    %c56_118 = arith.constant 56 : index
    %c32_119 = arith.constant 32 : index
    %89 = vector.load %arg6[%c56_118, %c32_119] : memref<192x128xf32, #tpu.memory_space<vmem>>, vector<49x32xf32>
    tpu.vector_store %arg6[%c56_118, %c32_119], %88 {strides = array<i32>} : memref<192x128xf32, #tpu.memory_space<vmem>>, vector<49x32xf32>,
    %c106_120 = arith.constant 106 : index
    %c0_121 = arith.constant 0 : index
    %90 = tpu.strided_load %arg5[%c106_120, %c0_121] {strides = array<i32: 2, 1>} : memref<208x32xf32, #tpu.memory_space<vmem>>, vector<49x32xf32>
    %c56_122 = arith.constant 56 : index
    %c64_123 = arith.constant 64 : index
    %91 = vector.load %arg6[%c56_122, %c64_123] : memref<192x128xf32, #tpu.memory_space<vmem>>, vector<49x32xf32>
    tpu.vector_store %arg6[%c56_122, %c64_123], %90 {strides = array<i32>} : memref<192x128xf32, #tpu.memory_space<vmem>>, vector<49x32xf32>,
    %c107 = arith.constant 107 : index
    %c0_124 = arith.constant 0 : index
    %92 = tpu.strided_load %arg5[%c107, %c0_124] {strides = array<i32: 2, 1>} : memref<208x32xf32, #tpu.memory_space<vmem>>, vector<49x32xf32>
    %c56_125 = arith.constant 56 : index
    %c96_126 = arith.constant 96 : index
    %93 = vector.load %arg6[%c56_125, %c96_126] : memref<192x128xf32, #tpu.memory_space<vmem>>, vector<49x32xf32>
    tpu.vector_store %arg6[%c56_125, %c96_126], %92 {strides = array<i32>} : memref<192x128xf32, #tpu.memory_space<vmem>>, vector<49x32xf32>,
    %c112 = arith.constant 112 : index
    %c0_127 = arith.constant 0 : index
    %94 = vector.load %arg2[%c112, %c0_127] : memref<1616x32xbf16, #tpu.memory_space<vmem>>, vector<128x32xbf16>
    %95 = arith.extf %94 : vector<128x32xbf16> to vector<128x32xf32>
    %c0_128 = arith.constant 0 : index
    %c0_129 = arith.constant 0 : index
    %96 = vector.load %arg6[%c0_128, %c0_129] : memref<192x128xf32, #tpu.memory_space<vmem>>, vector<112x128xf32>
    %cst_130 = arith.constant dense<0.000000e+00> : vector<112x32xf32>
    %97 = tpu.matmul %96, %95, %cst_130 {dimension_numbers = #tpu.dot_dimension_numbers<[1], [0], [0], [1], [0, 0, 1, 1], [], []>} : vector<112x128xf32>, vector<128x32xf32>, vector<112x32xf32> -> vector<112x32xf32>
    %c2_131 = arith.constant 2 : index
    %c0_132 = arith.constant 0 : index
    %98 = vector.load %arg3[%c2_131, %c0_132] : memref<18x32xf32, #tpu.memory_space<vmem>>, vector<1x32xf32>
    %99 = vector.broadcast %98 : vector<1x32xf32> to vector<112x32xf32>
    %100 = arith.addf %97, %99 : vector<112x32xf32>
    %cst_133 = arith.constant 0.000000e+00 : f32
    %101 = vector.broadcast %cst_133 : f32 to vector<112x32xf32>
    %102 = arith.maximumf %100, %101 : vector<112x32xf32>
    %103 = vector.extract_strided_slice %102 {offsets = [0, 0], sizes = [49, 32], strides = [1, 1]} : vector<112x32xf32> to vector<49x32xf32>
    %104 = vector.extract_strided_slice %102 {offsets = [56, 0], sizes = [49, 32], strides = [1, 1]} : vector<112x32xf32> to vector<49x32xf32>
    %cst_134 = arith.constant 0.000000e+00 : f32
    %105 = vector.broadcast %cst_134 : f32 to vector<1x32xf32>
    %c0_135 = arith.constant 0 : index
    %c0_136 = arith.constant 0 : index
    %106 = vector.load %arg5[%c0_135, %c0_136] : memref<208x32xf32, #tpu.memory_space<vmem>>, vector<1x32xf32>
    tpu.vector_store %arg5[%c0_135, %c0_136], %105 {strides = array<i32>} : memref<208x32xf32, #tpu.memory_space<vmem>>, vector<1x32xf32>,
    %c50 = arith.constant 50 : index
    %c0_137 = arith.constant 0 : index
    %107 = vector.load %arg5[%c50, %c0_137] : memref<208x32xf32, #tpu.memory_space<vmem>>, vector<1x32xf32>
    tpu.vector_store %arg5[%c50, %c0_137], %105 {strides = array<i32>} : memref<208x32xf32, #tpu.memory_space<vmem>>, vector<1x32xf32>,
    %c1_138 = arith.constant 1 : index
    %c0_139 = arith.constant 0 : index
    %108 = vector.load %arg5[%c1_138, %c0_139] : memref<208x32xf32, #tpu.memory_space<vmem>>, vector<49x32xf32>
    tpu.vector_store %arg5[%c1_138, %c0_139], %103 {strides = array<i32>} : memref<208x32xf32, #tpu.memory_space<vmem>>, vector<49x32xf32>,
    %cst_140 = arith.constant 0.000000e+00 : f32
    %109 = vector.broadcast %cst_140 : f32 to vector<1x32xf32>
    %c56_141 = arith.constant 56 : index
    %c0_142 = arith.constant 0 : index
    %110 = vector.load %arg5[%c56_141, %c0_142] : memref<208x32xf32, #tpu.memory_space<vmem>>, vector<1x32xf32>
    tpu.vector_store %arg5[%c56_141, %c0_142], %109 {strides = array<i32>} : memref<208x32xf32, #tpu.memory_space<vmem>>, vector<1x32xf32>,
    %c106_143 = arith.constant 106 : index
    %c0_144 = arith.constant 0 : index
    %111 = vector.load %arg5[%c106_143, %c0_144] : memref<208x32xf32, #tpu.memory_space<vmem>>, vector<1x32xf32>
    tpu.vector_store %arg5[%c106_143, %c0_144], %109 {strides = array<i32>} : memref<208x32xf32, #tpu.memory_space<vmem>>, vector<1x32xf32>,
    %c57 = arith.constant 57 : index
    %c0_145 = arith.constant 0 : index
    %112 = vector.load %arg5[%c57, %c0_145] : memref<208x32xf32, #tpu.memory_space<vmem>>, vector<49x32xf32>
    tpu.vector_store %arg5[%c57, %c0_145], %104 {strides = array<i32>} : memref<208x32xf32, #tpu.memory_space<vmem>>, vector<49x32xf32>,
    %c0_146 = arith.constant 0 : index
    %c0_147 = arith.constant 0 : index
    %113 = vector.load %arg5[%c0_146, %c0_147] : memref<208x32xf32, #tpu.memory_space<vmem>>, vector<49x32xf32>
    %c0_148 = arith.constant 0 : index
    %c0_149 = arith.constant 0 : index
    %114 = vector.load %arg6[%c0_148, %c0_149] : memref<192x128xf32, #tpu.memory_space<vmem>>, vector<49x32xf32>
    tpu.vector_store %arg6[%c0_148, %c0_149], %113 {strides = array<i32>} : memref<192x128xf32, #tpu.memory_space<vmem>>, vector<49x32xf32>,
    %c1_150 = arith.constant 1 : index
    %c0_151 = arith.constant 0 : index
    %115 = vector.load %arg5[%c1_150, %c0_151] : memref<208x32xf32, #tpu.memory_space<vmem>>, vector<49x32xf32>
    %c0_152 = arith.constant 0 : index
    %c32_153 = arith.constant 32 : index
    %116 = vector.load %arg6[%c0_152, %c32_153] : memref<192x128xf32, #tpu.memory_space<vmem>>, vector<49x32xf32>
    tpu.vector_store %arg6[%c0_152, %c32_153], %115 {strides = array<i32>} : memref<192x128xf32, #tpu.memory_space<vmem>>, vector<49x32xf32>,
    %c2_154 = arith.constant 2 : index
    %c0_155 = arith.constant 0 : index
    %117 = vector.load %arg5[%c2_154, %c0_155] : memref<208x32xf32, #tpu.memory_space<vmem>>, vector<49x32xf32>
    %c0_156 = arith.constant 0 : index
    %c64_157 = arith.constant 64 : index
    %118 = vector.load %arg6[%c0_156, %c64_157] : memref<192x128xf32, #tpu.memory_space<vmem>>, vector<49x32xf32>
    tpu.vector_store %arg6[%c0_156, %c64_157], %117 {strides = array<i32>} : memref<192x128xf32, #tpu.memory_space<vmem>>, vector<49x32xf32>,
    %c56_158 = arith.constant 56 : index
    %c0_159 = arith.constant 0 : index
    %119 = vector.load %arg5[%c56_158, %c0_159] : memref<208x32xf32, #tpu.memory_space<vmem>>, vector<49x32xf32>
    %c56_160 = arith.constant 56 : index
    %c0_161 = arith.constant 0 : index
    %120 = vector.load %arg6[%c56_160, %c0_161] : memref<192x128xf32, #tpu.memory_space<vmem>>, vector<49x32xf32>
    tpu.vector_store %arg6[%c56_160, %c0_161], %119 {strides = array<i32>} : memref<192x128xf32, #tpu.memory_space<vmem>>, vector<49x32xf32>,
    %c57_162 = arith.constant 57 : index
    %c0_163 = arith.constant 0 : index
    %121 = vector.load %arg5[%c57_162, %c0_163] : memref<208x32xf32, #tpu.memory_space<vmem>>, vector<49x32xf32>
    %c56_164 = arith.constant 56 : index
    %c32_165 = arith.constant 32 : index
    %122 = vector.load %arg6[%c56_164, %c32_165] : memref<192x128xf32, #tpu.memory_space<vmem>>, vector<49x32xf32>
    tpu.vector_store %arg6[%c56_164, %c32_165], %121 {strides = array<i32>} : memref<192x128xf32, #tpu.memory_space<vmem>>, vector<49x32xf32>,
    %c58 = arith.constant 58 : index
    %c0_166 = arith.constant 0 : index
    %123 = vector.load %arg5[%c58, %c0_166] : memref<208x32xf32, #tpu.memory_space<vmem>>, vector<49x32xf32>
    %c56_167 = arith.constant 56 : index
    %c64_168 = arith.constant 64 : index
    %124 = vector.load %arg6[%c56_167, %c64_168] : memref<192x128xf32, #tpu.memory_space<vmem>>, vector<49x32xf32>
    tpu.vector_store %arg6[%c56_167, %c64_168], %123 {strides = array<i32>} : memref<192x128xf32, #tpu.memory_space<vmem>>, vector<49x32xf32>,
    %c240 = arith.constant 240 : index
    %c0_169 = arith.constant 0 : index
    %125 = vector.load %arg2[%c240, %c0_169] : memref<1616x32xbf16, #tpu.memory_space<vmem>>, vector<96x32xbf16>
    %126 = arith.extf %125 : vector<96x32xbf16> to vector<96x32xf32>
    %c0_170 = arith.constant 0 : index
    %c0_171 = arith.constant 0 : index
    %127 = vector.load %arg6[%c0_170, %c0_171] : memref<192x128xf32, #tpu.memory_space<vmem>>, vector<112x96xf32>
    %cst_172 = arith.constant dense<0.000000e+00> : vector<112x32xf32>
    %128 = tpu.matmul %127, %126, %cst_172 {dimension_numbers = #tpu.dot_dimension_numbers<[1], [0], [0], [1], [0, 0, 1, 1], [], []>} : vector<112x96xf32>, vector<96x32xf32>, vector<112x32xf32> -> vector<112x32xf32>
    %c3_173 = arith.constant 3 : index
    %c0_174 = arith.constant 0 : index
    %129 = vector.load %arg3[%c3_173, %c0_174] : memref<18x32xf32, #tpu.memory_space<vmem>>, vector<1x32xf32>
    %130 = vector.broadcast %129 : vector<1x32xf32> to vector<112x32xf32>
    %131 = arith.addf %128, %130 : vector<112x32xf32>
    %cst_175 = arith.constant 0.000000e+00 : f32
    %132 = vector.broadcast %cst_175 : f32 to vector<112x32xf32>
    %133 = arith.maximumf %131, %132 : vector<112x32xf32>
    %134 = vector.extract_strided_slice %133 {offsets = [0, 0], sizes = [49, 32], strides = [1, 1]} : vector<112x32xf32> to vector<49x32xf32>
    %135 = vector.extract_strided_slice %133 {offsets = [56, 0], sizes = [49, 32], strides = [1, 1]} : vector<112x32xf32> to vector<49x32xf32>
    %136 = arith.addf %134, %103 : vector<49x32xf32>
    %137 = arith.addf %135, %104 : vector<49x32xf32>
    %cst_176 = arith.constant 0.000000e+00 : f32
    %138 = vector.broadcast %cst_176 : f32 to vector<1x32xf32>
    %c0_177 = arith.constant 0 : index
    %c0_178 = arith.constant 0 : index
    %139 = vector.load %arg5[%c0_177, %c0_178] : memref<208x32xf32, #tpu.memory_space<vmem>>, vector<1x32xf32>
    tpu.vector_store %arg5[%c0_177, %c0_178], %138 {strides = array<i32>} : memref<208x32xf32, #tpu.memory_space<vmem>>, vector<1x32xf32>,
    %c50_179 = arith.constant 50 : index
    %c0_180 = arith.constant 0 : index
    %140 = vector.load %arg5[%c50_179, %c0_180] : memref<208x32xf32, #tpu.memory_space<vmem>>, vector<1x32xf32>
    tpu.vector_store %arg5[%c50_179, %c0_180], %138 {strides = array<i32>} : memref<208x32xf32, #tpu.memory_space<vmem>>, vector<1x32xf32>,
    %c1_181 = arith.constant 1 : index
    %c0_182 = arith.constant 0 : index
    %141 = vector.load %arg5[%c1_181, %c0_182] : memref<208x32xf32, #tpu.memory_space<vmem>>, vector<49x32xf32>
    tpu.vector_store %arg5[%c1_181, %c0_182], %136 {strides = array<i32>} : memref<208x32xf32, #tpu.memory_space<vmem>>, vector<49x32xf32>,
    %cst_183 = arith.constant 0.000000e+00 : f32
    %142 = vector.broadcast %cst_183 : f32 to vector<1x32xf32>
    %c56_184 = arith.constant 56 : index
    %c0_185 = arith.constant 0 : index
    %143 = vector.load %arg5[%c56_184, %c0_185] : memref<208x32xf32, #tpu.memory_space<vmem>>, vector<1x32xf32>
    tpu.vector_store %arg5[%c56_184, %c0_185], %142 {strides = array<i32>} : memref<208x32xf32, #tpu.memory_space<vmem>>, vector<1x32xf32>,
    %c106_186 = arith.constant 106 : index
    %c0_187 = arith.constant 0 : index
    %144 = vector.load %arg5[%c106_186, %c0_187] : memref<208x32xf32, #tpu.memory_space<vmem>>, vector<1x32xf32>
    tpu.vector_store %arg5[%c106_186, %c0_187], %142 {strides = array<i32>} : memref<208x32xf32, #tpu.memory_space<vmem>>, vector<1x32xf32>,
    %c57_188 = arith.constant 57 : index
    %c0_189 = arith.constant 0 : index
    %145 = vector.load %arg5[%c57_188, %c0_189] : memref<208x32xf32, #tpu.memory_space<vmem>>, vector<49x32xf32>
    tpu.vector_store %arg5[%c57_188, %c0_189], %137 {strides = array<i32>} : memref<208x32xf32, #tpu.memory_space<vmem>>, vector<49x32xf32>,
    %c0_190 = arith.constant 0 : index
    %c0_191 = arith.constant 0 : index
    %146 = vector.load %arg5[%c0_190, %c0_191] : memref<208x32xf32, #tpu.memory_space<vmem>>, vector<49x32xf32>
    %c0_192 = arith.constant 0 : index
    %c0_193 = arith.constant 0 : index
    %147 = vector.load %arg6[%c0_192, %c0_193] : memref<192x128xf32, #tpu.memory_space<vmem>>, vector<49x32xf32>
    tpu.vector_store %arg6[%c0_192, %c0_193], %146 {strides = array<i32>} : memref<192x128xf32, #tpu.memory_space<vmem>>, vector<49x32xf32>,
    %c1_194 = arith.constant 1 : index
    %c0_195 = arith.constant 0 : index
    %148 = vector.load %arg5[%c1_194, %c0_195] : memref<208x32xf32, #tpu.memory_space<vmem>>, vector<49x32xf32>
    %c0_196 = arith.constant 0 : index
    %c32_197 = arith.constant 32 : index
    %149 = vector.load %arg6[%c0_196, %c32_197] : memref<192x128xf32, #tpu.memory_space<vmem>>, vector<49x32xf32>
    tpu.vector_store %arg6[%c0_196, %c32_197], %148 {strides = array<i32>} : memref<192x128xf32, #tpu.memory_space<vmem>>, vector<49x32xf32>,
    %c2_198 = arith.constant 2 : index
    %c0_199 = arith.constant 0 : index
    %150 = vector.load %arg5[%c2_198, %c0_199] : memref<208x32xf32, #tpu.memory_space<vmem>>, vector<49x32xf32>
    %c0_200 = arith.constant 0 : index
    %c64_201 = arith.constant 64 : index
    %151 = vector.load %arg6[%c0_200, %c64_201] : memref<192x128xf32, #tpu.memory_space<vmem>>, vector<49x32xf32>
    tpu.vector_store %arg6[%c0_200, %c64_201], %150 {strides = array<i32>} : memref<192x128xf32, #tpu.memory_space<vmem>>, vector<49x32xf32>,
    %c56_202 = arith.constant 56 : index
    %c0_203 = arith.constant 0 : index
    %152 = vector.load %arg5[%c56_202, %c0_203] : memref<208x32xf32, #tpu.memory_space<vmem>>, vector<49x32xf32>
    %c56_204 = arith.constant 56 : index
    %c0_205 = arith.constant 0 : index
    %153 = vector.load %arg6[%c56_204, %c0_205] : memref<192x128xf32, #tpu.memory_space<vmem>>, vector<49x32xf32>
    tpu.vector_store %arg6[%c56_204, %c0_205], %152 {strides = array<i32>} : memref<192x128xf32, #tpu.memory_space<vmem>>, vector<49x32xf32>,
    %c57_206 = arith.constant 57 : index
    %c0_207 = arith.constant 0 : index
    %154 = vector.load %arg5[%c57_206, %c0_207] : memref<208x32xf32, #tpu.memory_space<vmem>>, vector<49x32xf32>
    %c56_208 = arith.constant 56 : index
    %c32_209 = arith.constant 32 : index
    %155 = vector.load %arg6[%c56_208, %c32_209] : memref<192x128xf32, #tpu.memory_space<vmem>>, vector<49x32xf32>
    tpu.vector_store %arg6[%c56_208, %c32_209], %154 {strides = array<i32>} : memref<192x128xf32, #tpu.memory_space<vmem>>, vector<49x32xf32>,
    %c58_210 = arith.constant 58 : index
    %c0_211 = arith.constant 0 : index
    %156 = vector.load %arg5[%c58_210, %c0_211] : memref<208x32xf32, #tpu.memory_space<vmem>>, vector<49x32xf32>
    %c56_212 = arith.constant 56 : index
    %c64_213 = arith.constant 64 : index
    %157 = vector.load %arg6[%c56_212, %c64_213] : memref<192x128xf32, #tpu.memory_space<vmem>>, vector<49x32xf32>
    tpu.vector_store %arg6[%c56_212, %c64_213], %156 {strides = array<i32>} : memref<192x128xf32, #tpu.memory_space<vmem>>, vector<49x32xf32>,
    %c336 = arith.constant 336 : index
    %c0_214 = arith.constant 0 : index
    %158 = vector.load %arg2[%c336, %c0_214] : memref<1616x32xbf16, #tpu.memory_space<vmem>>, vector<96x32xbf16>
    %159 = arith.extf %158 : vector<96x32xbf16> to vector<96x32xf32>
    %c0_215 = arith.constant 0 : index
    %c0_216 = arith.constant 0 : index
    %160 = vector.load %arg6[%c0_215, %c0_216] : memref<192x128xf32, #tpu.memory_space<vmem>>, vector<112x96xf32>
    %cst_217 = arith.constant dense<0.000000e+00> : vector<112x32xf32>
    %161 = tpu.matmul %160, %159, %cst_217 {dimension_numbers = #tpu.dot_dimension_numbers<[1], [0], [0], [1], [0, 0, 1, 1], [], []>} : vector<112x96xf32>, vector<96x32xf32>, vector<112x32xf32> -> vector<112x32xf32>
    %c4_218 = arith.constant 4 : index
    %c0_219 = arith.constant 0 : index
    %162 = vector.load %arg3[%c4_218, %c0_219] : memref<18x32xf32, #tpu.memory_space<vmem>>, vector<1x32xf32>
    %163 = vector.broadcast %162 : vector<1x32xf32> to vector<112x32xf32>
    %164 = arith.addf %161, %163 : vector<112x32xf32>
    %cst_220 = arith.constant 0.000000e+00 : f32
    %165 = vector.broadcast %cst_220 : f32 to vector<112x32xf32>
    %166 = arith.maximumf %164, %165 : vector<112x32xf32>
    %167 = vector.extract_strided_slice %166 {offsets = [0, 0], sizes = [49, 32], strides = [1, 1]} : vector<112x32xf32> to vector<49x32xf32>
    %168 = vector.extract_strided_slice %166 {offsets = [56, 0], sizes = [49, 32], strides = [1, 1]} : vector<112x32xf32> to vector<49x32xf32>
    %169 = arith.addf %167, %136 : vector<49x32xf32>
    %170 = arith.addf %168, %137 : vector<49x32xf32>
    %cst_221 = arith.constant 0.000000e+00 : f32
    %171 = vector.broadcast %cst_221 : f32 to vector<2x32xf32>
    %c0_222 = arith.constant 0 : index
    %c0_223 = arith.constant 0 : index
    %172 = vector.load %arg5[%c0_222, %c0_223] : memref<208x32xf32, #tpu.memory_space<vmem>>, vector<2x32xf32>
    tpu.vector_store %arg5[%c0_222, %c0_223], %171 {strides = array<i32>} : memref<208x32xf32, #tpu.memory_space<vmem>>, vector<2x32xf32>,
    %c51 = arith.constant 51 : index
    %c0_224 = arith.constant 0 : index
    %173 = vector.load %arg5[%c51, %c0_224] : memref<208x32xf32, #tpu.memory_space<vmem>>, vector<2x32xf32>
    tpu.vector_store %arg5[%c51, %c0_224], %171 {strides = array<i32>} : memref<208x32xf32, #tpu.memory_space<vmem>>, vector<2x32xf32>,
    %c2_225 = arith.constant 2 : index
    %c0_226 = arith.constant 0 : index
    %174 = vector.load %arg5[%c2_225, %c0_226] : memref<208x32xf32, #tpu.memory_space<vmem>>, vector<49x32xf32>
    tpu.vector_store %arg5[%c2_225, %c0_226], %169 {strides = array<i32>} : memref<208x32xf32, #tpu.memory_space<vmem>>, vector<49x32xf32>,
    %cst_227 = arith.constant 0.000000e+00 : f32
    %175 = vector.broadcast %cst_227 : f32 to vector<2x32xf32>
    %c56_228 = arith.constant 56 : index
    %c0_229 = arith.constant 0 : index
    %176 = vector.load %arg5[%c56_228, %c0_229] : memref<208x32xf32, #tpu.memory_space<vmem>>, vector<2x32xf32>
    tpu.vector_store %arg5[%c56_228, %c0_229], %175 {strides = array<i32>} : memref<208x32xf32, #tpu.memory_space<vmem>>, vector<2x32xf32>,
    %c107_230 = arith.constant 107 : index
    %c0_231 = arith.constant 0 : index
    %177 = vector.load %arg5[%c107_230, %c0_231] : memref<208x32xf32, #tpu.memory_space<vmem>>, vector<2x32xf32>
    tpu.vector_store %arg5[%c107_230, %c0_231], %175 {strides = array<i32>} : memref<208x32xf32, #tpu.memory_space<vmem>>, vector<2x32xf32>,
    %c58_232 = arith.constant 58 : index
    %c0_233 = arith.constant 0 : index
    %178 = vector.load %arg5[%c58_232, %c0_233] : memref<208x32xf32, #tpu.memory_space<vmem>>, vector<49x32xf32>
    tpu.vector_store %arg5[%c58_232, %c0_233], %170 {strides = array<i32>} : memref<208x32xf32, #tpu.memory_space<vmem>>, vector<49x32xf32>,
    %c0_234 = arith.constant 0 : index
    %c0_235 = arith.constant 0 : index
    %179 = tpu.strided_load %arg5[%c0_234, %c0_235] {strides = array<i32: 2, 1>} : memref<208x32xf32, #tpu.memory_space<vmem>>, vector<25x32xf32>
    %c0_236 = arith.constant 0 : index
    %c0_237 = arith.constant 0 : index
    %180 = vector.load %arg6[%c0_236, %c0_237] : memref<192x128xf32, #tpu.memory_space<vmem>>, vector<25x32xf32>
    tpu.vector_store %arg6[%c0_236, %c0_237], %179 {strides = array<i32>} : memref<192x128xf32, #tpu.memory_space<vmem>>, vector<25x32xf32>,
    %c1_238 = arith.constant 1 : index
    %c0_239 = arith.constant 0 : index
    %181 = tpu.strided_load %arg5[%c1_238, %c0_239] {strides = array<i32: 2, 1>} : memref<208x32xf32, #tpu.memory_space<vmem>>, vector<25x32xf32>
    %c0_240 = arith.constant 0 : index
    %c32_241 = arith.constant 32 : index
    %182 = vector.load %arg6[%c0_240, %c32_241] : memref<192x128xf32, #tpu.memory_space<vmem>>, vector<25x32xf32>
    tpu.vector_store %arg6[%c0_240, %c32_241], %181 {strides = array<i32>} : memref<192x128xf32, #tpu.memory_space<vmem>>, vector<25x32xf32>,
    %c2_242 = arith.constant 2 : index
    %c0_243 = arith.constant 0 : index
    %183 = tpu.strided_load %arg5[%c2_242, %c0_243] {strides = array<i32: 2, 1>} : memref<208x32xf32, #tpu.memory_space<vmem>>, vector<25x32xf32>
    %c0_244 = arith.constant 0 : index
    %c64_245 = arith.constant 64 : index
    %184 = vector.load %arg6[%c0_244, %c64_245] : memref<192x128xf32, #tpu.memory_space<vmem>>, vector<25x32xf32>
    tpu.vector_store %arg6[%c0_244, %c64_245], %183 {strides = array<i32>} : memref<192x128xf32, #tpu.memory_space<vmem>>, vector<25x32xf32>,
    %c3_246 = arith.constant 3 : index
    %c0_247 = arith.constant 0 : index
    %185 = tpu.strided_load %arg5[%c3_246, %c0_247] {strides = array<i32: 2, 1>} : memref<208x32xf32, #tpu.memory_space<vmem>>, vector<25x32xf32>
    %c0_248 = arith.constant 0 : index
    %c96_249 = arith.constant 96 : index
    %186 = vector.load %arg6[%c0_248, %c96_249] : memref<192x128xf32, #tpu.memory_space<vmem>>, vector<25x32xf32>
    tpu.vector_store %arg6[%c0_248, %c96_249], %185 {strides = array<i32>} : memref<192x128xf32, #tpu.memory_space<vmem>>, vector<25x32xf32>,
    %c56_250 = arith.constant 56 : index
    %c0_251 = arith.constant 0 : index
    %187 = tpu.strided_load %arg5[%c56_250, %c0_251] {strides = array<i32: 2, 1>} : memref<208x32xf32, #tpu.memory_space<vmem>>, vector<25x32xf32>
    %c32_252 = arith.constant 32 : index
    %c0_253 = arith.constant 0 : index
    %188 = vector.load %arg6[%c32_252, %c0_253] : memref<192x128xf32, #tpu.memory_space<vmem>>, vector<25x32xf32>
    tpu.vector_store %arg6[%c32_252, %c0_253], %187 {strides = array<i32>} : memref<192x128xf32, #tpu.memory_space<vmem>>, vector<25x32xf32>,
    %c57_254 = arith.constant 57 : index
    %c0_255 = arith.constant 0 : index
    %189 = tpu.strided_load %arg5[%c57_254, %c0_255] {strides = array<i32: 2, 1>} : memref<208x32xf32, #tpu.memory_space<vmem>>, vector<25x32xf32>
    %c32_256 = arith.constant 32 : index
    %c32_257 = arith.constant 32 : index
    %190 = vector.load %arg6[%c32_256, %c32_257] : memref<192x128xf32, #tpu.memory_space<vmem>>, vector<25x32xf32>
    tpu.vector_store %arg6[%c32_256, %c32_257], %189 {strides = array<i32>} : memref<192x128xf32, #tpu.memory_space<vmem>>, vector<25x32xf32>,
    %c58_258 = arith.constant 58 : index
    %c0_259 = arith.constant 0 : index
    %191 = tpu.strided_load %arg5[%c58_258, %c0_259] {strides = array<i32: 2, 1>} : memref<208x32xf32, #tpu.memory_space<vmem>>, vector<25x32xf32>
    %c32_260 = arith.constant 32 : index
    %c64_261 = arith.constant 64 : index
    %192 = vector.load %arg6[%c32_260, %c64_261] : memref<192x128xf32, #tpu.memory_space<vmem>>, vector<25x32xf32>
    tpu.vector_store %arg6[%c32_260, %c64_261], %191 {strides = array<i32>} : memref<192x128xf32, #tpu.memory_space<vmem>>, vector<25x32xf32>,
    %c59 = arith.constant 59 : index
    %c0_262 = arith.constant 0 : index
    %193 = tpu.strided_load %arg5[%c59, %c0_262] {strides = array<i32: 2, 1>} : memref<208x32xf32, #tpu.memory_space<vmem>>, vector<25x32xf32>
    %c32_263 = arith.constant 32 : index
    %c96_264 = arith.constant 96 : index
    %194 = vector.load %arg6[%c32_263, %c96_264] : memref<192x128xf32, #tpu.memory_space<vmem>>, vector<25x32xf32>
    tpu.vector_store %arg6[%c32_263, %c96_264], %193 {strides = array<i32>} : memref<192x128xf32, #tpu.memory_space<vmem>>, vector<25x32xf32>,
    %c432 = arith.constant 432 : index
    %c0_265 = arith.constant 0 : index
    %195 = vector.load %arg2[%c432, %c0_265] : memref<1616x32xbf16, #tpu.memory_space<vmem>>, vector<128x32xbf16>
    %196 = arith.extf %195 : vector<128x32xbf16> to vector<128x32xf32>
    %c0_266 = arith.constant 0 : index
    %c0_267 = arith.constant 0 : index
    %197 = vector.load %arg6[%c0_266, %c0_267] : memref<192x128xf32, #tpu.memory_space<vmem>>, vector<64x128xf32>
    %cst_268 = arith.constant dense<0.000000e+00> : vector<64x32xf32>
    %198 = tpu.matmul %197, %196, %cst_268 {dimension_numbers = #tpu.dot_dimension_numbers<[1], [0], [0], [1], [0, 0, 1, 1], [], []>} : vector<64x128xf32>, vector<128x32xf32>, vector<64x32xf32> -> vector<64x32xf32>
    %c5 = arith.constant 5 : index
    %c0_269 = arith.constant 0 : index
    %199 = vector.load %arg3[%c5, %c0_269] : memref<18x32xf32, #tpu.memory_space<vmem>>, vector<1x32xf32>
    %200 = vector.broadcast %199 : vector<1x32xf32> to vector<64x32xf32>
    %201 = arith.addf %198, %200 : vector<64x32xf32>
    %cst_270 = arith.constant 0.000000e+00 : f32
    %202 = vector.broadcast %cst_270 : f32 to vector<64x32xf32>
    %203 = arith.maximumf %201, %202 : vector<64x32xf32>
    %204 = vector.extract_strided_slice %203 {offsets = [0, 0], sizes = [25, 32], strides = [1, 1]} : vector<64x32xf32> to vector<25x32xf32>
    %205 = vector.extract_strided_slice %203 {offsets = [32, 0], sizes = [25, 32], strides = [1, 1]} : vector<64x32xf32> to vector<25x32xf32>
    %cst_271 = arith.constant 0.000000e+00 : f32
    %206 = vector.broadcast %cst_271 : f32 to vector<1x32xf32>
    %c0_272 = arith.constant 0 : index
    %c0_273 = arith.constant 0 : index
    %207 = vector.load %arg5[%c0_272, %c0_273] : memref<208x32xf32, #tpu.memory_space<vmem>>, vector<1x32xf32>
    tpu.vector_store %arg5[%c0_272, %c0_273], %206 {strides = array<i32>} : memref<208x32xf32, #tpu.memory_space<vmem>>, vector<1x32xf32>,
    %c26 = arith.constant 26 : index
    %c0_274 = arith.constant 0 : index
    %208 = vector.load %arg5[%c26, %c0_274] : memref<208x32xf32, #tpu.memory_space<vmem>>, vector<1x32xf32>
    tpu.vector_store %arg5[%c26, %c0_274], %206 {strides = array<i32>} : memref<208x32xf32, #tpu.memory_space<vmem>>, vector<1x32xf32>,
    %c1_275 = arith.constant 1 : index
    %c0_276 = arith.constant 0 : index
    %209 = vector.load %arg5[%c1_275, %c0_276] : memref<208x32xf32, #tpu.memory_space<vmem>>, vector<25x32xf32>
    tpu.vector_store %arg5[%c1_275, %c0_276], %204 {strides = array<i32>} : memref<208x32xf32, #tpu.memory_space<vmem>>, vector<25x32xf32>,
    %cst_277 = arith.constant 0.000000e+00 : f32
    %210 = vector.broadcast %cst_277 : f32 to vector<1x32xf32>
    %c32_278 = arith.constant 32 : index
    %c0_279 = arith.constant 0 : index
    %211 = vector.load %arg5[%c32_278, %c0_279] : memref<208x32xf32, #tpu.memory_space<vmem>>, vector<1x32xf32>
    tpu.vector_store %arg5[%c32_278, %c0_279], %210 {strides = array<i32>} : memref<208x32xf32, #tpu.memory_space<vmem>>, vector<1x32xf32>,
    %c58_280 = arith.constant 58 : index
    %c0_281 = arith.constant 0 : index
    %212 = vector.load %arg5[%c58_280, %c0_281] : memref<208x32xf32, #tpu.memory_space<vmem>>, vector<1x32xf32>
    tpu.vector_store %arg5[%c58_280, %c0_281], %210 {strides = array<i32>} : memref<208x32xf32, #tpu.memory_space<vmem>>, vector<1x32xf32>,
    %c33 = arith.constant 33 : index
    %c0_282 = arith.constant 0 : index
    %213 = vector.load %arg5[%c33, %c0_282] : memref<208x32xf32, #tpu.memory_space<vmem>>, vector<25x32xf32>
    tpu.vector_store %arg5[%c33, %c0_282], %205 {strides = array<i32>} : memref<208x32xf32, #tpu.memory_space<vmem>>, vector<25x32xf32>,
    %c0_283 = arith.constant 0 : index
    %c0_284 = arith.constant 0 : index
    %214 = vector.load %arg5[%c0_283, %c0_284] : memref<208x32xf32, #tpu.memory_space<vmem>>, vector<25x32xf32>
    %c0_285 = arith.constant 0 : index
    %c0_286 = arith.constant 0 : index
    %215 = vector.load %arg6[%c0_285, %c0_286] : memref<192x128xf32, #tpu.memory_space<vmem>>, vector<25x32xf32>
    tpu.vector_store %arg6[%c0_285, %c0_286], %214 {strides = array<i32>} : memref<192x128xf32, #tpu.memory_space<vmem>>, vector<25x32xf32>,
    %c1_287 = arith.constant 1 : index
    %c0_288 = arith.constant 0 : index
    %216 = vector.load %arg5[%c1_287, %c0_288] : memref<208x32xf32, #tpu.memory_space<vmem>>, vector<25x32xf32>
    %c0_289 = arith.constant 0 : index
    %c32_290 = arith.constant 32 : index
    %217 = vector.load %arg6[%c0_289, %c32_290] : memref<192x128xf32, #tpu.memory_space<vmem>>, vector<25x32xf32>
    tpu.vector_store %arg6[%c0_289, %c32_290], %216 {strides = array<i32>} : memref<192x128xf32, #tpu.memory_space<vmem>>, vector<25x32xf32>,
    %c2_291 = arith.constant 2 : index
    %c0_292 = arith.constant 0 : index
    %218 = vector.load %arg5[%c2_291, %c0_292] : memref<208x32xf32, #tpu.memory_space<vmem>>, vector<25x32xf32>
    %c0_293 = arith.constant 0 : index
    %c64_294 = arith.constant 64 : index
    %219 = vector.load %arg6[%c0_293, %c64_294] : memref<192x128xf32, #tpu.memory_space<vmem>>, vector<25x32xf32>
    tpu.vector_store %arg6[%c0_293, %c64_294], %218 {strides = array<i32>} : memref<192x128xf32, #tpu.memory_space<vmem>>, vector<25x32xf32>,
    %c32_295 = arith.constant 32 : index
    %c0_296 = arith.constant 0 : index
    %220 = vector.load %arg5[%c32_295, %c0_296] : memref<208x32xf32, #tpu.memory_space<vmem>>, vector<25x32xf32>
    %c32_297 = arith.constant 32 : index
    %c0_298 = arith.constant 0 : index
    %221 = vector.load %arg6[%c32_297, %c0_298] : memref<192x128xf32, #tpu.memory_space<vmem>>, vector<25x32xf32>
    tpu.vector_store %arg6[%c32_297, %c0_298], %220 {strides = array<i32>} : memref<192x128xf32, #tpu.memory_space<vmem>>, vector<25x32xf32>,
    %c33_299 = arith.constant 33 : index
    %c0_300 = arith.constant 0 : index
    %222 = vector.load %arg5[%c33_299, %c0_300] : memref<208x32xf32, #tpu.memory_space<vmem>>, vector<25x32xf32>
    %c32_301 = arith.constant 32 : index
    %c32_302 = arith.constant 32 : index
    %223 = vector.load %arg6[%c32_301, %c32_302] : memref<192x128xf32, #tpu.memory_space<vmem>>, vector<25x32xf32>
    tpu.vector_store %arg6[%c32_301, %c32_302], %222 {strides = array<i32>} : memref<192x128xf32, #tpu.memory_space<vmem>>, vector<25x32xf32>,
    %c34 = arith.constant 34 : index
    %c0_303 = arith.constant 0 : index
    %224 = vector.load %arg5[%c34, %c0_303] : memref<208x32xf32, #tpu.memory_space<vmem>>, vector<25x32xf32>
    %c32_304 = arith.constant 32 : index
    %c64_305 = arith.constant 64 : index
    %225 = vector.load %arg6[%c32_304, %c64_305] : memref<192x128xf32, #tpu.memory_space<vmem>>, vector<25x32xf32>
    tpu.vector_store %arg6[%c32_304, %c64_305], %224 {strides = array<i32>} : memref<192x128xf32, #tpu.memory_space<vmem>>, vector<25x32xf32>,
    %c560 = arith.constant 560 : index
    %c0_306 = arith.constant 0 : index
    %226 = vector.load %arg2[%c560, %c0_306] : memref<1616x32xbf16, #tpu.memory_space<vmem>>, vector<96x32xbf16>
    %227 = arith.extf %226 : vector<96x32xbf16> to vector<96x32xf32>
    %c0_307 = arith.constant 0 : index
    %c0_308 = arith.constant 0 : index
    %228 = vector.load %arg6[%c0_307, %c0_308] : memref<192x128xf32, #tpu.memory_space<vmem>>, vector<64x96xf32>
    %cst_309 = arith.constant dense<0.000000e+00> : vector<64x32xf32>
    %229 = tpu.matmul %228, %227, %cst_309 {dimension_numbers = #tpu.dot_dimension_numbers<[1], [0], [0], [1], [0, 0, 1, 1], [], []>} : vector<64x96xf32>, vector<96x32xf32>, vector<64x32xf32> -> vector<64x32xf32>
    %c6 = arith.constant 6 : index
    %c0_310 = arith.constant 0 : index
    %230 = vector.load %arg3[%c6, %c0_310] : memref<18x32xf32, #tpu.memory_space<vmem>>, vector<1x32xf32>
    %231 = vector.broadcast %230 : vector<1x32xf32> to vector<64x32xf32>
    %232 = arith.addf %229, %231 : vector<64x32xf32>
    %cst_311 = arith.constant 0.000000e+00 : f32
    %233 = vector.broadcast %cst_311 : f32 to vector<64x32xf32>
    %234 = arith.maximumf %232, %233 : vector<64x32xf32>
    %235 = vector.extract_strided_slice %234 {offsets = [0, 0], sizes = [25, 32], strides = [1, 1]} : vector<64x32xf32> to vector<25x32xf32>
    %236 = vector.extract_strided_slice %234 {offsets = [32, 0], sizes = [25, 32], strides = [1, 1]} : vector<64x32xf32> to vector<25x32xf32>
    %237 = arith.addf %235, %204 : vector<25x32xf32>
    %238 = arith.addf %236, %205 : vector<25x32xf32>
    %cst_312 = arith.constant 0.000000e+00 : f32
    %239 = vector.broadcast %cst_312 : f32 to vector<1x32xf32>
    %c0_313 = arith.constant 0 : index
    %c0_314 = arith.constant 0 : index
    %240 = vector.load %arg5[%c0_313, %c0_314] : memref<208x32xf32, #tpu.memory_space<vmem>>, vector<1x32xf32>
    tpu.vector_store %arg5[%c0_313, %c0_314], %239 {strides = array<i32>} : memref<208x32xf32, #tpu.memory_space<vmem>>, vector<1x32xf32>,
    %c26_315 = arith.constant 26 : index
    %c0_316 = arith.constant 0 : index
    %241 = vector.load %arg5[%c26_315, %c0_316] : memref<208x32xf32, #tpu.memory_space<vmem>>, vector<1x32xf32>
    tpu.vector_store %arg5[%c26_315, %c0_316], %239 {strides = array<i32>} : memref<208x32xf32, #tpu.memory_space<vmem>>, vector<1x32xf32>,
    %c1_317 = arith.constant 1 : index
    %c0_318 = arith.constant 0 : index
    %242 = vector.load %arg5[%c1_317, %c0_318] : memref<208x32xf32, #tpu.memory_space<vmem>>, vector<25x32xf32>
    tpu.vector_store %arg5[%c1_317, %c0_318], %237 {strides = array<i32>} : memref<208x32xf32, #tpu.memory_space<vmem>>, vector<25x32xf32>,
    %cst_319 = arith.constant 0.000000e+00 : f32
    %243 = vector.broadcast %cst_319 : f32 to vector<1x32xf32>
    %c32_320 = arith.constant 32 : index
    %c0_321 = arith.constant 0 : index
    %244 = vector.load %arg5[%c32_320, %c0_321] : memref<208x32xf32, #tpu.memory_space<vmem>>, vector<1x32xf32>
    tpu.vector_store %arg5[%c32_320, %c0_321], %243 {strides = array<i32>} : memref<208x32xf32, #tpu.memory_space<vmem>>, vector<1x32xf32>,
    %c58_322 = arith.constant 58 : index
    %c0_323 = arith.constant 0 : index
    %245 = vector.load %arg5[%c58_322, %c0_323] : memref<208x32xf32, #tpu.memory_space<vmem>>, vector<1x32xf32>
    tpu.vector_store %arg5[%c58_322, %c0_323], %243 {strides = array<i32>} : memref<208x32xf32, #tpu.memory_space<vmem>>, vector<1x32xf32>,
    %c33_324 = arith.constant 33 : index
    %c0_325 = arith.constant 0 : index
    %246 = vector.load %arg5[%c33_324, %c0_325] : memref<208x32xf32, #tpu.memory_space<vmem>>, vector<25x32xf32>
    tpu.vector_store %arg5[%c33_324, %c0_325], %238 {strides = array<i32>} : memref<208x32xf32, #tpu.memory_space<vmem>>, vector<25x32xf32>,
    %c0_326 = arith.constant 0 : index
    %c0_327 = arith.constant 0 : index
    %247 = vector.load %arg5[%c0_326, %c0_327] : memref<208x32xf32, #tpu.memory_space<vmem>>, vector<25x32xf32>
    %c0_328 = arith.constant 0 : index
    %c0_329 = arith.constant 0 : index
    %248 = vector.load %arg6[%c0_328, %c0_329] : memref<192x128xf32, #tpu.memory_space<vmem>>, vector<25x32xf32>
    tpu.vector_store %arg6[%c0_328, %c0_329], %247 {strides = array<i32>} : memref<192x128xf32, #tpu.memory_space<vmem>>, vector<25x32xf32>,
    %c1_330 = arith.constant 1 : index
    %c0_331 = arith.constant 0 : index
    %249 = vector.load %arg5[%c1_330, %c0_331] : memref<208x32xf32, #tpu.memory_space<vmem>>, vector<25x32xf32>
    %c0_332 = arith.constant 0 : index
    %c32_333 = arith.constant 32 : index
    %250 = vector.load %arg6[%c0_332, %c32_333] : memref<192x128xf32, #tpu.memory_space<vmem>>, vector<25x32xf32>
    tpu.vector_store %arg6[%c0_332, %c32_333], %249 {strides = array<i32>} : memref<192x128xf32, #tpu.memory_space<vmem>>, vector<25x32xf32>,
    %c2_334 = arith.constant 2 : index
    %c0_335 = arith.constant 0 : index
    %251 = vector.load %arg5[%c2_334, %c0_335] : memref<208x32xf32, #tpu.memory_space<vmem>>, vector<25x32xf32>
    %c0_336 = arith.constant 0 : index
    %c64_337 = arith.constant 64 : index
    %252 = vector.load %arg6[%c0_336, %c64_337] : memref<192x128xf32, #tpu.memory_space<vmem>>, vector<25x32xf32>
    tpu.vector_store %arg6[%c0_336, %c64_337], %251 {strides = array<i32>} : memref<192x128xf32, #tpu.memory_space<vmem>>, vector<25x32xf32>,
    %c32_338 = arith.constant 32 : index
    %c0_339 = arith.constant 0 : index
    %253 = vector.load %arg5[%c32_338, %c0_339] : memref<208x32xf32, #tpu.memory_space<vmem>>, vector<25x32xf32>
    %c32_340 = arith.constant 32 : index
    %c0_341 = arith.constant 0 : index
    %254 = vector.load %arg6[%c32_340, %c0_341] : memref<192x128xf32, #tpu.memory_space<vmem>>, vector<25x32xf32>
    tpu.vector_store %arg6[%c32_340, %c0_341], %253 {strides = array<i32>} : memref<192x128xf32, #tpu.memory_space<vmem>>, vector<25x32xf32>,
    %c33_342 = arith.constant 33 : index
    %c0_343 = arith.constant 0 : index
    %255 = vector.load %arg5[%c33_342, %c0_343] : memref<208x32xf32, #tpu.memory_space<vmem>>, vector<25x32xf32>
    %c32_344 = arith.constant 32 : index
    %c32_345 = arith.constant 32 : index
    %256 = vector.load %arg6[%c32_344, %c32_345] : memref<192x128xf32, #tpu.memory_space<vmem>>, vector<25x32xf32>
    tpu.vector_store %arg6[%c32_344, %c32_345], %255 {strides = array<i32>} : memref<192x128xf32, #tpu.memory_space<vmem>>, vector<25x32xf32>,
    %c34_346 = arith.constant 34 : index
    %c0_347 = arith.constant 0 : index
    %257 = vector.load %arg5[%c34_346, %c0_347] : memref<208x32xf32, #tpu.memory_space<vmem>>, vector<25x32xf32>
    %c32_348 = arith.constant 32 : index
    %c64_349 = arith.constant 64 : index
    %258 = vector.load %arg6[%c32_348, %c64_349] : memref<192x128xf32, #tpu.memory_space<vmem>>, vector<25x32xf32>
    tpu.vector_store %arg6[%c32_348, %c64_349], %257 {strides = array<i32>} : memref<192x128xf32, #tpu.memory_space<vmem>>, vector<25x32xf32>,
    %c656 = arith.constant 656 : index
    %c0_350 = arith.constant 0 : index
    %259 = vector.load %arg2[%c656, %c0_350] : memref<1616x32xbf16, #tpu.memory_space<vmem>>, vector<96x32xbf16>
    %260 = arith.extf %259 : vector<96x32xbf16> to vector<96x32xf32>
    %c0_351 = arith.constant 0 : index
    %c0_352 = arith.constant 0 : index
    %261 = vector.load %arg6[%c0_351, %c0_352] : memref<192x128xf32, #tpu.memory_space<vmem>>, vector<64x96xf32>
    %cst_353 = arith.constant dense<0.000000e+00> : vector<64x32xf32>
    %262 = tpu.matmul %261, %260, %cst_353 {dimension_numbers = #tpu.dot_dimension_numbers<[1], [0], [0], [1], [0, 0, 1, 1], [], []>} : vector<64x96xf32>, vector<96x32xf32>, vector<64x32xf32> -> vector<64x32xf32>
    %c7 = arith.constant 7 : index
    %c0_354 = arith.constant 0 : index
    %263 = vector.load %arg3[%c7, %c0_354] : memref<18x32xf32, #tpu.memory_space<vmem>>, vector<1x32xf32>
    %264 = vector.broadcast %263 : vector<1x32xf32> to vector<64x32xf32>
    %265 = arith.addf %262, %264 : vector<64x32xf32>
    %cst_355 = arith.constant 0.000000e+00 : f32
    %266 = vector.broadcast %cst_355 : f32 to vector<64x32xf32>
    %267 = arith.maximumf %265, %266 : vector<64x32xf32>
    %268 = vector.extract_strided_slice %267 {offsets = [0, 0], sizes = [25, 32], strides = [1, 1]} : vector<64x32xf32> to vector<25x32xf32>
    %269 = vector.extract_strided_slice %267 {offsets = [32, 0], sizes = [25, 32], strides = [1, 1]} : vector<64x32xf32> to vector<25x32xf32>
    %270 = arith.addf %268, %237 : vector<25x32xf32>
    %271 = arith.addf %269, %238 : vector<25x32xf32>
    %cst_356 = arith.constant 0.000000e+00 : f32
    %272 = vector.broadcast %cst_356 : f32 to vector<2x32xf32>
    %c0_357 = arith.constant 0 : index
    %c0_358 = arith.constant 0 : index
    %273 = vector.load %arg5[%c0_357, %c0_358] : memref<208x32xf32, #tpu.memory_space<vmem>>, vector<2x32xf32>
    tpu.vector_store %arg5[%c0_357, %c0_358], %272 {strides = array<i32>} : memref<208x32xf32, #tpu.memory_space<vmem>>, vector<2x32xf32>,
    %c27 = arith.constant 27 : index
    %c0_359 = arith.constant 0 : index
    %274 = vector.load %arg5[%c27, %c0_359] : memref<208x32xf32, #tpu.memory_space<vmem>>, vector<2x32xf32>
    tpu.vector_store %arg5[%c27, %c0_359], %272 {strides = array<i32>} : memref<208x32xf32, #tpu.memory_space<vmem>>, vector<2x32xf32>,
    %c2_360 = arith.constant 2 : index
    %c0_361 = arith.constant 0 : index
    %275 = vector.load %arg5[%c2_360, %c0_361] : memref<208x32xf32, #tpu.memory_space<vmem>>, vector<25x32xf32>
    tpu.vector_store %arg5[%c2_360, %c0_361], %270 {strides = array<i32>} : memref<208x32xf32, #tpu.memory_space<vmem>>, vector<25x32xf32>,
    %cst_362 = arith.constant 0.000000e+00 : f32
    %276 = vector.broadcast %cst_362 : f32 to vector<2x32xf32>
    %c32_363 = arith.constant 32 : index
    %c0_364 = arith.constant 0 : index
    %277 = vector.load %arg5[%c32_363, %c0_364] : memref<208x32xf32, #tpu.memory_space<vmem>>, vector<2x32xf32>
    tpu.vector_store %arg5[%c32_363, %c0_364], %276 {strides = array<i32>} : memref<208x32xf32, #tpu.memory_space<vmem>>, vector<2x32xf32>,
    %c59_365 = arith.constant 59 : index
    %c0_366 = arith.constant 0 : index
    %278 = vector.load %arg5[%c59_365, %c0_366] : memref<208x32xf32, #tpu.memory_space<vmem>>, vector<2x32xf32>
    tpu.vector_store %arg5[%c59_365, %c0_366], %276 {strides = array<i32>} : memref<208x32xf32, #tpu.memory_space<vmem>>, vector<2x32xf32>,
    %c34_367 = arith.constant 34 : index
    %c0_368 = arith.constant 0 : index
    %279 = vector.load %arg5[%c34_367, %c0_368] : memref<208x32xf32, #tpu.memory_space<vmem>>, vector<25x32xf32>
    tpu.vector_store %arg5[%c34_367, %c0_368], %271 {strides = array<i32>} : memref<208x32xf32, #tpu.memory_space<vmem>>, vector<25x32xf32>,
    %c0_369 = arith.constant 0 : index
    %c0_370 = arith.constant 0 : index
    %280 = tpu.strided_load %arg5[%c0_369, %c0_370] {strides = array<i32: 2, 1>} : memref<208x32xf32, #tpu.memory_space<vmem>>, vector<13x32xf32>
    %c0_371 = arith.constant 0 : index
    %c0_372 = arith.constant 0 : index
    %281 = vector.load %arg6[%c0_371, %c0_372] : memref<192x128xf32, #tpu.memory_space<vmem>>, vector<13x32xf32>
    tpu.vector_store %arg6[%c0_371, %c0_372], %280 {strides = array<i32>} : memref<192x128xf32, #tpu.memory_space<vmem>>, vector<13x32xf32>,
    %c1_373 = arith.constant 1 : index
    %c0_374 = arith.constant 0 : index
    %282 = tpu.strided_load %arg5[%c1_373, %c0_374] {strides = array<i32: 2, 1>} : memref<208x32xf32, #tpu.memory_space<vmem>>, vector<13x32xf32>
    %c0_375 = arith.constant 0 : index
    %c32_376 = arith.constant 32 : index
    %283 = vector.load %arg6[%c0_375, %c32_376] : memref<192x128xf32, #tpu.memory_space<vmem>>, vector<13x32xf32>
    tpu.vector_store %arg6[%c0_375, %c32_376], %282 {strides = array<i32>} : memref<192x128xf32, #tpu.memory_space<vmem>>, vector<13x32xf32>,
    %c2_377 = arith.constant 2 : index
    %c0_378 = arith.constant 0 : index
    %284 = tpu.strided_load %arg5[%c2_377, %c0_378] {strides = array<i32: 2, 1>} : memref<208x32xf32, #tpu.memory_space<vmem>>, vector<13x32xf32>
    %c0_379 = arith.constant 0 : index
    %c64_380 = arith.constant 64 : index
    %285 = vector.load %arg6[%c0_379, %c64_380] : memref<192x128xf32, #tpu.memory_space<vmem>>, vector<13x32xf32>
    tpu.vector_store %arg6[%c0_379, %c64_380], %284 {strides = array<i32>} : memref<192x128xf32, #tpu.memory_space<vmem>>, vector<13x32xf32>,
    %c3_381 = arith.constant 3 : index
    %c0_382 = arith.constant 0 : index
    %286 = tpu.strided_load %arg5[%c3_381, %c0_382] {strides = array<i32: 2, 1>} : memref<208x32xf32, #tpu.memory_space<vmem>>, vector<13x32xf32>
    %c0_383 = arith.constant 0 : index
    %c96_384 = arith.constant 96 : index
    %287 = vector.load %arg6[%c0_383, %c96_384] : memref<192x128xf32, #tpu.memory_space<vmem>>, vector<13x32xf32>
    tpu.vector_store %arg6[%c0_383, %c96_384], %286 {strides = array<i32>} : memref<192x128xf32, #tpu.memory_space<vmem>>, vector<13x32xf32>,
    %c32_385 = arith.constant 32 : index
    %c0_386 = arith.constant 0 : index
    %288 = tpu.strided_load %arg5[%c32_385, %c0_386] {strides = array<i32: 2, 1>} : memref<208x32xf32, #tpu.memory_space<vmem>>, vector<13x32xf32>
    %c16_387 = arith.constant 16 : index
    %c0_388 = arith.constant 0 : index
    %289 = vector.load %arg6[%c16_387, %c0_388] : memref<192x128xf32, #tpu.memory_space<vmem>>, vector<13x32xf32>
    tpu.vector_store %arg6[%c16_387, %c0_388], %288 {strides = array<i32>} : memref<192x128xf32, #tpu.memory_space<vmem>>, vector<13x32xf32>,
    %c33_389 = arith.constant 33 : index
    %c0_390 = arith.constant 0 : index
    %290 = tpu.strided_load %arg5[%c33_389, %c0_390] {strides = array<i32: 2, 1>} : memref<208x32xf32, #tpu.memory_space<vmem>>, vector<13x32xf32>
    %c16_391 = arith.constant 16 : index
    %c32_392 = arith.constant 32 : index
    %291 = vector.load %arg6[%c16_391, %c32_392] : memref<192x128xf32, #tpu.memory_space<vmem>>, vector<13x32xf32>
    tpu.vector_store %arg6[%c16_391, %c32_392], %290 {strides = array<i32>} : memref<192x128xf32, #tpu.memory_space<vmem>>, vector<13x32xf32>,
    %c34_393 = arith.constant 34 : index
    %c0_394 = arith.constant 0 : index
    %292 = tpu.strided_load %arg5[%c34_393, %c0_394] {strides = array<i32: 2, 1>} : memref<208x32xf32, #tpu.memory_space<vmem>>, vector<13x32xf32>
    %c16_395 = arith.constant 16 : index
    %c64_396 = arith.constant 64 : index
    %293 = vector.load %arg6[%c16_395, %c64_396] : memref<192x128xf32, #tpu.memory_space<vmem>>, vector<13x32xf32>
    tpu.vector_store %arg6[%c16_395, %c64_396], %292 {strides = array<i32>} : memref<192x128xf32, #tpu.memory_space<vmem>>, vector<13x32xf32>,
    %c35 = arith.constant 35 : index
    %c0_397 = arith.constant 0 : index
    %294 = tpu.strided_load %arg5[%c35, %c0_397] {strides = array<i32: 2, 1>} : memref<208x32xf32, #tpu.memory_space<vmem>>, vector<13x32xf32>
    %c16_398 = arith.constant 16 : index
    %c96_399 = arith.constant 96 : index
    %295 = vector.load %arg6[%c16_398, %c96_399] : memref<192x128xf32, #tpu.memory_space<vmem>>, vector<13x32xf32>
    tpu.vector_store %arg6[%c16_398, %c96_399], %294 {strides = array<i32>} : memref<192x128xf32, #tpu.memory_space<vmem>>, vector<13x32xf32>,
    %c752 = arith.constant 752 : index
    %c0_400 = arith.constant 0 : index
    %296 = vector.load %arg2[%c752, %c0_400] : memref<1616x32xbf16, #tpu.memory_space<vmem>>, vector<128x32xbf16>
    %297 = arith.extf %296 : vector<128x32xbf16> to vector<128x32xf32>
    %c0_401 = arith.constant 0 : index
    %c0_402 = arith.constant 0 : index
    %298 = vector.load %arg6[%c0_401, %c0_402] : memref<192x128xf32, #tpu.memory_space<vmem>>, vector<32x128xf32>
    %cst_403 = arith.constant dense<0.000000e+00> : vector<32x32xf32>
    %299 = tpu.matmul %298, %297, %cst_403 {dimension_numbers = #tpu.dot_dimension_numbers<[1], [0], [0], [1], [0, 0, 1, 1], [], []>} : vector<32x128xf32>, vector<128x32xf32>, vector<32x32xf32> -> vector<32x32xf32>
    %c8_404 = arith.constant 8 : index
    %c0_405 = arith.constant 0 : index
    %300 = vector.load %arg3[%c8_404, %c0_405] : memref<18x32xf32, #tpu.memory_space<vmem>>, vector<1x32xf32>
    %301 = vector.broadcast %300 : vector<1x32xf32> to vector<32x32xf32>
    %302 = arith.addf %299, %301 : vector<32x32xf32>
    %cst_406 = arith.constant 0.000000e+00 : f32
    %303 = vector.broadcast %cst_406 : f32 to vector<32x32xf32>
    %304 = arith.maximumf %302, %303 : vector<32x32xf32>
    %305 = vector.extract_strided_slice %304 {offsets = [0, 0], sizes = [13, 32], strides = [1, 1]} : vector<32x32xf32> to vector<13x32xf32>
    %306 = vector.extract_strided_slice %304 {offsets = [16, 0], sizes = [13, 32], strides = [1, 1]} : vector<32x32xf32> to vector<13x32xf32>
    %cst_407 = arith.constant 0.000000e+00 : f32
    %307 = vector.broadcast %cst_407 : f32 to vector<1x32xf32>
    %c0_408 = arith.constant 0 : index
    %c0_409 = arith.constant 0 : index
    %308 = vector.load %arg5[%c0_408, %c0_409] : memref<208x32xf32, #tpu.memory_space<vmem>>, vector<1x32xf32>
    tpu.vector_store %arg5[%c0_408, %c0_409], %307 {strides = array<i32>} : memref<208x32xf32, #tpu.memory_space<vmem>>, vector<1x32xf32>,
    %c14 = arith.constant 14 : index
    %c0_410 = arith.constant 0 : index
    %309 = vector.load %arg5[%c14, %c0_410] : memref<208x32xf32, #tpu.memory_space<vmem>>, vector<1x32xf32>
    tpu.vector_store %arg5[%c14, %c0_410], %307 {strides = array<i32>} : memref<208x32xf32, #tpu.memory_space<vmem>>, vector<1x32xf32>,
    %c1_411 = arith.constant 1 : index
    %c0_412 = arith.constant 0 : index
    %310 = vector.load %arg5[%c1_411, %c0_412] : memref<208x32xf32, #tpu.memory_space<vmem>>, vector<13x32xf32>
    tpu.vector_store %arg5[%c1_411, %c0_412], %305 {strides = array<i32>} : memref<208x32xf32, #tpu.memory_space<vmem>>, vector<13x32xf32>,
    %cst_413 = arith.constant 0.000000e+00 : f32
    %311 = vector.broadcast %cst_413 : f32 to vector<1x32xf32>
    %c16_414 = arith.constant 16 : index
    %c0_415 = arith.constant 0 : index
    %312 = vector.load %arg5[%c16_414, %c0_415] : memref<208x32xf32, #tpu.memory_space<vmem>>, vector<1x32xf32>
    tpu.vector_store %arg5[%c16_414, %c0_415], %311 {strides = array<i32>} : memref<208x32xf32, #tpu.memory_space<vmem>>, vector<1x32xf32>,
    %c30 = arith.constant 30 : index
    %c0_416 = arith.constant 0 : index
    %313 = vector.load %arg5[%c30, %c0_416] : memref<208x32xf32, #tpu.memory_space<vmem>>, vector<1x32xf32>
    tpu.vector_store %arg5[%c30, %c0_416], %311 {strides = array<i32>} : memref<208x32xf32, #tpu.memory_space<vmem>>, vector<1x32xf32>,
    %c17 = arith.constant 17 : index
    %c0_417 = arith.constant 0 : index
    %314 = vector.load %arg5[%c17, %c0_417] : memref<208x32xf32, #tpu.memory_space<vmem>>, vector<13x32xf32>
    tpu.vector_store %arg5[%c17, %c0_417], %306 {strides = array<i32>} : memref<208x32xf32, #tpu.memory_space<vmem>>, vector<13x32xf32>,
    %c0_418 = arith.constant 0 : index
    %c0_419 = arith.constant 0 : index
    %315 = vector.load %arg5[%c0_418, %c0_419] : memref<208x32xf32, #tpu.memory_space<vmem>>, vector<13x32xf32>
    %c0_420 = arith.constant 0 : index
    %c0_421 = arith.constant 0 : index
    %316 = vector.load %arg6[%c0_420, %c0_421] : memref<192x128xf32, #tpu.memory_space<vmem>>, vector<13x32xf32>
    tpu.vector_store %arg6[%c0_420, %c0_421], %315 {strides = array<i32>} : memref<192x128xf32, #tpu.memory_space<vmem>>, vector<13x32xf32>,
    %c1_422 = arith.constant 1 : index
    %c0_423 = arith.constant 0 : index
    %317 = vector.load %arg5[%c1_422, %c0_423] : memref<208x32xf32, #tpu.memory_space<vmem>>, vector<13x32xf32>
    %c0_424 = arith.constant 0 : index
    %c32_425 = arith.constant 32 : index
    %318 = vector.load %arg6[%c0_424, %c32_425] : memref<192x128xf32, #tpu.memory_space<vmem>>, vector<13x32xf32>
    tpu.vector_store %arg6[%c0_424, %c32_425], %317 {strides = array<i32>} : memref<192x128xf32, #tpu.memory_space<vmem>>, vector<13x32xf32>,
    %c2_426 = arith.constant 2 : index
    %c0_427 = arith.constant 0 : index
    %319 = vector.load %arg5[%c2_426, %c0_427] : memref<208x32xf32, #tpu.memory_space<vmem>>, vector<13x32xf32>
    %c0_428 = arith.constant 0 : index
    %c64_429 = arith.constant 64 : index
    %320 = vector.load %arg6[%c0_428, %c64_429] : memref<192x128xf32, #tpu.memory_space<vmem>>, vector<13x32xf32>
    tpu.vector_store %arg6[%c0_428, %c64_429], %319 {strides = array<i32>} : memref<192x128xf32, #tpu.memory_space<vmem>>, vector<13x32xf32>,
    %c16_430 = arith.constant 16 : index
    %c0_431 = arith.constant 0 : index
    %321 = vector.load %arg5[%c16_430, %c0_431] : memref<208x32xf32, #tpu.memory_space<vmem>>, vector<13x32xf32>
    %c16_432 = arith.constant 16 : index
    %c0_433 = arith.constant 0 : index
    %322 = vector.load %arg6[%c16_432, %c0_433] : memref<192x128xf32, #tpu.memory_space<vmem>>, vector<13x32xf32>
    tpu.vector_store %arg6[%c16_432, %c0_433], %321 {strides = array<i32>} : memref<192x128xf32, #tpu.memory_space<vmem>>, vector<13x32xf32>,
    %c17_434 = arith.constant 17 : index
    %c0_435 = arith.constant 0 : index
    %323 = vector.load %arg5[%c17_434, %c0_435] : memref<208x32xf32, #tpu.memory_space<vmem>>, vector<13x32xf32>
    %c16_436 = arith.constant 16 : index
    %c32_437 = arith.constant 32 : index
    %324 = vector.load %arg6[%c16_436, %c32_437] : memref<192x128xf32, #tpu.memory_space<vmem>>, vector<13x32xf32>
    tpu.vector_store %arg6[%c16_436, %c32_437], %323 {strides = array<i32>} : memref<192x128xf32, #tpu.memory_space<vmem>>, vector<13x32xf32>,
    %c18 = arith.constant 18 : index
    %c0_438 = arith.constant 0 : index
    %325 = vector.load %arg5[%c18, %c0_438] : memref<208x32xf32, #tpu.memory_space<vmem>>, vector<13x32xf32>
    %c16_439 = arith.constant 16 : index
    %c64_440 = arith.constant 64 : index
    %326 = vector.load %arg6[%c16_439, %c64_440] : memref<192x128xf32, #tpu.memory_space<vmem>>, vector<13x32xf32>
    tpu.vector_store %arg6[%c16_439, %c64_440], %325 {strides = array<i32>} : memref<192x128xf32, #tpu.memory_space<vmem>>, vector<13x32xf32>,
    %c880 = arith.constant 880 : index
    %c0_441 = arith.constant 0 : index
    %327 = vector.load %arg2[%c880, %c0_441] : memref<1616x32xbf16, #tpu.memory_space<vmem>>, vector<96x32xbf16>
    %328 = arith.extf %327 : vector<96x32xbf16> to vector<96x32xf32>
    %c0_442 = arith.constant 0 : index
    %c0_443 = arith.constant 0 : index
    %329 = vector.load %arg6[%c0_442, %c0_443] : memref<192x128xf32, #tpu.memory_space<vmem>>, vector<32x96xf32>
    %cst_444 = arith.constant dense<0.000000e+00> : vector<32x32xf32>
    %330 = tpu.matmul %329, %328, %cst_444 {dimension_numbers = #tpu.dot_dimension_numbers<[1], [0], [0], [1], [0, 0, 1, 1], [], []>} : vector<32x96xf32>, vector<96x32xf32>, vector<32x32xf32> -> vector<32x32xf32>
    %c9 = arith.constant 9 : index
    %c0_445 = arith.constant 0 : index
    %331 = vector.load %arg3[%c9, %c0_445] : memref<18x32xf32, #tpu.memory_space<vmem>>, vector<1x32xf32>
    %332 = vector.broadcast %331 : vector<1x32xf32> to vector<32x32xf32>
    %333 = arith.addf %330, %332 : vector<32x32xf32>
    %cst_446 = arith.constant 0.000000e+00 : f32
    %334 = vector.broadcast %cst_446 : f32 to vector<32x32xf32>
    %335 = arith.maximumf %333, %334 : vector<32x32xf32>
    %336 = vector.extract_strided_slice %335 {offsets = [0, 0], sizes = [13, 32], strides = [1, 1]} : vector<32x32xf32> to vector<13x32xf32>
    %337 = vector.extract_strided_slice %335 {offsets = [16, 0], sizes = [13, 32], strides = [1, 1]} : vector<32x32xf32> to vector<13x32xf32>
    %338 = arith.addf %336, %305 : vector<13x32xf32>
    %339 = arith.addf %337, %306 : vector<13x32xf32>
    %cst_447 = arith.constant 0.000000e+00 : f32
    %340 = vector.broadcast %cst_447 : f32 to vector<1x32xf32>
    %c0_448 = arith.constant 0 : index
    %c0_449 = arith.constant 0 : index
    %341 = vector.load %arg5[%c0_448, %c0_449] : memref<208x32xf32, #tpu.memory_space<vmem>>, vector<1x32xf32>
    tpu.vector_store %arg5[%c0_448, %c0_449], %340 {strides = array<i32>} : memref<208x32xf32, #tpu.memory_space<vmem>>, vector<1x32xf32>,
    %c14_450 = arith.constant 14 : index
    %c0_451 = arith.constant 0 : index
    %342 = vector.load %arg5[%c14_450, %c0_451] : memref<208x32xf32, #tpu.memory_space<vmem>>, vector<1x32xf32>
    tpu.vector_store %arg5[%c14_450, %c0_451], %340 {strides = array<i32>} : memref<208x32xf32, #tpu.memory_space<vmem>>, vector<1x32xf32>,
    %c1_452 = arith.constant 1 : index
    %c0_453 = arith.constant 0 : index
    %343 = vector.load %arg5[%c1_452, %c0_453] : memref<208x32xf32, #tpu.memory_space<vmem>>, vector<13x32xf32>
    tpu.vector_store %arg5[%c1_452, %c0_453], %338 {strides = array<i32>} : memref<208x32xf32, #tpu.memory_space<vmem>>, vector<13x32xf32>,
    %cst_454 = arith.constant 0.000000e+00 : f32
    %344 = vector.broadcast %cst_454 : f32 to vector<1x32xf32>
    %c16_455 = arith.constant 16 : index
    %c0_456 = arith.constant 0 : index
    %345 = vector.load %arg5[%c16_455, %c0_456] : memref<208x32xf32, #tpu.memory_space<vmem>>, vector<1x32xf32>
    tpu.vector_store %arg5[%c16_455, %c0_456], %344 {strides = array<i32>} : memref<208x32xf32, #tpu.memory_space<vmem>>, vector<1x32xf32>,
    %c30_457 = arith.constant 30 : index
    %c0_458 = arith.constant 0 : index
    %346 = vector.load %arg5[%c30_457, %c0_458] : memref<208x32xf32, #tpu.memory_space<vmem>>, vector<1x32xf32>
    tpu.vector_store %arg5[%c30_457, %c0_458], %344 {strides = array<i32>} : memref<208x32xf32, #tpu.memory_space<vmem>>, vector<1x32xf32>,
    %c17_459 = arith.constant 17 : index
    %c0_460 = arith.constant 0 : index
    %347 = vector.load %arg5[%c17_459, %c0_460] : memref<208x32xf32, #tpu.memory_space<vmem>>, vector<13x32xf32>
    tpu.vector_store %arg5[%c17_459, %c0_460], %339 {strides = array<i32>} : memref<208x32xf32, #tpu.memory_space<vmem>>, vector<13x32xf32>,
    %c0_461 = arith.constant 0 : index
    %c0_462 = arith.constant 0 : index
    %348 = vector.load %arg5[%c0_461, %c0_462] : memref<208x32xf32, #tpu.memory_space<vmem>>, vector<13x32xf32>
    %c0_463 = arith.constant 0 : index
    %c0_464 = arith.constant 0 : index
    %349 = vector.load %arg6[%c0_463, %c0_464] : memref<192x128xf32, #tpu.memory_space<vmem>>, vector<13x32xf32>
    tpu.vector_store %arg6[%c0_463, %c0_464], %348 {strides = array<i32>} : memref<192x128xf32, #tpu.memory_space<vmem>>, vector<13x32xf32>,
    %c1_465 = arith.constant 1 : index
    %c0_466 = arith.constant 0 : index
    %350 = vector.load %arg5[%c1_465, %c0_466] : memref<208x32xf32, #tpu.memory_space<vmem>>, vector<13x32xf32>
    %c0_467 = arith.constant 0 : index
    %c32_468 = arith.constant 32 : index
    %351 = vector.load %arg6[%c0_467, %c32_468] : memref<192x128xf32, #tpu.memory_space<vmem>>, vector<13x32xf32>
    tpu.vector_store %arg6[%c0_467, %c32_468], %350 {strides = array<i32>} : memref<192x128xf32, #tpu.memory_space<vmem>>, vector<13x32xf32>,
    %c2_469 = arith.constant 2 : index
    %c0_470 = arith.constant 0 : index
    %352 = vector.load %arg5[%c2_469, %c0_470] : memref<208x32xf32, #tpu.memory_space<vmem>>, vector<13x32xf32>
    %c0_471 = arith.constant 0 : index
    %c64_472 = arith.constant 64 : index
    %353 = vector.load %arg6[%c0_471, %c64_472] : memref<192x128xf32, #tpu.memory_space<vmem>>, vector<13x32xf32>
    tpu.vector_store %arg6[%c0_471, %c64_472], %352 {strides = array<i32>} : memref<192x128xf32, #tpu.memory_space<vmem>>, vector<13x32xf32>,
    %c16_473 = arith.constant 16 : index
    %c0_474 = arith.constant 0 : index
    %354 = vector.load %arg5[%c16_473, %c0_474] : memref<208x32xf32, #tpu.memory_space<vmem>>, vector<13x32xf32>
    %c16_475 = arith.constant 16 : index
    %c0_476 = arith.constant 0 : index
    %355 = vector.load %arg6[%c16_475, %c0_476] : memref<192x128xf32, #tpu.memory_space<vmem>>, vector<13x32xf32>
    tpu.vector_store %arg6[%c16_475, %c0_476], %354 {strides = array<i32>} : memref<192x128xf32, #tpu.memory_space<vmem>>, vector<13x32xf32>,
    %c17_477 = arith.constant 17 : index
    %c0_478 = arith.constant 0 : index
    %356 = vector.load %arg5[%c17_477, %c0_478] : memref<208x32xf32, #tpu.memory_space<vmem>>, vector<13x32xf32>
    %c16_479 = arith.constant 16 : index
    %c32_480 = arith.constant 32 : index
    %357 = vector.load %arg6[%c16_479, %c32_480] : memref<192x128xf32, #tpu.memory_space<vmem>>, vector<13x32xf32>
    tpu.vector_store %arg6[%c16_479, %c32_480], %356 {strides = array<i32>} : memref<192x128xf32, #tpu.memory_space<vmem>>, vector<13x32xf32>,
    %c18_481 = arith.constant 18 : index
    %c0_482 = arith.constant 0 : index
    %358 = vector.load %arg5[%c18_481, %c0_482] : memref<208x32xf32, #tpu.memory_space<vmem>>, vector<13x32xf32>
    %c16_483 = arith.constant 16 : index
    %c64_484 = arith.constant 64 : index
    %359 = vector.load %arg6[%c16_483, %c64_484] : memref<192x128xf32, #tpu.memory_space<vmem>>, vector<13x32xf32>
    tpu.vector_store %arg6[%c16_483, %c64_484], %358 {strides = array<i32>} : memref<192x128xf32, #tpu.memory_space<vmem>>, vector<13x32xf32>,
    %c976 = arith.constant 976 : index
    %c0_485 = arith.constant 0 : index
    %360 = vector.load %arg2[%c976, %c0_485] : memref<1616x32xbf16, #tpu.memory_space<vmem>>, vector<96x32xbf16>
    %361 = arith.extf %360 : vector<96x32xbf16> to vector<96x32xf32>
    %c0_486 = arith.constant 0 : index
    %c0_487 = arith.constant 0 : index
    %362 = vector.load %arg6[%c0_486, %c0_487] : memref<192x128xf32, #tpu.memory_space<vmem>>, vector<32x96xf32>
    %cst_488 = arith.constant dense<0.000000e+00> : vector<32x32xf32>
    %363 = tpu.matmul %362, %361, %cst_488 {dimension_numbers = #tpu.dot_dimension_numbers<[1], [0], [0], [1], [0, 0, 1, 1], [], []>} : vector<32x96xf32>, vector<96x32xf32>, vector<32x32xf32> -> vector<32x32xf32>
    %c10 = arith.constant 10 : index
    %c0_489 = arith.constant 0 : index
    %364 = vector.load %arg3[%c10, %c0_489] : memref<18x32xf32, #tpu.memory_space<vmem>>, vector<1x32xf32>
    %365 = vector.broadcast %364 : vector<1x32xf32> to vector<32x32xf32>
    %366 = arith.addf %363, %365 : vector<32x32xf32>
    %cst_490 = arith.constant 0.000000e+00 : f32
    %367 = vector.broadcast %cst_490 : f32 to vector<32x32xf32>
    %368 = arith.maximumf %366, %367 : vector<32x32xf32>
    %369 = vector.extract_strided_slice %368 {offsets = [0, 0], sizes = [13, 32], strides = [1, 1]} : vector<32x32xf32> to vector<13x32xf32>
    %370 = vector.extract_strided_slice %368 {offsets = [16, 0], sizes = [13, 32], strides = [1, 1]} : vector<32x32xf32> to vector<13x32xf32>
    %371 = arith.addf %369, %338 : vector<13x32xf32>
    %372 = arith.addf %370, %339 : vector<13x32xf32>
    %cst_491 = arith.constant 0.000000e+00 : f32
    %373 = vector.broadcast %cst_491 : f32 to vector<2x32xf32>
    %c0_492 = arith.constant 0 : index
    %c0_493 = arith.constant 0 : index
    %374 = vector.load %arg5[%c0_492, %c0_493] : memref<208x32xf32, #tpu.memory_space<vmem>>, vector<2x32xf32>
    tpu.vector_store %arg5[%c0_492, %c0_493], %373 {strides = array<i32>} : memref<208x32xf32, #tpu.memory_space<vmem>>, vector<2x32xf32>,
    %c15 = arith.constant 15 : index
    %c0_494 = arith.constant 0 : index
    %375 = vector.load %arg5[%c15, %c0_494] : memref<208x32xf32, #tpu.memory_space<vmem>>, vector<2x32xf32>
    tpu.vector_store %arg5[%c15, %c0_494], %373 {strides = array<i32>} : memref<208x32xf32, #tpu.memory_space<vmem>>, vector<2x32xf32>,
    %c2_495 = arith.constant 2 : index
    %c0_496 = arith.constant 0 : index
    %376 = vector.load %arg5[%c2_495, %c0_496] : memref<208x32xf32, #tpu.memory_space<vmem>>, vector<13x32xf32>
    tpu.vector_store %arg5[%c2_495, %c0_496], %371 {strides = array<i32>} : memref<208x32xf32, #tpu.memory_space<vmem>>, vector<13x32xf32>,
    %cst_497 = arith.constant 0.000000e+00 : f32
    %377 = vector.broadcast %cst_497 : f32 to vector<2x32xf32>
    %c24 = arith.constant 24 : index
    %c0_498 = arith.constant 0 : index
    %378 = vector.load %arg5[%c24, %c0_498] : memref<208x32xf32, #tpu.memory_space<vmem>>, vector<2x32xf32>
    tpu.vector_store %arg5[%c24, %c0_498], %377 {strides = array<i32>} : memref<208x32xf32, #tpu.memory_space<vmem>>, vector<2x32xf32>,
    %c39 = arith.constant 39 : index
    %c0_499 = arith.constant 0 : index
    %379 = vector.load %arg5[%c39, %c0_499] : memref<208x32xf32, #tpu.memory_space<vmem>>, vector<2x32xf32>
    tpu.vector_store %arg5[%c39, %c0_499], %377 {strides = array<i32>} : memref<208x32xf32, #tpu.memory_space<vmem>>, vector<2x32xf32>,
    %c26_500 = arith.constant 26 : index
    %c0_501 = arith.constant 0 : index
    %380 = vector.load %arg5[%c26_500, %c0_501] : memref<208x32xf32, #tpu.memory_space<vmem>>, vector<13x32xf32>
    tpu.vector_store %arg5[%c26_500, %c0_501], %372 {strides = array<i32>} : memref<208x32xf32, #tpu.memory_space<vmem>>, vector<13x32xf32>,
    %c0_502 = arith.constant 0 : index
    %c0_503 = arith.constant 0 : index
    %381 = tpu.strided_load %arg5[%c0_502, %c0_503] {strides = array<i32: 2, 1>} : memref<208x32xf32, #tpu.memory_space<vmem>>, vector<7x32xf32>
    %c0_504 = arith.constant 0 : index
    %c0_505 = arith.constant 0 : index
    %382 = vector.load %arg6[%c0_504, %c0_505] : memref<192x128xf32, #tpu.memory_space<vmem>>, vector<7x32xf32>
    tpu.vector_store %arg6[%c0_504, %c0_505], %381 {strides = array<i32>} : memref<192x128xf32, #tpu.memory_space<vmem>>, vector<7x32xf32>,
    %c1_506 = arith.constant 1 : index
    %c0_507 = arith.constant 0 : index
    %383 = tpu.strided_load %arg5[%c1_506, %c0_507] {strides = array<i32: 2, 1>} : memref<208x32xf32, #tpu.memory_space<vmem>>, vector<7x32xf32>
    %c0_508 = arith.constant 0 : index
    %c32_509 = arith.constant 32 : index
    %384 = vector.load %arg6[%c0_508, %c32_509] : memref<192x128xf32, #tpu.memory_space<vmem>>, vector<7x32xf32>
    tpu.vector_store %arg6[%c0_508, %c32_509], %383 {strides = array<i32>} : memref<192x128xf32, #tpu.memory_space<vmem>>, vector<7x32xf32>,
    %c2_510 = arith.constant 2 : index
    %c0_511 = arith.constant 0 : index
    %385 = tpu.strided_load %arg5[%c2_510, %c0_511] {strides = array<i32: 2, 1>} : memref<208x32xf32, #tpu.memory_space<vmem>>, vector<7x32xf32>
    %c0_512 = arith.constant 0 : index
    %c64_513 = arith.constant 64 : index
    %386 = vector.load %arg6[%c0_512, %c64_513] : memref<192x128xf32, #tpu.memory_space<vmem>>, vector<7x32xf32>
    tpu.vector_store %arg6[%c0_512, %c64_513], %385 {strides = array<i32>} : memref<192x128xf32, #tpu.memory_space<vmem>>, vector<7x32xf32>,
    %c3_514 = arith.constant 3 : index
    %c0_515 = arith.constant 0 : index
    %387 = tpu.strided_load %arg5[%c3_514, %c0_515] {strides = array<i32: 2, 1>} : memref<208x32xf32, #tpu.memory_space<vmem>>, vector<7x32xf32>
    %c0_516 = arith.constant 0 : index
    %c96_517 = arith.constant 96 : index
    %388 = vector.load %arg6[%c0_516, %c96_517] : memref<192x128xf32, #tpu.memory_space<vmem>>, vector<7x32xf32>
    tpu.vector_store %arg6[%c0_516, %c96_517], %387 {strides = array<i32>} : memref<192x128xf32, #tpu.memory_space<vmem>>, vector<7x32xf32>,
    %c24_518 = arith.constant 24 : index
    %c0_519 = arith.constant 0 : index
    %389 = tpu.strided_load %arg5[%c24_518, %c0_519] {strides = array<i32: 2, 1>} : memref<208x32xf32, #tpu.memory_space<vmem>>, vector<7x32xf32>
    %c8_520 = arith.constant 8 : index
    %c0_521 = arith.constant 0 : index
    %390 = vector.load %arg6[%c8_520, %c0_521] : memref<192x128xf32, #tpu.memory_space<vmem>>, vector<7x32xf32>
    tpu.vector_store %arg6[%c8_520, %c0_521], %389 {strides = array<i32>} : memref<192x128xf32, #tpu.memory_space<vmem>>, vector<7x32xf32>,
    %c25 = arith.constant 25 : index
    %c0_522 = arith.constant 0 : index
    %391 = tpu.strided_load %arg5[%c25, %c0_522] {strides = array<i32: 2, 1>} : memref<208x32xf32, #tpu.memory_space<vmem>>, vector<7x32xf32>
    %c8_523 = arith.constant 8 : index
    %c32_524 = arith.constant 32 : index
    %392 = vector.load %arg6[%c8_523, %c32_524] : memref<192x128xf32, #tpu.memory_space<vmem>>, vector<7x32xf32>
    tpu.vector_store %arg6[%c8_523, %c32_524], %391 {strides = array<i32>} : memref<192x128xf32, #tpu.memory_space<vmem>>, vector<7x32xf32>,
    %c26_525 = arith.constant 26 : index
    %c0_526 = arith.constant 0 : index
    %393 = tpu.strided_load %arg5[%c26_525, %c0_526] {strides = array<i32: 2, 1>} : memref<208x32xf32, #tpu.memory_space<vmem>>, vector<7x32xf32>
    %c8_527 = arith.constant 8 : index
    %c64_528 = arith.constant 64 : index
    %394 = vector.load %arg6[%c8_527, %c64_528] : memref<192x128xf32, #tpu.memory_space<vmem>>, vector<7x32xf32>
    tpu.vector_store %arg6[%c8_527, %c64_528], %393 {strides = array<i32>} : memref<192x128xf32, #tpu.memory_space<vmem>>, vector<7x32xf32>,
    %c27_529 = arith.constant 27 : index
    %c0_530 = arith.constant 0 : index
    %395 = tpu.strided_load %arg5[%c27_529, %c0_530] {strides = array<i32: 2, 1>} : memref<208x32xf32, #tpu.memory_space<vmem>>, vector<7x32xf32>
    %c8_531 = arith.constant 8 : index
    %c96_532 = arith.constant 96 : index
    %396 = vector.load %arg6[%c8_531, %c96_532] : memref<192x128xf32, #tpu.memory_space<vmem>>, vector<7x32xf32>
    tpu.vector_store %arg6[%c8_531, %c96_532], %395 {strides = array<i32>} : memref<192x128xf32, #tpu.memory_space<vmem>>, vector<7x32xf32>,
    %c1072 = arith.constant 1072 : index
    %c0_533 = arith.constant 0 : index
    %397 = vector.load %arg2[%c1072, %c0_533] : memref<1616x32xbf16, #tpu.memory_space<vmem>>, vector<128x32xbf16>
    %398 = arith.extf %397 : vector<128x32xbf16> to vector<128x32xf32>
    %c0_534 = arith.constant 0 : index
    %c0_535 = arith.constant 0 : index
    %399 = vector.load %arg6[%c0_534, %c0_535] : memref<192x128xf32, #tpu.memory_space<vmem>>, vector<16x128xf32>
    %cst_536 = arith.constant dense<0.000000e+00> : vector<16x32xf32>
    %400 = tpu.matmul %399, %398, %cst_536 {dimension_numbers = #tpu.dot_dimension_numbers<[1], [0], [0], [1], [0, 0, 1, 1], [], []>} : vector<16x128xf32>, vector<128x32xf32>, vector<16x32xf32> -> vector<16x32xf32>
    %c11 = arith.constant 11 : index
    %c0_537 = arith.constant 0 : index
    %401 = vector.load %arg3[%c11, %c0_537] : memref<18x32xf32, #tpu.memory_space<vmem>>, vector<1x32xf32>
    %402 = vector.broadcast %401 : vector<1x32xf32> to vector<16x32xf32>
    %403 = arith.addf %400, %402 : vector<16x32xf32>
    %cst_538 = arith.constant 0.000000e+00 : f32
    %404 = vector.broadcast %cst_538 : f32 to vector<16x32xf32>
    %405 = arith.maximumf %403, %404 : vector<16x32xf32>
    %406 = vector.extract_strided_slice %405 {offsets = [0, 0], sizes = [7, 32], strides = [1, 1]} : vector<16x32xf32> to vector<7x32xf32>
    %407 = vector.extract_strided_slice %405 {offsets = [8, 0], sizes = [7, 32], strides = [1, 1]} : vector<16x32xf32> to vector<7x32xf32>
    %cst_539 = arith.constant 0.000000e+00 : f32
    %408 = vector.broadcast %cst_539 : f32 to vector<1x32xf32>
    %c0_540 = arith.constant 0 : index
    %c0_541 = arith.constant 0 : index
    %409 = vector.load %arg5[%c0_540, %c0_541] : memref<208x32xf32, #tpu.memory_space<vmem>>, vector<1x32xf32>
    tpu.vector_store %arg5[%c0_540, %c0_541], %408 {strides = array<i32>} : memref<208x32xf32, #tpu.memory_space<vmem>>, vector<1x32xf32>,
    %c8_542 = arith.constant 8 : index
    %c0_543 = arith.constant 0 : index
    %410 = vector.load %arg5[%c8_542, %c0_543] : memref<208x32xf32, #tpu.memory_space<vmem>>, vector<1x32xf32>
    tpu.vector_store %arg5[%c8_542, %c0_543], %408 {strides = array<i32>} : memref<208x32xf32, #tpu.memory_space<vmem>>, vector<1x32xf32>,
    %c1_544 = arith.constant 1 : index
    %c0_545 = arith.constant 0 : index
    %411 = vector.load %arg5[%c1_544, %c0_545] : memref<208x32xf32, #tpu.memory_space<vmem>>, vector<7x32xf32>
    tpu.vector_store %arg5[%c1_544, %c0_545], %406 {strides = array<i32>} : memref<208x32xf32, #tpu.memory_space<vmem>>, vector<7x32xf32>,
    %cst_546 = arith.constant 0.000000e+00 : f32
    %412 = vector.broadcast %cst_546 : f32 to vector<1x32xf32>
    %c16_547 = arith.constant 16 : index
    %c0_548 = arith.constant 0 : index
    %413 = vector.load %arg5[%c16_547, %c0_548] : memref<208x32xf32, #tpu.memory_space<vmem>>, vector<1x32xf32>
    tpu.vector_store %arg5[%c16_547, %c0_548], %412 {strides = array<i32>} : memref<208x32xf32, #tpu.memory_space<vmem>>, vector<1x32xf32>,
    %c24_549 = arith.constant 24 : index
    %c0_550 = arith.constant 0 : index
    %414 = vector.load %arg5[%c24_549, %c0_550] : memref<208x32xf32, #tpu.memory_space<vmem>>, vector<1x32xf32>
    tpu.vector_store %arg5[%c24_549, %c0_550], %412 {strides = array<i32>} : memref<208x32xf32, #tpu.memory_space<vmem>>, vector<1x32xf32>,
    %c17_551 = arith.constant 17 : index
    %c0_552 = arith.constant 0 : index
    %415 = vector.load %arg5[%c17_551, %c0_552] : memref<208x32xf32, #tpu.memory_space<vmem>>, vector<7x32xf32>
    tpu.vector_store %arg5[%c17_551, %c0_552], %407 {strides = array<i32>} : memref<208x32xf32, #tpu.memory_space<vmem>>, vector<7x32xf32>,
    %c0_553 = arith.constant 0 : index
    %c0_554 = arith.constant 0 : index
    %416 = vector.load %arg5[%c0_553, %c0_554] : memref<208x32xf32, #tpu.memory_space<vmem>>, vector<7x32xf32>
    %c0_555 = arith.constant 0 : index
    %c0_556 = arith.constant 0 : index
    %417 = vector.load %arg6[%c0_555, %c0_556] : memref<192x128xf32, #tpu.memory_space<vmem>>, vector<7x32xf32>
    tpu.vector_store %arg6[%c0_555, %c0_556], %416 {strides = array<i32>} : memref<192x128xf32, #tpu.memory_space<vmem>>, vector<7x32xf32>,
    %c1_557 = arith.constant 1 : index
    %c0_558 = arith.constant 0 : index
    %418 = vector.load %arg5[%c1_557, %c0_558] : memref<208x32xf32, #tpu.memory_space<vmem>>, vector<7x32xf32>
    %c0_559 = arith.constant 0 : index
    %c32_560 = arith.constant 32 : index
    %419 = vector.load %arg6[%c0_559, %c32_560] : memref<192x128xf32, #tpu.memory_space<vmem>>, vector<7x32xf32>
    tpu.vector_store %arg6[%c0_559, %c32_560], %418 {strides = array<i32>} : memref<192x128xf32, #tpu.memory_space<vmem>>, vector<7x32xf32>,
    %c2_561 = arith.constant 2 : index
    %c0_562 = arith.constant 0 : index
    %420 = vector.load %arg5[%c2_561, %c0_562] : memref<208x32xf32, #tpu.memory_space<vmem>>, vector<7x32xf32>
    %c0_563 = arith.constant 0 : index
    %c64_564 = arith.constant 64 : index
    %421 = vector.load %arg6[%c0_563, %c64_564] : memref<192x128xf32, #tpu.memory_space<vmem>>, vector<7x32xf32>
    tpu.vector_store %arg6[%c0_563, %c64_564], %420 {strides = array<i32>} : memref<192x128xf32, #tpu.memory_space<vmem>>, vector<7x32xf32>,
    %c16_565 = arith.constant 16 : index
    %c0_566 = arith.constant 0 : index
    %422 = vector.load %arg5[%c16_565, %c0_566] : memref<208x32xf32, #tpu.memory_space<vmem>>, vector<7x32xf32>
    %c8_567 = arith.constant 8 : index
    %c0_568 = arith.constant 0 : index
    %423 = vector.load %arg6[%c8_567, %c0_568] : memref<192x128xf32, #tpu.memory_space<vmem>>, vector<7x32xf32>
    tpu.vector_store %arg6[%c8_567, %c0_568], %422 {strides = array<i32>} : memref<192x128xf32, #tpu.memory_space<vmem>>, vector<7x32xf32>,
    %c17_569 = arith.constant 17 : index
    %c0_570 = arith.constant 0 : index
    %424 = vector.load %arg5[%c17_569, %c0_570] : memref<208x32xf32, #tpu.memory_space<vmem>>, vector<7x32xf32>
    %c8_571 = arith.constant 8 : index
    %c32_572 = arith.constant 32 : index
    %425 = vector.load %arg6[%c8_571, %c32_572] : memref<192x128xf32, #tpu.memory_space<vmem>>, vector<7x32xf32>
    tpu.vector_store %arg6[%c8_571, %c32_572], %424 {strides = array<i32>} : memref<192x128xf32, #tpu.memory_space<vmem>>, vector<7x32xf32>,
    %c18_573 = arith.constant 18 : index
    %c0_574 = arith.constant 0 : index
    %426 = vector.load %arg5[%c18_573, %c0_574] : memref<208x32xf32, #tpu.memory_space<vmem>>, vector<7x32xf32>
    %c8_575 = arith.constant 8 : index
    %c64_576 = arith.constant 64 : index
    %427 = vector.load %arg6[%c8_575, %c64_576] : memref<192x128xf32, #tpu.memory_space<vmem>>, vector<7x32xf32>
    tpu.vector_store %arg6[%c8_575, %c64_576], %426 {strides = array<i32>} : memref<192x128xf32, #tpu.memory_space<vmem>>, vector<7x32xf32>,
    %c1200 = arith.constant 1200 : index
    %c0_577 = arith.constant 0 : index
    %428 = vector.load %arg2[%c1200, %c0_577] : memref<1616x32xbf16, #tpu.memory_space<vmem>>, vector<96x32xbf16>
    %429 = arith.extf %428 : vector<96x32xbf16> to vector<96x32xf32>
    %c0_578 = arith.constant 0 : index
    %c0_579 = arith.constant 0 : index
    %430 = vector.load %arg6[%c0_578, %c0_579] : memref<192x128xf32, #tpu.memory_space<vmem>>, vector<16x96xf32>
    %cst_580 = arith.constant dense<0.000000e+00> : vector<16x32xf32>
    %431 = tpu.matmul %430, %429, %cst_580 {dimension_numbers = #tpu.dot_dimension_numbers<[1], [0], [0], [1], [0, 0, 1, 1], [], []>} : vector<16x96xf32>, vector<96x32xf32>, vector<16x32xf32> -> vector<16x32xf32>
    %c12 = arith.constant 12 : index
    %c0_581 = arith.constant 0 : index
    %432 = vector.load %arg3[%c12, %c0_581] : memref<18x32xf32, #tpu.memory_space<vmem>>, vector<1x32xf32>
    %433 = vector.broadcast %432 : vector<1x32xf32> to vector<16x32xf32>
    %434 = arith.addf %431, %433 : vector<16x32xf32>
    %cst_582 = arith.constant 0.000000e+00 : f32
    %435 = vector.broadcast %cst_582 : f32 to vector<16x32xf32>
    %436 = arith.maximumf %434, %435 : vector<16x32xf32>
    %437 = vector.extract_strided_slice %436 {offsets = [0, 0], sizes = [7, 32], strides = [1, 1]} : vector<16x32xf32> to vector<7x32xf32>
    %438 = vector.extract_strided_slice %436 {offsets = [8, 0], sizes = [7, 32], strides = [1, 1]} : vector<16x32xf32> to vector<7x32xf32>
    %439 = arith.addf %437, %406 : vector<7x32xf32>
    %440 = arith.addf %438, %407 : vector<7x32xf32>
    %cst_583 = arith.constant 0.000000e+00 : f32
    %441 = vector.broadcast %cst_583 : f32 to vector<1x32xf32>
    %c0_584 = arith.constant 0 : index
    %c0_585 = arith.constant 0 : index
    %442 = vector.load %arg5[%c0_584, %c0_585] : memref<208x32xf32, #tpu.memory_space<vmem>>, vector<1x32xf32>
    tpu.vector_store %arg5[%c0_584, %c0_585], %441 {strides = array<i32>} : memref<208x32xf32, #tpu.memory_space<vmem>>, vector<1x32xf32>,
    %c8_586 = arith.constant 8 : index
    %c0_587 = arith.constant 0 : index
    %443 = vector.load %arg5[%c8_586, %c0_587] : memref<208x32xf32, #tpu.memory_space<vmem>>, vector<1x32xf32>
    tpu.vector_store %arg5[%c8_586, %c0_587], %441 {strides = array<i32>} : memref<208x32xf32, #tpu.memory_space<vmem>>, vector<1x32xf32>,
    %c1_588 = arith.constant 1 : index
    %c0_589 = arith.constant 0 : index
    %444 = vector.load %arg5[%c1_588, %c0_589] : memref<208x32xf32, #tpu.memory_space<vmem>>, vector<7x32xf32>
    tpu.vector_store %arg5[%c1_588, %c0_589], %439 {strides = array<i32>} : memref<208x32xf32, #tpu.memory_space<vmem>>, vector<7x32xf32>,
    %cst_590 = arith.constant 0.000000e+00 : f32
    %445 = vector.broadcast %cst_590 : f32 to vector<1x32xf32>
    %c16_591 = arith.constant 16 : index
    %c0_592 = arith.constant 0 : index
    %446 = vector.load %arg5[%c16_591, %c0_592] : memref<208x32xf32, #tpu.memory_space<vmem>>, vector<1x32xf32>
    tpu.vector_store %arg5[%c16_591, %c0_592], %445 {strides = array<i32>} : memref<208x32xf32, #tpu.memory_space<vmem>>, vector<1x32xf32>,
    %c24_593 = arith.constant 24 : index
    %c0_594 = arith.constant 0 : index
    %447 = vector.load %arg5[%c24_593, %c0_594] : memref<208x32xf32, #tpu.memory_space<vmem>>, vector<1x32xf32>
    tpu.vector_store %arg5[%c24_593, %c0_594], %445 {strides = array<i32>} : memref<208x32xf32, #tpu.memory_space<vmem>>, vector<1x32xf32>,
    %c17_595 = arith.constant 17 : index
    %c0_596 = arith.constant 0 : index
    %448 = vector.load %arg5[%c17_595, %c0_596] : memref<208x32xf32, #tpu.memory_space<vmem>>, vector<7x32xf32>
    tpu.vector_store %arg5[%c17_595, %c0_596], %440 {strides = array<i32>} : memref<208x32xf32, #tpu.memory_space<vmem>>, vector<7x32xf32>,
    %c0_597 = arith.constant 0 : index
    %c0_598 = arith.constant 0 : index
    %449 = vector.load %arg5[%c0_597, %c0_598] : memref<208x32xf32, #tpu.memory_space<vmem>>, vector<7x32xf32>
    %c0_599 = arith.constant 0 : index
    %c0_600 = arith.constant 0 : index
    %450 = vector.load %arg6[%c0_599, %c0_600] : memref<192x128xf32, #tpu.memory_space<vmem>>, vector<7x32xf32>
    tpu.vector_store %arg6[%c0_599, %c0_600], %449 {strides = array<i32>} : memref<192x128xf32, #tpu.memory_space<vmem>>, vector<7x32xf32>,
    %c1_601 = arith.constant 1 : index
    %c0_602 = arith.constant 0 : index
    %451 = vector.load %arg5[%c1_601, %c0_602] : memref<208x32xf32, #tpu.memory_space<vmem>>, vector<7x32xf32>
    %c0_603 = arith.constant 0 : index
    %c32_604 = arith.constant 32 : index
    %452 = vector.load %arg6[%c0_603, %c32_604] : memref<192x128xf32, #tpu.memory_space<vmem>>, vector<7x32xf32>
    tpu.vector_store %arg6[%c0_603, %c32_604], %451 {strides = array<i32>} : memref<192x128xf32, #tpu.memory_space<vmem>>, vector<7x32xf32>,
    %c2_605 = arith.constant 2 : index
    %c0_606 = arith.constant 0 : index
    %453 = vector.load %arg5[%c2_605, %c0_606] : memref<208x32xf32, #tpu.memory_space<vmem>>, vector<7x32xf32>
    %c0_607 = arith.constant 0 : index
    %c64_608 = arith.constant 64 : index
    %454 = vector.load %arg6[%c0_607, %c64_608] : memref<192x128xf32, #tpu.memory_space<vmem>>, vector<7x32xf32>
    tpu.vector_store %arg6[%c0_607, %c64_608], %453 {strides = array<i32>} : memref<192x128xf32, #tpu.memory_space<vmem>>, vector<7x32xf32>,
    %c16_609 = arith.constant 16 : index
    %c0_610 = arith.constant 0 : index
    %455 = vector.load %arg5[%c16_609, %c0_610] : memref<208x32xf32, #tpu.memory_space<vmem>>, vector<7x32xf32>
    %c8_611 = arith.constant 8 : index
    %c0_612 = arith.constant 0 : index
    %456 = vector.load %arg6[%c8_611, %c0_612] : memref<192x128xf32, #tpu.memory_space<vmem>>, vector<7x32xf32>
    tpu.vector_store %arg6[%c8_611, %c0_612], %455 {strides = array<i32>} : memref<192x128xf32, #tpu.memory_space<vmem>>, vector<7x32xf32>,
    %c17_613 = arith.constant 17 : index
    %c0_614 = arith.constant 0 : index
    %457 = vector.load %arg5[%c17_613, %c0_614] : memref<208x32xf32, #tpu.memory_space<vmem>>, vector<7x32xf32>
    %c8_615 = arith.constant 8 : index
    %c32_616 = arith.constant 32 : index
    %458 = vector.load %arg6[%c8_615, %c32_616] : memref<192x128xf32, #tpu.memory_space<vmem>>, vector<7x32xf32>
    tpu.vector_store %arg6[%c8_615, %c32_616], %457 {strides = array<i32>} : memref<192x128xf32, #tpu.memory_space<vmem>>, vector<7x32xf32>,
    %c18_617 = arith.constant 18 : index
    %c0_618 = arith.constant 0 : index
    %459 = vector.load %arg5[%c18_617, %c0_618] : memref<208x32xf32, #tpu.memory_space<vmem>>, vector<7x32xf32>
    %c8_619 = arith.constant 8 : index
    %c64_620 = arith.constant 64 : index
    %460 = vector.load %arg6[%c8_619, %c64_620] : memref<192x128xf32, #tpu.memory_space<vmem>>, vector<7x32xf32>
    tpu.vector_store %arg6[%c8_619, %c64_620], %459 {strides = array<i32>} : memref<192x128xf32, #tpu.memory_space<vmem>>, vector<7x32xf32>,
    %c1296 = arith.constant 1296 : index
    %c0_621 = arith.constant 0 : index
    %461 = vector.load %arg2[%c1296, %c0_621] : memref<1616x32xbf16, #tpu.memory_space<vmem>>, vector<96x32xbf16>
    %462 = arith.extf %461 : vector<96x32xbf16> to vector<96x32xf32>
    %c0_622 = arith.constant 0 : index
    %c0_623 = arith.constant 0 : index
    %463 = vector.load %arg6[%c0_622, %c0_623] : memref<192x128xf32, #tpu.memory_space<vmem>>, vector<16x96xf32>
    %cst_624 = arith.constant dense<0.000000e+00> : vector<16x32xf32>
    %464 = tpu.matmul %463, %462, %cst_624 {dimension_numbers = #tpu.dot_dimension_numbers<[1], [0], [0], [1], [0, 0, 1, 1], [], []>} : vector<16x96xf32>, vector<96x32xf32>, vector<16x32xf32> -> vector<16x32xf32>
    %c13 = arith.constant 13 : index
    %c0_625 = arith.constant 0 : index
    %465 = vector.load %arg3[%c13, %c0_625] : memref<18x32xf32, #tpu.memory_space<vmem>>, vector<1x32xf32>
    %466 = vector.broadcast %465 : vector<1x32xf32> to vector<16x32xf32>
    %467 = arith.addf %464, %466 : vector<16x32xf32>
    %cst_626 = arith.constant 0.000000e+00 : f32
    %468 = vector.broadcast %cst_626 : f32 to vector<16x32xf32>
    %469 = arith.maximumf %467, %468 : vector<16x32xf32>
    %470 = vector.extract_strided_slice %469 {offsets = [0, 0], sizes = [7, 32], strides = [1, 1]} : vector<16x32xf32> to vector<7x32xf32>
    %471 = vector.extract_strided_slice %469 {offsets = [8, 0], sizes = [7, 32], strides = [1, 1]} : vector<16x32xf32> to vector<7x32xf32>
    %472 = arith.addf %470, %439 : vector<7x32xf32>
    %473 = arith.addf %471, %440 : vector<7x32xf32>
    %cst_627 = arith.constant 0.000000e+00 : f32
    %474 = vector.broadcast %cst_627 : f32 to vector<7x32xf32>
    %475 = arith.maximumf %472, %474 : vector<7x32xf32>
    %cst_628 = arith.constant 0.000000e+00 : f32
    %476 = vector.broadcast %cst_628 : f32 to vector<1x32xf32>
    %c0_629 = arith.constant 0 : index
    %c0_630 = arith.constant 0 : index
    %477 = vector.load %arg5[%c0_629, %c0_630] : memref<208x32xf32, #tpu.memory_space<vmem>>, vector<1x32xf32>
    tpu.vector_store %arg5[%c0_629, %c0_630], %476 {strides = array<i32>} : memref<208x32xf32, #tpu.memory_space<vmem>>, vector<1x32xf32>,
    %c8_631 = arith.constant 8 : index
    %c0_632 = arith.constant 0 : index
    %478 = vector.load %arg5[%c8_631, %c0_632] : memref<208x32xf32, #tpu.memory_space<vmem>>, vector<1x32xf32>
    tpu.vector_store %arg5[%c8_631, %c0_632], %476 {strides = array<i32>} : memref<208x32xf32, #tpu.memory_space<vmem>>, vector<1x32xf32>,
    %c1_633 = arith.constant 1 : index
    %c0_634 = arith.constant 0 : index
    %479 = vector.load %arg5[%c1_633, %c0_634] : memref<208x32xf32, #tpu.memory_space<vmem>>, vector<7x32xf32>
    tpu.vector_store %arg5[%c1_633, %c0_634], %475 {strides = array<i32>} : memref<208x32xf32, #tpu.memory_space<vmem>>, vector<7x32xf32>,
    %cst_635 = arith.constant 0.000000e+00 : f32
    %480 = vector.broadcast %cst_635 : f32 to vector<7x32xf32>
    %481 = arith.maximumf %473, %480 : vector<7x32xf32>
    %cst_636 = arith.constant 0.000000e+00 : f32
    %482 = vector.broadcast %cst_636 : f32 to vector<1x32xf32>
    %c16_637 = arith.constant 16 : index
    %c0_638 = arith.constant 0 : index
    %483 = vector.load %arg5[%c16_637, %c0_638] : memref<208x32xf32, #tpu.memory_space<vmem>>, vector<1x32xf32>
    tpu.vector_store %arg5[%c16_637, %c0_638], %482 {strides = array<i32>} : memref<208x32xf32, #tpu.memory_space<vmem>>, vector<1x32xf32>,
    %c24_639 = arith.constant 24 : index
    %c0_640 = arith.constant 0 : index
    %484 = vector.load %arg5[%c24_639, %c0_640] : memref<208x32xf32, #tpu.memory_space<vmem>>, vector<1x32xf32>
    tpu.vector_store %arg5[%c24_639, %c0_640], %482 {strides = array<i32>} : memref<208x32xf32, #tpu.memory_space<vmem>>, vector<1x32xf32>,
    %c17_641 = arith.constant 17 : index
    %c0_642 = arith.constant 0 : index
    %485 = vector.load %arg5[%c17_641, %c0_642] : memref<208x32xf32, #tpu.memory_space<vmem>>, vector<7x32xf32>
    tpu.vector_store %arg5[%c17_641, %c0_642], %481 {strides = array<i32>} : memref<208x32xf32, #tpu.memory_space<vmem>>, vector<7x32xf32>,
    %c0_643 = arith.constant 0 : index
    %c0_644 = arith.constant 0 : index
    %486 = vector.load %arg5[%c0_643, %c0_644] : memref<208x32xf32, #tpu.memory_space<vmem>>, vector<7x32xf32>
    %c0_645 = arith.constant 0 : index
    %c0_646 = arith.constant 0 : index
    %487 = vector.load %arg6[%c0_645, %c0_646] : memref<192x128xf32, #tpu.memory_space<vmem>>, vector<7x32xf32>
    tpu.vector_store %arg6[%c0_645, %c0_646], %486 {strides = array<i32>} : memref<192x128xf32, #tpu.memory_space<vmem>>, vector<7x32xf32>,
    %c1_647 = arith.constant 1 : index
    %c0_648 = arith.constant 0 : index
    %488 = vector.load %arg5[%c1_647, %c0_648] : memref<208x32xf32, #tpu.memory_space<vmem>>, vector<7x32xf32>
    %c0_649 = arith.constant 0 : index
    %c32_650 = arith.constant 32 : index
    %489 = vector.load %arg6[%c0_649, %c32_650] : memref<192x128xf32, #tpu.memory_space<vmem>>, vector<7x32xf32>
    tpu.vector_store %arg6[%c0_649, %c32_650], %488 {strides = array<i32>} : memref<192x128xf32, #tpu.memory_space<vmem>>, vector<7x32xf32>,
    %c2_651 = arith.constant 2 : index
    %c0_652 = arith.constant 0 : index
    %490 = vector.load %arg5[%c2_651, %c0_652] : memref<208x32xf32, #tpu.memory_space<vmem>>, vector<7x32xf32>
    %c0_653 = arith.constant 0 : index
    %c64_654 = arith.constant 64 : index
    %491 = vector.load %arg6[%c0_653, %c64_654] : memref<192x128xf32, #tpu.memory_space<vmem>>, vector<7x32xf32>
    tpu.vector_store %arg6[%c0_653, %c64_654], %490 {strides = array<i32>} : memref<192x128xf32, #tpu.memory_space<vmem>>, vector<7x32xf32>,
    %c16_655 = arith.constant 16 : index
    %c0_656 = arith.constant 0 : index
    %492 = vector.load %arg5[%c16_655, %c0_656] : memref<208x32xf32, #tpu.memory_space<vmem>>, vector<7x32xf32>
    %c8_657 = arith.constant 8 : index
    %c0_658 = arith.constant 0 : index
    %493 = vector.load %arg6[%c8_657, %c0_658] : memref<192x128xf32, #tpu.memory_space<vmem>>, vector<7x32xf32>
    tpu.vector_store %arg6[%c8_657, %c0_658], %492 {strides = array<i32>} : memref<192x128xf32, #tpu.memory_space<vmem>>, vector<7x32xf32>,
    %c17_659 = arith.constant 17 : index
    %c0_660 = arith.constant 0 : index
    %494 = vector.load %arg5[%c17_659, %c0_660] : memref<208x32xf32, #tpu.memory_space<vmem>>, vector<7x32xf32>
    %c8_661 = arith.constant 8 : index
    %c32_662 = arith.constant 32 : index
    %495 = vector.load %arg6[%c8_661, %c32_662] : memref<192x128xf32, #tpu.memory_space<vmem>>, vector<7x32xf32>
    tpu.vector_store %arg6[%c8_661, %c32_662], %494 {strides = array<i32>} : memref<192x128xf32, #tpu.memory_space<vmem>>, vector<7x32xf32>,
    %c18_663 = arith.constant 18 : index
    %c0_664 = arith.constant 0 : index
    %496 = vector.load %arg5[%c18_663, %c0_664] : memref<208x32xf32, #tpu.memory_space<vmem>>, vector<7x32xf32>
    %c8_665 = arith.constant 8 : index
    %c64_666 = arith.constant 64 : index
    %497 = vector.load %arg6[%c8_665, %c64_666] : memref<192x128xf32, #tpu.memory_space<vmem>>, vector<7x32xf32>
    tpu.vector_store %arg6[%c8_665, %c64_666], %496 {strides = array<i32>} : memref<192x128xf32, #tpu.memory_space<vmem>>, vector<7x32xf32>,
    %c1392 = arith.constant 1392 : index
    %c0_667 = arith.constant 0 : index
    %498 = vector.load %arg2[%c1392, %c0_667] : memref<1616x32xbf16, #tpu.memory_space<vmem>>, vector<96x16xbf16>
    %499 = arith.extf %498 : vector<96x16xbf16> to vector<96x16xf32>
    %c0_668 = arith.constant 0 : index
    %c0_669 = arith.constant 0 : index
    %500 = vector.load %arg6[%c0_668, %c0_669] : memref<192x128xf32, #tpu.memory_space<vmem>>, vector<16x96xf32>
    %cst_670 = arith.constant dense<0.000000e+00> : vector<16x16xf32>
    %501 = tpu.matmul %500, %499, %cst_670 {dimension_numbers = #tpu.dot_dimension_numbers<[1], [0], [0], [1], [0, 0, 1, 1], [], []>} : vector<16x96xf32>, vector<96x16xf32>, vector<16x16xf32> -> vector<16x16xf32>
    %c14_671 = arith.constant 14 : index
    %c0_672 = arith.constant 0 : index
    %502 = vector.load %arg3[%c14_671, %c0_672] : memref<18x32xf32, #tpu.memory_space<vmem>>, vector<1x16xf32>
    %503 = vector.broadcast %502 : vector<1x16xf32> to vector<16x16xf32>
    %504 = arith.addf %501, %503 : vector<16x16xf32>
    %505 = vector.extract_strided_slice %504 {offsets = [0, 0], sizes = [7, 16], strides = [1, 1]} : vector<16x16xf32> to vector<7x16xf32>
    %506 = vector.extract_strided_slice %504 {offsets = [8, 0], sizes = [7, 16], strides = [1, 1]} : vector<16x16xf32> to vector<7x16xf32>
    %cst_673 = arith.constant 0.000000e+00 : f32
    %507 = vector.broadcast %cst_673 : f32 to vector<7x16xf32>
    %508 = arith.maximumf %505, %507 : vector<7x16xf32>
    %c0_674 = arith.constant 0 : index
    %c0_675 = arith.constant 0 : index
    %509 = vector.load %arg5[%c0_674, %c0_675] : memref<208x32xf32, #tpu.memory_space<vmem>>, vector<7x16xf32>
    tpu.vector_store %arg5[%c0_674, %c0_675], %508 {strides = array<i32>} : memref<208x32xf32, #tpu.memory_space<vmem>>, vector<7x16xf32>,
    %cst_676 = arith.constant 0.000000e+00 : f32
    %510 = vector.broadcast %cst_676 : f32 to vector<7x16xf32>
    %511 = arith.maximumf %506, %510 : vector<7x16xf32>
    %c8_677 = arith.constant 8 : index
    %c0_678 = arith.constant 0 : index
    %512 = vector.load %arg5[%c8_677, %c0_678] : memref<208x32xf32, #tpu.memory_space<vmem>>, vector<7x16xf32>
    tpu.vector_store %arg5[%c8_677, %c0_678], %511 {strides = array<i32>} : memref<208x32xf32, #tpu.memory_space<vmem>>, vector<7x16xf32>,
    %c0_679 = arith.constant 0 : index
    %c0_680 = arith.constant 0 : index
    %513 = vector.load %arg5[%c0_679, %c0_680] : memref<208x32xf32, #tpu.memory_space<vmem>>, vector<7x16xf32>
    %c0_681 = arith.constant 0 : index
    %c0_682 = arith.constant 0 : index
    %514 = vector.load %arg6[%c0_681, %c0_682] : memref<192x128xf32, #tpu.memory_space<vmem>>, vector<7x16xf32>
    tpu.vector_store %arg6[%c0_681, %c0_682], %513 {strides = array<i32>} : memref<192x128xf32, #tpu.memory_space<vmem>>, vector<7x16xf32>,
    %c8_683 = arith.constant 8 : index
    %c0_684 = arith.constant 0 : index
    %515 = vector.load %arg5[%c8_683, %c0_684] : memref<208x32xf32, #tpu.memory_space<vmem>>, vector<7x16xf32>
    %c8_685 = arith.constant 8 : index
    %c0_686 = arith.constant 0 : index
    %516 = vector.load %arg6[%c8_685, %c0_686] : memref<192x128xf32, #tpu.memory_space<vmem>>, vector<7x16xf32>
    tpu.vector_store %arg6[%c8_685, %c0_686], %515 {strides = array<i32>} : memref<192x128xf32, #tpu.memory_space<vmem>>, vector<7x16xf32>,
    %c1488 = arith.constant 1488 : index
    %c0_687 = arith.constant 0 : index
    %517 = vector.load %arg2[%c1488, %c0_687] : memref<1616x32xbf16, #tpu.memory_space<vmem>>, vector<16x32xbf16>
    %518 = arith.extf %517 : vector<16x32xbf16> to vector<16x32xf32>
    %c0_688 = arith.constant 0 : index
    %c0_689 = arith.constant 0 : index
    %519 = vector.load %arg6[%c0_688, %c0_689] : memref<192x128xf32, #tpu.memory_space<vmem>>, vector<16x16xf32>
    %cst_690 = arith.constant dense<0.000000e+00> : vector<16x32xf32>
    %520 = tpu.matmul %519, %518, %cst_690 {dimension_numbers = #tpu.dot_dimension_numbers<[1], [0], [0], [1], [0, 0, 1, 1], [], []>} : vector<16x16xf32>, vector<16x32xf32>, vector<16x32xf32> -> vector<16x32xf32>
    %c15_691 = arith.constant 15 : index
    %c0_692 = arith.constant 0 : index
    %521 = vector.load %arg3[%c15_691, %c0_692] : memref<18x32xf32, #tpu.memory_space<vmem>>, vector<1x32xf32>
    %522 = vector.broadcast %521 : vector<1x32xf32> to vector<16x32xf32>
    %523 = arith.addf %520, %522 : vector<16x32xf32>
    %524 = vector.extract_strided_slice %523 {offsets = [0, 0], sizes = [7, 32], strides = [1, 1]} : vector<16x32xf32> to vector<7x32xf32>
    %525 = vector.extract_strided_slice %523 {offsets = [8, 0], sizes = [7, 32], strides = [1, 1]} : vector<16x32xf32> to vector<7x32xf32>
    %526 = arith.addf %524, %472 : vector<7x32xf32>
    %527 = arith.addf %525, %473 : vector<7x32xf32>
    %cst_693 = arith.constant 0.000000e+00 : f32
    %528 = vector.broadcast %cst_693 : f32 to vector<7x32xf32>
    %529 = arith.maximumf %526, %528 : vector<7x32xf32>
    %cst_694 = arith.constant 0.000000e+00 : f32
    %530 = vector.broadcast %cst_694 : f32 to vector<1x32xf32>
    %c0_695 = arith.constant 0 : index
    %c0_696 = arith.constant 0 : index
    %531 = vector.load %arg5[%c0_695, %c0_696] : memref<208x32xf32, #tpu.memory_space<vmem>>, vector<1x32xf32>
    tpu.vector_store %arg5[%c0_695, %c0_696], %530 {strides = array<i32>} : memref<208x32xf32, #tpu.memory_space<vmem>>, vector<1x32xf32>,
    %c8_697 = arith.constant 8 : index
    %c0_698 = arith.constant 0 : index
    %532 = vector.load %arg5[%c8_697, %c0_698] : memref<208x32xf32, #tpu.memory_space<vmem>>, vector<1x32xf32>
    tpu.vector_store %arg5[%c8_697, %c0_698], %530 {strides = array<i32>} : memref<208x32xf32, #tpu.memory_space<vmem>>, vector<1x32xf32>,
    %c1_699 = arith.constant 1 : index
    %c0_700 = arith.constant 0 : index
    %533 = vector.load %arg5[%c1_699, %c0_700] : memref<208x32xf32, #tpu.memory_space<vmem>>, vector<7x32xf32>
    tpu.vector_store %arg5[%c1_699, %c0_700], %529 {strides = array<i32>} : memref<208x32xf32, #tpu.memory_space<vmem>>, vector<7x32xf32>,
    %cst_701 = arith.constant 0.000000e+00 : f32
    %534 = vector.broadcast %cst_701 : f32 to vector<7x32xf32>
    %535 = arith.maximumf %527, %534 : vector<7x32xf32>
    %cst_702 = arith.constant 0.000000e+00 : f32
    %536 = vector.broadcast %cst_702 : f32 to vector<1x32xf32>
    %c16_703 = arith.constant 16 : index
    %c0_704 = arith.constant 0 : index
    %537 = vector.load %arg5[%c16_703, %c0_704] : memref<208x32xf32, #tpu.memory_space<vmem>>, vector<1x32xf32>
    tpu.vector_store %arg5[%c16_703, %c0_704], %536 {strides = array<i32>} : memref<208x32xf32, #tpu.memory_space<vmem>>, vector<1x32xf32>,
    %c24_705 = arith.constant 24 : index
    %c0_706 = arith.constant 0 : index
    %538 = vector.load %arg5[%c24_705, %c0_706] : memref<208x32xf32, #tpu.memory_space<vmem>>, vector<1x32xf32>
    tpu.vector_store %arg5[%c24_705, %c0_706], %536 {strides = array<i32>} : memref<208x32xf32, #tpu.memory_space<vmem>>, vector<1x32xf32>,
    %c17_707 = arith.constant 17 : index
    %c0_708 = arith.constant 0 : index
    %539 = vector.load %arg5[%c17_707, %c0_708] : memref<208x32xf32, #tpu.memory_space<vmem>>, vector<7x32xf32>
    tpu.vector_store %arg5[%c17_707, %c0_708], %535 {strides = array<i32>} : memref<208x32xf32, #tpu.memory_space<vmem>>, vector<7x32xf32>,
    %c0_709 = arith.constant 0 : index
    %c0_710 = arith.constant 0 : index
    %540 = vector.load %arg5[%c0_709, %c0_710] : memref<208x32xf32, #tpu.memory_space<vmem>>, vector<7x32xf32>
    %c0_711 = arith.constant 0 : index
    %c0_712 = arith.constant 0 : index
    %541 = vector.load %arg6[%c0_711, %c0_712] : memref<192x128xf32, #tpu.memory_space<vmem>>, vector<7x32xf32>
    tpu.vector_store %arg6[%c0_711, %c0_712], %540 {strides = array<i32>} : memref<192x128xf32, #tpu.memory_space<vmem>>, vector<7x32xf32>,
    %c1_713 = arith.constant 1 : index
    %c0_714 = arith.constant 0 : index
    %542 = vector.load %arg5[%c1_713, %c0_714] : memref<208x32xf32, #tpu.memory_space<vmem>>, vector<7x32xf32>
    %c0_715 = arith.constant 0 : index
    %c32_716 = arith.constant 32 : index
    %543 = vector.load %arg6[%c0_715, %c32_716] : memref<192x128xf32, #tpu.memory_space<vmem>>, vector<7x32xf32>
    tpu.vector_store %arg6[%c0_715, %c32_716], %542 {strides = array<i32>} : memref<192x128xf32, #tpu.memory_space<vmem>>, vector<7x32xf32>,
    %c2_717 = arith.constant 2 : index
    %c0_718 = arith.constant 0 : index
    %544 = vector.load %arg5[%c2_717, %c0_718] : memref<208x32xf32, #tpu.memory_space<vmem>>, vector<7x32xf32>
    %c0_719 = arith.constant 0 : index
    %c64_720 = arith.constant 64 : index
    %545 = vector.load %arg6[%c0_719, %c64_720] : memref<192x128xf32, #tpu.memory_space<vmem>>, vector<7x32xf32>
    tpu.vector_store %arg6[%c0_719, %c64_720], %544 {strides = array<i32>} : memref<192x128xf32, #tpu.memory_space<vmem>>, vector<7x32xf32>,
    %c16_721 = arith.constant 16 : index
    %c0_722 = arith.constant 0 : index
    %546 = vector.load %arg5[%c16_721, %c0_722] : memref<208x32xf32, #tpu.memory_space<vmem>>, vector<7x32xf32>
    %c8_723 = arith.constant 8 : index
    %c0_724 = arith.constant 0 : index
    %547 = vector.load %arg6[%c8_723, %c0_724] : memref<192x128xf32, #tpu.memory_space<vmem>>, vector<7x32xf32>
    tpu.vector_store %arg6[%c8_723, %c0_724], %546 {strides = array<i32>} : memref<192x128xf32, #tpu.memory_space<vmem>>, vector<7x32xf32>,
    %c17_725 = arith.constant 17 : index
    %c0_726 = arith.constant 0 : index
    %548 = vector.load %arg5[%c17_725, %c0_726] : memref<208x32xf32, #tpu.memory_space<vmem>>, vector<7x32xf32>
    %c8_727 = arith.constant 8 : index
    %c32_728 = arith.constant 32 : index
    %549 = vector.load %arg6[%c8_727, %c32_728] : memref<192x128xf32, #tpu.memory_space<vmem>>, vector<7x32xf32>
    tpu.vector_store %arg6[%c8_727, %c32_728], %548 {strides = array<i32>} : memref<192x128xf32, #tpu.memory_space<vmem>>, vector<7x32xf32>,
    %c18_729 = arith.constant 18 : index
    %c0_730 = arith.constant 0 : index
    %550 = vector.load %arg5[%c18_729, %c0_730] : memref<208x32xf32, #tpu.memory_space<vmem>>, vector<7x32xf32>
    %c8_731 = arith.constant 8 : index
    %c64_732 = arith.constant 64 : index
    %551 = vector.load %arg6[%c8_731, %c64_732] : memref<192x128xf32, #tpu.memory_space<vmem>>, vector<7x32xf32>
    tpu.vector_store %arg6[%c8_731, %c64_732], %550 {strides = array<i32>} : memref<192x128xf32, #tpu.memory_space<vmem>>, vector<7x32xf32>,
    %c1504 = arith.constant 1504 : index
    %c0_733 = arith.constant 0 : index
    %552 = vector.load %arg2[%c1504, %c0_733] : memref<1616x32xbf16, #tpu.memory_space<vmem>>, vector<96x16xbf16>
    %553 = arith.extf %552 : vector<96x16xbf16> to vector<96x16xf32>
    %c0_734 = arith.constant 0 : index
    %c0_735 = arith.constant 0 : index
    %554 = vector.load %arg6[%c0_734, %c0_735] : memref<192x128xf32, #tpu.memory_space<vmem>>, vector<16x96xf32>
    %cst_736 = arith.constant dense<0.000000e+00> : vector<16x16xf32>
    %555 = tpu.matmul %554, %553, %cst_736 {dimension_numbers = #tpu.dot_dimension_numbers<[1], [0], [0], [1], [0, 0, 1, 1], [], []>} : vector<16x96xf32>, vector<96x16xf32>, vector<16x16xf32> -> vector<16x16xf32>
    %c16_737 = arith.constant 16 : index
    %c0_738 = arith.constant 0 : index
    %556 = vector.load %arg3[%c16_737, %c0_738] : memref<18x32xf32, #tpu.memory_space<vmem>>, vector<1x16xf32>
    %557 = vector.broadcast %556 : vector<1x16xf32> to vector<16x16xf32>
    %558 = arith.addf %555, %557 : vector<16x16xf32>
    %559 = vector.extract_strided_slice %558 {offsets = [0, 0], sizes = [7, 16], strides = [1, 1]} : vector<16x16xf32> to vector<7x16xf32>
    %560 = vector.extract_strided_slice %558 {offsets = [8, 0], sizes = [7, 16], strides = [1, 1]} : vector<16x16xf32> to vector<7x16xf32>
    %cst_739 = arith.constant 0.000000e+00 : f32
    %561 = vector.broadcast %cst_739 : f32 to vector<7x16xf32>
    %562 = arith.maximumf %559, %561 : vector<7x16xf32>
    %c0_740 = arith.constant 0 : index
    %c0_741 = arith.constant 0 : index
    %563 = vector.load %arg5[%c0_740, %c0_741] : memref<208x32xf32, #tpu.memory_space<vmem>>, vector<7x16xf32>
    tpu.vector_store %arg5[%c0_740, %c0_741], %562 {strides = array<i32>} : memref<208x32xf32, #tpu.memory_space<vmem>>, vector<7x16xf32>,
    %cst_742 = arith.constant 0.000000e+00 : f32
    %564 = vector.broadcast %cst_742 : f32 to vector<7x16xf32>
    %565 = arith.maximumf %560, %564 : vector<7x16xf32>
    %c8_743 = arith.constant 8 : index
    %c0_744 = arith.constant 0 : index
    %566 = vector.load %arg5[%c8_743, %c0_744] : memref<208x32xf32, #tpu.memory_space<vmem>>, vector<7x16xf32>
    tpu.vector_store %arg5[%c8_743, %c0_744], %565 {strides = array<i32>} : memref<208x32xf32, #tpu.memory_space<vmem>>, vector<7x16xf32>,
    %c0_745 = arith.constant 0 : index
    %c0_746 = arith.constant 0 : index
    %567 = vector.load %arg5[%c0_745, %c0_746] : memref<208x32xf32, #tpu.memory_space<vmem>>, vector<7x16xf32>
    %c0_747 = arith.constant 0 : index
    %c0_748 = arith.constant 0 : index
    %568 = vector.load %arg6[%c0_747, %c0_748] : memref<192x128xf32, #tpu.memory_space<vmem>>, vector<7x16xf32>
    tpu.vector_store %arg6[%c0_747, %c0_748], %567 {strides = array<i32>} : memref<192x128xf32, #tpu.memory_space<vmem>>, vector<7x16xf32>,
    %c8_749 = arith.constant 8 : index
    %c0_750 = arith.constant 0 : index
    %569 = vector.load %arg5[%c8_749, %c0_750] : memref<208x32xf32, #tpu.memory_space<vmem>>, vector<7x16xf32>
    %c8_751 = arith.constant 8 : index
    %c0_752 = arith.constant 0 : index
    %570 = vector.load %arg6[%c8_751, %c0_752] : memref<192x128xf32, #tpu.memory_space<vmem>>, vector<7x16xf32>
    tpu.vector_store %arg6[%c8_751, %c0_752], %569 {strides = array<i32>} : memref<192x128xf32, #tpu.memory_space<vmem>>, vector<7x16xf32>,
    %c1600 = arith.constant 1600 : index
    %c0_753 = arith.constant 0 : index
    %571 = vector.load %arg2[%c1600, %c0_753] : memref<1616x32xbf16, #tpu.memory_space<vmem>>, vector<16x32xbf16>
    %572 = arith.extf %571 : vector<16x32xbf16> to vector<16x32xf32>
    %c0_754 = arith.constant 0 : index
    %c0_755 = arith.constant 0 : index
    %573 = vector.load %arg6[%c0_754, %c0_755] : memref<192x128xf32, #tpu.memory_space<vmem>>, vector<16x16xf32>
    %cst_756 = arith.constant dense<0.000000e+00> : vector<16x32xf32>
    %574 = tpu.matmul %573, %572, %cst_756 {dimension_numbers = #tpu.dot_dimension_numbers<[1], [0], [0], [1], [0, 0, 1, 1], [], []>} : vector<16x16xf32>, vector<16x32xf32>, vector<16x32xf32> -> vector<16x32xf32>
    %c17_757 = arith.constant 17 : index
    %c0_758 = arith.constant 0 : index
    %575 = vector.load %arg3[%c17_757, %c0_758] : memref<18x32xf32, #tpu.memory_space<vmem>>, vector<1x32xf32>
    %576 = vector.broadcast %575 : vector<1x32xf32> to vector<16x32xf32>
    %577 = arith.addf %574, %576 : vector<16x32xf32>
    %578 = vector.extract_strided_slice %577 {offsets = [0, 0], sizes = [7, 32], strides = [1, 1]} : vector<16x32xf32> to vector<7x32xf32>
    %579 = vector.extract_strided_slice %577 {offsets = [8, 0], sizes = [7, 32], strides = [1, 1]} : vector<16x32xf32> to vector<7x32xf32>
    %580 = arith.addf %578, %526 : vector<7x32xf32>
    %581 = arith.addf %579, %527 : vector<7x32xf32>
    %cst_759 = arith.constant 0.000000e+00 : f32
    %582 = vector.broadcast %cst_759 : f32 to vector<7x32xf32>
    %583 = arith.maximumf %580, %582 : vector<7x32xf32>
    %584 = arith.addf %583, %472 : vector<7x32xf32>
    %c0_760 = arith.constant 0 : index
    %c0_761 = arith.constant 0 : index
    %c0_762 = arith.constant 0 : index
    %585 = vector.load %arg4[%c0_760, %c0_761, %c0_762] : memref<2x7x32xf32, #tpu.memory_space<vmem>>, vector<1x7x32xf32>
    %586 = vector.shape_cast %585 : vector<1x7x32xf32> to vector<7x32xf32>
    %587 = vector.shape_cast %584 : vector<7x32xf32> to vector<1x7x32xf32>
    tpu.vector_store %arg4[%c0_760, %c0_761, %c0_762], %587 {strides = array<i32>} : memref<2x7x32xf32, #tpu.memory_space<vmem>>, vector<1x7x32xf32>,
    %cst_763 = arith.constant 0.000000e+00 : f32
    %588 = vector.broadcast %cst_763 : f32 to vector<7x32xf32>
    %589 = arith.maximumf %581, %588 : vector<7x32xf32>
    %590 = arith.addf %589, %473 : vector<7x32xf32>
    %c1_764 = arith.constant 1 : index
    %c0_765 = arith.constant 0 : index
    %c0_766 = arith.constant 0 : index
    %591 = vector.load %arg4[%c1_764, %c0_765, %c0_766] : memref<2x7x32xf32, #tpu.memory_space<vmem>>, vector<1x7x32xf32>
    %592 = vector.shape_cast %591 : vector<1x7x32xf32> to vector<7x32xf32>
    %593 = vector.shape_cast %590 : vector<7x32xf32> to vector<1x7x32xf32>
    tpu.vector_store %arg4[%c1_764, %c0_765, %c0_766], %593 {strides = array<i32>} : memref<2x7x32xf32, #tpu.memory_space<vmem>>, vector<1x7x32xf32>,
    return
  }
  func.func @transform_0(%arg0: i32) -> (i32, i32, i32) {
    %c0_i32 = arith.constant 0 : i32
    %c0_i32_0 = arith.constant 0 : i32
    %c0_i32_1 = arith.constant 0 : i32
    return %arg0, %c0_i32, %c0_i32_0 : i32, i32, i32
  }
  func.func @transform_1(%arg0: i32) -> (i32, i32) {
    %c0_i32 = arith.constant 0 : i32
    %c0_i32_0 = arith.constant 0 : i32
    %c0_i32_1 = arith.constant 0 : i32
    return %c0_i32, %c0_i32_0 : i32, i32
  }
  func.func @transform_2(%arg0: i32) -> (i32, i32) {
    %c0_i32 = arith.constant 0 : i32
    %c0_i32_0 = arith.constant 0 : i32
    %c0_i32_1 = arith.constant 0 : i32
    return %c0_i32, %c0_i32_0 : i32, i32
  }
  func.func @transform_3(%arg0: i32) -> (i32, i32, i32) {
    %c0_i32 = arith.constant 0 : i32
    %c0_i32_0 = arith.constant 0 : i32
    %c0_i32_1 = arith.constant 0 : i32
    return %arg0, %c0_i32, %c0_i32_0 : i32, i32, i32
  }
}

</mosaic_0001>

<bundles_post_ra>
// kernel: tpu_custom_call.1
= control target key start
LH: loop header
LB: loop body
LE: loop exit
PB: predicated region body
PF: predicated region fallthrough
CT: control target
= control target key end

     0   :  { %vm66_vm0 = vcmask 31744   ;;  %vm63_vm1 = vcmask 24576   ;;  %v7154_v3 = vmov 0.0   ;;  %vm537_vm2 = vcmask 1043456   ;;  %s7155_s6 = smov 4   ;;  %s7156_s7 = smov 8   ;;  %s9430_s0 = inlined_call_operand.vmem [shape: f32[2,96,4], index: 0, kind: input, shape index: {}]   ;;  %s9431_s1 = inlined_call_operand.vmem [shape: bf16[1616,32], index: 1, kind: input, shape index: {}]   ;;  %s9432_s2 = inlined_call_operand.vmem [shape: f32[18,32], index: 2, kind: input, shape index: {}]   ;;  %s9433_s3 = inlined_call_operand.vmem [shape: f32[2,7,32], index: 3, kind: output, shape index: {}]  }
   0x1   :  { %v38_v0 = vld [vmem:[%s9430_s0] sm:$0xff]  ;;  %v39_v1 = vld [vmem:[%s9430_s0 + $0x8] sm:$0xff]  ;;  %v40_v2 = vld [vmem:[%s9430_s0 + $0x10] sm:$0xff]  ;;  %64 = vst.msk [vmem:[#allocation2] sm:$0x1] %vm63_vm1, %v7154_v3  ;;  %vm750_vm3 = vcmask 253952  }
   0x2   :  { %65 = vst.msk [vmem:[#allocation2 + $0x61] sm:$0x1] %vm63_vm1, %v7154_v3  ;;  %79 = vst.msk [vmem:[#allocation2 + $0x68] sm:$0x1] %vm63_vm1, %v7154_v3  ;;  %v41_v4 = vld [vmem:[%s9430_s0 + $0x18] sm:$0xff]  ;;  %v42_v5 = vld [vmem:[%s9430_s0 + $0x20] sm:$0xff] }
   0x3   :  { %14 = vst [vmem:[#allocation3] sm:$0xff] %v7154_v3  ;;  %15 = vst [vmem:[#allocation3 + $0x8] sm:$0xff] %v7154_v3  ;;  %v43_v6 = vld [vmem:[%s9430_s0 + $0x28] sm:$0xff]  ;;  %v44_v7 = vld [vmem:[%s9430_s0 + $0x30] sm:$0xff]  ;;  %vm177_vm4 = vcmask 64544   ;;  %vm250_vm5 = vcmask 97344  }
   0x4   :  { %16 = vst [vmem:[#allocation3 + $0x10] sm:$0xff] %v7154_v3  ;;  %17 = vst [vmem:[#allocation3 + $0x18] sm:$0xff] %v7154_v3  ;;  %v45_v8 = vld [vmem:[%s9430_s0 + $0x38] sm:$0xff]  ;;  %v46_v9 = vld [vmem:[%s9430_s0 + $0x40] sm:$0xff]  ;;  %vm464_vm6 = vcmask 97280   ;;  %vm1477_vm7 = vcmask 254976  }
   0x5   :  { %18 = vst [vmem:[#allocation3 + $0x20] sm:$0xff] %v7154_v3  ;;  %19 = vst [vmem:[#allocation3 + $0x28] sm:$0xff] %v7154_v3  ;;  %v47_v10 = vld [vmem:[%s9430_s0 + $0x48] sm:$0xff]  ;;  %v48_v11 = vld [vmem:[%s9430_s0 + $0x50] sm:$0xff]  ;;  %vm753_vm8 = vcmask 261120   ;;  %s7157_s13 = smov 32  }
   0x6   :  { %20 = vst [vmem:[#allocation3 + $0x30] sm:$0xff] %v7154_v3  ;;  %21 = vst [vmem:[#allocation3 + $0x38] sm:$0xff] %v7154_v3  ;;  %v49_v12 = vld [vmem:[%s9430_s0 + $0x58] sm:$0xff]  ;;  %v5544_v13 = vld [vmem:[%s9430_s0 + $0x60] sm:$0xff]  ;;  %s7158_s14 = smov 64   ;;  %vm864_vm9 = vcmask 523520  }
   0x7   :  { %22 = vst [vmem:[#allocation3 + $0x40] sm:$0xff] %v7154_v3  ;;  %23 = vst [vmem:[#allocation3 + $0x48] sm:$0xff] %v7154_v3  ;;  %v5545_v14 = vld [vmem:[%s9430_s0 + $0x68] sm:$0xff]  ;;  %v5546_v15 = vld [vmem:[%s9430_s0 + $0x70] sm:$0xff]  ;;  %vm937_vm10 = vcmask 785920   ;;  %vm1171_vm11 = vcmask 785408  }
   0x8   :  { %24 = vst [vmem:[#allocation3 + $0x50] sm:$0xff] %v7154_v3  ;;  %25 = vst [vmem:[#allocation3 + $0x58] sm:$0xff] %v7154_v3  ;;  %v5547_v16 = vld [vmem:[%s9430_s0 + $0x78] sm:$0xff]  ;;  %v5548_v17 = vld [vmem:[%s9430_s0 + $0x80] sm:$0xff]  ;;  %s7159_s27 = smov 96   ;;  %vm1668_vm12 = vcmask 1048320  }
   0x9   :  { %26 = vst [vmem:[#allocation3 + $0x60] sm:$0xff] %v7154_v3  ;;  %27 = vst [vmem:[#allocation3 + $0x68] sm:$0xff] %v7154_v3  ;;  %v5549_v18 = vld [vmem:[%s9430_s0 + $0x88] sm:$0xff]  ;;  %v5550_v19 = vld [vmem:[%s9430_s0 + $0x90] sm:$0xff]  ;;  %vm1574_vm13 = vcmask 516352   ;;  %vm1624_vm14 = vcmask 778752  }
   0xa   :  { %28 = vst [vmem:[#allocation3 + $0x70] sm:$0xff] %v7154_v3  ;;  %29 = vst [vmem:[#allocation3 + $0x78] sm:$0xff] %v7154_v3  ;;  %v5551_v20 = vld [vmem:[%s9430_s0 + $0x98] sm:$0xff]  ;;  %v5552_v21 = vld [vmem:[%s9430_s0 + $0xa0] sm:$0xff]  ;;  %vm1675_vm15 = vcmask 1041152  }
   0xb   :  { %30 = vst [vmem:[#allocation3 + $0x80] sm:$0xff] %v7154_v3  ;;  %31 = vst [vmem:[#allocation3 + $0x88] sm:$0xff] %v7154_v3  ;;  %v5553_v22 = vld [vmem:[%s9430_s0 + $0xa8] sm:$0xff]  ;;  %v5554_v23 = vld [vmem:[%s9430_s0 + $0xb0] sm:$0xff] }
   0xc   :  { %32 = vst [vmem:[#allocation3 + $0x90] sm:$0xff] %v7154_v3  ;;  %33 = vst [vmem:[#allocation3 + $0x98] sm:$0xff] %v7154_v3  ;;  %v432_v24 = vld [vmem:[%s9431_s1 + $0x4] sm:$0x3]  ;;  %v431_v47 = vld [vmem:[%s9431_s1] sm:$0xf] }
   0xd   :  { %34 = vst [vmem:[#allocation3 + $0xa0] sm:$0xff] %v7154_v3  ;;  %35 = vst [vmem:[#allocation3 + $0xa8] sm:$0xff] %v7154_v3  ;;  %v434_v28 = vunpack.c.l.bf16 %v432_v24  ;;  %v433_v49 = vunpack.c.l.bf16 %v431_v47  ;;  %v5555_v50 = vld [vmem:[%s9430_s0 + $0xb8] sm:$0xff] }
   0xe   :  { %36 = vst [vmem:[#allocation3 + $0xb0] sm:$0xff] %v7154_v3  ;;  %37 = vst [vmem:[#allocation3 + $0xb8] sm:$0xff] %v7154_v3 }
   0xf   :  { %80 = vst.msk [vmem:[#allocation2 + $0xc9] sm:$0x1] %vm63_vm1, %v7154_v3  ;;  %6530 = vmatprep.subr.msk.mxu0 %vm537_vm2, %v434_v28  ;;  %7144 = vmatprep.subr.msk.mxu1 %vm537_vm2, %v434_v28  ;;  %vm3957_vm1 = vcmask 520448  }
  0x10   :  { %67 = vst.msk [vmem:[#allocation2 + $0x1] sm:$0xff] %vm66_vm0, %v38_v0  ;;  %68 = vst.msk [vmem:[#allocation2 + $0x9] sm:$0xff] %vm66_vm0, %v39_v1  ;;  %6531 = vmatpush3.msk.msra.mxu0 %vm537_vm2, %v434_v28  ;;  %7146 = vmatpush3.msk.msra.mxu1 %vm537_vm2, %v434_v28  ;;  %vm3970_vm2 = vcmask 782848  }
  0x11   :  { %69 = vst.msk [vmem:[#allocation2 + $0x11] sm:$0xff] %vm66_vm0, %v40_v2  ;;  %70 = vst.msk [vmem:[#allocation2 + $0x19] sm:$0xff] %vm66_vm0, %v41_v4  ;;  %6532 = vmatprep.subr.mxu0 %v433_v49  ;;  %7145 = vmatprep.subr.mxu1 %v433_v49 }
  0x12   :  { %71 = vst.msk [vmem:[#allocation2 + $0x21] sm:$0xff] %vm66_vm0, %v42_v5  ;;  %72 = vst.msk [vmem:[#allocation2 + $0x29] sm:$0xff] %vm66_vm0, %v43_v6  ;;  %6533 = vmatpush3.msra.mxu0 %v433_v49  ;;  %7147 = vmatpush3.msra.mxu1 %v433_v49 }
  0x13   :  { %73 = vst.msk [vmem:[#allocation2 + $0x31] sm:$0xff] %vm66_vm0, %v44_v7  ;;  %74 = vst.msk [vmem:[#allocation2 + $0x39] sm:$0xff] %vm66_vm0, %v45_v8 }
  0x14   :  { %75 = vst.msk [vmem:[#allocation2 + $0x41] sm:$0xff] %vm66_vm0, %v46_v9  ;;  %76 = vst.msk [vmem:[#allocation2 + $0x49] sm:$0xff] %vm66_vm0, %v47_v10 }
  0x15   :  { %77 = vst.msk [vmem:[#allocation2 + $0x51] sm:$0xff] %vm66_vm0, %v48_v11  ;;  %78 = vst.msk [vmem:[#allocation2 + $0x59] sm:$0xff] %vm66_vm0, %v49_v12 }
  0x16   :  { %81 = vst.msk [vmem:[#allocation2 + $0x69] sm:$0xff] %vm66_vm0, %v5544_v13  ;;  %82 = vst.msk [vmem:[#allocation2 + $0x71] sm:$0xff] %vm66_vm0, %v5545_v14 }
  0x17   :  { %83 = vst.msk [vmem:[#allocation2 + $0x79] sm:$0xff] %vm66_vm0, %v5546_v15  ;;  %84 = vst.msk [vmem:[#allocation2 + $0x81] sm:$0xff] %vm66_vm0, %v5547_v16  ;;  %v117_v25 = vld [vmem:[#allocation2 + $0x1] sm:$0xff]  ;;  %v118_v30 = vld [vmem:[#allocation2 + $0x9] sm:$0xff] }
  0x18   :  { %85 = vst.msk [vmem:[#allocation2 + $0x89] sm:$0xff] %vm66_vm0, %v5548_v17  ;;  %86 = vst.msk [vmem:[#allocation2 + $0x91] sm:$0xff] %vm66_vm0, %v5549_v18  ;;  %v190_v26 = vld [vmem:[#allocation2 + $0x2] sm:$0xff]  ;;  %141 = vrot.lane.b32.xlu0 %v117_v25, %s7155_s6  ;;  %v95_v29 = vld [vmem:[#allocation2 + $0x10] sm:$0xff] }
  0x19   :  { %87 = vst.msk [vmem:[#allocation2 + $0x99] sm:$0xff] %vm66_vm0, %v5550_v19  ;;  %88 = vst.msk [vmem:[#allocation2 + $0xa1] sm:$0xff] %vm66_vm0, %v5551_v20  ;;  %v94_v27 = vld [vmem:[#allocation2 + $0x8] sm:$0xff]  ;;  %214 = vrot.lane.b32.xlu1 %v190_v26, %s7156_s7  ;;  %v96_v32 = vld [vmem:[#allocation2 + $0x18] sm:$0xff] }
  0x1a   :  { %89 = vst.msk [vmem:[#allocation2 + $0xa9] sm:$0xff] %vm66_vm0, %v5552_v21  ;;  %90 = vst.msk [vmem:[#allocation2 + $0xb1] sm:$0xff] %vm66_vm0, %v5553_v22  ;;  %v191_v31 = vld [vmem:[#allocation2 + $0xa] sm:$0xff]  ;;  %v97_v33 = vld [vmem:[#allocation2 + $0x20] sm:$0xff] }
  0x1b   :  { %91 = vst.msk [vmem:[#allocation2 + $0xb9] sm:$0xff] %vm66_vm0, %v5554_v23  ;;  %106 = vst.msk [vmem:[#allocation3 + $0x8] sm:$0xff] %vm66_vm0, %v94_v27  ;;  %v98_v34 = vld [vmem:[#allocation2 + $0x28] sm:$0xff]  ;;  %v99_v35 = vld [vmem:[#allocation2 + $0x30] sm:$0xff] }
  0x1c   :  { %107 = vst.msk [vmem:[#allocation3 + $0x10] sm:$0xff] %vm66_vm0, %v95_v29  ;;  %108 = vst.msk [vmem:[#allocation3 + $0x18] sm:$0xff] %vm66_vm0, %v96_v32  ;;  %143 = vrot.lane.b32.xlu0 %v118_v30, %s7155_s6  ;;  %v119_v36 = vld [vmem:[#allocation2 + $0x11] sm:$0xff]  ;;  %v120_v37 = vld [vmem:[#allocation2 + $0x19] sm:$0xff] }
  0x1d   :  { %109 = vst.msk [vmem:[#allocation3 + $0x20] sm:$0xff] %vm66_vm0, %v97_v33  ;;  %216 = vrot.lane.b32.xlu1 %v191_v31, %s7156_s7  ;;  %110 = vst.msk [vmem:[#allocation3 + $0x28] sm:$0xff] %vm66_vm0, %v98_v34  ;;  %v100_v38 = vld [vmem:[#allocation2 + $0x38] sm:$0xff]  ;;  %v263_v42 = vld [vmem:[#allocation2 + $0x68] sm:$0xff] }
  0x1e   :  { %111 = vst.msk [vmem:[#allocation3 + $0x30] sm:$0xff] %vm66_vm0, %v99_v35  ;;  %112 = vst.msk [vmem:[#allocation3 + $0x38] sm:$0xff] %vm66_vm0, %v100_v38  ;;  %v192_v39 = vld [vmem:[#allocation2 + $0x12] sm:$0xff]  ;;  %v193_v40 = vld [vmem:[#allocation2 + $0x1a] sm:$0xff] }
  0x1f   :  { %v7324_v41 = vld [vmem:[#allocation2 + $0x5a] sm:$0xff]  ;;  %766 = vst.msk [vmem:[#allocation2 + $0x68] sm:$0x1] %vm750_vm3, %v7154_v3  ;;  %v122_v45 = vld [vmem:[#allocation2 + $0x29] sm:$0xff]  ;;  %v123_v53 = vld [vmem:[#allocation2 + $0x31] sm:$0xff] }
  0x20   :  { %145 = vrot.lane.b32.xlu0 %v119_v36, %s7155_s6  ;;  %v93_v43 = vld [vmem:[#allocation2] sm:$0xff]  ;;  %752 = vst.msk [vmem:[#allocation2 + $0x61] sm:$0x1] %vm750_vm3, %v7154_v3  ;;  %v195_v48 = vld [vmem:[#allocation2 + $0x2a] sm:$0xff]  ;;  %v196_v56 = vld [vmem:[#allocation2 + $0x32] sm:$0xff] }
  0x21   :  { %147 = vrot.lane.b32.xlu1 %v120_v37, %s7155_s6  ;;  %751 = vst.msk [vmem:[#allocation2] sm:$0x1] %vm750_vm3, %v7154_v3  ;;  %v121_v44 = vld [vmem:[#allocation2 + $0x21] sm:$0xff]  ;;  %v124_v54 = vld [vmem:[#allocation2 + $0x39] sm:$0xff]  ;;  %v103_v55 = vld [vmem:[#allocation2 + $0x50] sm:$0xff] }
  0x22   :  { %105 = vst.msk [vmem:[#allocation3] sm:$0xff] %vm66_vm0, %v93_v43  ;;  %275 = vst.msk [vmem:[#allocation3 + $0x60] sm:$0xff] %vm66_vm0, %v263_v42  ;;  %v194_v46 = vld [vmem:[#allocation2 + $0x22] sm:$0xff]  ;;  %v197_v57 = vld [vmem:[#allocation2 + $0x3a] sm:$0xff] }
  0x23   :  { %v101_v51 = vld [vmem:[#allocation2 + $0x40] sm:$0xff]  ;;  %92 = vst.msk [vmem:[#allocation2 + $0xc1] sm:$0xff] %vm66_vm0, %v5555_v50  ;;  %v102_v52 = vld [vmem:[#allocation2 + $0x48] sm:$0xff]  ;;  %115 = vst.msk [vmem:[#allocation3 + $0x50] sm:$0xff] %vm66_vm0, %v103_v55 }
  0x24   :  { %218 = vrot.lane.b32.xlu0 %v192_v39, %s7156_s7  ;;  %113 = vst.msk [vmem:[#allocation3 + $0x40] sm:$0xff] %vm66_vm0, %v101_v51  ;;  %114 = vst.msk [vmem:[#allocation3 + $0x48] sm:$0xff] %vm66_vm0, %v102_v52  ;;  %v104_v59 = vld [vmem:[#allocation2 + $0x58] sm:$0xff]  ;;  %v125_v60 = vld [vmem:[#allocation2 + $0x41] sm:$0xff] }
  0x25   :  { %220 = vrot.lane.b32.xlu1 %v193_v40, %s7156_s7  ;;  %116 = vst.msk [vmem:[#allocation3 + $0x58] sm:$0xff] %vm66_vm0, %v104_v59  ;;  %v126_v61 = vld [vmem:[#allocation2 + $0x49] sm:$0xff]  ;;  %v127_v1 = vld [vmem:[#allocation2 + $0x51] sm:$0xff]  ;;  %v128_v2 = vld [vmem:[#allocation2 + $0x59] sm:$0xff] }
  0x26   :  { %v198_v62 = vld [vmem:[#allocation2 + $0x42] sm:$0xff]  ;;  %v199_v63 = vld [vmem:[#allocation2 + $0x4a] sm:$0xff]  ;;  %v265_v4 = vld [vmem:[#allocation2 + $0x78] sm:$0xff]  ;;  %1479 = vst.msk [vmem:[#allocation2 + $0x62] sm:$0x3] %vm1477_vm7, %v7154_v3 }
  0x27   :  { %v264_v0 = vld [vmem:[#allocation2 + $0x70] sm:$0xff]  ;;  %277 = vst.msk [vmem:[#allocation3 + $0x70] sm:$0xff] %vm66_vm0, %v265_v4  ;;  %v266_v6 = vld [vmem:[#allocation2 + $0x80] sm:$0xff]  ;;  %v267_v9 = vld [vmem:[#allocation2 + $0x88] sm:$0xff] }
  0x28   :  { %149 = vrot.lane.b32.xlu0 %v121_v44, %s7155_s6  ;;  %276 = vst.msk [vmem:[#allocation3 + $0x68] sm:$0xff] %vm66_vm0, %v264_v0  ;;  %v200_v5 = vld [vmem:[#allocation2 + $0x52] sm:$0xff]  ;;  %278 = vst.msk [vmem:[#allocation3 + $0x78] sm:$0xff] %vm66_vm0, %v266_v6  ;;  %v287_v7 = vld [vmem:[#allocation2 + $0x69] sm:$0xff] }
  0x29   :  { %151 = vrot.lane.b32.xlu1 %v122_v45, %s7155_s6  ;;  %v288_v8 = vld [vmem:[#allocation2 + $0x71] sm:$0xff]  ;;  %279 = vst.msk [vmem:[#allocation3 + $0x80] sm:$0xff] %vm66_vm0, %v267_v9  ;;  %v289_v13 = vld [vmem:[#allocation2 + $0x79] sm:$0xff]  ;;  %v290_v14 = vld [vmem:[#allocation2 + $0x81] sm:$0xff] }
  0x2a   :  { %v7351_v58 = vld [vmem:[#allocation2 + $0xc2] sm:$0xff]  ;;  %v359_v10 = vld [vmem:[#allocation2 + $0x6a] sm:$0xff]  ;;  %v360_v11 = vld [vmem:[#allocation2 + $0x72] sm:$0xff]  ;;  %1493 = vst.msk [vmem:[#allocation2 + $0xca] sm:$0x3] %vm1477_vm7, %v7154_v3 }
  0x2b   :  { %767 = vst.msk [vmem:[#allocation2 + $0xc9] sm:$0x1] %vm750_vm3, %v7154_v3  ;;  %v268_v12 = vld [vmem:[#allocation2 + $0x90] sm:$0xff]  ;;  %v269_v15 = vld [vmem:[#allocation2 + $0x98] sm:$0xff]  ;;  %v362_v17 = vld [vmem:[#allocation2 + $0x82] sm:$0xff] }
  0x2c   :  { %222 = vrot.lane.b32.xlu0 %v194_v46, %s7156_s7  ;;  %280 = vst.msk [vmem:[#allocation3 + $0x88] sm:$0xff] %vm66_vm0, %v268_v12  ;;  %v361_v16 = vld [vmem:[#allocation2 + $0x7a] sm:$0xff]  ;;  %281 = vst.msk [vmem:[#allocation3 + $0x90] sm:$0xff] %vm66_vm0, %v269_v15  ;;  %v291_v19 = vld [vmem:[#allocation2 + $0x89] sm:$0xff] }
  0x2d   :  { %224 = vrot.lane.b32.xlu1 %v195_v48, %s7156_s7  ;;  %v270_v18 = vld [vmem:[#allocation2 + $0xa0] sm:$0xff]  ;;  %v292_v20 = vld [vmem:[#allocation2 + $0x91] sm:$0xff]  ;;  %v271_v21 = vld [vmem:[#allocation2 + $0xa8] sm:$0xff] }
  0x2e   :  { %282 = vst.msk [vmem:[#allocation3 + $0x98] sm:$0xff] %vm66_vm0, %v270_v18  ;;  %v363_v22 = vld [vmem:[#allocation2 + $0x8a] sm:$0xff]  ;;  %v364_v23 = vld [vmem:[#allocation2 + $0x92] sm:$0xff]  ;;  %283 = vst.msk [vmem:[#allocation3 + $0xa0] sm:$0xff] %vm66_vm0, %v271_v21 }
  0x2f   :  { %v272_v24 = vld [vmem:[#allocation2 + $0xb0] sm:$0xff]  ;;  %v293_v25 = vld [vmem:[#allocation2 + $0x99] sm:$0xff]  ;;  %v294_v26 = vld [vmem:[#allocation2 + $0xa1] sm:$0xff] }
  0x30   :  { %153 = vrot.lane.b32.xlu0 %v123_v53, %s7155_s6  ;;  %284 = vst.msk [vmem:[#allocation3 + $0xa8] sm:$0xff] %vm66_vm0, %v272_v24  ;;  %v365_v27 = vld [vmem:[#allocation2 + $0x9a] sm:$0xff]  ;;  %v366_v28 = vld [vmem:[#allocation2 + $0xa2] sm:$0xff]  ;;  %v296_v30 = vld [vmem:[#allocation2 + $0xb1] sm:$0xff] }
  0x31   :  { %155 = vrot.lane.b32.xlu1 %v124_v54, %s7155_s6  ;;  %v295_v29 = vld [vmem:[#allocation2 + $0xa9] sm:$0xff]  ;;  %v273_v31 = vld [vmem:[#allocation2 + $0xb8] sm:$0xff]  ;;  %v274_v32 = vld [vmem:[#allocation2 + $0xc0] sm:$0xff] }
  0x32   :  { %v367_v33 = vld [vmem:[#allocation2 + $0xaa] sm:$0xff]  ;;  %v368_v34 = vld [vmem:[#allocation2 + $0xb2] sm:$0xff]  ;;  %285 = vst.msk [vmem:[#allocation3 + $0xb0] sm:$0xff] %vm66_vm0, %v273_v31  ;;  %286 = vst.msk [vmem:[#allocation3 + $0xb8] sm:$0xff] %vm66_vm0, %v274_v32  ;;  %vm3944_vm0 = vcmask 258048  }
  0x33   :  { %v297_v35 = vld [vmem:[#allocation2 + $0xb9] sm:$0xff]  ;;  %v298_v36 = vld [vmem:[#allocation2 + $0xc1] sm:$0xff] }
  0x34   :  { %226 = vrot.lane.b32.xlu0 %v196_v56, %s7156_s7  ;;  %v369_v37 = vld [vmem:[#allocation2 + $0xba] sm:$0xff] }
  0x35   :  { %228 = vrot.lane.b32.xlu1 %v197_v57, %s7156_s7 }
  0x38   :  { %157 = vrot.lane.b32.xlu0 %v125_v60, %s7155_s6 }
  0x39   :  { %159 = vrot.lane.b32.xlu1 %v126_v61, %s7155_s6 }
  0x3c   :  { %230 = vrot.lane.b32.xlu0 %v198_v62, %s7156_s7 }
  0x3d   :  { %232 = vrot.lane.b32.xlu1 %v199_v63, %s7156_s7 }
  0x40   :  { %161 = vrot.lane.b32.xlu0 %v127_v1, %s7155_s6 }
  0x41   :  { %163 = vrot.lane.b32.xlu1 %v128_v2, %s7155_s6 }
  0x44   :  { %234 = vrot.lane.b32.xlu0 %v200_v5, %s7156_s7 }
  0x45   :  { %236 = vrot.lane.b32.xlu1 %v7324_v41, %s7156_s7 }
  0x48   :  { %311 = vrot.lane.b32.xlu0 %v287_v7, %s7155_s6 }
  0x49   :  { %313 = vrot.lane.b32.xlu1 %v288_v8, %s7155_s6 }
  0x4c   :  { %383 = vrot.lane.b32.xlu0 %v359_v10, %s7156_s7 }
  0x4d   :  { %385 = vrot.lane.b32.xlu1 %v360_v11, %s7156_s7 }
  0x50   :  { %315 = vrot.lane.b32.xlu0 %v289_v13, %s7155_s6 }
  0x51   :  { %317 = vrot.lane.b32.xlu1 %v290_v14, %s7155_s6 }
  0x54   :  { %387 = vrot.lane.b32.xlu0 %v361_v16, %s7156_s7 }
  0x55   :  { %389 = vrot.lane.b32.xlu1 %v362_v17, %s7156_s7 }
  0x58   :  { %319 = vrot.lane.b32.xlu0 %v291_v19, %s7155_s6 }
  0x59   :  { %321 = vrot.lane.b32.xlu1 %v292_v20, %s7155_s6 }
  0x5c   :  { %391 = vrot.lane.b32.xlu0 %v363_v22, %s7156_s7 }
  0x5d   :  { %393 = vrot.lane.b32.xlu1 %v364_v23, %s7156_s7 }
  0x60   :  { %323 = vrot.lane.b32.xlu0 %v293_v25, %s7155_s6 }
  0x61   :  { %325 = vrot.lane.b32.xlu1 %v294_v26, %s7155_s6 }
  0x64   :  { %395 = vrot.lane.b32.xlu0 %v365_v27, %s7156_s7 }
  0x65   :  { %397 = vrot.lane.b32.xlu1 %v366_v28, %s7156_s7 }
  0x68   :  { %327 = vrot.lane.b32.xlu0 %v295_v29, %s7155_s6 }
  0x69   :  { %329 = vrot.lane.b32.xlu1 %v296_v30, %s7155_s6 }
  0x6c   :  { %399 = vrot.lane.b32.xlu0 %v367_v33, %s7156_s7 }
  0x6d   :  { %401 = vrot.lane.b32.xlu1 %v368_v34, %s7156_s7 }
  0x70   :  { %331 = vrot.lane.b32.xlu0 %v297_v35, %s7155_s6 }
  0x71   :  { %333 = vrot.lane.b32.xlu1 %v298_v36, %s7155_s6 }
  0x74   :  { %403 = vrot.lane.b32.xlu0 %v369_v37, %s7156_s7 }
  0x75   :  { %405 = vrot.lane.b32.xlu1 %v7351_v58, %s7156_s7 }
  0x8a   :  { %v142_v38 = vpop.permute.xlu0 %141 }
  0x8b   :  { %v215_v39 = vpop.permute.xlu1 %214  ;;  %178 = vst.msk [vmem:[#allocation3] sm:$0xff] %vm177_vm4, %v142_v38 }
  0x8c   :  { %251 = vst.msk [vmem:[#allocation3] sm:$0xff] %vm250_vm5, %v215_v39 }
  0x8e   :  { %v144_v40 = vpop.permute.xlu0 %143 }
  0x8f   :  { %v217_v41 = vpop.permute.xlu1 %216  ;;  %179 = vst.msk [vmem:[#allocation3 + $0x8] sm:$0xff] %vm177_vm4, %v144_v40 }
  0x90   :  { %252 = vst.msk [vmem:[#allocation3 + $0x8] sm:$0xff] %vm250_vm5, %v217_v41 }
  0x92   :  { %v146_v42 = vpop.permute.xlu0 %145 }
  0x93   :  { %v148_v43 = vpop.permute.xlu1 %147  ;;  %180 = vst.msk [vmem:[#allocation3 + $0x10] sm:$0xff] %vm177_vm4, %v146_v42  ;;  %v435_v44 = vld [vmem:[#allocation3] sm:$0xff] }
  0x94   :  { %181 = vst.msk [vmem:[#allocation3 + $0x18] sm:$0xff] %vm177_vm4, %v148_v43  ;;  %6534 = vmatprep.mubr.msk.f32.mxu0 %vm464_vm6, %v435_v44 }
  0x96   :  { %v219_v45 = vpop.permute.xlu0 %218 }
  0x97   :  { %v221_v46 = vpop.permute.xlu1 %220  ;;  %253 = vst.msk [vmem:[#allocation3 + $0x10] sm:$0xff] %vm250_vm5, %v219_v45  ;;  %v436_v47 = vld [vmem:[#allocation3 + $0x8] sm:$0xff] }
  0x98   :  { %254 = vst.msk [vmem:[#allocation3 + $0x18] sm:$0xff] %vm250_vm5, %v221_v46  ;;  %6535 = vmatmul.mubr.msk.f32.vlgmr.msra.gmra.mxu0 %vm464_vm6, %v436_v47  ;;  %v7483_v47 = vld [vmem:[%s9432_s2] ss:$0 sm:$0xff] }
  0x9a   :  { %v150_v48 = vpop.permute.xlu0 %149 }
  0x9b   :  { %v152_v49 = vpop.permute.xlu1 %151  ;;  %182 = vst.msk [vmem:[#allocation3 + $0x20] sm:$0xff] %vm177_vm4, %v150_v48 }
  0x9c   :  { %183 = vst.msk [vmem:[#allocation3 + $0x28] sm:$0xff] %vm177_vm4, %v152_v49 }
  0x9e   :  { %v223_v50 = vpop.permute.xlu0 %222  ;;  %v437_v52 = vld [vmem:[#allocation3 + $0x10] sm:$0xff] }
  0x9f   :  { %v225_v51 = vpop.permute.xlu1 %224  ;;  %v438_v53 = vld [vmem:[#allocation3 + $0x18] sm:$0xff]  ;;  %255 = vst.msk [vmem:[#allocation3 + $0x20] sm:$0xff] %vm250_vm5, %v223_v50  ;;  %6537 = vmatprep.mubr.msk.f32.mxu0 %vm464_vm6, %v437_v52 }
  0xa0   :  { %256 = vst.msk [vmem:[#allocation3 + $0x28] sm:$0xff] %vm250_vm5, %v225_v51  ;;  %6538 = vmatmul.mubr.msk.f32.gmra.mxu0 %vm464_vm6, %v438_v53 }
  0xa2   :  { %v154_v54 = vpop.permute.xlu0 %153 }
  0xa3   :  { %v156_v55 = vpop.permute.xlu1 %155  ;;  %184 = vst.msk [vmem:[#allocation3 + $0x30] sm:$0xff] %vm177_vm4, %v154_v54 }
  0xa4   :  { %185 = vst.msk [vmem:[#allocation3 + $0x38] sm:$0xff] %vm177_vm4, %v156_v55 }
  0xa6   :  { %v227_v56 = vpop.permute.xlu0 %226  ;;  %v439_v58 = vld [vmem:[#allocation3 + $0x20] sm:$0xff] }
  0xa7   :  { %v229_v57 = vpop.permute.xlu1 %228  ;;  %v440_v59 = vld [vmem:[#allocation3 + $0x28] sm:$0xff]  ;;  %257 = vst.msk [vmem:[#allocation3 + $0x30] sm:$0xff] %vm250_vm5, %v227_v56  ;;  %6540 = vmatprep.mubr.msk.f32.mxu0 %vm464_vm6, %v439_v58 }
  0xa8   :  { %258 = vst.msk [vmem:[#allocation3 + $0x38] sm:$0xff] %vm250_vm5, %v229_v57  ;;  %6541 = vmatmul.mubr.msk.f32.gmra.mxu0 %vm464_vm6, %v440_v59 }
  0xaa   :  { %v158_v60 = vpop.permute.xlu0 %157 }
  0xab   :  { %v160_v61 = vpop.permute.xlu1 %159  ;;  %186 = vst.msk [vmem:[#allocation3 + $0x40] sm:$0xff] %vm177_vm4, %v158_v60 }
  0xac   :  { %187 = vst.msk [vmem:[#allocation3 + $0x48] sm:$0xff] %vm177_vm4, %v160_v61 }
  0xae   :  { %v231_v62 = vpop.permute.xlu0 %230  ;;  %v441_v0 = vld [vmem:[#allocation3 + $0x30] sm:$0xff] }
  0xaf   :  { %v233_v63 = vpop.permute.xlu1 %232  ;;  %v442_v1 = vld [vmem:[#allocation3 + $0x38] sm:$0xff]  ;;  %259 = vst.msk [vmem:[#allocation3 + $0x40] sm:$0xff] %vm250_vm5, %v231_v62  ;;  %6543 = vmatprep.mubr.msk.f32.mxu0 %vm464_vm6, %v441_v0 }
  0xb0   :  { %260 = vst.msk [vmem:[#allocation3 + $0x48] sm:$0xff] %vm250_vm5, %v233_v63  ;;  %6544 = vmatmul.mubr.msk.f32.gmra.mxu0 %vm464_vm6, %v442_v1 }
  0xb2   :  { %v162_v2 = vpop.permute.xlu0 %161 }
  0xb3   :  { %v164_v4 = vpop.permute.xlu1 %163  ;;  %188 = vst.msk [vmem:[#allocation3 + $0x50] sm:$0xff] %vm177_vm4, %v162_v2 }
  0xb4   :  { %189 = vst.msk [vmem:[#allocation3 + $0x58] sm:$0xff] %vm177_vm4, %v164_v4 }
  0xb6   :  { %v235_v5 = vpop.permute.xlu0 %234  ;;  %v443_v7 = vld [vmem:[#allocation3 + $0x40] sm:$0xff] }
  0xb7   :  { %v237_v6 = vpop.permute.xlu1 %236  ;;  %v444_v8 = vld [vmem:[#allocation3 + $0x48] sm:$0xff]  ;;  %261 = vst.msk [vmem:[#allocation3 + $0x50] sm:$0xff] %vm250_vm5, %v235_v5  ;;  %6546 = vmatprep.mubr.msk.f32.mxu0 %vm464_vm6, %v443_v7 }
  0xb8   :  { %262 = vst.msk [vmem:[#allocation3 + $0x58] sm:$0xff] %vm250_vm5, %v237_v6  ;;  %6547 = vmatmul.mubr.msk.f32.gmra.mxu0 %vm464_vm6, %v444_v8 }
  0xba   :  { %v312_v9 = vpop.permute.xlu0 %311 }
  0xbb   :  { %v314_v10 = vpop.permute.xlu1 %313  ;;  %347 = vst.msk [vmem:[#allocation3 + $0x60] sm:$0xff] %vm177_vm4, %v312_v9 }
  0xbc   :  { %348 = vst.msk [vmem:[#allocation3 + $0x68] sm:$0xff] %vm177_vm4, %v314_v10 }
  0xbe   :  { %v384_v11 = vpop.permute.xlu0 %383  ;;  %v445_v13 = vld [vmem:[#allocation3 + $0x50] sm:$0xff] }
  0xbf   :  { %v386_v12 = vpop.permute.xlu1 %385  ;;  %v446_v14 = vld [vmem:[#allocation3 + $0x58] sm:$0xff]  ;;  %419 = vst.msk [vmem:[#allocation3 + $0x60] sm:$0xff] %vm250_vm5, %v384_v11  ;;  %6549 = vmatprep.mubr.msk.f32.mxu0 %vm464_vm6, %v445_v13 }
  0xc0   :  { %420 = vst.msk [vmem:[#allocation3 + $0x68] sm:$0xff] %vm250_vm5, %v386_v12  ;;  %6550 = vmatmul.mubr.msk.f32.gmra.mxu0 %vm464_vm6, %v446_v14 }
  0xc2   :  { %v316_v15 = vpop.permute.xlu0 %315 }
  0xc3   :  { %v318_v16 = vpop.permute.xlu1 %317  ;;  %349 = vst.msk [vmem:[#allocation3 + $0x70] sm:$0xff] %vm177_vm4, %v316_v15 }
  0xc4   :  { %350 = vst.msk [vmem:[#allocation3 + $0x78] sm:$0xff] %vm177_vm4, %v318_v16 }
  0xc6   :  { %v388_v17 = vpop.permute.xlu0 %387  ;;  %v447_v19 = vld [vmem:[#allocation3 + $0x60] sm:$0xff] }
  0xc7   :  { %v390_v18 = vpop.permute.xlu1 %389  ;;  %v448_v20 = vld [vmem:[#allocation3 + $0x68] sm:$0xff]  ;;  %421 = vst.msk [vmem:[#allocation3 + $0x70] sm:$0xff] %vm250_vm5, %v388_v17  ;;  %6552 = vmatprep.mubr.msk.f32.mxu0 %vm464_vm6, %v447_v19 }
  0xc8   :  { %422 = vst.msk [vmem:[#allocation3 + $0x78] sm:$0xff] %vm250_vm5, %v390_v18  ;;  %6553 = vmatmul.mubr.msk.f32.gmra.mxu0 %vm464_vm6, %v448_v20 }
  0xca   :  { %v320_v21 = vpop.permute.xlu0 %319 }
  0xcb   :  { %v322_v22 = vpop.permute.xlu1 %321  ;;  %351 = vst.msk [vmem:[#allocation3 + $0x80] sm:$0xff] %vm177_vm4, %v320_v21 }
  0xcc   :  { %352 = vst.msk [vmem:[#allocation3 + $0x88] sm:$0xff] %vm177_vm4, %v322_v22 }
  0xce   :  { %v392_v23 = vpop.permute.xlu0 %391  ;;  %v449_v25 = vld [vmem:[#allocation3 + $0x70] sm:$0xff] }
  0xcf   :  { %v394_v24 = vpop.permute.xlu1 %393  ;;  %v450_v26 = vld [vmem:[#allocation3 + $0x78] sm:$0xff]  ;;  %423 = vst.msk [vmem:[#allocation3 + $0x80] sm:$0xff] %vm250_vm5, %v392_v23  ;;  %6555 = vmatprep.mubr.msk.f32.mxu0 %vm464_vm6, %v449_v25 }
  0xd0   :  { %424 = vst.msk [vmem:[#allocation3 + $0x88] sm:$0xff] %vm250_vm5, %v394_v24  ;;  %6556 = vmatmul.mubr.msk.f32.gmra.mxu0 %vm464_vm6, %v450_v26  ;;  %v6093_v24 = vld [vmem:[%s9431_s1 + $0x30] sm:$0xff]  }
  0xd2   :  { %v324_v27 = vpop.permute.xlu0 %323 }
  0xd3   :  { %v326_v28 = vpop.permute.xlu1 %325  ;;  %353 = vst.msk [vmem:[#allocation3 + $0x90] sm:$0xff] %vm177_vm4, %v324_v27  ;;  %v5711_v27 = vunpack.c.h.bf16 %v6093_v24 }
  0xd4   :  { %354 = vst.msk [vmem:[#allocation3 + $0x98] sm:$0xff] %vm177_vm4, %v326_v28  ;;  %v5710_v28 = vunpack.c.l.bf16 %v6093_v24  ;;  %v6090_v24 = vld [vmem:[%s9431_s1 + $0x18] sm:$0xff]  }
  0xd5   :  { %6570 = vmatprep.subr.mxu1 %v5711_v27 }
  0xd6   :  { %v396_v29 = vpop.permute.xlu0 %395  ;;  %v451_v31 = vld [vmem:[#allocation3 + $0x80] sm:$0xff] }
  0xd7   :  { %v398_v30 = vpop.permute.xlu1 %397  ;;  %v452_v32 = vld [vmem:[#allocation3 + $0x88] sm:$0xff]  ;;  %425 = vst.msk [vmem:[#allocation3 + $0x90] sm:$0xff] %vm250_vm5, %v396_v29  ;;  %6558 = vmatprep.mubr.msk.f32.mxu1 %vm464_vm6, %v451_v31 }
  0xd8   :  { %426 = vst.msk [vmem:[#allocation3 + $0x98] sm:$0xff] %vm250_vm5, %v398_v30  ;;  %6559 = vmatmul.mubr.msk.f32.vlgmr.msra.gmra.mxu1 %vm464_vm6, %v452_v32 }
  0xd9   :  { %6571 = vmatpush3.msra.mxu1 %v5711_v27 }
  0xda   :  { %v328_v33 = vpop.permute.xlu0 %327  ;;  %6572 = vmatprep.subr.mxu1 %v5710_v28 }
  0xdb   :  { %v330_v34 = vpop.permute.xlu1 %329  ;;  %355 = vst.msk [vmem:[#allocation3 + $0xa0] sm:$0xff] %vm177_vm4, %v328_v33  ;;  %6573 = vmatpush3.msra.mxu1 %v5710_v28  ;;  %v5699_v28 = vunpack.c.h.bf16 %v6090_v24 }
  0xdc   :  { %356 = vst.msk [vmem:[#allocation3 + $0xa8] sm:$0xff] %vm177_vm4, %v330_v34 }
  0xde   :  { %v400_v35 = vpop.permute.xlu0 %399  ;;  %v453_v37 = vld [vmem:[#allocation3 + $0x90] sm:$0xff] }
  0xdf   :  { %v402_v36 = vpop.permute.xlu1 %401  ;;  %v454_v38 = vld [vmem:[#allocation3 + $0x98] sm:$0xff]  ;;  %427 = vst.msk [vmem:[#allocation3 + $0xa0] sm:$0xff] %vm250_vm5, %v400_v35  ;;  %6561 = vmatprep.mubr.msk.f32.mxu1 %vm464_vm6, %v453_v37 }
  0xe0   :  { %428 = vst.msk [vmem:[#allocation3 + $0xa8] sm:$0xff] %vm250_vm5, %v402_v36  ;;  %6562 = vmatmul.mubr.msk.f32.gmra.mxu1 %vm464_vm6, %v454_v38 }
  0xe2   :  { %v332_v39 = vpop.permute.xlu0 %331 }
  0xe3   :  { %v334_v40 = vpop.permute.xlu1 %333  ;;  %357 = vst.msk [vmem:[#allocation3 + $0xb0] sm:$0xff] %vm177_vm4, %v332_v39 }
  0xe4   :  { %358 = vst.msk [vmem:[#allocation3 + $0xb8] sm:$0xff] %vm177_vm4, %v334_v40  ;;  %vm3983_vm4 = vcmask 1045248  }
  0xe6   :  { %v455_v41 = vld [vmem:[#allocation3 + $0xa0] sm:$0xff]  ;;  %v404_v43 = vpop.permute.xlu0 %403 }
  0xe7   :  { %v456_v42 = vld [vmem:[#allocation3 + $0xa8] sm:$0xff]  ;;  %v406_v44 = vpop.permute.xlu1 %405  ;;  %6564 = vmatprep.mubr.msk.f32.mxu1 %vm464_vm6, %v455_v41  ;;  %429 = vst.msk [vmem:[#allocation3 + $0xb0] sm:$0xff] %vm250_vm5, %v404_v43 }
  0xe8   :  { %430 = vst.msk [vmem:[#allocation3 + $0xb8] sm:$0xff] %vm250_vm5, %v406_v44  ;;  %6565 = vmatmul.mubr.msk.f32.gmra.mxu1 %vm464_vm6, %v456_v42  ;;  %vm4568_vm5 = vcmask 260096  }
  0xee   :  { %v457_v45 = vld [vmem:[#allocation3 + $0xb0] sm:$0xff] }
  0xef   :  { %v458_v46 = vld [vmem:[#allocation3 + $0xb8] sm:$0xff]  ;;  %6567 = vmatprep.mubr.msk.f32.mxu1 %vm464_vm6, %v457_v45 }
  0xf0   :  { %6568 = vmatmul.mubr.msk.f32.gmra.mxu1 %vm464_vm6, %v458_v46  ;;  %vm4575_vm6 = vcmask 522496  }
 0x158   :  { %v6536_v48 = vpop.f32.mrf.mxu0 }
 0x159   :  { %v7486_v49 = vadd.f32 %v6536_v48, %v7483_v47 }
 0x15a   :  { %v607_v50 = vpop.f32.mrf.mxu0 }
 0x15b   :  { %v727_v51 = vmax.f32 %v7486_v49, 0.0  ;;  %v7490_v52 = vadd.f32 %v7483_v47, %v607_v50  ;;  %v6098_v49 = vld [vmem:[%s9431_s1 + $0x58] sm:$0xff]  }
 0x15d   :  { %755 = vst.msk [vmem:[#allocation2 + $0x9] sm:$0xff] %vm753_vm8, %v727_v51  ;;  %v726_v53 = vmax.f32 %v7490_v52, 0.0 }
 0x15f   :  { %754 = vst.msk [vmem:[#allocation2 + $0x1] sm:$0xff] %vm753_vm8, %v726_v53 }
 0x160   :  { %v6539_v54 = vpop.f32.mrf.mxu0 }
 0x161   :  { %v7500_v55 = vadd.f32 %v6539_v54, %v7483_v47 }
 0x162   :  { %v617_v56 = vpop.f32.mrf.mxu0 }
 0x163   :  { %v729_v57 = vmax.f32 %v7500_v55, 0.0  ;;  %v7504_v58 = vadd.f32 %v7483_v47, %v617_v56 }
 0x164   :  { %v805_v59 = vld [vmem:[#allocation2 + $0x9] sm:$0xff] }
 0x165   :  { %757 = vst.msk [vmem:[#allocation2 + $0x19] sm:$0xff] %vm753_vm8, %v729_v57  ;;  %v728_v60 = vmax.f32 %v7504_v58, 0.0  ;;  %830 = vrot.lane.b32.xlu1 %v805_v59, %s7157_s13  ;;  %v6092_v59 = vld [vmem:[%s9431_s1 + $0x28] sm:$0xff]   ;;  %v6095_v58 = vld [vmem:[%s9431_s1 + $0x40] sm:$0xff]  }
 0x166   :  { %v780_v61 = vld [vmem:[#allocation2] sm:$0xff]  ;;  %v781_v62 = vld [vmem:[#allocation2 + $0x8] sm:$0xff] }
 0x167   :  { %v804_v63 = vld [vmem:[#allocation2 + $0x1] sm:$0xff]  ;;  %792 = vst.msk [vmem:[#allocation3] sm:$0xff] %vm753_vm8, %v780_v61  ;;  %793 = vst.msk [vmem:[#allocation3 + $0x8] sm:$0xff] %vm753_vm8, %v781_v62  ;;  %v5707_v62 = vunpack.c.h.bf16 %v6092_v59 }
 0x168   :  { %756 = vst.msk [vmem:[#allocation2 + $0x11] sm:$0xff] %vm753_vm8, %v728_v60  ;;  %828 = vrot.lane.b32.xlu0 %v804_v63, %s7157_s13  ;;  %v6542_v0 = vpop.f32.mrf.mxu0  ;;  %v877_v4 = vld [vmem:[#allocation2 + $0x2] sm:$0xff] }
 0x169   :  { %1478 = vst.msk [vmem:[#allocation2] sm:$0x3] %vm1477_vm7, %v7154_v3  ;;  %v7520_v1 = vadd.f32 %v6542_v0, %v7483_v47  ;;  %6574 = vmatprep.subr.mxu1 %v5707_v62 }
 0x16a   :  { %v627_v2 = vpop.f32.mrf.mxu0  ;;  %6575 = vmatpush3.msra.mxu1 %v5707_v62 }
 0x16b   :  { %v731_v5 = vmax.f32 %v7520_v1, 0.0  ;;  %v7524_v6 = vadd.f32 %v7483_v47, %v627_v2 }
 0x16c   :  { %901 = vrot.lane.b32.xlu0 %v877_v4, %s7158_s14 }
 0x16d   :  { %759 = vst.msk [vmem:[#allocation2 + $0x29] sm:$0xff] %vm753_vm8, %v731_v5  ;;  %v730_v7 = vmax.f32 %v7524_v6, 0.0 }
 0x16f   :  { %v782_v8 = vld [vmem:[#allocation2 + $0x10] sm:$0xff]  ;;  %v783_v9 = vld [vmem:[#allocation2 + $0x18] sm:$0xff]  ;;  %758 = vst.msk [vmem:[#allocation2 + $0x21] sm:$0xff] %vm753_vm8, %v730_v7 }
 0x170   :  { %794 = vst.msk [vmem:[#allocation3 + $0x10] sm:$0xff] %vm753_vm8, %v782_v8  ;;  %795 = vst.msk [vmem:[#allocation3 + $0x18] sm:$0xff] %vm753_vm8, %v783_v9  ;;  %v6545_v10 = vpop.f32.mrf.mxu0  ;;  %v5706_v8 = vunpack.c.l.bf16 %v6092_v59 }
 0x171   :  { %v7537_v11 = vadd.f32 %v6545_v10, %v7483_v47  ;;  %v6091_v10 = vld [vmem:[%s9431_s1 + $0x20] sm:$0xff]  }
 0x172   :  { %v637_v12 = vpop.f32.mrf.mxu0  ;;  %6576 = vmatprep.subr.mxu1 %v5706_v8 }
 0x173   :  { %v733_v13 = vmax.f32 %v7537_v11, 0.0  ;;  %v7541_v14 = vadd.f32 %v7483_v47, %v637_v12  ;;  %6577 = vmatpush3.msra.mxu1 %v5706_v8  ;;  %v807_v8 = vld [vmem:[#allocation2 + $0x19] sm:$0xff] }
 0x175   :  { %761 = vst.msk [vmem:[#allocation2 + $0x39] sm:$0xff] %vm753_vm8, %v733_v13  ;;  %v732_v15 = vmax.f32 %v7541_v14, 0.0 }
 0x176   :  { %v784_v16 = vld [vmem:[#allocation2 + $0x20] sm:$0xff]  ;;  %v785_v17 = vld [vmem:[#allocation2 + $0x28] sm:$0xff] }
 0x177   :  { %796 = vst.msk [vmem:[#allocation3 + $0x20] sm:$0xff] %vm753_vm8, %v784_v16  ;;  %797 = vst.msk [vmem:[#allocation3 + $0x28] sm:$0xff] %vm753_vm8, %v785_v17  ;;  %v5703_v17 = vunpack.c.h.bf16 %v6091_v10 }
 0x178   :  { %760 = vst.msk [vmem:[#allocation2 + $0x31] sm:$0xff] %vm753_vm8, %v732_v15  ;;  %v6548_v18 = vpop.f32.mrf.mxu0 }
 0x179   :  { %v7553_v19 = vadd.f32 %v6548_v18, %v7483_v47  ;;  %6578 = vmatprep.subr.mxu1 %v5703_v17 }
 0x17a   :  { %v647_v20 = vpop.f32.mrf.mxu0  ;;  %6579 = vmatpush3.msra.mxu1 %v5703_v17 }
 0x17b   :  { %v735_v21 = vmax.f32 %v7553_v19, 0.0  ;;  %v7557_v22 = vadd.f32 %v7483_v47, %v647_v20  ;;  %v5702_v20 = vunpack.c.l.bf16 %v6091_v10 }
 0x17d   :  { %763 = vst.msk [vmem:[#allocation2 + $0x49] sm:$0xff] %vm753_vm8, %v735_v21  ;;  %v734_v23 = vmax.f32 %v7557_v22, 0.0  ;;  %6580 = vmatprep.subr.mxu1 %v5702_v20 }
 0x17e   :  { %6581 = vmatpush3.msra.mxu1 %v5702_v20 }
 0x17f   :  { %v786_v25 = vld [vmem:[#allocation2 + $0x30] sm:$0xff]  ;;  %v787_v26 = vld [vmem:[#allocation2 + $0x38] sm:$0xff]  ;;  %762 = vst.msk [vmem:[#allocation2 + $0x41] sm:$0xff] %vm753_vm8, %v734_v23  ;;  %6582 = vmatprep.subr.mxu1 %v5699_v28 }
 0x180   :  { %798 = vst.msk [vmem:[#allocation3 + $0x30] sm:$0xff] %vm753_vm8, %v786_v25  ;;  %799 = vst.msk [vmem:[#allocation3 + $0x38] sm:$0xff] %vm753_vm8, %v787_v26  ;;  %v6551_v29 = vpop.f32.mrf.mxu0  ;;  %6583 = vmatpush3.msra.mxu1 %v5699_v28 }
 0x181   :  { %v7572_v30 = vadd.f32 %v6551_v29, %v7483_v47 }
 0x182   :  { %v657_v31 = vpop.f32.mrf.mxu0 }
 0x183   :  { %v737_v32 = vmax.f32 %v7572_v30, 0.0  ;;  %v7576_v33 = vadd.f32 %v7483_v47, %v657_v31  ;;  %v5698_v31 = vunpack.c.l.bf16 %v6090_v24 }
 0x185   :  { %765 = vst.msk [vmem:[#allocation2 + $0x59] sm:$0xff] %vm753_vm8, %v737_v32  ;;  %v736_v34 = vmax.f32 %v7576_v33, 0.0  ;;  %6584 = vmatprep.subr.mxu1 %v5698_v31 }
 0x186   :  { %v789_v35 = vld [vmem:[#allocation2 + $0x48] sm:$0xff]  ;;  %v788_v36 = vld [vmem:[#allocation2 + $0x40] sm:$0xff]  ;;  %6585 = vmatpush3.msra.mxu1 %v5698_v31  ;;  %v806_v31 = vld [vmem:[#allocation2 + $0x11] sm:$0xff] }
 0x187   :  { %764 = vst.msk [vmem:[#allocation2 + $0x51] sm:$0xff] %vm753_vm8, %v736_v34  ;;  %801 = vst.msk [vmem:[#allocation3 + $0x48] sm:$0xff] %vm753_vm8, %v789_v35 }
 0x188   :  { %v6554_v37 = vpop.f32.mrf.mxu0  ;;  %800 = vst.msk [vmem:[#allocation3 + $0x40] sm:$0xff] %vm753_vm8, %v788_v36  ;;  %v6089_v36 = vld [vmem:[%s9431_s1 + $0x10] sm:$0xff]  }
 0x189   :  { %v7588_v38 = vadd.f32 %v6554_v37, %v7483_v47 }
 0x18a   :  { %v667_v39 = vpop.f32.mrf.mxu0 }
 0x18b   :  { %v739_v40 = vmax.f32 %v7588_v38, 0.0  ;;  %v7592_v41 = vadd.f32 %v7483_v47, %v667_v39 }
 0x18d   :  { %769 = vst.msk [vmem:[#allocation2 + $0x71] sm:$0xff] %vm753_vm8, %v739_v40  ;;  %v738_v42 = vmax.f32 %v7592_v41, 0.0 }
 0x18e   :  { %v791_v43 = vld [vmem:[#allocation2 + $0x58] sm:$0xff]  ;;  %v790_v44 = vld [vmem:[#allocation2 + $0x50] sm:$0xff] }
 0x18f   :  { %768 = vst.msk [vmem:[#allocation2 + $0x69] sm:$0xff] %vm753_vm8, %v738_v42  ;;  %803 = vst.msk [vmem:[#allocation3 + $0x58] sm:$0xff] %vm753_vm8, %v791_v43  ;;  %v5695_v43 = vunpack.c.h.bf16 %v6089_v36 }
 0x190   :  { %v6557_v45 = vpop.f32.mrf.mxu0  ;;  %802 = vst.msk [vmem:[#allocation3 + $0x50] sm:$0xff] %vm753_vm8, %v790_v44 }
 0x191   :  { %v7604_v46 = vadd.f32 %v6557_v45, %v7483_v47  ;;  %6586 = vmatprep.subr.mxu1 %v5695_v43 }
 0x192   :  { %v677_v48 = vpop.f32.mrf.mxu0  ;;  %6587 = vmatpush3.msra.mxu1 %v5695_v43  ;;  %v878_v43 = vld [vmem:[#allocation2 + $0xa] sm:$0xff] }
 0x193   :  { %v741_v50 = vmax.f32 %v7604_v46, 0.0  ;;  %v7608_v54 = vadd.f32 %v7483_v47, %v677_v48  ;;  %v5694_v48 = vunpack.c.l.bf16 %v6089_v36 }
 0x195   :  { %771 = vst.msk [vmem:[#allocation2 + $0x81] sm:$0xff] %vm753_vm8, %v741_v50  ;;  %v740_v56 = vmax.f32 %v7608_v54, 0.0  ;;  %6588 = vmatprep.subr.mxu1 %v5694_v48 }
 0x196   :  { %v7620_v61 = vld [vmem:[#allocation2 + $0x69] sm:$0xff]  ;;  %6589 = vmatpush3.msra.mxu1 %v5694_v48 }
 0x197   :  { %770 = vst.msk [vmem:[#allocation2 + $0x79] sm:$0xff] %vm753_vm8, %v740_v56  ;;  %v951_v63 = vld [vmem:[#allocation2 + $0x70] sm:$0xff]  ;;  %v950_v0 = vld [vmem:[#allocation2 + $0x68] sm:$0xff] }
 0x198   :  { %v6560_v2 = vpop.f32.mrf.mxu1  ;;  %963 = vst.msk [vmem:[#allocation3 + $0x68] sm:$0xff] %vm753_vm8, %v951_v63  ;;  %962 = vst.msk [vmem:[#allocation3 + $0x60] sm:$0xff] %vm753_vm8, %v950_v0  ;;  %v6088_v0 = vld [vmem:[%s9431_s1 + $0x8] sm:$0xff]  }
 0x199   :  { %1492 = vst.msk [vmem:[#allocation2 + $0x68] sm:$0x3] %vm1477_vm7, %v7154_v3  ;;  %v7627_v4 = vadd.f32 %v6560_v2, %v7483_v47  ;;  %v5690_v17 = vunpack.c.l.bf16 %v6088_v0 }
 0x19a   :  { %v687_v9 = vpop.f32.mrf.mxu1 }
 0x19b   :  { %v743_v12 = vmax.f32 %v7627_v4, 0.0  ;;  %v7634_v16 = vadd.f32 %v7483_v47, %v687_v9  ;;  %v5691_v9 = vunpack.c.h.bf16 %v6088_v0 }
 0x19d   :  { %773 = vst.msk [vmem:[#allocation2 + $0x91] sm:$0xff] %vm753_vm8, %v743_v12  ;;  %v742_v18 = vmax.f32 %v7634_v16, 0.0  ;;  %6590 = vmatprep.subr.mxu1 %v5691_v9 }
 0x19e   :  { %v953_v25 = vld [vmem:[#allocation2 + $0x80] sm:$0xff]  ;;  %v952_v26 = vld [vmem:[#allocation2 + $0x78] sm:$0xff]  ;;  %6591 = vmatpush3.msra.mxu1 %v5691_v9 }
 0x19f   :  { %772 = vst.msk [vmem:[#allocation2 + $0x89] sm:$0xff] %vm753_vm8, %v742_v18  ;;  %965 = vst.msk [vmem:[#allocation3 + $0x78] sm:$0xff] %vm753_vm8, %v953_v25  ;;  %6592 = vmatprep.subr.mxu1 %v5690_v17 }
 0x1a0   :  { %v6563_v27 = vpop.f32.mrf.mxu1  ;;  %964 = vst.msk [vmem:[#allocation3 + $0x70] sm:$0xff] %vm753_vm8, %v952_v26  ;;  %6593 = vmatpush3.msra.mxu1 %v5690_v17 }
 0x1a1   :  { %v7649_v29 = vadd.f32 %v6563_v27, %v7483_v47 }
 0x1a2   :  { %v697_v35 = vpop.f32.mrf.mxu1 }
 0x1a3   :  { %v745_v37 = vmax.f32 %v7649_v29, 0.0  ;;  %v7656_v39 = vadd.f32 %v7483_v47, %v697_v35 }
 0x1a4   :  { %v979_v44 = vld [vmem:[#allocation2 + $0x91] sm:$0xff] }
 0x1a5   :  { %775 = vst.msk [vmem:[#allocation2 + $0xa1] sm:$0xff] %vm753_vm8, %v745_v37  ;;  %v744_v45 = vmax.f32 %v7656_v39, 0.0  ;;  %1008 = vrot.lane.b32.xlu1 %v979_v44, %s7157_s13 }
 0x1a6   :  { %v978_v59 = vld [vmem:[#allocation2 + $0x89] sm:$0xff] }
 0x1a7   :  { %774 = vst.msk [vmem:[#allocation2 + $0x99] sm:$0xff] %vm753_vm8, %v744_v45  ;;  %1006 = vrot.lane.b32.xlu0 %v978_v59, %s7157_s13  ;;  %v955_v62 = vld [vmem:[#allocation2 + $0x90] sm:$0xff]  ;;  %v954_v63 = vld [vmem:[#allocation2 + $0x88] sm:$0xff] }
 0x1a8   :  { %v6566_v2 = vpop.f32.mrf.mxu1  ;;  %967 = vst.msk [vmem:[#allocation3 + $0x88] sm:$0xff] %vm753_vm8, %v955_v62  ;;  %966 = vst.msk [vmem:[#allocation3 + $0x80] sm:$0xff] %vm753_vm8, %v954_v63  ;;  %v1050_v24 = vld [vmem:[#allocation2 + $0x8a] sm:$0xff]  ;;  %v879_v59 = vld [vmem:[#allocation2 + $0x12] sm:$0xff] }
 0x1a9   :  { %v7673_v10 = vadd.f32 %v6566_v2, %v7483_v47  ;;  %834 = vrot.lane.b32.xlu1 %v807_v8, %s7157_s13 }
 0x1aa   :  { %v707_v20 = vpop.f32.mrf.mxu1 }
 0x1ab   :  { %v747_v25 = vmax.f32 %v7673_v10, 0.0  ;;  %v7678_v26 = vadd.f32 %v7483_v47, %v707_v20  ;;  %1078 = vrot.lane.b32.xlu0 %v1050_v24, %s7158_s14 }
 0x1ac   :  { %v981_v27 = vld [vmem:[#allocation2 + $0xa1] sm:$0xff] }
 0x1ad   :  { %777 = vst.msk [vmem:[#allocation2 + $0xb1] sm:$0xff] %vm753_vm8, %v747_v25  ;;  %v746_v28 = vmax.f32 %v7678_v26, 0.0  ;;  %1012 = vrot.lane.b32.xlu1 %v981_v27, %s7157_s13  ;;  %v880_v27 = vld [vmem:[#allocation2 + $0x1a] sm:$0xff] }
 0x1ae   :  { %v957_v35 = vld [vmem:[#allocation2 + $0xa0] sm:$0xff]  ;;  %v956_v36 = vld [vmem:[#allocation2 + $0x98] sm:$0xff] }
 0x1af   :  { %776 = vst.msk [vmem:[#allocation2 + $0xa9] sm:$0xff] %vm753_vm8, %v746_v28  ;;  %832 = vrot.lane.b32.xlu0 %v806_v31, %s7157_s13  ;;  %969 = vst.msk [vmem:[#allocation3 + $0x98] sm:$0xff] %vm753_vm8, %v957_v35  ;;  %v1051_v2 = vld [vmem:[#allocation2 + $0x92] sm:$0xff]  ;;  %v1052_v24 = vld [vmem:[#allocation2 + $0x9a] sm:$0xff] }
 0x1b0   :  { %v6569_v44 = vpop.f32.mrf.mxu1  ;;  %968 = vst.msk [vmem:[#allocation3 + $0x90] sm:$0xff] %vm753_vm8, %v956_v36  ;;  %v980_v9 = vld [vmem:[#allocation2 + $0x99] sm:$0xff]  ;;  %v808_v31 = vld [vmem:[#allocation2 + $0x21] sm:$0xff] }
 0x1b1   :  { %903 = vrot.lane.b32.xlu1 %v878_v43, %s7158_s14  ;;  %v7694_v48 = vadd.f32 %v6569_v44, %v7483_v47  ;;  %v811_v43 = vld [vmem:[#allocation2 + $0x39] sm:$0xff]  ;;  %v881_v44 = vld [vmem:[#allocation2 + $0x22] sm:$0xff] }
 0x1b2   :  { %v717_v62 = vpop.f32.mrf.mxu1 }
 0x1b3   :  { %905 = vrot.lane.b32.xlu0 %v879_v59, %s7158_s14  ;;  %v749_v63 = vmax.f32 %v7694_v48, 0.0  ;;  %v7699_v0 = vadd.f32 %v7483_v47, %v717_v62  ;;  %v809_v47 = vld [vmem:[#allocation2 + $0x29] sm:$0xff]  ;;  %v810_v62 = vld [vmem:[#allocation2 + $0x31] sm:$0xff] }
 0x1b4   :  { %v882_v59 = vld [vmem:[#allocation2 + $0x2a] sm:$0xff] }
 0x1b5   :  { %1080 = vrot.lane.b32.xlu1 %v1051_v2, %s7158_s14  ;;  %779 = vst.msk [vmem:[#allocation2 + $0xc1] sm:$0xff] %vm753_vm8, %v749_v63  ;;  %v748_v8 = vmax.f32 %v7699_v0, 0.0  ;;  %v813_v2 = vld [vmem:[#allocation2 + $0x49] sm:$0xff] }
 0x1b6   :  { %v958_v17 = vld [vmem:[#allocation2 + $0xa8] sm:$0xff]  ;;  %v959_v20 = vld [vmem:[#allocation2 + $0xb0] sm:$0xff] }
 0x1b7   :  { %1010 = vrot.lane.b32.xlu0 %v980_v9, %s7157_s13  ;;  %778 = vst.msk [vmem:[#allocation2 + $0xb9] sm:$0xff] %vm753_vm8, %v748_v8  ;;  %970 = vst.msk [vmem:[#allocation3 + $0xa0] sm:$0xff] %vm753_vm8, %v958_v17  ;;  %v883_v9 = vld [vmem:[#allocation2 + $0x32] sm:$0xff]  ;;  %v884_v17 = vld [vmem:[#allocation2 + $0x3a] sm:$0xff] }
 0x1b8   :  { %971 = vst.msk [vmem:[#allocation3 + $0xa8] sm:$0xff] %vm753_vm8, %v959_v20  ;;  %v812_v20 = vld [vmem:[#allocation2 + $0x41] sm:$0xff] }
 0x1b9   :  { %838 = vrot.lane.b32.xlu1 %v809_v47, %s7157_s13  ;;  %v815_v47 = vld [vmem:[#allocation2 + $0x59] sm:$0xff] }
 0x1bb   :  { %1082 = vrot.lane.b32.xlu0 %v1052_v24, %s7158_s14  ;;  %v885_v24 = vld [vmem:[#allocation2 + $0x42] sm:$0xff] }
 0x1bd   :  { %907 = vrot.lane.b32.xlu1 %v880_v27, %s7158_s14  ;;  %v888_v27 = vld [vmem:[#allocation2 + $0x5a] sm:$0xff] }
 0x1be   :  { %v960_v35 = vld [vmem:[#allocation2 + $0xb8] sm:$0xff]  ;;  %v961_v36 = vld [vmem:[#allocation2 + $0xc0] sm:$0xff] }
 0x1bf   :  { %836 = vrot.lane.b32.xlu0 %v808_v31, %s7157_s13  ;;  %972 = vst.msk [vmem:[#allocation3 + $0xb0] sm:$0xff] %vm753_vm8, %v960_v35  ;;  %973 = vst.msk [vmem:[#allocation3 + $0xb8] sm:$0xff] %vm753_vm8, %v961_v36  ;;  %v814_v31 = vld [vmem:[#allocation2 + $0x51] sm:$0xff] }
 0x1c0   :  { %v886_v36 = vld [vmem:[#allocation2 + $0x4a] sm:$0xff] }
 0x1c1   :  { %842 = vrot.lane.b32.xlu1 %v811_v43, %s7157_s13 }
 0x1c3   :  { %909 = vrot.lane.b32.xlu0 %v881_v44, %s7158_s14  ;;  %v887_v44 = vld [vmem:[#allocation2 + $0x52] sm:$0xff] }
 0x1c5   :  { %911 = vrot.lane.b32.xlu1 %v882_v59, %s7158_s14  ;;  %v975_v59 = vld [vmem:[#allocation2 + $0x71] sm:$0xff] }
 0x1c7   :  { %840 = vrot.lane.b32.xlu0 %v810_v62, %s7157_s13 }
 0x1c9   :  { %846 = vrot.lane.b32.xlu1 %v813_v2, %s7157_s13  ;;  %v977_v2 = vld [vmem:[#allocation2 + $0x81] sm:$0xff] }
 0x1cb   :  { %913 = vrot.lane.b32.xlu0 %v883_v9, %s7158_s14  ;;  %v1046_v9 = vld [vmem:[#allocation2 + $0x6a] sm:$0xff] }
 0x1cd   :  { %915 = vrot.lane.b32.xlu1 %v884_v17, %s7158_s14  ;;  %v1049_v17 = vld [vmem:[#allocation2 + $0x82] sm:$0xff] }
 0x1cf   :  { %844 = vrot.lane.b32.xlu0 %v812_v20, %s7157_s13 }
 0x1d1   :  { %850 = vrot.lane.b32.xlu1 %v815_v47, %s7157_s13  ;;  %v976_v47 = vld [vmem:[#allocation2 + $0x79] sm:$0xff] }
 0x1d3   :  { %917 = vrot.lane.b32.xlu0 %v885_v24, %s7158_s14  ;;  %v1047_v24 = vld [vmem:[#allocation2 + $0x72] sm:$0xff] }
 0x1d5   :  { %923 = vrot.lane.b32.xlu1 %v888_v27, %s7158_s14  ;;  %v1053_v27 = vld [vmem:[#allocation2 + $0xa2] sm:$0xff] }
 0x1d7   :  { %v831_v35 = vpop.permute.xlu1 %830  ;;  %848 = vrot.lane.b32.xlu0 %v814_v31, %s7157_s13  ;;  %v982_v31 = vld [vmem:[#allocation2 + $0xa9] sm:$0xff] }
 0x1d8   :  { %866 = vst.msk [vmem:[#allocation3 + $0x8] sm:$0xff] %vm864_vm9, %v831_v35  ;;  %v983_v35 = vld [vmem:[#allocation2 + $0xb1] sm:$0xff] }
 0x1d9   :  { %919 = vrot.lane.b32.xlu1 %v886_v36, %s7158_s14  ;;  %v1054_v36 = vld [vmem:[#allocation2 + $0xaa] sm:$0xff] }
 0x1da   :  { %v829_v43 = vpop.permute.xlu0 %828 }
 0x1db   :  { %865 = vst.msk [vmem:[#allocation3] sm:$0xff] %vm864_vm9, %v829_v43  ;;  %921 = vrot.lane.b32.xlu0 %v887_v44, %s7158_s14  ;;  %v1055_v43 = vld [vmem:[#allocation2 + $0xb2] sm:$0xff] }
 0x1dc   :  { %v984_v44 = vld [vmem:[#allocation2 + $0xb9] sm:$0xff] }
 0x1dd   :  { %1000 = vrot.lane.b32.xlu1 %v975_v59, %s7157_s13  ;;  %v985_v59 = vld [vmem:[#allocation2 + $0xc1] sm:$0xff] }
 0x1de   :  { %v902_v62 = vpop.permute.xlu0 %901 }
 0x1df   :  { %938 = vst.msk [vmem:[#allocation3] sm:$0xff] %vm937_vm10, %v902_v62  ;;  %998 = vrot.lane.b32.xlu0 %v7620_v61, %s7157_s13  ;;  %v1048_v61 = vld [vmem:[#allocation2 + $0x7a] sm:$0xff] }
 0x1e0   :  { %v1056_v62 = vld [vmem:[#allocation2 + $0xba] sm:$0xff] }
 0x1e1   :  { %1004 = vrot.lane.b32.xlu1 %v977_v2, %s7157_s13  ;;  %v1057_v2 = vld [vmem:[#allocation2 + $0xc2] sm:$0xff] }
 0x1e3   :  { %1070 = vrot.lane.b32.xlu0 %v1046_v9, %s7158_s14 }
 0x1e5   :  { %1076 = vrot.lane.b32.xlu1 %v1049_v17, %s7158_s14 }
 0x1e6   :  { %v1142_v20 = vld [vmem:[#allocation3] sm:$0xff] }
 0x1e7   :  { %6594 = vmatprep.mubr.msk.f32.mxu1 %vm1171_vm11, %v1142_v20  ;;  %1002 = vrot.lane.b32.xlu0 %v976_v47, %s7157_s13 }
 0x1e9   :  { %1072 = vrot.lane.b32.xlu1 %v1047_v24, %s7158_s14 }
 0x1eb   :  { %1074 = vrot.lane.b32.xlu0 %v1048_v61, %s7158_s14 }
 0x1ed   :  { %1084 = vrot.lane.b32.xlu1 %v1053_v27, %s7158_s14 }
 0x1ef   :  { %1014 = vrot.lane.b32.xlu0 %v982_v31, %s7157_s13 }
 0x1f1   :  { %1016 = vrot.lane.b32.xlu1 %v983_v35, %s7157_s13 }
 0x1f3   :  { %1086 = vrot.lane.b32.xlu0 %v1054_v36, %s7158_s14 }
 0x1f5   :  { %1088 = vrot.lane.b32.xlu1 %v1055_v43, %s7158_s14 }
 0x1f7   :  { %1018 = vrot.lane.b32.xlu0 %v984_v44, %s7157_s13 }
 0x1f9   :  { %1020 = vrot.lane.b32.xlu1 %v985_v59, %s7157_s13 }
 0x1fb   :  { %1090 = vrot.lane.b32.xlu0 %v1056_v62, %s7158_s14 }
 0x1fd   :  { %1092 = vrot.lane.b32.xlu1 %v1057_v2, %s7158_s14 }
 0x217   :  { %v1009_v9 = vpop.permute.xlu1 %1008 }
 0x218   :  { %1039 = vst.msk [vmem:[#allocation3 + $0x88] sm:$0xff] %vm864_vm9, %v1009_v9 }
 0x219   :  { %v1007_v17 = vpop.permute.xlu0 %1006 }
 0x21a   :  { %1038 = vst.msk [vmem:[#allocation3 + $0x80] sm:$0xff] %vm864_vm9, %v1007_v17 }
 0x21b   :  { %v835_v20 = vpop.permute.xlu1 %834 }
 0x21c   :  { %868 = vst.msk [vmem:[#allocation3 + $0x18] sm:$0xff] %vm864_vm9, %v835_v20 }
 0x21d   :  { %v1079_v47 = vpop.permute.xlu0 %1078 }
 0x21e   :  { %1110 = vst.msk [vmem:[#allocation3 + $0x80] sm:$0xff] %vm937_vm10, %v1079_v47 }
 0x21f   :  { %v1013_v24 = vpop.permute.xlu1 %1012 }
 0x220   :  { %1041 = vst.msk [vmem:[#allocation3 + $0x98] sm:$0xff] %vm864_vm9, %v1013_v24 }
 0x221   :  { %v833_v61 = vpop.permute.xlu0 %832 }
 0x222   :  { %867 = vst.msk [vmem:[#allocation3 + $0x10] sm:$0xff] %vm864_vm9, %v833_v61 }
 0x223   :  { %v904_v27 = vpop.permute.xlu1 %903 }
 0x224   :  { %939 = vst.msk [vmem:[#allocation3 + $0x8] sm:$0xff] %vm937_vm10, %v904_v27 }
 0x225   :  { %v906_v31 = vpop.permute.xlu0 %905 }
 0x226   :  { %940 = vst.msk [vmem:[#allocation3 + $0x10] sm:$0xff] %vm937_vm10, %v906_v31 }
 0x227   :  { %v1081_v35 = vpop.permute.xlu1 %1080 }
 0x228   :  { %1111 = vst.msk [vmem:[#allocation3 + $0x88] sm:$0xff] %vm937_vm10, %v1081_v35 }
 0x229   :  { %v1011_v36 = vpop.permute.xlu0 %1010 }
 0x22a   :  { %1040 = vst.msk [vmem:[#allocation3 + $0x90] sm:$0xff] %vm864_vm9, %v1011_v36 }
 0x22b   :  { %v839_v43 = vpop.permute.xlu1 %838  ;;  %v1143_v44 = vld [vmem:[#allocation3 + $0x8] sm:$0xff] }
 0x22c   :  { %870 = vst.msk [vmem:[#allocation3 + $0x28] sm:$0xff] %vm864_vm9, %v839_v43  ;;  %6595 = vmatmul.mubr.msk.f32.vlgmr.msra.gmra.mxu1 %vm1171_vm11, %v1143_v44 }
 0x22d   :  { %v1083_v59 = vpop.permute.xlu0 %1082  ;;  %v1144_v62 = vld [vmem:[#allocation3 + $0x10] sm:$0xff] }
 0x22e   :  { %1112 = vst.msk [vmem:[#allocation3 + $0x90] sm:$0xff] %vm937_vm10, %v1083_v59  ;;  %6597 = vmatprep.mubr.msk.f32.mxu1 %vm1171_vm11, %v1144_v62 }
 0x22f   :  { %v908_v2 = vpop.permute.xlu1 %907 }
 0x230   :  { %941 = vst.msk [vmem:[#allocation3 + $0x18] sm:$0xff] %vm937_vm10, %v908_v2 }
 0x231   :  { %v837_v9 = vpop.permute.xlu0 %836 }
 0x232   :  { %869 = vst.msk [vmem:[#allocation3 + $0x20] sm:$0xff] %vm864_vm9, %v837_v9 }
 0x233   :  { %v843_v17 = vpop.permute.xlu1 %842 }
 0x234   :  { %872 = vst.msk [vmem:[#allocation3 + $0x38] sm:$0xff] %vm864_vm9, %v843_v17 }
 0x235   :  { %v910_v20 = vpop.permute.xlu0 %909 }
 0x236   :  { %942 = vst.msk [vmem:[#allocation3 + $0x20] sm:$0xff] %vm937_vm10, %v910_v20 }
 0x237   :  { %v912_v47 = vpop.permute.xlu1 %911  ;;  %v1145_v24 = vld [vmem:[#allocation3 + $0x18] sm:$0xff] }
 0x238   :  { %943 = vst.msk [vmem:[#allocation3 + $0x28] sm:$0xff] %vm937_vm10, %v912_v47  ;;  %6598 = vmatmul.mubr.msk.f32.gmra.mxu1 %vm1171_vm11, %v1145_v24 }
 0x239   :  { %v841_v61 = vpop.permute.xlu0 %840 }
 0x23a   :  { %871 = vst.msk [vmem:[#allocation3 + $0x30] sm:$0xff] %vm864_vm9, %v841_v61 }
 0x23b   :  { %v847_v27 = vpop.permute.xlu1 %846 }
 0x23c   :  { %874 = vst.msk [vmem:[#allocation3 + $0x48] sm:$0xff] %vm864_vm9, %v847_v27 }
 0x23d   :  { %v914_v31 = vpop.permute.xlu0 %913  ;;  %v1146_v35 = vld [vmem:[#allocation3 + $0x20] sm:$0xff] }
 0x23e   :  { %944 = vst.msk [vmem:[#allocation3 + $0x30] sm:$0xff] %vm937_vm10, %v914_v31  ;;  %6600 = vmatprep.mubr.msk.f32.mxu1 %vm1171_vm11, %v1146_v35 }
 0x23f   :  { %v916_v36 = vpop.permute.xlu1 %915  ;;  %v1147_v43 = vld [vmem:[#allocation3 + $0x28] sm:$0xff] }
 0x240   :  { %945 = vst.msk [vmem:[#allocation3 + $0x38] sm:$0xff] %vm937_vm10, %v916_v36  ;;  %6601 = vmatmul.mubr.msk.f32.gmra.mxu1 %vm1171_vm11, %v1147_v43 }
 0x241   :  { %v845_v44 = vpop.permute.xlu0 %844 }
 0x242   :  { %873 = vst.msk [vmem:[#allocation3 + $0x40] sm:$0xff] %vm864_vm9, %v845_v44 }
 0x243   :  { %v851_v59 = vpop.permute.xlu1 %850 }
 0x244   :  { %876 = vst.msk [vmem:[#allocation3 + $0x58] sm:$0xff] %vm864_vm9, %v851_v59 }
 0x245   :  { %v1148_v62 = vld [vmem:[#allocation3 + $0x30] sm:$0xff]  ;;  %v918_v2 = vpop.permute.xlu0 %917 }
 0x246   :  { %946 = vst.msk [vmem:[#allocation3 + $0x40] sm:$0xff] %vm937_vm10, %v918_v2  ;;  %6603 = vmatprep.mubr.msk.f32.mxu1 %vm1171_vm11, %v1148_v62 }
 0x247   :  { %v924_v9 = vpop.permute.xlu1 %923  ;;  %v1149_v17 = vld [vmem:[#allocation3 + $0x38] sm:$0xff] }
 0x248   :  { %949 = vst.msk [vmem:[#allocation3 + $0x58] sm:$0xff] %vm937_vm10, %v924_v9  ;;  %6604 = vmatmul.mubr.msk.f32.gmra.mxu1 %vm1171_vm11, %v1149_v17 }
 0x249   :  { %v849_v20 = vpop.permute.xlu0 %848 }
 0x24a   :  { %875 = vst.msk [vmem:[#allocation3 + $0x50] sm:$0xff] %vm864_vm9, %v849_v20 }
 0x24b   :  { %v920_v47 = vpop.permute.xlu1 %919 }
 0x24c   :  { %947 = vst.msk [vmem:[#allocation3 + $0x48] sm:$0xff] %vm937_vm10, %v920_v47 }
 0x24d   :  { %v922_v24 = vpop.permute.xlu0 %921  ;;  %v1150_v61 = vld [vmem:[#allocation3 + $0x40] sm:$0xff] }
 0x24e   :  { %948 = vst.msk [vmem:[#allocation3 + $0x50] sm:$0xff] %vm937_vm10, %v922_v24  ;;  %6606 = vmatprep.mubr.msk.f32.mxu1 %vm1171_vm11, %v1150_v61 }
 0x24f   :  { %v1001_v27 = vpop.permute.xlu1 %1000  ;;  %v1153_v62 = vld [vmem:[#allocation3 + $0x58] sm:$0xff] }
 0x250   :  { %1035 = vst.msk [vmem:[#allocation3 + $0x68] sm:$0xff] %vm864_vm9, %v1001_v27 }
 0x251   :  { %v999_v31 = vpop.permute.xlu0 %998 }
 0x252   :  { %1034 = vst.msk [vmem:[#allocation3 + $0x60] sm:$0xff] %vm864_vm9, %v999_v31 }
 0x253   :  { %v1005_v35 = vpop.permute.xlu1 %1004  ;;  %v1151_v36 = vld [vmem:[#allocation3 + $0x48] sm:$0xff] }
 0x254   :  { %1037 = vst.msk [vmem:[#allocation3 + $0x78] sm:$0xff] %vm864_vm9, %v1005_v35  ;;  %6607 = vmatmul.mubr.msk.f32.gmra.mxu1 %vm1171_vm11, %v1151_v36 }
 0x255   :  { %v1071_v43 = vpop.permute.xlu0 %1070  ;;  %v1152_v44 = vld [vmem:[#allocation3 + $0x50] sm:$0xff] }
 0x256   :  { %1106 = vst.msk [vmem:[#allocation3 + $0x60] sm:$0xff] %vm937_vm10, %v1071_v43  ;;  %6609 = vmatprep.mubr.msk.f32.mxu1 %vm1171_vm11, %v1152_v44  ;;  %v1158_v44 = vld [vmem:[#allocation3 + $0x80] sm:$0xff] }
 0x257   :  { %v1077_v59 = vpop.permute.xlu1 %1076 }
 0x258   :  { %1109 = vst.msk [vmem:[#allocation3 + $0x78] sm:$0xff] %vm937_vm10, %v1077_v59  ;;  %6610 = vmatmul.mubr.msk.f32.gmra.mxu1 %vm1171_vm11, %v1153_v62 }
 0x259   :  { %v1003_v2 = vpop.permute.xlu0 %1002 }
 0x25a   :  { %1036 = vst.msk [vmem:[#allocation3 + $0x70] sm:$0xff] %vm864_vm9, %v1003_v2  ;;  %v1159_v2 = vld [vmem:[#allocation3 + $0x88] sm:$0xff] }
 0x25b   :  { %v1073_v9 = vpop.permute.xlu1 %1072 }
 0x25c   :  { %1107 = vst.msk [vmem:[#allocation3 + $0x68] sm:$0xff] %vm937_vm10, %v1073_v9  ;;  %v1160_v9 = vld [vmem:[#allocation3 + $0x90] sm:$0xff] }
 0x25d   :  { %v1075_v17 = vpop.permute.xlu0 %1074  ;;  %v1154_v20 = vld [vmem:[#allocation3 + $0x60] sm:$0xff] }
 0x25e   :  { %1108 = vst.msk [vmem:[#allocation3 + $0x70] sm:$0xff] %vm937_vm10, %v1075_v17  ;;  %6612 = vmatprep.mubr.msk.f32.mxu1 %vm1171_vm11, %v1154_v20 }
 0x25f   :  { %v1085_v47 = vpop.permute.xlu1 %1084  ;;  %v1157_v43 = vld [vmem:[#allocation3 + $0x78] sm:$0xff] }
 0x260   :  { %1113 = vst.msk [vmem:[#allocation3 + $0x98] sm:$0xff] %vm937_vm10, %v1085_v47 }
 0x261   :  { %v1015_v24 = vpop.permute.xlu0 %1014 }
 0x262   :  { %1042 = vst.msk [vmem:[#allocation3 + $0xa0] sm:$0xff] %vm864_vm9, %v1015_v24 }
 0x263   :  { %v1017_v61 = vpop.permute.xlu1 %1016  ;;  %v1155_v27 = vld [vmem:[#allocation3 + $0x68] sm:$0xff] }
 0x264   :  { %1043 = vst.msk [vmem:[#allocation3 + $0xa8] sm:$0xff] %vm864_vm9, %v1017_v61  ;;  %6613 = vmatmul.mubr.msk.f32.gmra.mxu1 %vm1171_vm11, %v1155_v27 }
 0x265   :  { %v1087_v31 = vpop.permute.xlu0 %1086  ;;  %v1156_v35 = vld [vmem:[#allocation3 + $0x70] sm:$0xff] }
 0x266   :  { %1114 = vst.msk [vmem:[#allocation3 + $0xa0] sm:$0xff] %vm937_vm10, %v1087_v31  ;;  %6615 = vmatprep.mubr.msk.f32.mxu1 %vm1171_vm11, %v1156_v35  ;;  %v1589_v35 = vld [vmem:[#allocation2 + $0x62] ss:$2 sm:$0x1] }
 0x267   :  { %v1089_v36 = vpop.permute.xlu1 %1088  ;;  %v1161_v24 = vld [vmem:[#allocation3 + $0x98] sm:$0xff]  ;;  %1609 = vrot.lane.b32.xlu1 %v1589_v35, %s7158_s14 }
 0x268   :  { %1115 = vst.msk [vmem:[#allocation3 + $0xa8] sm:$0xff] %vm937_vm10, %v1089_v36  ;;  %6616 = vmatmul.mubr.msk.f32.gmra.mxu1 %vm1171_vm11, %v1157_v43  ;;  %v1639_v36 = vld [vmem:[#allocation2 + $0x63] ss:$2 sm:$0x1] }
 0x269   :  { %6618 = vmatprep.mubr.msk.f32.mxu1 %vm1171_vm11, %v1158_v44  ;;  %v1019_v59 = vpop.permute.xlu0 %1018  ;;  %v1760_v43 = vld [vmem:[#allocation2 + $0xca] ss:$2 sm:$0x1]  ;;  %v6101_v44 = vld [vmem:[%s9431_s1 + $0x70] sm:$0xff]  }
 0x26a   :  { %1044 = vst.msk [vmem:[#allocation3 + $0xb0] sm:$0xff] %vm864_vm9, %v1019_v59  ;;  %v5743_v59 = vunpack.c.h.bf16 %v6101_v44 }
 0x26b   :  { %v1021_v62 = vpop.permute.xlu1 %1020  ;;  %1659 = vrot.lane.b32.xlu1 %v1639_v36, %s7159_s27 }
 0x26c   :  { %1045 = vst.msk [vmem:[#allocation3 + $0xb8] sm:$0xff] %vm864_vm9, %v1021_v62  ;;  %6619 = vmatmul.mubr.msk.f32.gmra.mxu1 %vm1171_vm11, %v1159_v2  ;;  %v5742_v62 = vunpack.c.l.bf16 %v6101_v44  ;;  %6630 = vmatprep.subr.mxu0 %v5743_v59  ;;  %v7831_v2 = vld [vmem:[%s9432_s2 + $0x1] ss:$0 sm:$0xff] }
 0x26d   :  { %6621 = vmatprep.mubr.msk.f32.mxu1 %vm1171_vm11, %v1160_v9  ;;  %v1091_v17 = vpop.permute.xlu0 %1090  ;;  %v1162_v20 = vld [vmem:[#allocation3 + $0xa0] sm:$0xff]  ;;  %6631 = vmatpush3.msra.mxu0 %v5743_v59 }
 0x26e   :  { %1116 = vst.msk [vmem:[#allocation3 + $0xb0] sm:$0xff] %vm937_vm10, %v1091_v17  ;;  %6632 = vmatprep.subr.mxu0 %v5742_v62 }
 0x26f   :  { %v1093_v47 = vpop.permute.xlu1 %1092  ;;  %v1163_v61 = vld [vmem:[#allocation3 + $0xa8] sm:$0xff]  ;;  %1780 = vrot.lane.b32.xlu1 %v1760_v43, %s7158_s14  ;;  %6633 = vmatpush3.msra.mxu0 %v5742_v62  ;;  %v6099_v43 = vld [vmem:[%s9431_s1 + $0x60] sm:$0xff]  }
 0x270   :  { %1117 = vst.msk [vmem:[#allocation3 + $0xb8] sm:$0xff] %vm937_vm10, %v1093_v47  ;;  %6622 = vmatmul.mubr.msk.f32.gmra.mxu1 %vm1171_vm11, %v1161_v24  ;;  %v6100_v47 = vld [vmem:[%s9431_s1 + $0x68] sm:$0xff]   ;;  %v5735_v59 = vunpack.c.h.bf16 %v6099_v43  ;;  %v5734_v62 = vunpack.c.l.bf16 %v6099_v43 }
 0x271   :  { %6624 = vmatprep.mubr.msk.f32.mxu1 %vm1171_vm11, %v1162_v20 }
 0x274   :  { %6625 = vmatmul.mubr.msk.f32.gmra.mxu1 %vm1171_vm11, %v1163_v61 }
 0x275   :  { %v1164_v27 = vld [vmem:[#allocation3 + $0xb0] sm:$0xff] }
 0x276   :  { %6627 = vmatprep.mubr.msk.f32.mxu1 %vm1171_vm11, %v1164_v27  ;;  %v5739_v27 = vunpack.c.h.bf16 %v6100_v47 }
 0x277   :  { %v1165_v31 = vld [vmem:[#allocation3 + $0xb8] sm:$0xff] }
 0x278   :  { %6628 = vmatmul.mubr.msk.f32.gmra.mxu1 %vm1171_vm11, %v1165_v31  ;;  %v5738_v31 = vunpack.c.l.bf16 %v6100_v47  ;;  %6634 = vmatprep.subr.mxu0 %v5739_v27 }
 0x279   :  { %6635 = vmatpush3.msra.mxu0 %v5739_v27 }
 0x27a   :  { %6636 = vmatprep.subr.mxu0 %v5738_v31 }
 0x27b   :  { %6637 = vmatpush3.msra.mxu0 %v5738_v31 }
 0x27c   :  { %6638 = vmatprep.subr.mxu0 %v5735_v59 }
 0x27d   :  { %6639 = vmatpush3.msra.mxu0 %v5735_v59 }
 0x27e   :  { %6640 = vmatprep.subr.mxu0 %v5734_v62 }
 0x27f   :  { %6641 = vmatpush3.msra.mxu0 %v5734_v62 }
 0x2ec   :  { %v6596_v9 = vpop.f32.mrf.mxu1 }
 0x2ed   :  { %v1316_v17 = vadd.f32 %v6596_v9, %v7831_v2 }
 0x2ee   :  { %v1310_v20 = vpop.f32.mrf.mxu1 }
 0x2ef   :  { %v1430_v24 = vmax.f32 %v1316_v17, 0.0  ;;  %v1311_v61 = vadd.f32 %v7831_v2, %v1310_v20  ;;  %v5730_v17 = vunpack.c.l.bf16 %v6098_v49  ;;  %v6097_v20 = vld [vmem:[%s9431_s1 + $0x50] sm:$0xff]  }
 0x2f0   :  { %v5726_v43 = vunpack.c.l.bf16 %v6097_v20 }
 0x2f1   :  { %v1454_v35 = vadd.f32 %v1430_v24, %v727_v51  ;;  %v1429_v36 = vmax.f32 %v1311_v61, 0.0  ;;  %v5731_v51 = vunpack.c.h.bf16 %v6098_v49  ;;  %v5727_v61 = vunpack.c.h.bf16 %v6097_v20 }
 0x2f3   :  { %1481 = vst.msk [vmem:[#allocation2 + $0xa] sm:$0xff] %vm753_vm8, %v1454_v35  ;;  %v1453_v44 = vadd.f32 %v1429_v36, %v726_v53  ;;  %6642 = vmatprep.subr.mxu0 %v5731_v51 }
 0x2f4   :  { %6643 = vmatpush3.msra.mxu0 %v5731_v51 }
 0x2f5   :  { %1480 = vst.msk [vmem:[#allocation2 + $0x2] sm:$0xff] %vm753_vm8, %v1453_v44  ;;  %6644 = vmatprep.subr.mxu0 %v5730_v17  ;;  %v6096_v44 = vld [vmem:[%s9431_s1 + $0x48] sm:$0xff]  }
 0x2f6   :  { %6645 = vmatpush3.msra.mxu0 %v5730_v17  ;;  %v5723_v62 = vunpack.c.h.bf16 %v6096_v44  ;;  %v5722_v51 = vunpack.c.l.bf16 %v6096_v44 }
 0x2f7   :  { %6646 = vmatprep.subr.mxu0 %v5727_v61 }
 0x2f8   :  { %v6599_v9 = vpop.f32.mrf.mxu1  ;;  %6647 = vmatpush3.msra.mxu0 %v5727_v61  ;;  %v6094_v61 = vld [vmem:[%s9431_s1 + $0x38] sm:$0xff]  }
 0x2f9   :  { %v1326_v52 = vadd.f32 %v6599_v9, %v7831_v2  ;;  %6648 = vmatprep.subr.mxu0 %v5726_v43 }
 0x2fa   :  { %v1320_v53 = vpop.f32.mrf.mxu1  ;;  %6649 = vmatpush3.msra.mxu0 %v5726_v43 }
 0x2fb   :  { %v1432_v47 = vmax.f32 %v1326_v52, 0.0  ;;  %v1321_v24 = vadd.f32 %v7831_v2, %v1320_v53  ;;  %6650 = vmatprep.subr.mxu0 %v5723_v62  ;;  %v5719_v52 = vunpack.c.h.bf16 %v6095_v58 }
 0x2fc   :  { %v1506_v27 = vld [vmem:[#allocation2] ss:$2 sm:$0xff]  ;;  %v1527_v31 = vld [vmem:[#allocation2 + $0x1] ss:$2 sm:$0xff]  ;;  %6651 = vmatpush3.msra.mxu0 %v5723_v62 }
 0x2fd   :  { %1519 = vst.msk [vmem:[#allocation3] sm:$0xff] %vm753_vm8, %v1506_v27  ;;  %v1456_v35 = vadd.f32 %v1432_v47, %v729_v57  ;;  %v1431_v36 = vmax.f32 %v1321_v24, 0.0  ;;  %1547 = vrot.lane.b32.xlu0 %v1527_v31, %s7157_s13  ;;  %v1577_v49 = vld [vmem:[#allocation2 + $0x2] ss:$2 sm:$0xff]  ;;  %6652 = vmatprep.subr.mxu0 %v5722_v51  ;;  %v1627_v53 = vld [vmem:[#allocation2 + $0x3] ss:$2 sm:$0xff]  ;;  %v5718_v24 = vunpack.c.l.bf16 %v6095_v58  ;;  %v5715_v31 = vunpack.c.h.bf16 %v6094_v61 }
 0x2fe   :  { %2045 = vst.msk [vmem:[#allocation2] sm:$0x1] %vm750_vm3, %v7154_v3  ;;  %6653 = vmatpush3.msra.mxu0 %v5722_v51 }
 0x2ff   :  { %1483 = vst.msk [vmem:[#allocation2 + $0x1a] sm:$0xff] %vm753_vm8, %v1456_v35  ;;  %v1455_v59 = vadd.f32 %v1431_v36, %v728_v60  ;;  %6654 = vmatprep.subr.mxu0 %v5719_v52 }
 0x300   :  { %v6602_v55 = vpop.f32.mrf.mxu1  ;;  %6655 = vmatpush3.msra.mxu0 %v5719_v52 }
 0x301   :  { %1482 = vst.msk [vmem:[#allocation2 + $0x12] sm:$0xff] %vm753_vm8, %v1455_v59  ;;  %v1336_v57 = vadd.f32 %v6602_v55, %v7831_v2  ;;  %1597 = vrot.lane.b32.xlu0 %v1577_v49, %s7158_s14  ;;  %6656 = vmatprep.subr.mxu0 %v5718_v24 }
 0x302   :  { %v1330_v9 = vpop.f32.mrf.mxu1  ;;  %6657 = vmatpush3.msra.mxu0 %v5718_v24 }
 0x303   :  { %v1434_v60 = vmax.f32 %v1336_v57, 0.0  ;;  %v1331_v17 = vadd.f32 %v7831_v2, %v1330_v9  ;;  %6658 = vmatprep.subr.mxu0 %v5715_v31 }
 0x304   :  { %6659 = vmatpush3.msra.mxu0 %v5715_v31 }
 0x305   :  { %v1458_v20 = vadd.f32 %v1434_v60, %v731_v5  ;;  %v1433_v47 = vmax.f32 %v1331_v17, 0.0  ;;  %1647 = vrot.lane.b32.xlu0 %v1627_v53, %s7159_s27  ;;  %v5714_v5 = vunpack.c.l.bf16 %v6094_v61 }
 0x307   :  { %1485 = vst.msk [vmem:[#allocation2 + $0x2a] sm:$0xff] %vm753_vm8, %v1458_v20  ;;  %v1457_v27 = vadd.f32 %v1433_v47, %v730_v7  ;;  %6660 = vmatprep.subr.mxu0 %v5714_v5 }
 0x308   :  { %v1508_v35 = vld [vmem:[#allocation2 + $0x10] ss:$2 sm:$0xff]  ;;  %v6605_v1 = vpop.f32.mrf.mxu1  ;;  %v1529_v43 = vld [vmem:[#allocation2 + $0x11] ss:$2 sm:$0xff]  ;;  %6661 = vmatpush3.msra.mxu0 %v5714_v5 }
 0x309   :  { %1520 = vst.msk [vmem:[#allocation3 + $0x8] sm:$0xff] %vm753_vm8, %v1508_v35  ;;  %1484 = vst.msk [vmem:[#allocation2 + $0x22] sm:$0xff] %vm753_vm8, %v1457_v27  ;;  %v1346_v36 = vadd.f32 %v6605_v1, %v7831_v2  ;;  %1549 = vrot.lane.b32.xlu1 %v1529_v43, %s7157_s13  ;;  %v1579_v59 = vld [vmem:[#allocation2 + $0x12] ss:$2 sm:$0xff]  ;;  %v1629_v9 = vld [vmem:[#allocation2 + $0x13] ss:$2 sm:$0xff] }
 0x30a   :  { %v1340_v44 = vpop.f32.mrf.mxu1 }
 0x30b   :  { %v1436_v6 = vmax.f32 %v1346_v36, 0.0  ;;  %v1341_v7 = vadd.f32 %v7831_v2, %v1340_v44 }
 0x30d   :  { %v1460_v62 = vadd.f32 %v1436_v6, %v733_v13  ;;  %v1435_v49 = vmax.f32 %v1341_v7, 0.0  ;;  %1599 = vrot.lane.b32.xlu1 %v1579_v59, %s7158_s14 }
 0x30f   :  { %1487 = vst.msk [vmem:[#allocation2 + $0x3a] sm:$0xff] %vm753_vm8, %v1460_v62  ;;  %v1459_v55 = vadd.f32 %v1435_v49, %v732_v15 }
 0x310   :  { %v1510_v57 = vld [vmem:[#allocation2 + $0x20] ss:$2 sm:$0xff]  ;;  %v1531_v51 = vld [vmem:[#allocation2 + $0x21] ss:$2 sm:$0xff] }
 0x311   :  { %1521 = vst.msk [vmem:[#allocation3 + $0x10] sm:$0xff] %vm753_vm8, %v1510_v57  ;;  %1486 = vst.msk [vmem:[#allocation2 + $0x32] sm:$0xff] %vm753_vm8, %v1459_v55  ;;  %1551 = vrot.lane.b32.xlu0 %v1531_v51, %s7157_s13  ;;  %1649 = vrot.lane.b32.xlu1 %v1629_v9, %s7159_s27  ;;  %v1581_v13 = vld [vmem:[#allocation2 + $0x22] ss:$2 sm:$0xff]  ;;  %v1631_v17 = vld [vmem:[#allocation2 + $0x23] ss:$2 sm:$0xff] }
 0x314   :  { %v6608_v11 = vpop.f32.mrf.mxu1 }
 0x315   :  { %v1356_v58 = vadd.f32 %v6608_v11, %v7831_v2  ;;  %1601 = vrot.lane.b32.xlu0 %v1581_v13, %s7158_s14 }
 0x316   :  { %v1350_v60 = vpop.f32.mrf.mxu1 }
 0x317   :  { %v1438_v14 = vmax.f32 %v1356_v58, 0.0  ;;  %v1351_v15 = vadd.f32 %v7831_v2, %v1350_v60 }
 0x318   :  { %v6611_v52 = vpop.f32.mrf.mxu1  ;;  %v1512_v53 = vld [vmem:[#allocation2 + $0x30] ss:$2 sm:$0xff]  ;;  %v1533_v20 = vld [vmem:[#allocation2 + $0x31] ss:$2 sm:$0xff] }
 0x319   :  { %v1583_v47 = vld [vmem:[#allocation2 + $0x32] ss:$2 sm:$0xff]  ;;  %v1462_v24 = vadd.f32 %v1438_v14, %v735_v21  ;;  %v1437_v61 = vmax.f32 %v1351_v15, 0.0  ;;  %v1366_v27 = vadd.f32 %v6611_v52, %v7831_v2  ;;  %1553 = vrot.lane.b32.xlu1 %v1533_v20, %s7157_s13  ;;  %1522 = vst.msk [vmem:[#allocation3 + $0x18] sm:$0xff] %vm753_vm8, %v1512_v53  ;;  %1651 = vrot.lane.b32.xlu0 %v1631_v17, %s7159_s27  ;;  %v1633_v31 = vld [vmem:[#allocation2 + $0x33] ss:$2 sm:$0xff] }
 0x31a   :  { %2046 = vst.msk [vmem:[#allocation2 + $0x32] sm:$0x1] %vm750_vm3, %v7154_v3  ;;  %2054 = vst.msk [vmem:[#allocation2 + $0x38] sm:$0x1] %vm750_vm3, %v7154_v3  ;;  %v1360_v35 = vpop.f32.mrf.mxu1 }
 0x31b   :  { %2970 = vst.msk [vmem:[#allocation2 + $0x33] sm:$0x3] %vm1477_vm7, %v7154_v3  ;;  %v1461_v19 = vadd.f32 %v1437_v61, %v734_v23  ;;  %v1440_v21 = vmax.f32 %v1366_v27, 0.0  ;;  %v1361_v1 = vadd.f32 %v7831_v2, %v1360_v35 }
 0x31c   :  { %1489 = vst.msk [vmem:[#allocation2 + $0x4a] sm:$0xff] %vm753_vm8, %v1462_v24 }
 0x31d   :  { %1488 = vst.msk [vmem:[#allocation2 + $0x42] sm:$0xff] %vm753_vm8, %v1461_v19  ;;  %v1464_v5 = vadd.f32 %v1440_v21, %v737_v32  ;;  %v1439_v36 = vmax.f32 %v1361_v1, 0.0  ;;  %1603 = vrot.lane.b32.xlu1 %v1583_v47, %s7158_s14 }
 0x31f   :  { %1491 = vst.msk [vmem:[#allocation2 + $0x5a] sm:$0xff] %vm753_vm8, %v1464_v5  ;;  %v1463_v43 = vadd.f32 %v1439_v36, %v736_v34 }
 0x321   :  { %1490 = vst.msk [vmem:[#allocation2 + $0x52] sm:$0xff] %vm753_vm8, %v1463_v43  ;;  %1653 = vrot.lane.b32.xlu1 %v1633_v31, %s7159_s27 }
 0x324   :  { %v6614_v22 = vpop.f32.mrf.mxu1  ;;  %v1535_v23 = vld [vmem:[#allocation2 + $0x41] ss:$2 sm:$0xff]  ;;  %v1514_v30 = vld [vmem:[#allocation2 + $0x40] ss:$2 sm:$0xff] }
 0x325   :  { %v1376_v44 = vadd.f32 %v6614_v22, %v7831_v2  ;;  %1555 = vrot.lane.b32.xlu0 %v1535_v23, %s7157_s13  ;;  %1523 = vst.msk [vmem:[#allocation3 + $0x20] sm:$0xff] %vm753_vm8, %v1514_v30  ;;  %v1585_v62 = vld [vmem:[#allocation2 + $0x42] ss:$2 sm:$0xff]  ;;  %v1635_v60 = vld [vmem:[#allocation2 + $0x43] ss:$2 sm:$0xff] }
 0x326   :  { %v1370_v32 = vpop.f32.mrf.mxu1  ;;  %v1518_v6 = vld [vmem:[#allocation2 + $0x60] ss:$2 sm:$0x1]  ;;  %v1539_v46 = vld [vmem:[#allocation2 + $0x61] ss:$2 sm:$0x1] }
 0x327   :  { %v1442_v7 = vmax.f32 %v1376_v44, 0.0  ;;  %v1371_v59 = vadd.f32 %v7831_v2, %v1370_v32  ;;  %1525 = vst.msk [vmem:[#allocation3 + $0x30] sm:$0x1] %vm750_vm3, %v1518_v6 }
 0x328   :  { %v6617_v33 = vpop.f32.mrf.mxu1  ;;  %v1537_v34 = vld [vmem:[#allocation2 + $0x51] ss:$2 sm:$0xff]  ;;  %v1516_v51 = vld [vmem:[#allocation2 + $0x50] ss:$2 sm:$0xff] }
 0x329   :  { %v1466_v49 = vadd.f32 %v1442_v7, %v739_v40  ;;  %v1441_v55 = vmax.f32 %v1371_v59, 0.0  ;;  %v1386_v57 = vadd.f32 %v6617_v33, %v7831_v2  ;;  %1557 = vrot.lane.b32.xlu1 %v1537_v34, %s7157_s13  ;;  %1605 = vrot.lane.b32.xlu0 %v1585_v62, %s7158_s14  ;;  %1524 = vst.msk [vmem:[#allocation3 + $0x28] sm:$0xff] %vm753_vm8, %v1516_v51  ;;  %v1587_v58 = vld [vmem:[#allocation2 + $0x52] ss:$2 sm:$0xff]  ;;  %v1637_v47 = vld [vmem:[#allocation2 + $0x53] ss:$2 sm:$0xff] }
 0x32a   :  { %v1380_v9 = vpop.f32.mrf.mxu1 }
 0x32b   :  { %1495 = vst.msk [vmem:[#allocation2 + $0x72] sm:$0xff] %vm753_vm8, %v1466_v49  ;;  %v1465_v11 = vadd.f32 %v1441_v55, %v738_v42  ;;  %v1444_v13 = vmax.f32 %v1386_v57, 0.0  ;;  %v1381_v38 = vadd.f32 %v7831_v2, %v1380_v9 }
 0x32c   :  { %v6620_v40 = vpop.f32.mrf.mxu1 }
 0x32d   :  { %1494 = vst.msk [vmem:[#allocation2 + $0x6a] sm:$0xff] %vm753_vm8, %v1465_v11  ;;  %v1468_v14 = vadd.f32 %v1444_v13, %v741_v50  ;;  %v1443_v15 = vmax.f32 %v1381_v38, 0.0  ;;  %v1396_v17 = vadd.f32 %v6620_v40, %v7831_v2  ;;  %1607 = vrot.lane.b32.xlu1 %v1587_v58, %s7158_s14  ;;  %1655 = vrot.lane.b32.xlu0 %v1635_v60, %s7159_s27  ;;  %v1809_v40 = vld [vmem:[#allocation2 + $0xcb] ss:$2 sm:$0x1] }
 0x32e   :  { %v1390_v41 = vpop.f32.mrf.mxu1 }
 0x32f   :  { %1497 = vst.msk [vmem:[#allocation2 + $0x82] sm:$0xff] %vm753_vm8, %v1468_v14  ;;  %v1467_v42 = vadd.f32 %v1443_v15, %v740_v56  ;;  %v1446_v52 = vmax.f32 %v1396_v17, 0.0  ;;  %v1391_v53 = vadd.f32 %v7831_v2, %v1390_v41  ;;  %v1610_v14 = vpop.permute.xlu1 %1609 }
 0x330   :  { %v6623_v20 = vpop.f32.mrf.mxu1 }
 0x331   :  { %1496 = vst.msk [vmem:[#allocation2 + $0x7a] sm:$0xff] %vm753_vm8, %v1467_v42  ;;  %v1470_v50 = vadd.f32 %v1446_v52, %v743_v12  ;;  %v1445_v24 = vmax.f32 %v1391_v53, 0.0  ;;  %v1406_v61 = vadd.f32 %v6623_v20, %v7831_v2  ;;  %1657 = vrot.lane.b32.xlu1 %v1637_v47, %s7159_s27  ;;  %1559 = vrot.lane.b32.xlu0 %v1539_v46, %s7157_s13 }
 0x332   :  { %v1400_v54 = vpop.f32.mrf.mxu1 }
 0x333   :  { %1499 = vst.msk [vmem:[#allocation2 + $0x92] sm:$0xff] %vm753_vm8, %v1470_v50  ;;  %v1469_v56 = vadd.f32 %v1445_v24, %v742_v18  ;;  %v1448_v27 = vmax.f32 %v1406_v61, 0.0  ;;  %v1401_v31 = vadd.f32 %v7831_v2, %v1400_v54  ;;  %v1660_v17 = vpop.permute.xlu1 %1659 }
 0x334   :  { %v6626_v35 = vpop.f32.mrf.mxu1  ;;  %v1797_v19 = vld [vmem:[#allocation2 + $0x6b] ss:$2 sm:$0xff]  ;;  %v1748_v16 = vld [vmem:[#allocation2 + $0x6a] ss:$2 sm:$0xff] }
 0x335   :  { %v1699_v4 = vld [vmem:[#allocation2 + $0x69] ss:$2 sm:$0xff]  ;;  %1498 = vst.msk [vmem:[#allocation2 + $0x8a] sm:$0xff] %vm753_vm8, %v1469_v56  ;;  %v1472_v12 = vadd.f32 %v1448_v27, %v745_v37  ;;  %v1447_v21 = vmax.f32 %v1401_v31, 0.0  ;;  %v1416_v1 = vadd.f32 %v6626_v35, %v7831_v2  ;;  %1817 = vrot.lane.b32.xlu1 %v1797_v19, %s7159_s27  ;;  %v1678_v18 = vld [vmem:[#allocation2 + $0x68] ss:$2 sm:$0xff] }
 0x336   :  { %1719 = vrot.lane.b32.xlu0 %v1699_v4, %s7157_s13  ;;  %v1410_v5 = vpop.f32.mrf.mxu1  ;;  %1691 = vst.msk [vmem:[#allocation3 + $0x38] sm:$0xff] %vm753_vm8, %v1678_v18 }
 0x337   :  { %2055 = vst.msk [vmem:[#allocation2 + $0x6a] sm:$0x1] %vm750_vm3, %v7154_v3  ;;  %v1471_v29 = vadd.f32 %v1447_v21, %v744_v45  ;;  %v1450_v37 = vmax.f32 %v1416_v1, 0.0  ;;  %v1411_v36 = vadd.f32 %v7831_v2, %v1410_v5  ;;  %v8017_v42 = vpop.permute.xlu1 %1780 }
 0x338   :  { %2979 = vst.msk [vmem:[#allocation2 + $0x6b] sm:$0x3] %vm1477_vm7, %v7154_v3  ;;  %v6629_v43 = vpop.f32.mrf.mxu1  ;;  %v1680_v30 = vld [vmem:[#allocation2 + $0x78] ss:$2 sm:$0xff]  ;;  %v1701_v10 = vld [vmem:[#allocation2 + $0x79] ss:$2 sm:$0xff] }
 0x339   :  { %1501 = vst.msk [vmem:[#allocation2 + $0xa2] sm:$0xff] %vm753_vm8, %v1472_v12  ;;  %1500 = vst.msk [vmem:[#allocation2 + $0x9a] sm:$0xff] %vm753_vm8, %v1471_v29  ;;  %v1474_v22 = vadd.f32 %v1450_v37, %v747_v25  ;;  %v1449_v23 = vmax.f32 %v1411_v36, 0.0  ;;  %v1426_v44 = vadd.f32 %v6629_v43, %v7831_v2  ;;  %v1799_v34 = vld [vmem:[#allocation2 + $0x7b] ss:$2 sm:$0xff] }
 0x33a   :  { %1768 = vrot.lane.b32.xlu0 %v1748_v16, %s7158_s14  ;;  %v1420_v32 = vpop.f32.mrf.mxu1  ;;  %1692 = vst.msk [vmem:[#allocation3 + $0x40] sm:$0xff] %vm753_vm8, %v1680_v30 }
 0x33b   :  { %1503 = vst.msk [vmem:[#allocation2 + $0xb2] sm:$0xff] %vm753_vm8, %v1474_v22  ;;  %v1473_v39 = vadd.f32 %v1449_v23, %v746_v28  ;;  %v1452_v45 = vmax.f32 %v1426_v44, 0.0  ;;  %v1421_v6 = vadd.f32 %v7831_v2, %v1420_v32  ;;  %v1750_v2 = vld [vmem:[#allocation2 + $0x7a] ss:$2 sm:$0xff] }
 0x33c   :  { %v1703_v7 = vld [vmem:[#allocation2 + $0x89] ss:$2 sm:$0xff]  ;;  %v1682_v33 = vld [vmem:[#allocation2 + $0x88] ss:$2 sm:$0xff] }
 0x33d   :  { %1502 = vst.msk [vmem:[#allocation2 + $0xaa] sm:$0xff] %vm753_vm8, %v1473_v39  ;;  %v1476_v25 = vadd.f32 %v1452_v45, %v749_v63  ;;  %v1451_v59 = vmax.f32 %v1421_v6, 0.0  ;;  %1723 = vrot.lane.b32.xlu1 %v1703_v7, %s7157_s13  ;;  %1693 = vst.msk [vmem:[#allocation3 + $0x48] sm:$0xff] %vm753_vm8, %v1682_v33  ;;  %v1752_v28 = vld [vmem:[#allocation2 + $0x8a] ss:$2 sm:$0xff] }
 0x33e   :  { %1721 = vrot.lane.b32.xlu0 %v1701_v10, %s7157_s13  ;;  %v1801_v63 = vld [vmem:[#allocation2 + $0x8b] ss:$2 sm:$0xff] }
 0x33f   :  { %1505 = vst.msk [vmem:[#allocation2 + $0xc2] sm:$0xff] %vm753_vm8, %v1476_v25  ;;  %v1475_v26 = vadd.f32 %v1451_v59, %v748_v8 }
 0x340   :  { %v1684_v48 = vld [vmem:[#allocation2 + $0x98] ss:$2 sm:$0xff]  ;;  %v1705_v49 = vld [vmem:[#allocation2 + $0x99] ss:$2 sm:$0xff] }
 0x341   :  { %1504 = vst.msk [vmem:[#allocation2 + $0xba] sm:$0xff] %vm753_vm8, %v1475_v26  ;;  %1772 = vrot.lane.b32.xlu1 %v1752_v28, %s7158_s14  ;;  %1694 = vst.msk [vmem:[#allocation3 + $0x50] sm:$0xff] %vm753_vm8, %v1684_v48  ;;  %v1754_v51 = vld [vmem:[#allocation2 + $0x9a] ss:$2 sm:$0xff]  ;;  %v1803_v11 = vld [vmem:[#allocation2 + $0x9b] ss:$2 sm:$0xff] }
 0x342   :  { %1770 = vrot.lane.b32.xlu0 %v1750_v2, %s7158_s14 }
 0x344   :  { %v1686_v62 = vld [vmem:[#allocation2 + $0xa8] ss:$2 sm:$0xff]  ;;  %v1707_v8 = vld [vmem:[#allocation2 + $0xa9] ss:$2 sm:$0xff] }
 0x345   :  { %1821 = vrot.lane.b32.xlu1 %v1801_v63, %s7159_s27  ;;  %1695 = vst.msk [vmem:[#allocation3 + $0x58] sm:$0xff] %vm753_vm8, %v1686_v62  ;;  %v1756_v57 = vld [vmem:[#allocation2 + $0xaa] ss:$2 sm:$0xff]  ;;  %v1805_v9 = vld [vmem:[#allocation2 + $0xab] ss:$2 sm:$0xff] }
 0x346   :  { %1819 = vrot.lane.b32.xlu0 %v1799_v34, %s7159_s27  ;;  %v1690_v0 = vld [vmem:[#allocation2 + $0xc8] ss:$2 sm:$0x1]  ;;  %v1711_v13 = vld [vmem:[#allocation2 + $0xc9] ss:$2 sm:$0x1] }
 0x347   :  { %1697 = vst.msk [vmem:[#allocation3 + $0x68] sm:$0x1] %vm750_vm3, %v1690_v0 }
 0x348   :  { %v1688_v55 = vld [vmem:[#allocation2 + $0xb8] ss:$2 sm:$0xff]  ;;  %v1709_v38 = vld [vmem:[#allocation2 + $0xb9] ss:$2 sm:$0xff] }
 0x349   :  { %1727 = vrot.lane.b32.xlu1 %v1707_v8, %s7157_s13  ;;  %1696 = vst.msk [vmem:[#allocation3 + $0x60] sm:$0xff] %vm753_vm8, %v1688_v55  ;;  %v1758_v58 = vld [vmem:[#allocation2 + $0xba] ss:$2 sm:$0xff]  ;;  %v1807_v60 = vld [vmem:[#allocation2 + $0xbb] ss:$2 sm:$0xff] }
 0x34a   :  { %1725 = vrot.lane.b32.xlu0 %v1705_v49, %s7157_s13 }
 0x34d   :  { %1776 = vrot.lane.b32.xlu1 %v1756_v57, %s7158_s14  ;;  %v2125_v57 = vld [vmem:[#allocation2 + $0x32] sm:$0x1] }
 0x34e   :  { %1774 = vrot.lane.b32.xlu0 %v1754_v51, %s7158_s14  ;;  %2508 = vst.msk [vmem:[#allocation2 + $0x32] sm:$0x1] %vm750_vm3, %v7154_v3 }
 0x351   :  { %1825 = vrot.lane.b32.xlu1 %v1805_v9, %s7159_s27 }
 0x352   :  { %1823 = vrot.lane.b32.xlu0 %v1803_v11, %s7159_s27  ;;  %v8063_v11 = vld [vmem:[#allocation2 + $0x6a] sm:$0x1] }
 0x353   :  { %2517 = vst.msk [vmem:[#allocation2 + $0x6a] sm:$0x1] %vm750_vm3, %v7154_v3 }
 0x355   :  { %1731 = vrot.lane.b32.xlu1 %v1711_v13, %s7157_s13  ;;  %v8070_v13 = vld [vmem:[%s9432_s2 + $0x2] ss:$0 sm:$0xff] }
 0x356   :  { %1729 = vrot.lane.b32.xlu0 %v1709_v38, %s7157_s13 }
 0x359   :  { %1829 = vrot.lane.b32.xlu1 %v1809_v40, %s7159_s27 }
 0x35a   :  { %1778 = vrot.lane.b32.xlu0 %v1758_v58, %s7158_s14 }
 0x35d   :  { %2145 = vrot.lane.b32.xlu1 %v2125_v57, %s7158_s14 }
 0x35e   :  { %1827 = vrot.lane.b32.xlu0 %v1807_v60, %s7159_s27  ;;  %v6107_v60 = vld [vmem:[%s9431_s1 + $0xa0] sm:$0xff]  }
 0x36f   :  { %v1548_v15 = vpop.permute.xlu0 %1547 }
 0x370   :  { %1568 = vst.msk [vmem:[#allocation3] sm:$0xff] %vm864_vm9, %v1548_v15 }
 0x373   :  { %v1598_v41 = vpop.permute.xlu0 %1597 }
 0x374   :  { %1618 = vst.msk [vmem:[#allocation3] sm:$0xff] %vm937_vm10, %v1598_v41 }
 0x377   :  { %v1648_v52 = vpop.permute.xlu0 %1647 }
 0x378   :  { %1669 = vst.msk [vmem:[#allocation3] sm:$0xff] %vm1668_vm12, %v1648_v52  ;;  %v6106_v52 = vld [vmem:[%s9431_s1 + $0x98] sm:$0xff]  }
 0x37b   :  { %v1550_v53 = vpop.permute.xlu1 %1549 }
 0x37c   :  { %1569 = vst.msk [vmem:[#allocation3 + $0x8] sm:$0xff] %vm864_vm9, %v1550_v53  ;;  %v6105_v53 = vld [vmem:[%s9431_s1 + $0x90] sm:$0xff]  }
 0x37f   :  { %v1877_v20 = vld [vmem:[#allocation3] sm:$0xff]  ;;  %v1600_v47 = vpop.permute.xlu1 %1599 }
 0x380   :  { %6662 = vmatprep.mubr.f32.mxu0 %v1877_v20  ;;  %1619 = vst.msk [vmem:[#allocation3 + $0x8] sm:$0xff] %vm937_vm10, %v1600_v47  ;;  %v5763_v20 = vunpack.c.h.bf16 %v6106_v52  ;;  %v5762_v47 = vunpack.c.l.bf16 %v6106_v52 }
 0x383   :  { %v1552_v46 = vpop.permute.xlu0 %1551  ;;  %v1650_v50 = vpop.permute.xlu1 %1649 }
 0x384   :  { %1570 = vst.msk [vmem:[#allocation3 + $0x10] sm:$0xff] %vm864_vm9, %v1552_v46  ;;  %v5759_v46 = vunpack.c.h.bf16 %v6105_v53 }
 0x385   :  { %1670 = vst.msk [vmem:[#allocation3 + $0x8] sm:$0xff] %vm1668_vm12, %v1650_v50  ;;  %v5758_v50 = vunpack.c.l.bf16 %v6105_v53 }
 0x387   :  { %v1602_v24 = vpop.permute.xlu0 %1601 }
 0x388   :  { %1620 = vst.msk [vmem:[#allocation3 + $0x10] sm:$0xff] %vm937_vm10, %v1602_v24 }
 0x38b   :  { %v1554_v61 = vpop.permute.xlu1 %1553  ;;  %v1652_v54 = vpop.permute.xlu0 %1651 }
 0x38c   :  { %1571 = vst.msk [vmem:[#allocation3 + $0x18] sm:$0xff] %vm864_vm9, %v1554_v61  ;;  %v1878_v56 = vld [vmem:[#allocation3 + $0x8] sm:$0xff] }
 0x38d   :  { %1671 = vst.msk [vmem:[#allocation3 + $0x10] sm:$0xff] %vm1668_vm12, %v1652_v54  ;;  %6663 = vmatmul.mubr.f32.vlgmr.msra.gmra.mxu0 %v1878_v56 }
 0x38f   :  { %v1604_v27 = vpop.permute.xlu1 %1603 }
 0x390   :  { %1621 = vst.msk [vmem:[#allocation3 + $0x18] sm:$0xff] %vm937_vm10, %v1604_v27 }
 0x393   :  { %v1654_v31 = vpop.permute.xlu1 %1653 }
 0x394   :  { %v1879_v35 = vld [vmem:[#allocation3 + $0x10] sm:$0xff]  ;;  %1672 = vst.msk [vmem:[#allocation3 + $0x18] sm:$0xff] %vm1668_vm12, %v1654_v31  ;;  %v6104_v31 = vld [vmem:[%s9431_s1 + $0x88] sm:$0xff]  }
 0x395   :  { %6665 = vmatprep.mubr.f32.mxu0 %v1879_v35 }
 0x397   :  { %v1556_v19 = vpop.permute.xlu0 %1555 }
 0x398   :  { %1572 = vst.msk [vmem:[#allocation3 + $0x20] sm:$0xff] %vm864_vm9, %v1556_v19  ;;  %v5755_v19 = vunpack.c.h.bf16 %v6104_v31 }
 0x39b   :  { %v1558_v4 = vpop.permute.xlu1 %1557  ;;  %v1606_v12 = vpop.permute.xlu0 %1605  ;;  %v1880_v21 = vld [vmem:[#allocation3 + $0x18] sm:$0xff] }
 0x39c   :  { %1573 = vst.msk [vmem:[#allocation3 + $0x28] sm:$0xff] %vm864_vm9, %v1558_v4  ;;  %6666 = vmatmul.mubr.f32.gmra.mxu0 %v1880_v21 }
 0x39d   :  { %1622 = vst.msk [vmem:[#allocation3 + $0x20] sm:$0xff] %vm937_vm10, %v1606_v12  ;;  %v5754_v12 = vunpack.c.l.bf16 %v6104_v31 }
 0x39f   :  { %v1608_v1 = vpop.permute.xlu1 %1607  ;;  %v1656_v16 = vpop.permute.xlu0 %1655 }
 0x3a0   :  { %1623 = vst.msk [vmem:[#allocation3 + $0x28] sm:$0xff] %vm937_vm10, %v1608_v1 }
 0x3a1   :  { %1673 = vst.msk [vmem:[#allocation3 + $0x20] sm:$0xff] %vm1668_vm12, %v1656_v16 }
 0x3a3   :  { %v1658_v18 = vpop.permute.xlu1 %1657  ;;  %v1560_v5 = vpop.permute.xlu0 %1559 }
 0x3a4   :  { %1674 = vst.msk [vmem:[#allocation3 + $0x28] sm:$0xff] %vm1668_vm12, %v1658_v18  ;;  %v6103_v18 = vld [vmem:[%s9431_s1 + $0x80] sm:$0xff]  }
 0x3a5   :  { %1575 = vst.msk [vmem:[#allocation3 + $0x30] sm:$0x1] %vm1574_vm13, %v1560_v5  ;;  %v5751_v5 = vunpack.c.h.bf16 %v6103_v18 }
 0x3a6   :  { %1625 = vst.msk [vmem:[#allocation3 + $0x30] sm:$0x1] %vm1624_vm14, %v1610_v14 }
 0x3a7   :  { %1676 = vst.msk [vmem:[#allocation3 + $0x30] sm:$0x1] %vm1675_vm15, %v1660_v17  ;;  %v1818_v36 = vpop.permute.xlu1 %1817  ;;  %v5767_v17 = vunpack.c.h.bf16 %v6107_v60 }
 0x3a8   :  { %v1720_v29 = vpop.permute.xlu0 %1719  ;;  %v1881_v37 = vld [vmem:[#allocation3 + $0x20] sm:$0xff] }
 0x3a9   :  { %1740 = vst.msk [vmem:[#allocation3 + $0x38] sm:$0xff] %vm864_vm9, %v1720_v29  ;;  %6668 = vmatprep.mubr.f32.mxu0 %v1881_v37  ;;  %6683 = vmatprep.subr.mxu1 %v5767_v17  ;;  %v5750_v37 = vunpack.c.l.bf16 %v6103_v18 }
 0x3aa   :  { %6684 = vmatpush3.msra.mxu1 %v5767_v17 }
 0x3ab   :  { %v1882_v22 = vld [vmem:[#allocation3 + $0x28] sm:$0xff] }
 0x3ac   :  { %v1769_v43 = vpop.permute.xlu0 %1768  ;;  %6669 = vmatmul.mubr.f32.gmra.mxu0 %v1882_v22 }
 0x3ad   :  { %1789 = vst.msk [vmem:[#allocation3 + $0x38] sm:$0xff] %vm937_vm10, %v1769_v43 }
 0x3ae   :  { %1838 = vst.msk [vmem:[#allocation3 + $0x38] sm:$0xff] %vm1668_vm12, %v1818_v36  ;;  %v1883_v23 = vld [vmem:[#allocation3 + $0x30] sm:$0xff]  ;;  %v6102_v36 = vld [vmem:[%s9431_s1 + $0x78] sm:$0xff]  }
 0x3af   :  { %6671 = vmatprep.mubr.f32.mxu0 %v1883_v23  ;;  %v1724_v44 = vpop.permute.xlu1 %1723  ;;  %v5747_v43 = vunpack.c.h.bf16 %v6102_v36  ;;  %v5746_v22 = vunpack.c.l.bf16 %v6102_v36 }
 0x3b0   :  { %v1722_v30 = vpop.permute.xlu0 %1721  ;;  %1742 = vst.msk [vmem:[#allocation3 + $0x48] sm:$0xff] %vm864_vm9, %v1724_v44 }
 0x3b1   :  { %1741 = vst.msk [vmem:[#allocation3 + $0x40] sm:$0xff] %vm864_vm9, %v1722_v30 }
 0x3b3   :  { %v1773_v32 = vpop.permute.xlu1 %1772 }
 0x3b4   :  { %v1771_v39 = vpop.permute.xlu0 %1770  ;;  %1791 = vst.msk [vmem:[#allocation3 + $0x48] sm:$0xff] %vm937_vm10, %v1773_v32 }
 0x3b5   :  { %1790 = vst.msk [vmem:[#allocation3 + $0x40] sm:$0xff] %vm937_vm10, %v1771_v39  ;;  %v1884_v45 = vld [vmem:[#allocation3 + $0x38] sm:$0xff] }
 0x3b6   :  { %6672 = vmatmul.mubr.f32.gmra.mxu0 %v1884_v45 }
 0x3b7   :  { %v1822_v6 = vpop.permute.xlu1 %1821 }
 0x3b8   :  { %v1820_v7 = vpop.permute.xlu0 %1819  ;;  %1840 = vst.msk [vmem:[#allocation3 + $0x48] sm:$0xff] %vm1668_vm12, %v1822_v6 }
 0x3b9   :  { %1839 = vst.msk [vmem:[#allocation3 + $0x40] sm:$0xff] %vm1668_vm12, %v1820_v7 }
 0x3bb   :  { %v1728_v10 = vpop.permute.xlu1 %1727 }
 0x3bc   :  { %v1726_v25 = vpop.permute.xlu0 %1725  ;;  %1744 = vst.msk [vmem:[#allocation3 + $0x58] sm:$0xff] %vm864_vm9, %v1728_v10 }
 0x3bd   :  { %1743 = vst.msk [vmem:[#allocation3 + $0x50] sm:$0xff] %vm864_vm9, %v1726_v25 }
 0x3bf   :  { %v1777_v59 = vpop.permute.xlu1 %1776  ;;  %v1886_v28 = vld [vmem:[#allocation3 + $0x48] sm:$0xff] }
 0x3c0   :  { %v1775_v33 = vpop.permute.xlu0 %1774  ;;  %v1885_v26 = vld [vmem:[#allocation3 + $0x40] sm:$0xff]  ;;  %1793 = vst.msk [vmem:[#allocation3 + $0x58] sm:$0xff] %vm937_vm10, %v1777_v59 }
 0x3c1   :  { %1792 = vst.msk [vmem:[#allocation3 + $0x50] sm:$0xff] %vm937_vm10, %v1775_v33  ;;  %6674 = vmatprep.mubr.f32.mxu0 %v1885_v26 }
 0x3c2   :  { %6675 = vmatmul.mubr.f32.gmra.mxu0 %v1886_v28 }
 0x3c3   :  { %v1826_v2 = vpop.permute.xlu1 %1825 }
 0x3c4   :  { %v1824_v48 = vpop.permute.xlu0 %1823  ;;  %1842 = vst.msk [vmem:[#allocation3 + $0x58] sm:$0xff] %vm1668_vm12, %v1826_v2 }
 0x3c5   :  { %1841 = vst.msk [vmem:[#allocation3 + $0x50] sm:$0xff] %vm1668_vm12, %v1824_v48 }
 0x3c7   :  { %v1732_v63 = vpop.permute.xlu1 %1731 }
 0x3c8   :  { %v1730_v34 = vpop.permute.xlu0 %1729  ;;  %1746 = vst.msk [vmem:[#allocation3 + $0x68] sm:$0x1] %vm1574_vm13, %v1732_v63 }
 0x3c9   :  { %1745 = vst.msk [vmem:[#allocation3 + $0x60] sm:$0xff] %vm864_vm9, %v1730_v34 }
 0x3ca   :  { %1795 = vst.msk [vmem:[#allocation3 + $0x68] sm:$0x1] %vm1624_vm14, %v8017_v42  ;;  %v5766_v42 = vunpack.c.l.bf16 %v6107_v60 }
 0x3cb   :  { %v1830_v62 = vpop.permute.xlu1 %1829  ;;  %v1888_v49 = vld [vmem:[#allocation3 + $0x58] sm:$0xff] }
 0x3cc   :  { %v1779_v0 = vpop.permute.xlu0 %1778  ;;  %v1887_v8 = vld [vmem:[#allocation3 + $0x50] sm:$0xff]  ;;  %1844 = vst.msk [vmem:[#allocation3 + $0x68] sm:$0x1] %vm1675_vm15, %v1830_v62  ;;  %6685 = vmatprep.subr.mxu1 %v5766_v42 }
 0x3cd   :  { %1794 = vst.msk [vmem:[#allocation3 + $0x60] sm:$0xff] %vm937_vm10, %v1779_v0  ;;  %6677 = vmatprep.mubr.f32.mxu0 %v1887_v8  ;;  %6686 = vmatpush3.msra.mxu1 %v5766_v42 }
 0x3ce   :  { %6678 = vmatmul.mubr.f32.gmra.mxu0 %v1888_v49  ;;  %6687 = vmatprep.subr.mxu1 %v5763_v20 }
 0x3cf   :  { %6688 = vmatpush3.msra.mxu1 %v5763_v20 }
 0x3d0   :  { %v1828_v55 = vpop.permute.xlu0 %1827  ;;  %6689 = vmatprep.subr.mxu1 %v5762_v47 }
 0x3d1   :  { %1843 = vst.msk [vmem:[#allocation3 + $0x60] sm:$0xff] %vm1668_vm12, %v1828_v55  ;;  %6690 = vmatpush3.msra.mxu1 %v5762_v47 }
 0x3d2   :  { %6691 = vmatprep.subr.mxu1 %v5759_v46 }
 0x3d3   :  { %v1890_v9 = vld [vmem:[#allocation3 + $0x68] sm:$0xff]  ;;  %6692 = vmatpush3.msra.mxu1 %v5759_v46 }
 0x3d4   :  { %6693 = vmatprep.subr.mxu1 %v5758_v50 }
 0x3d5   :  { %6694 = vmatpush3.msra.mxu1 %v5758_v50 }
 0x3d6   :  { %6695 = vmatprep.subr.mxu1 %v5755_v19 }
 0x3d7   :  { %6696 = vmatpush3.msra.mxu1 %v5755_v19 }
 0x3d8   :  { %v1889_v51 = vld [vmem:[#allocation3 + $0x60] sm:$0xff]  ;;  %6697 = vmatprep.subr.mxu1 %v5754_v12 }
 0x3d9   :  { %6680 = vmatprep.mubr.f32.mxu0 %v1889_v51  ;;  %6698 = vmatpush3.msra.mxu1 %v5754_v12 }
 0x3da   :  { %6681 = vmatmul.mubr.f32.gmra.mxu0 %v1890_v9  ;;  %6699 = vmatprep.subr.mxu1 %v5751_v5 }
 0x3db   :  { %6700 = vmatpush3.msra.mxu1 %v5751_v5 }
 0x3dc   :  { %6701 = vmatprep.subr.mxu1 %v5750_v37 }
 0x3dd   :  { %6702 = vmatpush3.msra.mxu1 %v5750_v37 }
 0x3de   :  { %6703 = vmatprep.subr.mxu1 %v5747_v43 }
 0x3df   :  { %6704 = vmatpush3.msra.mxu1 %v5747_v43 }
 0x3e0   :  { %6705 = vmatprep.subr.mxu1 %v5746_v22 }
 0x3e1   :  { %6706 = vmatpush3.msra.mxu1 %v5746_v22 }
 0x44d   :  { %v6664_v38 = vpop.f32.mrf.mxu0 }
 0x44e   :  { %v8073_v40 = vadd.f32 %v6664_v38, %v8070_v13 }
 0x44f   :  { %v1962_v58 = vpop.f32.mrf.mxu0 }
 0x450   :  { %v2032_v14 = vmax.f32 %v8073_v40, 0.0  ;;  %v8080_v15 = vadd.f32 %v8070_v13, %v1962_v58 }
 0x452   :  { %2048 = vst.msk [vmem:[#allocation2 + $0x9] sm:$0xff] %vm753_vm8, %v2032_v14  ;;  %v2031_v41 = vmax.f32 %v8080_v15, 0.0 }
 0x454   :  { %2047 = vst.msk [vmem:[#allocation2 + $0x1] sm:$0xff] %vm753_vm8, %v2031_v41 }
 0x459   :  { %v2078_v24 = vld [vmem:[#allocation2 + $0x9] sm:$0xff] }
 0x45a   :  { %2093 = vrot.lane.b32.xlu1 %v2078_v24, %s7157_s13 }
 0x45b   :  { %v2077_v61 = vld [vmem:[#allocation2 + $0x1] sm:$0xff] }
 0x45c   :  { %v2063_v54 = vld [vmem:[#allocation2] sm:$0xff]  ;;  %v2064_v56 = vld [vmem:[#allocation2 + $0x8] sm:$0xff]  ;;  %2091 = vrot.lane.b32.xlu0 %v2077_v61, %s7157_s13  ;;  %v6667_v27 = vpop.f32.mrf.mxu0 }
 0x45d   :  { %2070 = vst.msk [vmem:[#allocation3] sm:$0xff] %vm753_vm8, %v2063_v54  ;;  %2071 = vst.msk [vmem:[#allocation3 + $0x8] sm:$0xff] %vm753_vm8, %v2064_v56  ;;  %v8105_v35 = vadd.f32 %v6667_v27, %v8070_v13  ;;  %v2119_v16 = vld [vmem:[#allocation2 + $0x2] sm:$0xff] }
 0x45e   :  { %2507 = vst.msk [vmem:[#allocation2] sm:$0x1] %vm750_vm3, %v7154_v3  ;;  %v1972_v4 = vpop.f32.mrf.mxu0 }
 0x45f   :  { %v2034_v21 = vmax.f32 %v8105_v35, 0.0  ;;  %v8109_v1 = vadd.f32 %v8070_v13, %v1972_v4 }
 0x460   :  { %2133 = vrot.lane.b32.xlu0 %v2119_v16, %s7158_s14 }
 0x461   :  { %2050 = vst.msk [vmem:[#allocation2 + $0x19] sm:$0xff] %vm753_vm8, %v2034_v21  ;;  %v2033_v29 = vmax.f32 %v8109_v1, 0.0 }
 0x463   :  { %2049 = vst.msk [vmem:[#allocation2 + $0x11] sm:$0xff] %vm753_vm8, %v2033_v29 }
 0x468   :  { %v2080_v23 = vld [vmem:[#allocation2 + $0x19] sm:$0xff] }
 0x469   :  { %2097 = vrot.lane.b32.xlu1 %v2080_v23, %s7157_s13 }
 0x46a   :  { %v2065_v44 = vld [vmem:[#allocation2 + $0x10] sm:$0xff]  ;;  %v2066_v30 = vld [vmem:[#allocation2 + $0x18] sm:$0xff] }
 0x46b   :  { %v2079_v32 = vld [vmem:[#allocation2 + $0x11] sm:$0xff]  ;;  %2072 = vst.msk [vmem:[#allocation3 + $0x10] sm:$0xff] %vm753_vm8, %v2065_v44  ;;  %2073 = vst.msk [vmem:[#allocation3 + $0x18] sm:$0xff] %vm753_vm8, %v2066_v30 }
 0x46c   :  { %2095 = vrot.lane.b32.xlu0 %v2079_v32, %s7157_s13  ;;  %v6670_v39 = vpop.f32.mrf.mxu0  ;;  %v2120_v45 = vld [vmem:[#allocation2 + $0xa] sm:$0xff]  ;;  %v2121_v10 = vld [vmem:[#allocation2 + $0x12] sm:$0xff] }
 0x46d   :  { %v8130_v6 = vadd.f32 %v6670_v39, %v8070_v13  ;;  %2135 = vrot.lane.b32.xlu1 %v2120_v45, %s7158_s14 }
 0x46e   :  { %v1982_v7 = vpop.f32.mrf.mxu0 }
 0x46f   :  { %v2036_v25 = vmax.f32 %v8130_v6, 0.0  ;;  %v8135_v59 = vadd.f32 %v8070_v13, %v1982_v7 }
 0x470   :  { %2137 = vrot.lane.b32.xlu0 %v2121_v10, %s7158_s14 }
 0x471   :  { %2052 = vst.msk [vmem:[#allocation2 + $0x29] sm:$0xff] %vm753_vm8, %v2036_v25  ;;  %v2035_v33 = vmax.f32 %v8135_v59, 0.0 }
 0x473   :  { %2051 = vst.msk [vmem:[#allocation2 + $0x21] sm:$0xff] %vm753_vm8, %v2035_v33 }
 0x476   :  { %v6673_v26 = vpop.f32.mrf.mxu0 }
 0x477   :  { %v8146_v28 = vadd.f32 %v6673_v26, %v8070_v13 }
 0x478   :  { %v1992_v2 = vpop.f32.mrf.mxu0  ;;  %v2082_v34 = vld [vmem:[#allocation2 + $0x29] sm:$0xff] }
 0x479   :  { %v2038_v48 = vmax.f32 %v8146_v28, 0.0  ;;  %v8150_v63 = vadd.f32 %v8070_v13, %v1992_v2  ;;  %v2069_v62 = vld [vmem:[#allocation2 + $0x30] sm:$0x1]  ;;  %2101 = vrot.lane.b32.xlu1 %v2082_v34, %s7157_s13 }
 0x47a   :  { %2076 = vst.msk [vmem:[#allocation3 + $0x30] sm:$0x1] %vm750_vm3, %v2069_v62  ;;  %v2081_v8 = vld [vmem:[#allocation2 + $0x21] sm:$0xff]  ;;  %v2146_v62 = vpop.permute.xlu1 %2145 }
 0x47b   :  { %2056 = vst.msk [vmem:[#allocation2 + $0x39] sm:$0xff] %vm753_vm8, %v2038_v48  ;;  %v2037_v0 = vmax.f32 %v8150_v63, 0.0  ;;  %2099 = vrot.lane.b32.xlu0 %v2081_v8, %s7157_s13  ;;  %v2068_v49 = vld [vmem:[#allocation2 + $0x28] sm:$0xff]  ;;  %v2067_v55 = vld [vmem:[#allocation2 + $0x20] sm:$0xff] }
 0x47c   :  { %v2122_v57 = vld [vmem:[#allocation2 + $0x1a] sm:$0xff]  ;;  %2075 = vst.msk [vmem:[#allocation3 + $0x28] sm:$0xff] %vm753_vm8, %v2068_v49  ;;  %2074 = vst.msk [vmem:[#allocation3 + $0x20] sm:$0xff] %vm753_vm8, %v2067_v55  ;;  %v2123_v51 = vld [vmem:[#allocation2 + $0x22] sm:$0xff] }
 0x47d   :  { %2053 = vst.msk [vmem:[#allocation2 + $0x31] sm:$0x1] %vm750_vm3, %v2037_v0  ;;  %2139 = vrot.lane.b32.xlu1 %v2122_v57, %s7158_s14 }
 0x47f   :  { %2141 = vrot.lane.b32.xlu0 %v2123_v51, %s7158_s14 }
 0x482   :  { %v6676_v9 = vpop.f32.mrf.mxu0  ;;  %v2175_v38 = vld [vmem:[#allocation2 + $0x39] sm:$0xff] }
 0x483   :  { %v2161_v58 = vld [vmem:[#allocation2 + $0x38] sm:$0xff]  ;;  %v8167_v60 = vadd.f32 %v6676_v9, %v8070_v13  ;;  %2189 = vrot.lane.b32.xlu0 %v2175_v38, %s7157_s13 }
 0x484   :  { %2168 = vst.msk [vmem:[#allocation3 + $0x38] sm:$0xff] %vm753_vm8, %v2161_v58  ;;  %v2002_v17 = vpop.f32.mrf.mxu0  ;;  %v2124_v42 = vld [vmem:[#allocation2 + $0x2a] sm:$0xff] }
 0x485   :  { %2516 = vst.msk [vmem:[#allocation2 + $0x38] sm:$0x1] %vm750_vm3, %v7154_v3  ;;  %v2040_v52 = vmax.f32 %v8167_v60, 0.0  ;;  %v8175_v53 = vadd.f32 %v8070_v13, %v2002_v17  ;;  %2143 = vrot.lane.b32.xlu1 %v2124_v42, %s7158_s14  ;;  %v2083_v47 = vld [vmem:[#allocation2 + $0x31] sm:$0x1] }
 0x487   :  { %2058 = vst.msk [vmem:[#allocation2 + $0x49] sm:$0xff] %vm753_vm8, %v2040_v52  ;;  %v2039_v20 = vmax.f32 %v8175_v53, 0.0  ;;  %2103 = vrot.lane.b32.xlu0 %v2083_v47, %s7157_s13 }
 0x489   :  { %2057 = vst.msk [vmem:[#allocation2 + $0x41] sm:$0xff] %vm753_vm8, %v2039_v20 }
 0x48e   :  { %v6679_v46 = vpop.f32.mrf.mxu0  ;;  %v2177_v50 = vld [vmem:[#allocation2 + $0x49] sm:$0xff] }
 0x48f   :  { %v8187_v24 = vadd.f32 %v6679_v46, %v8070_v13  ;;  %2193 = vrot.lane.b32.xlu1 %v2177_v50, %s7157_s13 }
 0x490   :  { %v2012_v61 = vpop.f32.mrf.mxu0  ;;  %v2176_v54 = vld [vmem:[#allocation2 + $0x41] sm:$0xff] }
 0x491   :  { %v2042_v56 = vmax.f32 %v8187_v24, 0.0  ;;  %v8192_v27 = vadd.f32 %v8070_v13, %v2012_v61  ;;  %2191 = vrot.lane.b32.xlu0 %v2176_v54, %s7157_s13  ;;  %v2163_v31 = vld [vmem:[#allocation2 + $0x48] sm:$0xff]  ;;  %v2162_v19 = vld [vmem:[#allocation2 + $0x40] sm:$0xff] }
 0x492   :  { %v2217_v4 = vld [vmem:[#allocation2 + $0x3a] sm:$0xff]  ;;  %2170 = vst.msk [vmem:[#allocation3 + $0x48] sm:$0xff] %vm753_vm8, %v2163_v31  ;;  %2169 = vst.msk [vmem:[#allocation3 + $0x40] sm:$0xff] %vm753_vm8, %v2162_v19  ;;  %v2218_v16 = vld [vmem:[#allocation2 + $0x42] sm:$0xff] }
 0x493   :  { %2060 = vst.msk [vmem:[#allocation2 + $0x59] sm:$0xff] %vm753_vm8, %v2042_v56  ;;  %v2041_v12 = vmax.f32 %v8192_v27, 0.0  ;;  %2231 = vrot.lane.b32.xlu1 %v2217_v4, %s7158_s14 }
 0x495   :  { %2059 = vst.msk [vmem:[#allocation2 + $0x51] sm:$0xff] %vm753_vm8, %v2041_v12  ;;  %2233 = vrot.lane.b32.xlu0 %v2218_v16, %s7158_s14 }
 0x49a   :  { %v6682_v18 = vpop.f32.mrf.mxu0  ;;  %v2179_v5 = vld [vmem:[#allocation2 + $0x59] sm:$0xff] }
 0x49b   :  { %v8207_v37 = vadd.f32 %v6682_v18, %v8070_v13  ;;  %2197 = vrot.lane.b32.xlu1 %v2179_v5, %s7157_s13 }
 0x49c   :  { %v2022_v36 = vpop.f32.mrf.mxu0  ;;  %v2178_v43 = vld [vmem:[#allocation2 + $0x51] sm:$0xff] }
 0x49d   :  { %v2044_v22 = vmax.f32 %v8207_v37, 0.0  ;;  %v8212_v23 = vadd.f32 %v8070_v13, %v2022_v36  ;;  %2195 = vrot.lane.b32.xlu0 %v2178_v43, %s7157_s13  ;;  %v2165_v44 = vld [vmem:[#allocation2 + $0x58] sm:$0xff]  ;;  %v2164_v30 = vld [vmem:[#allocation2 + $0x50] sm:$0xff] }
 0x49e   :  { %v2219_v32 = vld [vmem:[#allocation2 + $0x4a] sm:$0xff]  ;;  %2172 = vst.msk [vmem:[#allocation3 + $0x58] sm:$0xff] %vm753_vm8, %v2165_v44  ;;  %2171 = vst.msk [vmem:[#allocation3 + $0x50] sm:$0xff] %vm753_vm8, %v2164_v30  ;;  %v2220_v45 = vld [vmem:[#allocation2 + $0x52] sm:$0xff] }
 0x49f   :  { %2062 = vst.msk [vmem:[#allocation2 + $0x69] sm:$0x1] %vm750_vm3, %v2044_v22  ;;  %v2043_v39 = vmax.f32 %v8212_v23, 0.0  ;;  %2235 = vrot.lane.b32.xlu1 %v2219_v32, %s7158_s14 }
 0x4a1   :  { %2061 = vst.msk [vmem:[#allocation2 + $0x61] sm:$0xff] %vm753_vm8, %v2043_v39  ;;  %2237 = vrot.lane.b32.xlu0 %v2220_v45, %s7158_s14 }
 0x4a6   :  { %v2181_v13 = vld [vmem:[#allocation2 + $0x69] sm:$0x1] }
 0x4a7   :  { %2201 = vrot.lane.b32.xlu1 %v2181_v13, %s7157_s13 }
 0x4a8   :  { %v2180_v7 = vld [vmem:[#allocation2 + $0x61] sm:$0xff] }
 0x4a9   :  { %2199 = vrot.lane.b32.xlu0 %v2180_v7, %s7157_s13  ;;  %v2167_v10 = vld [vmem:[#allocation2 + $0x68] sm:$0x1]  ;;  %v2166_v26 = vld [vmem:[#allocation2 + $0x60] sm:$0xff] }
 0x4aa   :  { %v2221_v2 = vld [vmem:[#allocation2 + $0x5a] sm:$0xff]  ;;  %2174 = vst.msk [vmem:[#allocation3 + $0x68] sm:$0x1] %vm750_vm3, %v2167_v10  ;;  %v2222_v34 = vld [vmem:[#allocation2 + $0x62] sm:$0xff] }
 0x4ab   :  { %2173 = vst.msk [vmem:[#allocation3 + $0x60] sm:$0xff] %vm753_vm8, %v2166_v26  ;;  %2239 = vrot.lane.b32.xlu1 %v2221_v2, %s7158_s14 }
 0x4ad   :  { %2241 = vrot.lane.b32.xlu0 %v2222_v34, %s7158_s14 }
 0x4af   :  { %2243 = vrot.lane.b32.xlu1 %v8063_v11, %s7158_s14 }
 0x4cc   :  { %v2094_v8 = vpop.permute.xlu1 %2093 }
 0x4cd   :  { %2113 = vst.msk [vmem:[#allocation3 + $0x8] sm:$0xff] %vm864_vm9, %v2094_v8 }
 0x4ce   :  { %v2092_v49 = vpop.permute.xlu0 %2091 }
 0x4cf   :  { %2112 = vst.msk [vmem:[#allocation3] sm:$0xff] %vm864_vm9, %v2092_v49 }
 0x4d2   :  { %v2134_v55 = vpop.permute.xlu0 %2133 }
 0x4d3   :  { %2154 = vst.msk [vmem:[#allocation3] sm:$0xff] %vm937_vm10, %v2134_v55 }
 0x4da   :  { %v2283_v57 = vld [vmem:[#allocation3] sm:$0xff] }
 0x4db   :  { %6707 = vmatprep.mubr.msk.f32.mxu1 %vm1171_vm11, %v2283_v57  ;;  %v2098_v51 = vpop.permute.xlu1 %2097 }
 0x4dc   :  { %2115 = vst.msk [vmem:[#allocation3 + $0x18] sm:$0xff] %vm864_vm9, %v2098_v51 }
 0x4de   :  { %v2096_v9 = vpop.permute.xlu0 %2095 }
 0x4df   :  { %2114 = vst.msk [vmem:[#allocation3 + $0x10] sm:$0xff] %vm864_vm9, %v2096_v9  ;;  %v2136_v11 = vpop.permute.xlu1 %2135 }
 0x4e0   :  { %2155 = vst.msk [vmem:[#allocation3 + $0x8] sm:$0xff] %vm937_vm10, %v2136_v11  ;;  %v2587_v11 = vld [vmem:[#allocation2 + $0x32] sm:$0x1] }
 0x4e1   :  { %2607 = vrot.lane.b32.xlu1 %v2587_v11, %s7158_s14  ;;  %v6108_v11 = vld [vmem:[%s9431_s1 + $0xa8] sm:$0xff]  }
 0x4e2   :  { %v2138_v38 = vpop.permute.xlu0 %2137 }
 0x4e3   :  { %2156 = vst.msk [vmem:[#allocation3 + $0x10] sm:$0xff] %vm937_vm10, %v2138_v38  ;;  %v8280_v38 = vld [vmem:[%s9432_s2 + $0x3] ss:$0 sm:$0xff] }
 0x4e7   :  { %v2284_v58 = vld [vmem:[#allocation3 + $0x8] sm:$0xff] }
 0x4e8   :  { %6708 = vmatmul.mubr.msk.f32.vlgmr.msra.gmra.mxu1 %vm1171_vm11, %v2284_v58 }
 0x4ea   :  { %v2285_v17 = vld [vmem:[#allocation3 + $0x10] sm:$0xff] }
 0x4eb   :  { %6710 = vmatprep.mubr.msk.f32.mxu1 %vm1171_vm11, %v2285_v17  ;;  %v2102_v42 = vpop.permute.xlu1 %2101 }
 0x4ec   :  { %2117 = vst.msk [vmem:[#allocation3 + $0x28] sm:$0xff] %vm864_vm9, %v2102_v42 }
 0x4ed   :  { %v2100_v47 = vpop.permute.xlu0 %2099 }
 0x4ee   :  { %2116 = vst.msk [vmem:[#allocation3 + $0x20] sm:$0xff] %vm864_vm9, %v2100_v47 }
 0x4ef   :  { %v2140_v46 = vpop.permute.xlu1 %2139 }
 0x4f0   :  { %2157 = vst.msk [vmem:[#allocation3 + $0x18] sm:$0xff] %vm937_vm10, %v2140_v46 }
 0x4f1   :  { %v2142_v50 = vpop.permute.xlu0 %2141 }
 0x4f2   :  { %2158 = vst.msk [vmem:[#allocation3 + $0x20] sm:$0xff] %vm937_vm10, %v2142_v50  ;;  %v6113_v50 = vld [vmem:[%s9431_s1 + $0xd0] sm:$0xff]  }
 0x4f5   :  { %v2190_v61 = vpop.permute.xlu0 %2189 }
 0x4f6   :  { %2210 = vst.msk [vmem:[#allocation3 + $0x38] sm:$0xff] %vm864_vm9, %v2190_v61 }
 0x4f7   :  { %v2144_v54 = vpop.permute.xlu1 %2143  ;;  %v2286_v31 = vld [vmem:[#allocation3 + $0x18] sm:$0xff] }
 0x4f8   :  { %2159 = vst.msk [vmem:[#allocation3 + $0x28] sm:$0xff] %vm937_vm10, %v2144_v54  ;;  %6711 = vmatmul.mubr.msk.f32.gmra.mxu1 %vm1171_vm11, %v2286_v31  ;;  %v5791_v31 = vunpack.c.h.bf16 %v6113_v50 }
 0x4f9   :  { %v2104_v19 = vpop.permute.xlu0 %2103  ;;  %v2287_v4 = vld [vmem:[#allocation3 + $0x20] sm:$0xff] }
 0x4fa   :  { %2118 = vst.msk [vmem:[#allocation3 + $0x30] sm:$0x1] %vm1574_vm13, %v2104_v19  ;;  %6713 = vmatprep.mubr.msk.f32.mxu1 %vm1171_vm11, %v2287_v4  ;;  %6728 = vmatprep.subr.mxu0 %v5791_v31  ;;  %v5790_v4 = vunpack.c.l.bf16 %v6113_v50 }
 0x4fb   :  { %2160 = vst.msk [vmem:[#allocation3 + $0x30] sm:$0x1] %vm1624_vm14, %v2146_v62  ;;  %6729 = vmatpush3.msra.mxu0 %v5791_v31 }
 0x4fc   :  { %6730 = vmatprep.subr.mxu0 %v5790_v4 }
 0x4fd   :  { %6731 = vmatpush3.msra.mxu0 %v5790_v4 }
 0x4ff   :  { %v2288_v16 = vld [vmem:[#allocation3 + $0x28] sm:$0xff] }
 0x500   :  { %6714 = vmatmul.mubr.msk.f32.gmra.mxu1 %vm1171_vm11, %v2288_v16  ;;  %v6112_v16 = vld [vmem:[%s9431_s1 + $0xc8] sm:$0xff]  }
 0x501   :  { %v2194_v18 = vpop.permute.xlu1 %2193  ;;  %v5787_v40 = vunpack.c.h.bf16 %v6112_v16 }
 0x502   :  { %2212 = vst.msk [vmem:[#allocation3 + $0x48] sm:$0xff] %vm864_vm9, %v2194_v18  ;;  %v2289_v36 = vld [vmem:[#allocation3 + $0x30] sm:$0xff]  ;;  %v5786_v18 = vunpack.c.l.bf16 %v6112_v16 }
 0x503   :  { %v2192_v5 = vpop.permute.xlu0 %2191  ;;  %6716 = vmatprep.mubr.msk.f32.mxu1 %vm1171_vm11, %v2289_v36  ;;  %6732 = vmatprep.subr.mxu0 %v5787_v40 }
 0x504   :  { %2211 = vst.msk [vmem:[#allocation3 + $0x40] sm:$0xff] %vm864_vm9, %v2192_v5  ;;  %6733 = vmatpush3.msra.mxu0 %v5787_v40 }
 0x505   :  { %v2232_v43 = vpop.permute.xlu1 %2231  ;;  %6734 = vmatprep.subr.mxu0 %v5786_v18 }
 0x506   :  { %2252 = vst.msk [vmem:[#allocation3 + $0x38] sm:$0xff] %vm937_vm10, %v2232_v43  ;;  %6735 = vmatpush3.msra.mxu0 %v5786_v18 }
 0x507   :  { %v2234_v44 = vpop.permute.xlu0 %2233 }
 0x508   :  { %2253 = vst.msk [vmem:[#allocation3 + $0x40] sm:$0xff] %vm937_vm10, %v2234_v44 }
 0x50d   :  { %v2198_v30 = vpop.permute.xlu1 %2197  ;;  %v2290_v32 = vld [vmem:[#allocation3 + $0x38] sm:$0xff] }
 0x50e   :  { %2214 = vst.msk [vmem:[#allocation3 + $0x58] sm:$0xff] %vm864_vm9, %v2198_v30  ;;  %6717 = vmatmul.mubr.msk.f32.gmra.mxu1 %vm1171_vm11, %v2290_v32 }
 0x50f   :  { %v2196_v45 = vpop.permute.xlu0 %2195  ;;  %v2291_v13 = vld [vmem:[#allocation3 + $0x40] sm:$0xff] }
 0x510   :  { %2213 = vst.msk [vmem:[#allocation3 + $0x50] sm:$0xff] %vm864_vm9, %v2196_v45  ;;  %6719 = vmatprep.mubr.msk.f32.mxu1 %vm1171_vm11, %v2291_v13  ;;  %v6110_v45 = vld [vmem:[%s9431_s1 + $0xb8] sm:$0xff]  }
 0x511   :  { %v2236_v7 = vpop.permute.xlu1 %2235 }
 0x512   :  { %2254 = vst.msk [vmem:[#allocation3 + $0x48] sm:$0xff] %vm937_vm10, %v2236_v7  ;;  %v5779_v7 = vunpack.c.h.bf16 %v6110_v45 }
 0x513   :  { %v2238_v10 = vpop.permute.xlu0 %2237 }
 0x514   :  { %2255 = vst.msk [vmem:[#allocation3 + $0x50] sm:$0xff] %vm937_vm10, %v2238_v10 }
 0x519   :  { %v2202_v26 = vpop.permute.xlu1 %2201  ;;  %v2292_v2 = vld [vmem:[#allocation3 + $0x48] sm:$0xff] }
 0x51a   :  { %2216 = vst.msk [vmem:[#allocation3 + $0x68] sm:$0x1] %vm1574_vm13, %v2202_v26  ;;  %6720 = vmatmul.mubr.msk.f32.gmra.mxu1 %vm1171_vm11, %v2292_v2 }
 0x51b   :  { %v2200_v34 = vpop.permute.xlu0 %2199  ;;  %v2293_v62 = vld [vmem:[#allocation3 + $0x50] sm:$0xff] }
 0x51c   :  { %2215 = vst.msk [vmem:[#allocation3 + $0x60] sm:$0xff] %vm864_vm9, %v2200_v34  ;;  %6722 = vmatprep.mubr.msk.f32.mxu1 %vm1171_vm11, %v2293_v62  ;;  %v5778_v34 = vunpack.c.l.bf16 %v6110_v45 }
 0x51d   :  { %v2240_v8 = vpop.permute.xlu1 %2239 }
 0x51e   :  { %2256 = vst.msk [vmem:[#allocation3 + $0x58] sm:$0xff] %vm937_vm10, %v2240_v8 }
 0x51f   :  { %v2242_v49 = vpop.permute.xlu0 %2241 }
 0x520   :  { %2257 = vst.msk [vmem:[#allocation3 + $0x60] sm:$0xff] %vm937_vm10, %v2242_v49  ;;  %v6109_v49 = vld [vmem:[%s9431_s1 + $0xb0] sm:$0xff]  }
 0x521   :  { %v2244_v55 = vpop.permute.xlu1 %2243 }
 0x522   :  { %2258 = vst.msk [vmem:[#allocation3 + $0x68] sm:$0x1] %vm1624_vm14, %v2244_v55  ;;  %v5775_v55 = vunpack.c.h.bf16 %v6109_v49 }
 0x525   :  { %v2294_v57 = vld [vmem:[#allocation3 + $0x58] sm:$0xff] }
 0x526   :  { %6723 = vmatmul.mubr.msk.f32.gmra.mxu1 %vm1171_vm11, %v2294_v57 }
 0x527   :  { %v2295_v51 = vld [vmem:[#allocation3 + $0x60] sm:$0xff] }
 0x528   :  { %6725 = vmatprep.mubr.msk.f32.mxu1 %vm1171_vm11, %v2295_v51  ;;  %v5774_v51 = vunpack.c.l.bf16 %v6109_v49 }
 0x529   :  { %v2296_v9 = vld [vmem:[#allocation3 + $0x68] sm:$0xff] }
 0x52a   :  { %6726 = vmatmul.mubr.msk.f32.gmra.mxu1 %vm1171_vm11, %v2296_v9 }
 0x5a8   :  { %v6709_v58 = vpop.f32.mrf.mxu1 }
 0x5a9   :  { %v2416_v17 = vadd.f32 %v6709_v58, %v8280_v38 }
 0x5aa   :  { %v2410_v42 = vpop.f32.mrf.mxu1 }
 0x5ab   :  { %v2480_v47 = vmax.f32 %v2416_v17, 0.0  ;;  %v2411_v46 = vadd.f32 %v8280_v38, %v2410_v42 }
 0x5ad   :  { %v8289_v61 = vadd.f32 %v2480_v47, %v2032_v14  ;;  %v2479_v54 = vmax.f32 %v2411_v46, 0.0  ;;  %v6111_v14 = vld [vmem:[%s9431_s1 + $0xc0] sm:$0xff]   ;;  %v5770_v47 = vunpack.c.l.bf16 %v6108_v11 }
 0x5ae   :  { %v5783_v15 = vunpack.c.h.bf16 %v6111_v14  ;;  %v5782_v5 = vunpack.c.l.bf16 %v6111_v14 }
 0x5af   :  { %2510 = vst.msk [vmem:[#allocation2 + $0x9] sm:$0xff] %vm753_vm8, %v8289_v61  ;;  %v8295_v19 = vadd.f32 %v2479_v54, %v2031_v41 }
 0x5b0   :  { %6736 = vmatprep.subr.mxu0 %v5783_v15 }
 0x5b1   :  { %2509 = vst.msk [vmem:[#allocation2 + $0x1] sm:$0xff] %vm753_vm8, %v8295_v19  ;;  %6737 = vmatpush3.msra.mxu0 %v5783_v15 }
 0x5b2   :  { %6738 = vmatprep.subr.mxu0 %v5782_v5 }
 0x5b3   :  { %6739 = vmatpush3.msra.mxu0 %v5782_v5 }
 0x5b4   :  { %6740 = vmatprep.subr.mxu0 %v5779_v7 }
 0x5b5   :  { %6741 = vmatpush3.msra.mxu0 %v5779_v7 }
 0x5b6   :  { %v2540_v41 = vld [vmem:[#allocation2 + $0x9] sm:$0xff]  ;;  %6742 = vmatprep.subr.mxu0 %v5778_v34 }
 0x5b7   :  { %2555 = vrot.lane.b32.xlu1 %v2540_v41, %s7157_s13  ;;  %6743 = vmatpush3.msra.mxu0 %v5778_v34 }
 0x5b8   :  { %v6712_v36 = vpop.f32.mrf.mxu1  ;;  %v2539_v43 = vld [vmem:[#allocation2 + $0x1] sm:$0xff]  ;;  %6744 = vmatprep.subr.mxu0 %v5775_v55 }
 0x5b9   :  { %v2525_v44 = vld [vmem:[#allocation2] sm:$0xff]  ;;  %v2526_v30 = vld [vmem:[#allocation2 + $0x8] sm:$0xff]  ;;  %v2426_v32 = vadd.f32 %v6712_v36, %v8280_v38  ;;  %2553 = vrot.lane.b32.xlu0 %v2539_v43, %s7157_s13  ;;  %6745 = vmatpush3.msra.mxu0 %v5775_v55 }
 0x5ba   :  { %2969 = vst.msk [vmem:[#allocation2] sm:$0x3] %vm1477_vm7, %v7154_v3  ;;  %v2420_v13 = vpop.f32.mrf.mxu1  ;;  %v2581_v2 = vld [vmem:[#allocation2 + $0x2] sm:$0xff]  ;;  %6746 = vmatprep.subr.mxu0 %v5774_v51 }
 0x5bb   :  { %2532 = vst.msk [vmem:[#allocation3] sm:$0xff] %vm753_vm8, %v2525_v44  ;;  %2533 = vst.msk [vmem:[#allocation3 + $0x8] sm:$0xff] %vm753_vm8, %v2526_v30  ;;  %v2482_v10 = vmax.f32 %v2426_v32, 0.0  ;;  %v2421_v26 = vadd.f32 %v8280_v38, %v2420_v13  ;;  %6747 = vmatpush3.msra.mxu0 %v5774_v51 }
 0x5bd   :  { %v8318_v62 = vadd.f32 %v2482_v10, %v2034_v21  ;;  %v2481_v8 = vmax.f32 %v2421_v26, 0.0  ;;  %2595 = vrot.lane.b32.xlu0 %v2581_v2, %s7158_s14 }
 0x5bf   :  { %2512 = vst.msk [vmem:[#allocation2 + $0x19] sm:$0xff] %vm753_vm8, %v8318_v62  ;;  %v8328_v57 = vadd.f32 %v2481_v8, %v2033_v29  ;;  %v5771_v29 = vunpack.c.h.bf16 %v6108_v11 }
 0x5c0   :  { %v6715_v35 = vpop.f32.mrf.mxu1 }
 0x5c1   :  { %v2436_v21 = vadd.f32 %v6715_v35, %v8280_v38  ;;  %2511 = vst.msk [vmem:[#allocation2 + $0x11] sm:$0xff] %vm753_vm8, %v8328_v57  ;;  %6748 = vmatprep.subr.mxu0 %v5771_v29 }
 0x5c2   :  { %v2430_v9 = vpop.f32.mrf.mxu1  ;;  %6749 = vmatpush3.msra.mxu0 %v5771_v29 }
 0x5c3   :  { %v2484_v58 = vmax.f32 %v2436_v21, 0.0  ;;  %v2431_v1 = vadd.f32 %v8280_v38, %v2430_v9  ;;  %6750 = vmatprep.subr.mxu0 %v5770_v47 }
 0x5c4   :  { %6751 = vmatpush3.msra.mxu0 %v5770_v47 }
 0x5c5   :  { %v8339_v17 = vadd.f32 %v2484_v58, %v2036_v25  ;;  %v2483_v42 = vmax.f32 %v2431_v1, 0.0 }
 0x5c6   :  { %v2542_v50 = vld [vmem:[#allocation2 + $0x19] sm:$0xff] }
 0x5c7   :  { %2514 = vst.msk [vmem:[#allocation2 + $0x29] sm:$0xff] %vm753_vm8, %v8339_v17  ;;  %v8345_v46 = vadd.f32 %v2483_v42, %v2035_v33  ;;  %2559 = vrot.lane.b32.xlu1 %v2542_v50, %s7157_s13 }
 0x5c8   :  { %v2527_v6 = vld [vmem:[#allocation2 + $0x10] sm:$0xff]  ;;  %v2528_v25 = vld [vmem:[#allocation2 + $0x18] sm:$0xff] }
 0x5c9   :  { %2513 = vst.msk [vmem:[#allocation2 + $0x21] sm:$0xff] %vm753_vm8, %v8345_v46  ;;  %v2541_v54 = vld [vmem:[#allocation2 + $0x11] sm:$0xff]  ;;  %2534 = vst.msk [vmem:[#allocation3 + $0x10] sm:$0xff] %vm753_vm8, %v2527_v6 }
 0x5ca   :  { %2557 = vrot.lane.b32.xlu0 %v2541_v54, %s7157_s13  ;;  %2535 = vst.msk [vmem:[#allocation3 + $0x18] sm:$0xff] %vm753_vm8, %v2528_v25  ;;  %v2582_v59 = vld [vmem:[#allocation2 + $0xa] sm:$0xff]  ;;  %v2583_v33 = vld [vmem:[#allocation2 + $0x12] sm:$0xff] }
 0x5cb   :  { %2597 = vrot.lane.b32.xlu1 %v2582_v59, %s7158_s14 }
 0x5ce   :  { %v6718_v31 = vpop.f32.mrf.mxu1  ;;  %2599 = vrot.lane.b32.xlu0 %v2583_v33, %s7158_s14  ;;  %v2544_v4 = vld [vmem:[#allocation2 + $0x29] sm:$0xff] }
 0x5cf   :  { %v2531_v16 = vld [vmem:[#allocation2 + $0x30] sm:$0x1]  ;;  %v2446_v40 = vadd.f32 %v6718_v31, %v8280_v38  ;;  %2563 = vrot.lane.b32.xlu1 %v2544_v4, %s7157_s13 }
 0x5d0   :  { %2538 = vst.msk [vmem:[#allocation3 + $0x30] sm:$0x1] %vm750_vm3, %v2531_v16  ;;  %v2440_v14 = vpop.f32.mrf.mxu1  ;;  %v2543_v18 = vld [vmem:[#allocation2 + $0x21] sm:$0xff] }
 0x5d1   :  { %v2486_v15 = vmax.f32 %v2446_v40, 0.0  ;;  %v2441_v41 = vadd.f32 %v8280_v38, %v2440_v14  ;;  %v2530_v5 = vld [vmem:[#allocation2 + $0x28] sm:$0xff]  ;;  %v2529_v36 = vld [vmem:[#allocation2 + $0x20] sm:$0xff] }
 0x5d2   :  { %2561 = vrot.lane.b32.xlu0 %v2543_v18, %s7157_s13  ;;  %2537 = vst.msk [vmem:[#allocation3 + $0x28] sm:$0xff] %vm753_vm8, %v2530_v5  ;;  %2536 = vst.msk [vmem:[#allocation3 + $0x20] sm:$0xff] %vm753_vm8, %v2529_v36  ;;  %v2584_v30 = vld [vmem:[#allocation2 + $0x1a] sm:$0xff]  ;;  %v2585_v45 = vld [vmem:[#allocation2 + $0x22] sm:$0xff]  ;;  %v2608_v18 = vpop.permute.xlu1 %2607 }
 0x5d3   :  { %v8364_v43 = vadd.f32 %v2486_v15, %v2038_v48  ;;  %v2485_v44 = vmax.f32 %v2441_v41, 0.0  ;;  %2601 = vrot.lane.b32.xlu1 %v2584_v30, %s7158_s14  ;;  %v2685_v14 = vld [vmem:[#allocation2 + $0x6a] sm:$0x1] }
 0x5d5   :  { %2518 = vst.msk [vmem:[#allocation2 + $0x39] sm:$0xff] %vm753_vm8, %v8364_v43  ;;  %v8371_v32 = vadd.f32 %v2485_v44, %v2037_v0 }
 0x5d6   :  { %2603 = vrot.lane.b32.xlu0 %v2585_v45, %s7158_s14 }
 0x5d7   :  { %2515 = vst.msk [vmem:[#allocation2 + $0x31] sm:$0x1] %vm750_vm3, %v8371_v32 }
 0x5da   :  { %v6721_v28 = vpop.f32.mrf.mxu1 }
 0x5db   :  { %v2456_v48 = vadd.f32 %v6721_v28, %v8280_v38 }
 0x5dc   :  { %v2450_v13 = vpop.f32.mrf.mxu1  ;;  %v2637_v7 = vld [vmem:[#allocation2 + $0x39] sm:$0xff] }
 0x5dd   :  { %v2623_v10 = vld [vmem:[#allocation2 + $0x38] sm:$0xff]  ;;  %v2488_v26 = vmax.f32 %v2456_v48, 0.0  ;;  %v2451_v2 = vadd.f32 %v8280_v38, %v2450_v13  ;;  %2651 = vrot.lane.b32.xlu0 %v2637_v7, %s7157_s13 }
 0x5de   :  { %2630 = vst.msk [vmem:[#allocation3 + $0x38] sm:$0xff] %vm753_vm8, %v2623_v10  ;;  %v2586_v63 = vld [vmem:[#allocation2 + $0x2a] sm:$0xff] }
 0x5df   :  { %2978 = vst.msk [vmem:[#allocation2 + $0x38] sm:$0x3] %vm1477_vm7, %v7154_v3  ;;  %v8384_v0 = vadd.f32 %v2488_v26, %v2040_v52  ;;  %v2487_v34 = vmax.f32 %v2451_v2, 0.0  ;;  %2605 = vrot.lane.b32.xlu1 %v2586_v63, %s7158_s14  ;;  %v2545_v8 = vld [vmem:[#allocation2 + $0x31] sm:$0x1] }
 0x5e1   :  { %2520 = vst.msk [vmem:[#allocation2 + $0x49] sm:$0xff] %vm753_vm8, %v8384_v0  ;;  %v8391_v49 = vadd.f32 %v2487_v34, %v2039_v20  ;;  %2565 = vrot.lane.b32.xlu0 %v2545_v8, %s7157_s13 }
 0x5e3   :  { %2519 = vst.msk [vmem:[#allocation2 + $0x41] sm:$0xff] %vm753_vm8, %v8391_v49 }
 0x5e6   :  { %v6724_v55 = vpop.f32.mrf.mxu1 }
 0x5e7   :  { %v2466_v60 = vadd.f32 %v6724_v55, %v8280_v38 }
 0x5e8   :  { %v2460_v52 = vpop.f32.mrf.mxu1  ;;  %v2639_v35 = vld [vmem:[#allocation2 + $0x49] sm:$0xff] }
 0x5e9   :  { %v2490_v21 = vmax.f32 %v2466_v60, 0.0  ;;  %v2461_v51 = vadd.f32 %v8280_v38, %v2460_v52  ;;  %2655 = vrot.lane.b32.xlu1 %v2639_v35, %s7157_s13 }
 0x5ea   :  { %v6727_v9 = vpop.f32.mrf.mxu1  ;;  %v2638_v11 = vld [vmem:[#allocation2 + $0x41] sm:$0xff] }
 0x5eb   :  { %v8401_v53 = vadd.f32 %v2490_v21, %v2042_v56  ;;  %v2489_v20 = vmax.f32 %v2461_v51, 0.0  ;;  %v2476_v58 = vadd.f32 %v6727_v9, %v8280_v38  ;;  %2653 = vrot.lane.b32.xlu0 %v2638_v11, %s7157_s13  ;;  %v2625_v1 = vld [vmem:[#allocation2 + $0x48] sm:$0xff]  ;;  %v2624_v29 = vld [vmem:[#allocation2 + $0x40] sm:$0xff] }
 0x5ec   :  { %v2470_v42 = vpop.f32.mrf.mxu1  ;;  %v2679_v47 = vld [vmem:[#allocation2 + $0x3a] sm:$0xff]  ;;  %2632 = vst.msk [vmem:[#allocation3 + $0x48] sm:$0xff] %vm753_vm8, %v2625_v1  ;;  %2631 = vst.msk [vmem:[#allocation3 + $0x40] sm:$0xff] %vm753_vm8, %v2624_v29  ;;  %v2680_v6 = vld [vmem:[#allocation2 + $0x42] sm:$0xff] }
 0x5ed   :  { %2522 = vst.msk [vmem:[#allocation2 + $0x59] sm:$0xff] %vm753_vm8, %v8401_v53  ;;  %v8411_v24 = vadd.f32 %v2489_v20, %v2041_v12  ;;  %v2492_v56 = vmax.f32 %v2476_v58, 0.0  ;;  %v2471_v50 = vadd.f32 %v8280_v38, %v2470_v42  ;;  %2693 = vrot.lane.b32.xlu1 %v2679_v47, %s7158_s14 }
 0x5ef   :  { %2521 = vst.msk [vmem:[#allocation2 + $0x51] sm:$0xff] %vm753_vm8, %v8411_v24  ;;  %v8419_v25 = vadd.f32 %v2492_v56, %v2044_v22  ;;  %v2491_v54 = vmax.f32 %v2471_v50, 0.0  ;;  %2695 = vrot.lane.b32.xlu0 %v2680_v6, %s7158_s14 }
 0x5f1   :  { %2524 = vst.msk [vmem:[#allocation2 + $0x69] sm:$0x1] %vm750_vm3, %v8419_v25  ;;  %v8426_v27 = vadd.f32 %v2491_v54, %v2043_v39 }
 0x5f3   :  { %2523 = vst.msk [vmem:[#allocation2 + $0x61] sm:$0xff] %vm753_vm8, %v8426_v27 }
 0x5f4   :  { %v2641_v12 = vld [vmem:[#allocation2 + $0x59] sm:$0xff] }
 0x5f5   :  { %2659 = vrot.lane.b32.xlu1 %v2641_v12, %s7157_s13 }
 0x5f6   :  { %v2640_v38 = vld [vmem:[#allocation2 + $0x51] sm:$0xff] }
 0x5f7   :  { %2657 = vrot.lane.b32.xlu0 %v2640_v38, %s7157_s13  ;;  %v2627_v37 = vld [vmem:[#allocation2 + $0x58] sm:$0xff]  ;;  %v2626_v22 = vld [vmem:[#allocation2 + $0x50] sm:$0xff] }
 0x5f8   :  { %v2681_v59 = vld [vmem:[#allocation2 + $0x4a] sm:$0xff]  ;;  %2634 = vst.msk [vmem:[#allocation3 + $0x58] sm:$0xff] %vm753_vm8, %v2627_v37  ;;  %2633 = vst.msk [vmem:[#allocation3 + $0x50] sm:$0xff] %vm753_vm8, %v2626_v22  ;;  %v2682_v23 = vld [vmem:[#allocation2 + $0x52] sm:$0xff] }
 0x5f9   :  { %2697 = vrot.lane.b32.xlu1 %v2681_v59, %s7158_s14  ;;  %v2643_v31 = vld [vmem:[#allocation2 + $0x69] sm:$0x1] }
 0x5fa   :  { %v2629_v39 = vld [vmem:[#allocation2 + $0x68] sm:$0x1]  ;;  %v2628_v33 = vld [vmem:[#allocation2 + $0x60] sm:$0xff] }
 0x5fb   :  { %2699 = vrot.lane.b32.xlu0 %v2682_v23, %s7158_s14  ;;  %2636 = vst.msk [vmem:[#allocation3 + $0x68] sm:$0x1] %vm750_vm3, %v2629_v39  ;;  %v2642_v4 = vld [vmem:[#allocation2 + $0x61] sm:$0xff]  ;;  %v3046_v39 = vld [vmem:[#allocation2 + $0x33] ss:$2 sm:$0x1] }
 0x5fc   :  { %2635 = vst.msk [vmem:[#allocation3 + $0x60] sm:$0xff] %vm753_vm8, %v2628_v33  ;;  %v2683_v16 = vld [vmem:[#allocation2 + $0x5a] sm:$0xff]  ;;  %v2684_v40 = vld [vmem:[#allocation2 + $0x62] sm:$0xff]  ;;  %v6121_v33 = vld [vmem:[%s9431_s1 + $0x110] sm:$0xff]  }
 0x5fd   :  { %2663 = vrot.lane.b32.xlu1 %v2643_v31, %s7157_s13  ;;  %v6120_v31 = vld [vmem:[%s9431_s1 + $0x108] sm:$0xff]  }
 0x5ff   :  { %2661 = vrot.lane.b32.xlu0 %v2642_v4, %s7157_s13  ;;  %v5823_v4 = vunpack.c.h.bf16 %v6121_v33 }
 0x601   :  { %2701 = vrot.lane.b32.xlu1 %v2683_v16, %s7158_s14  ;;  %v5822_v16 = vunpack.c.l.bf16 %v6121_v33  ;;  %6773 = vmatprep.subr.mxu1 %v5823_v4 }
 0x602   :  { %6774 = vmatpush3.msra.mxu1 %v5823_v4 }
 0x603   :  { %2703 = vrot.lane.b32.xlu0 %v2684_v40, %s7158_s14  ;;  %v5819_v40 = vunpack.c.h.bf16 %v6120_v31  ;;  %6775 = vmatprep.subr.mxu1 %v5822_v16 }
 0x604   :  { %6776 = vmatpush3.msra.mxu1 %v5822_v16 }
 0x605   :  { %2705 = vrot.lane.b32.xlu1 %v2685_v14, %s7158_s14  ;;  %v5818_v14 = vunpack.c.l.bf16 %v6120_v31  ;;  %6777 = vmatprep.subr.mxu1 %v5819_v40 }
 0x606   :  { %6778 = vmatpush3.msra.mxu1 %v5819_v40 }
 0x607   :  { %6779 = vmatprep.subr.mxu1 %v5818_v14 }
 0x608   :  { %6780 = vmatpush3.msra.mxu1 %v5818_v14 }
 0x609   :  { %3057 = vrot.lane.b32.xlu1 %v3046_v39, %s7159_s27 }
 0x629   :  { %v2556_v15 = vpop.permute.xlu1 %2555 }
 0x62a   :  { %2575 = vst.msk [vmem:[#allocation3 + $0x8] sm:$0xff] %vm864_vm9, %v2556_v15 }
 0x62b   :  { %v2554_v41 = vpop.permute.xlu0 %2553 }
 0x62c   :  { %2574 = vst.msk [vmem:[#allocation3] sm:$0xff] %vm864_vm9, %v2554_v41 }
 0x62f   :  { %v2596_v5 = vpop.permute.xlu0 %2595 }
 0x630   :  { %2616 = vst.msk [vmem:[#allocation3] sm:$0xff] %vm937_vm10, %v2596_v5 }
 0x637   :  { %v2745_v36 = vld [vmem:[#allocation3] sm:$0xff] }
 0x638   :  { %6752 = vmatprep.mubr.msk.f32.mxu0 %vm1171_vm11, %v2745_v36 }
 0x639   :  { %v2560_v44 = vpop.permute.xlu1 %2559 }
 0x63a   :  { %2577 = vst.msk [vmem:[#allocation3 + $0x18] sm:$0xff] %vm864_vm9, %v2560_v44 }
 0x63c   :  { %v2558_v30 = vpop.permute.xlu0 %2557 }
 0x63d   :  { %2576 = vst.msk [vmem:[#allocation3 + $0x10] sm:$0xff] %vm864_vm9, %v2558_v30  ;;  %v2598_v45 = vpop.permute.xlu1 %2597  ;;  %v6119_v30 = vld [vmem:[%s9431_s1 + $0x100] sm:$0xff]  }
 0x63e   :  { %2617 = vst.msk [vmem:[#allocation3 + $0x8] sm:$0xff] %vm937_vm10, %v2598_v45  ;;  %v5815_v45 = vunpack.c.h.bf16 %v6119_v30 }
 0x640   :  { %v2600_v28 = vpop.permute.xlu0 %2599  ;;  %6781 = vmatprep.subr.mxu1 %v5815_v45 }
 0x641   :  { %2618 = vst.msk [vmem:[#allocation3 + $0x10] sm:$0xff] %vm937_vm10, %v2600_v28  ;;  %v2564_v48 = vpop.permute.xlu1 %2563  ;;  %v5814_v28 = vunpack.c.l.bf16 %v6119_v30  ;;  %6782 = vmatpush3.msra.mxu1 %v5815_v45 }
 0x642   :  { %2579 = vst.msk [vmem:[#allocation3 + $0x28] sm:$0xff] %vm864_vm9, %v2564_v48 }
 0x643   :  { %6783 = vmatprep.subr.mxu1 %v5814_v28 }
 0x644   :  { %v2562_v13 = vpop.permute.xlu0 %2561  ;;  %6784 = vmatpush3.msra.mxu1 %v5814_v28 }
 0x645   :  { %2578 = vst.msk [vmem:[#allocation3 + $0x20] sm:$0xff] %vm864_vm9, %v2562_v13  ;;  %v2602_v7 = vpop.permute.xlu1 %2601  ;;  %v2746_v10 = vld [vmem:[#allocation3 + $0x8] sm:$0xff] }
 0x646   :  { %2619 = vst.msk [vmem:[#allocation3 + $0x18] sm:$0xff] %vm937_vm10, %v2602_v7  ;;  %6753 = vmatmul.mubr.msk.f32.vlgmr.msra.gmra.mxu0 %vm1171_vm11, %v2746_v10  ;;  %v6118_v10 = vld [vmem:[%s9431_s1 + $0xf8] sm:$0xff]  }
 0x648   :  { %v2604_v26 = vpop.permute.xlu0 %2603  ;;  %v2747_v2 = vld [vmem:[#allocation3 + $0x10] sm:$0xff] }
 0x649   :  { %2620 = vst.msk [vmem:[#allocation3 + $0x20] sm:$0xff] %vm937_vm10, %v2604_v26  ;;  %6755 = vmatprep.mubr.msk.f32.mxu0 %vm1171_vm11, %v2747_v2  ;;  %v5811_v2 = vunpack.c.h.bf16 %v6118_v10 }
 0x64b   :  { %6785 = vmatprep.subr.mxu1 %v5811_v2 }
 0x64c   :  { %6786 = vmatpush3.msra.mxu1 %v5811_v2 }
 0x64d   :  { %v2748_v63 = vld [vmem:[#allocation3 + $0x18] sm:$0xff] }
 0x64e   :  { %6756 = vmatmul.mubr.msk.f32.gmra.mxu0 %vm1171_vm11, %v2748_v63  ;;  %v5810_v63 = vunpack.c.l.bf16 %v6118_v10 }
 0x64f   :  { %v2652_v34 = vpop.permute.xlu0 %2651 }
 0x650   :  { %2672 = vst.msk [vmem:[#allocation3 + $0x38] sm:$0xff] %vm864_vm9, %v2652_v34  ;;  %v2749_v8 = vld [vmem:[#allocation3 + $0x20] sm:$0xff]  ;;  %6787 = vmatprep.subr.mxu1 %v5810_v63 }
 0x651   :  { %v2606_v55 = vpop.permute.xlu1 %2605  ;;  %6758 = vmatprep.mubr.msk.f32.mxu0 %vm1171_vm11, %v2749_v8  ;;  %6788 = vmatpush3.msra.mxu1 %v5810_v63 }
 0x652   :  { %2621 = vst.msk [vmem:[#allocation3 + $0x28] sm:$0xff] %vm937_vm10, %v2606_v55 }
 0x653   :  { %v2566_v60 = vpop.permute.xlu0 %2565 }
 0x654   :  { %2580 = vst.msk [vmem:[#allocation3 + $0x30] sm:$0x1] %vm1574_vm13, %v2566_v60 }
 0x655   :  { %2622 = vst.msk [vmem:[#allocation3 + $0x30] sm:$0x1] %vm1624_vm14, %v2608_v18  ;;  %v8495_v18 = vld [vmem:[%s9432_s2 + $0x4] ss:$0 sm:$0xff] }
 0x659   :  { %v2750_v52 = vld [vmem:[#allocation3 + $0x28] sm:$0xff] }
 0x65a   :  { %6759 = vmatmul.mubr.msk.f32.gmra.mxu0 %vm1171_vm11, %v2750_v52 }
 0x65b   :  { %v2656_v35 = vpop.permute.xlu1 %2655 }
 0x65c   :  { %2674 = vst.msk [vmem:[#allocation3 + $0x48] sm:$0xff] %vm864_vm9, %v2656_v35  ;;  %v2751_v21 = vld [vmem:[#allocation3 + $0x30] sm:$0xff] }
 0x65d   :  { %v2654_v51 = vpop.permute.xlu0 %2653  ;;  %6761 = vmatprep.mubr.msk.f32.mxu0 %vm1171_vm11, %v2751_v21 }
 0x65e   :  { %2673 = vst.msk [vmem:[#allocation3 + $0x40] sm:$0xff] %vm864_vm9, %v2654_v51 }
 0x65f   :  { %v2694_v9 = vpop.permute.xlu1 %2693 }
 0x660   :  { %2714 = vst.msk [vmem:[#allocation3 + $0x38] sm:$0xff] %vm937_vm10, %v2694_v9  ;;  %v6116_v9 = vld [vmem:[%s9431_s1 + $0xe8] sm:$0xff]  }
 0x661   :  { %v2696_v11 = vpop.permute.xlu0 %2695 }
 0x662   :  { %2715 = vst.msk [vmem:[#allocation3 + $0x40] sm:$0xff] %vm937_vm10, %v2696_v11 }
 0x667   :  { %v2660_v20 = vpop.permute.xlu1 %2659  ;;  %v2752_v58 = vld [vmem:[#allocation3 + $0x38] sm:$0xff] }
 0x668   :  { %2676 = vst.msk [vmem:[#allocation3 + $0x58] sm:$0xff] %vm864_vm9, %v2660_v20  ;;  %6762 = vmatmul.mubr.msk.f32.gmra.mxu0 %vm1171_vm11, %v2752_v58  ;;  %v5803_v58 = vunpack.c.h.bf16 %v6116_v9 }
 0x669   :  { %v2658_v1 = vpop.permute.xlu0 %2657  ;;  %v2753_v29 = vld [vmem:[#allocation3 + $0x40] sm:$0xff] }
 0x66a   :  { %2675 = vst.msk [vmem:[#allocation3 + $0x50] sm:$0xff] %vm864_vm9, %v2658_v1  ;;  %6764 = vmatprep.mubr.msk.f32.mxu0 %vm1171_vm11, %v2753_v29  ;;  %v5802_v1 = vunpack.c.l.bf16 %v6116_v9 }
 0x66b   :  { %v2698_v42 = vpop.permute.xlu1 %2697 }
 0x66c   :  { %2716 = vst.msk [vmem:[#allocation3 + $0x48] sm:$0xff] %vm937_vm10, %v2698_v42 }
 0x66d   :  { %v2700_v47 = vpop.permute.xlu0 %2699 }
 0x66e   :  { %2717 = vst.msk [vmem:[#allocation3 + $0x50] sm:$0xff] %vm937_vm10, %v2700_v47 }
 0x66f   :  { %v2664_v56 = vpop.permute.xlu1 %2663 }
 0x670   :  { %2678 = vst.msk [vmem:[#allocation3 + $0x68] sm:$0x1] %vm1574_vm13, %v2664_v56 }
 0x671   :  { %v2662_v50 = vpop.permute.xlu0 %2661 }
 0x672   :  { %2677 = vst.msk [vmem:[#allocation3 + $0x60] sm:$0xff] %vm864_vm9, %v2662_v50 }
 0x673   :  { %v2702_v6 = vpop.permute.xlu1 %2701  ;;  %v2754_v54 = vld [vmem:[#allocation3 + $0x48] sm:$0xff] }
 0x674   :  { %2718 = vst.msk [vmem:[#allocation3 + $0x58] sm:$0xff] %vm937_vm10, %v2702_v6  ;;  %6765 = vmatmul.mubr.msk.f32.gmra.mxu0 %vm1171_vm11, %v2754_v54 }
 0x675   :  { %v2704_v12 = vpop.permute.xlu0 %2703  ;;  %v2755_v38 = vld [vmem:[#allocation3 + $0x50] sm:$0xff] }
 0x676   :  { %2719 = vst.msk [vmem:[#allocation3 + $0x60] sm:$0xff] %vm937_vm10, %v2704_v12  ;;  %6767 = vmatprep.mubr.msk.f32.mxu0 %vm1171_vm11, %v2755_v38  ;;  %v6114_v38 = vld [vmem:[%s9431_s1 + $0xd8] sm:$0xff]  }
 0x677   :  { %v2706_v37 = vpop.permute.xlu1 %2705  ;;  %v5795_v39 = vunpack.c.h.bf16 %v6114_v38  ;;  %v5794_v4 = vunpack.c.l.bf16 %v6114_v38 }
 0x678   :  { %2720 = vst.msk [vmem:[#allocation3 + $0x68] sm:$0x1] %vm1624_vm14, %v2706_v37 }
 0x67b   :  { %v2756_v22 = vld [vmem:[#allocation3 + $0x58] sm:$0xff] }
 0x67c   :  { %6768 = vmatmul.mubr.msk.f32.gmra.mxu0 %vm1171_vm11, %v2756_v22 }
 0x67d   :  { %v2757_v59 = vld [vmem:[#allocation3 + $0x60] sm:$0xff] }
 0x67e   :  { %6770 = vmatprep.mubr.msk.f32.mxu0 %vm1171_vm11, %v2757_v59 }
 0x67f   :  { %v2758_v23 = vld [vmem:[#allocation3 + $0x68] sm:$0xff] }
 0x680   :  { %6771 = vmatmul.mubr.msk.f32.gmra.mxu0 %vm1171_vm11, %v2758_v23 }
 0x706   :  { %v6754_v15 = vpop.f32.mrf.mxu0 }
 0x707   :  { %v2878_v41 = vadd.f32 %v6754_v15, %v8495_v18 }
 0x708   :  { %v2872_v5 = vpop.f32.mrf.mxu0 }
 0x709   :  { %v2942_v36 = vmax.f32 %v2878_v41, 0.0  ;;  %v2873_v44 = vadd.f32 %v8495_v18, %v2872_v5 }
 0x70b   :  { %v2956_v48 = vadd.f32 %v2942_v36, %v8289_v61  ;;  %v2941_v13 = vmax.f32 %v2873_v44, 0.0 }
 0x70d   :  { %2972 = vst.msk [vmem:[#allocation2 + $0xa] sm:$0xff] %vm753_vm8, %v2956_v48  ;;  %v2955_v7 = vadd.f32 %v2941_v13, %v8295_v19  ;;  %v6117_v19 = vld [vmem:[%s9431_s1 + $0xf0] sm:$0xff]  }
 0x70e   :  { %v6757_v26 = vpop.f32.mrf.mxu0  ;;  %v5807_v60 = vunpack.c.h.bf16 %v6117_v19  ;;  %v5806_v52 = vunpack.c.l.bf16 %v6117_v19 }
 0x70f   :  { %2971 = vst.msk [vmem:[#allocation2 + $0x2] sm:$0xff] %vm753_vm8, %v2955_v7  ;;  %v2888_v34 = vadd.f32 %v6757_v26, %v8495_v18 }
 0x710   :  { %v2882_v61 = vpop.f32.mrf.mxu0  ;;  %6789 = vmatprep.subr.mxu1 %v5807_v60 }
 0x711   :  { %v2944_v8 = vmax.f32 %v2888_v34, 0.0  ;;  %v2883_v55 = vadd.f32 %v8495_v18, %v2882_v61  ;;  %6790 = vmatpush3.msra.mxu1 %v5807_v60 }
 0x712   :  { %6791 = vmatprep.subr.mxu1 %v5806_v52 }
 0x713   :  { %v2958_v35 = vadd.f32 %v2944_v8, %v8318_v62  ;;  %v2943_v21 = vmax.f32 %v2883_v55, 0.0  ;;  %6792 = vmatpush3.msra.mxu1 %v5806_v52 }
 0x714   :  { %6793 = vmatprep.subr.mxu1 %v5803_v58 }
 0x715   :  { %2974 = vst.msk [vmem:[#allocation2 + $0x1a] sm:$0xff] %vm753_vm8, %v2958_v35  ;;  %v2957_v51 = vadd.f32 %v2943_v21, %v8328_v57  ;;  %6794 = vmatpush3.msra.mxu1 %v5803_v58  ;;  %v6115_v57 = vld [vmem:[%s9431_s1 + $0xe0] sm:$0xff]  }
 0x716   :  { %v2987_v11 = vld [vmem:[#allocation2] ss:$2 sm:$0xff]  ;;  %v2995_v20 = vld [vmem:[#allocation2 + $0x1] ss:$2 sm:$0xff]  ;;  %6795 = vmatprep.subr.mxu1 %v5802_v1  ;;  %v5799_v47 = vunpack.c.h.bf16 %v6115_v57  ;;  %v5798_v56 = vunpack.c.l.bf16 %v6115_v57 }
 0x717   :  { %2991 = vst.msk [vmem:[#allocation3] sm:$0xff] %vm753_vm8, %v2987_v11  ;;  %2973 = vst.msk [vmem:[#allocation2 + $0x12] sm:$0xff] %vm753_vm8, %v2957_v51  ;;  %3003 = vrot.lane.b32.xlu0 %v2995_v20, %s7157_s13  ;;  %v3019_v29 = vld [vmem:[#allocation2 + $0x2] ss:$2 sm:$0xff]  ;;  %6796 = vmatpush3.msra.mxu1 %v5802_v1  ;;  %v3043_v12 = vld [vmem:[#allocation2 + $0x3] ss:$2 sm:$0xff] }
 0x718   :  { %3317 = vst.msk [vmem:[#allocation2] sm:$0x1] %vm750_vm3, %v7154_v3  ;;  %6797 = vmatprep.subr.mxu1 %v5799_v47 }
 0x719   :  { %6798 = vmatpush3.msra.mxu1 %v5799_v47 }
 0x71a   :  { %v6760_v62 = vpop.f32.mrf.mxu0  ;;  %6799 = vmatprep.subr.mxu1 %v5798_v56 }
 0x71b   :  { %v2898_v42 = vadd.f32 %v6760_v62, %v8495_v18  ;;  %3027 = vrot.lane.b32.xlu0 %v3019_v29, %s7158_s14  ;;  %6800 = vmatpush3.msra.mxu1 %v5798_v56 }
 0x71c   :  { %v2892_v50 = vpop.f32.mrf.mxu0  ;;  %6801 = vmatprep.subr.mxu1 %v5795_v39 }
 0x71d   :  { %v2946_v6 = vmax.f32 %v2898_v42, 0.0  ;;  %v2893_v54 = vadd.f32 %v8495_v18, %v2892_v50  ;;  %6802 = vmatpush3.msra.mxu1 %v5795_v39 }
 0x71e   :  { %v2988_v37 = vld [vmem:[#allocation2 + $0x10] ss:$2 sm:$0xff]  ;;  %v2996_v23 = vld [vmem:[#allocation2 + $0x11] ss:$2 sm:$0xff]  ;;  %6803 = vmatprep.subr.mxu1 %v5794_v4 }
 0x71f   :  { %v2960_v22 = vadd.f32 %v2946_v6, %v8339_v17  ;;  %v2945_v59 = vmax.f32 %v2893_v54, 0.0  ;;  %2992 = vst.msk [vmem:[#allocation3 + $0x8] sm:$0xff] %vm753_vm8, %v2988_v37  ;;  %3005 = vrot.lane.b32.xlu1 %v2996_v23, %s7157_s13  ;;  %3051 = vrot.lane.b32.xlu0 %v3043_v12, %s7159_s27  ;;  %v3020_v33 = vld [vmem:[#allocation2 + $0x12] ss:$2 sm:$0xff]  ;;  %v3044_v31 = vld [vmem:[#allocation2 + $0x13] ss:$2 sm:$0xff] }
 0x720   :  { %3318 = vst.msk [vmem:[#allocation2 + $0x1a] sm:$0x1] %vm750_vm3, %v7154_v3  ;;  %4160 = vst.msk [vmem:[#allocation2 + $0x1e] sm:$0x1] %vm750_vm3, %v7154_v3  ;;  %6804 = vmatpush3.msra.mxu1 %v5794_v4 }
 0x721   :  { %2976 = vst.msk [vmem:[#allocation2 + $0x2a] sm:$0xff] %vm753_vm8, %v2960_v22  ;;  %v2959_v16 = vadd.f32 %v2945_v59, %v8345_v46  ;;  %v3138_v37 = vld [vmem:[#allocation2 + $0x6b] ss:$2 sm:$0x1]  ;;  %v3058_v59 = vpop.permute.xlu1 %3057 }
 0x722   :  { %3930 = vst.msk [vmem:[#allocation2 + $0x1b] sm:$0x3] %vm1477_vm7, %v7154_v3 }
 0x723   :  { %2975 = vst.msk [vmem:[#allocation2 + $0x22] sm:$0xff] %vm753_vm8, %v2959_v16  ;;  %3029 = vrot.lane.b32.xlu1 %v3020_v33, %s7158_s14 }
 0x727   :  { %3053 = vrot.lane.b32.xlu1 %v3044_v31, %s7159_s27 }
 0x728   :  { %v6763_v17 = vpop.f32.mrf.mxu0  ;;  %v2990_v46 = vld [vmem:[#allocation2 + $0x30] ss:$2 sm:$0x1]  ;;  %v2998_v36 = vld [vmem:[#allocation2 + $0x31] ss:$2 sm:$0x1] }
 0x729   :  { %v2908_v40 = vadd.f32 %v6763_v17, %v8495_v18  ;;  %2994 = vst.msk [vmem:[#allocation3 + $0x18] sm:$0x1] %vm750_vm3, %v2990_v46 }
 0x72a   :  { %v2902_v14 = vpop.f32.mrf.mxu0  ;;  %v2997_v15 = vld [vmem:[#allocation2 + $0x21] ss:$2 sm:$0xff]  ;;  %v2989_v44 = vld [vmem:[#allocation2 + $0x20] ss:$2 sm:$0xff] }
 0x72b   :  { %v2948_v41 = vmax.f32 %v2908_v40, 0.0  ;;  %v2903_v5 = vadd.f32 %v8495_v18, %v2902_v14  ;;  %3007 = vrot.lane.b32.xlu0 %v2997_v15, %s7157_s13  ;;  %3009 = vrot.lane.b32.xlu1 %v2998_v36, %s7157_s13  ;;  %2993 = vst.msk [vmem:[#allocation3 + $0x10] sm:$0xff] %vm753_vm8, %v2989_v44  ;;  %v3021_v28 = vld [vmem:[#allocation2 + $0x22] ss:$2 sm:$0xff]  ;;  %v3045_v13 = vld [vmem:[#allocation2 + $0x23] ss:$2 sm:$0xff] }
 0x72c   :  { %3323 = vst.msk [vmem:[#allocation2 + $0x20] sm:$0x1] %vm750_vm3, %v7154_v3 }
 0x72d   :  { %v2962_v30 = vadd.f32 %v2948_v41, %v8364_v43  ;;  %v2947_v45 = vmax.f32 %v2903_v5, 0.0 }
 0x72f   :  { %2980 = vst.msk [vmem:[#allocation2 + $0x3a] sm:$0xff] %vm753_vm8, %v2962_v30  ;;  %v2961_v48 = vadd.f32 %v2947_v45, %v8371_v32  ;;  %3031 = vrot.lane.b32.xlu0 %v3021_v28, %s7158_s14 }
 0x731   :  { %2977 = vst.msk [vmem:[#allocation2 + $0x32] sm:$0x1] %vm750_vm3, %v2961_v48 }
 0x733   :  { %3055 = vrot.lane.b32.xlu0 %v3045_v13, %s7159_s27 }
 0x734   :  { %v6766_v7 = vpop.f32.mrf.mxu0 }
 0x735   :  { %v2918_v10 = vadd.f32 %v6766_v7, %v8495_v18 }
 0x736   :  { %v2912_v26 = vpop.f32.mrf.mxu0 }
 0x737   :  { %v2950_v2 = vmax.f32 %v2918_v10, 0.0  ;;  %v2913_v43 = vadd.f32 %v8495_v18, %v2912_v26 }
 0x738   :  { %v3022_v63 = vld [vmem:[#allocation2 + $0x32] ss:$2 sm:$0x1] }
 0x739   :  { %v2964_v34 = vadd.f32 %v2950_v2, %v8384_v0  ;;  %v2949_v61 = vmax.f32 %v2913_v43, 0.0  ;;  %3033 = vrot.lane.b32.xlu1 %v3022_v63, %s7158_s14 }
 0x73b   :  { %2982 = vst.msk [vmem:[#allocation2 + $0x4a] sm:$0xff] %vm753_vm8, %v2964_v34  ;;  %v2963_v32 = vadd.f32 %v2949_v61, %v8391_v49 }
 0x73c   :  { %v6769_v8 = vpop.f32.mrf.mxu0 }
 0x73d   :  { %2981 = vst.msk [vmem:[#allocation2 + $0x42] sm:$0xff] %vm753_vm8, %v2963_v32  ;;  %v2928_v55 = vadd.f32 %v6769_v8, %v8495_v18 }
 0x73e   :  { %v2922_v19 = vpop.f32.mrf.mxu0 }
 0x73f   :  { %v2952_v60 = vmax.f32 %v2928_v55, 0.0  ;;  %v2923_v52 = vadd.f32 %v8495_v18, %v2922_v19  ;;  %v3364_v55 = vld [vmem:[#allocation2 + $0x1a] sm:$0x1] }
 0x740   :  { %v6772_v35 = vpop.f32.mrf.mxu0  ;;  %3624 = vst.msk [vmem:[#allocation2 + $0x1a] sm:$0x1] %vm750_vm3, %v7154_v3 }
 0x741   :  { %v2966_v21 = vadd.f32 %v2952_v60, %v8401_v53  ;;  %v2951_v0 = vmax.f32 %v2923_v52, 0.0  ;;  %v2938_v51 = vadd.f32 %v6772_v35, %v8495_v18  ;;  %v8636_v60 = vld [vmem:[%s9432_s2 + $0x5] ss:$0 sm:$0xff] }
 0x742   :  { %v2932_v9 = vpop.f32.mrf.mxu0 }
 0x743   :  { %2984 = vst.msk [vmem:[#allocation2 + $0x5a] sm:$0xff] %vm753_vm8, %v2966_v21  ;;  %v2965_v49 = vadd.f32 %v2951_v0, %v8411_v24  ;;  %v2954_v11 = vmax.f32 %v2938_v51, 0.0  ;;  %v2933_v20 = vadd.f32 %v8495_v18, %v2932_v9 }
 0x744   :  { %v3079_v58 = vld [vmem:[#allocation2 + $0x39] ss:$2 sm:$0xff]  ;;  %v3106_v1 = vld [vmem:[#allocation2 + $0x3a] ss:$2 sm:$0xff] }
 0x745   :  { %2983 = vst.msk [vmem:[#allocation2 + $0x52] sm:$0xff] %vm753_vm8, %v2965_v49  ;;  %v2968_v62 = vadd.f32 %v2954_v11, %v8419_v25  ;;  %v2953_v57 = vmax.f32 %v2933_v20, 0.0  ;;  %3089 = vrot.lane.b32.xlu0 %v3079_v58, %s7157_s13  ;;  %v3133_v53 = vld [vmem:[#allocation2 + $0x3b] ss:$2 sm:$0xff]  ;;  %v3068_v29 = vld [vmem:[#allocation2 + $0x38] ss:$2 sm:$0xff] }
 0x746   :  { %3074 = vst.msk [vmem:[#allocation3 + $0x20] sm:$0xff] %vm753_vm8, %v3068_v29  ;;  %v6127_v49 = vld [vmem:[%s9431_s1 + $0x140] sm:$0xff]   ;;  %v6126_v58 = vld [vmem:[%s9431_s1 + $0x138] sm:$0xff]  }
 0x747   :  { %3324 = vst.msk [vmem:[#allocation2 + $0x3a] sm:$0x1] %vm750_vm3, %v7154_v3  ;;  %2986 = vst.msk [vmem:[#allocation2 + $0x6a] sm:$0x1] %vm750_vm3, %v2968_v62  ;;  %v2967_v24 = vadd.f32 %v2953_v57, %v8426_v27  ;;  %v5847_v11 = vunpack.c.h.bf16 %v6127_v49  ;;  %v5846_v20 = vunpack.c.l.bf16 %v6127_v49  ;;  %v6125_v62 = vld [vmem:[%s9431_s1 + $0x130] sm:$0xff]   ;;  %v5842_v57 = vunpack.c.l.bf16 %v6126_v58 }
 0x748   :  { %3936 = vst.msk [vmem:[#allocation2 + $0x3b] sm:$0x3] %vm1477_vm7, %v7154_v3  ;;  %v5839_v29 = vunpack.c.h.bf16 %v6125_v62 }
 0x749   :  { %2985 = vst.msk [vmem:[#allocation2 + $0x62] sm:$0xff] %vm753_vm8, %v2967_v24  ;;  %3116 = vrot.lane.b32.xlu0 %v3106_v1, %s7158_s14  ;;  %6817 = vmatprep.subr.mxu0 %v5847_v11  ;;  %v5843_v1 = vunpack.c.h.bf16 %v6126_v58 }
 0x74a   :  { %6818 = vmatpush3.msra.mxu0 %v5847_v11 }
 0x74b   :  { %6819 = vmatprep.subr.mxu0 %v5846_v20 }
 0x74c   :  { %v3081_v25 = vld [vmem:[#allocation2 + $0x49] ss:$2 sm:$0xff]  ;;  %v3070_v18 = vld [vmem:[#allocation2 + $0x48] ss:$2 sm:$0xff]  ;;  %6820 = vmatpush3.msra.mxu0 %v5846_v20 }
 0x74d   :  { %3091 = vrot.lane.b32.xlu1 %v3081_v25, %s7157_s13  ;;  %3143 = vrot.lane.b32.xlu0 %v3133_v53, %s7159_s27  ;;  %3075 = vst.msk [vmem:[#allocation3 + $0x28] sm:$0xff] %vm753_vm8, %v3070_v18  ;;  %v3108_v42 = vld [vmem:[#allocation2 + $0x4a] ss:$2 sm:$0xff]  ;;  %v3135_v50 = vld [vmem:[#allocation2 + $0x4b] ss:$2 sm:$0xff] }
 0x74e   :  { %v3111_v54 = vld [vmem:[#allocation2 + $0x6a] ss:$2 sm:$0x1]  ;;  %v8629_v19 = vld [vmem:[#allocation2 + $0x3a] sm:$0x1]  ;;  %6821 = vmatprep.subr.mxu0 %v5843_v1 }
 0x74f   :  { %3630 = vst.msk [vmem:[#allocation2 + $0x3a] sm:$0x1] %vm750_vm3, %v7154_v3  ;;  %6822 = vmatpush3.msra.mxu0 %v5843_v1 }
 0x750   :  { %v3083_v47 = vld [vmem:[#allocation2 + $0x59] ss:$2 sm:$0xff]  ;;  %v3072_v56 = vld [vmem:[#allocation2 + $0x58] ss:$2 sm:$0xff]  ;;  %6823 = vmatprep.subr.mxu0 %v5842_v57 }
 0x751   :  { %3118 = vrot.lane.b32.xlu1 %v3108_v42, %s7158_s14  ;;  %3093 = vrot.lane.b32.xlu0 %v3083_v47, %s7157_s13  ;;  %3076 = vst.msk [vmem:[#allocation3 + $0x30] sm:$0xff] %vm753_vm8, %v3072_v56  ;;  %v3073_v27 = vld [vmem:[#allocation2 + $0x68] ss:$2 sm:$0x1]  ;;  %v3137_v12 = vld [vmem:[#allocation2 + $0x5b] ss:$2 sm:$0xff]  ;;  %v5838_v42 = vunpack.c.l.bf16 %v6125_v62 }
 0x752   :  { %3077 = vst.msk [vmem:[#allocation3 + $0x38] sm:$0x1] %vm750_vm3, %v3073_v27  ;;  %v3110_v6 = vld [vmem:[#allocation2 + $0x5a] ss:$2 sm:$0xff]  ;;  %6824 = vmatpush3.msra.mxu0 %v5842_v57 }
 0x753   :  { %v3084_v38 = vld [vmem:[#allocation2 + $0x69] ss:$2 sm:$0x1]  ;;  %6825 = vmatprep.subr.mxu0 %v5839_v29 }
 0x754   :  { %6826 = vmatpush3.msra.mxu0 %v5839_v29  ;;  %v6124_v47 = vld [vmem:[%s9431_s1 + $0x128] sm:$0xff]  }
 0x755   :  { %3145 = vrot.lane.b32.xlu1 %v3135_v50, %s7159_s27  ;;  %3120 = vrot.lane.b32.xlu0 %v3110_v6, %s7158_s14  ;;  %v5835_v50 = vunpack.c.h.bf16 %v6124_v47 }
 0x756   :  { %6827 = vmatprep.subr.mxu0 %v5838_v42 }
 0x757   :  { %6828 = vmatpush3.msra.mxu0 %v5838_v42 }
 0x758   :  { %6829 = vmatprep.subr.mxu0 %v5835_v50 }
 0x759   :  { %3122 = vrot.lane.b32.xlu1 %v3111_v54, %s7158_s14  ;;  %3147 = vrot.lane.b32.xlu0 %v3137_v12, %s7159_s27  ;;  %v5834_v12 = vunpack.c.l.bf16 %v6124_v47 }
 0x75a   :  { %6830 = vmatpush3.msra.mxu0 %v5835_v50 }
 0x75b   :  { %6831 = vmatprep.subr.mxu0 %v5834_v12 }
 0x75c   :  { %6832 = vmatpush3.msra.mxu0 %v5834_v12 }
 0x75d   :  { %3095 = vrot.lane.b32.xlu1 %v3084_v38, %s7157_s13 }
 0x761   :  { %3149 = vrot.lane.b32.xlu1 %v3138_v37, %s7159_s27 }
 0x765   :  { %3375 = vrot.lane.b32.xlu1 %v3364_v55, %s7158_s14 }
 0x789   :  { %v3004_v22 = vpop.permute.xlu0 %3003 }
 0x78a   :  { %3015 = vst.msk [vmem:[#allocation3] sm:$0xff] %vm864_vm9, %v3004_v22  ;;  %v6123_v22 = vld [vmem:[%s9431_s1 + $0x120] sm:$0xff]  }
 0x78d   :  { %v3028_v23 = vpop.permute.xlu0 %3027 }
 0x78e   :  { %3039 = vst.msk [vmem:[#allocation3] sm:$0xff] %vm937_vm10, %v3028_v23 }
 0x791   :  { %v3006_v39 = vpop.permute.xlu1 %3005  ;;  %v3052_v33 = vpop.permute.xlu0 %3051 }
 0x792   :  { %3016 = vst.msk [vmem:[#allocation3 + $0x8] sm:$0xff] %vm864_vm9, %v3006_v39  ;;  %v5830_v39 = vunpack.c.l.bf16 %v6123_v22 }
 0x793   :  { %3063 = vst.msk [vmem:[#allocation3] sm:$0xff] %vm1668_vm12, %v3052_v33  ;;  %v6122_v33 = vld [vmem:[%s9431_s1 + $0x118] sm:$0xff]  }
 0x795   :  { %v3030_v31 = vpop.permute.xlu1 %3029 }
 0x796   :  { %3040 = vst.msk [vmem:[#allocation3 + $0x8] sm:$0xff] %vm937_vm10, %v3030_v31  ;;  %v5827_v31 = vunpack.c.h.bf16 %v6122_v33 }
 0x799   :  { %v3054_v4 = vpop.permute.xlu1 %3053 }
 0x79a   :  { %v3191_v16 = vld [vmem:[#allocation3] sm:$0xff]  ;;  %3064 = vst.msk [vmem:[#allocation3 + $0x8] sm:$0xff] %vm1668_vm12, %v3054_v4  ;;  %v5826_v4 = vunpack.c.l.bf16 %v6122_v33 }
 0x79b   :  { %6805 = vmatprep.mubr.f32.mxu1 %v3191_v16 }
 0x79d   :  { %v3008_v17 = vpop.permute.xlu0 %3007  ;;  %v3010_v46 = vpop.permute.xlu1 %3009 }
 0x79e   :  { %3017 = vst.msk [vmem:[#allocation3 + $0x10] sm:$0xff] %vm864_vm9, %v3008_v17 }
 0x79f   :  { %3018 = vst.msk [vmem:[#allocation3 + $0x18] sm:$0x1] %vm1574_vm13, %v3010_v46 }
 0x7a1   :  { %v3032_v40 = vpop.permute.xlu0 %3031  ;;  %v3192_v14 = vld [vmem:[#allocation3 + $0x8] sm:$0xff] }
 0x7a2   :  { %3041 = vst.msk [vmem:[#allocation3 + $0x10] sm:$0xff] %vm937_vm10, %v3032_v40  ;;  %6806 = vmatmul.mubr.f32.vlgmr.msra.gmra.mxu1 %v3192_v14 }
 0x7a5   :  { %v3056_v15 = vpop.permute.xlu0 %3055 }
 0x7a6   :  { %3065 = vst.msk [vmem:[#allocation3 + $0x10] sm:$0xff] %vm1668_vm12, %v3056_v15 }
 0x7ab   :  { %v3034_v41 = vpop.permute.xlu1 %3033 }
 0x7ac   :  { %3042 = vst.msk [vmem:[#allocation3 + $0x18] sm:$0x1] %vm1624_vm14, %v3034_v41 }
 0x7ad   :  { %3066 = vst.msk [vmem:[#allocation3 + $0x18] sm:$0x1] %vm1675_vm15, %v3058_v59  ;;  %v3193_v5 = vld [vmem:[#allocation3 + $0x10] sm:$0xff]  ;;  %v5831_v59 = vunpack.c.h.bf16 %v6123_v22 }
 0x7ae   :  { %6808 = vmatprep.mubr.f32.mxu1 %v3193_v5 }
 0x7af   :  { %6833 = vmatprep.subr.mxu0 %v5831_v59 }
 0x7b0   :  { %6834 = vmatpush3.msra.mxu0 %v5831_v59 }
 0x7b1   :  { %6835 = vmatprep.subr.mxu0 %v5830_v39 }
 0x7b2   :  { %6836 = vmatpush3.msra.mxu0 %v5830_v39 }
 0x7b3   :  { %6837 = vmatprep.subr.mxu0 %v5827_v31 }
 0x7b4   :  { %v3194_v36 = vld [vmem:[#allocation3 + $0x18] sm:$0xff]  ;;  %6838 = vmatpush3.msra.mxu0 %v5827_v31  ;;  %v3670_v31 = vld [vmem:[#allocation2 + $0x1a] sm:$0x1] }
 0x7b5   :  { %6809 = vmatmul.mubr.f32.gmra.mxu1 %v3194_v36  ;;  %6839 = vmatprep.subr.mxu0 %v5826_v4 }
 0x7b6   :  { %6840 = vmatpush3.msra.mxu0 %v5826_v4  ;;  %v6133_v4 = vld [vmem:[%s9431_s1 + $0x170] sm:$0xff]  }
 0x7b7   :  { %v3090_v44 = vpop.permute.xlu0 %3089 }
 0x7b8   :  { %3101 = vst.msk [vmem:[#allocation3 + $0x20] sm:$0xff] %vm864_vm9, %v3090_v44 }
 0x7bb   :  { %v3117_v30 = vpop.permute.xlu0 %3116 }
 0x7bc   :  { %3128 = vst.msk [vmem:[#allocation3 + $0x20] sm:$0xff] %vm937_vm10, %v3117_v30 }
 0x7bf   :  { %v3092_v45 = vpop.permute.xlu1 %3091  ;;  %v3144_v28 = vpop.permute.xlu0 %3143 }
 0x7c0   :  { %3102 = vst.msk [vmem:[#allocation3 + $0x28] sm:$0xff] %vm864_vm9, %v3092_v45 }
 0x7c1   :  { %3155 = vst.msk [vmem:[#allocation3 + $0x20] sm:$0xff] %vm1668_vm12, %v3144_v28 }
 0x7c3   :  { %v3119_v48 = vpop.permute.xlu1 %3118  ;;  %v3094_v13 = vpop.permute.xlu0 %3093 }
 0x7c4   :  { %3129 = vst.msk [vmem:[#allocation3 + $0x28] sm:$0xff] %vm937_vm10, %v3119_v48 }
 0x7c5   :  { %3103 = vst.msk [vmem:[#allocation3 + $0x30] sm:$0xff] %vm864_vm9, %v3094_v13 }
 0x7c7   :  { %v3146_v7 = vpop.permute.xlu1 %3145  ;;  %v3121_v10 = vpop.permute.xlu0 %3120 }
 0x7c8   :  { %v3195_v26 = vld [vmem:[#allocation3 + $0x20] sm:$0xff]  ;;  %3156 = vst.msk [vmem:[#allocation3 + $0x28] sm:$0xff] %vm1668_vm12, %v3146_v7 }
 0x7c9   :  { %3130 = vst.msk [vmem:[#allocation3 + $0x30] sm:$0xff] %vm937_vm10, %v3121_v10  ;;  %6811 = vmatprep.mubr.f32.mxu1 %v3195_v26 }
 0x7cb   :  { %v3123_v2 = vpop.permute.xlu1 %3122  ;;  %v3148_v43 = vpop.permute.xlu0 %3147 }
 0x7cc   :  { %3157 = vst.msk [vmem:[#allocation3 + $0x30] sm:$0xff] %vm1668_vm12, %v3148_v43 }
 0x7cf   :  { %v3096_v63 = vpop.permute.xlu1 %3095  ;;  %v3196_v34 = vld [vmem:[#allocation3 + $0x28] sm:$0xff] }
 0x7d0   :  { %3104 = vst.msk [vmem:[#allocation3 + $0x38] sm:$0x1] %vm1574_vm13, %v3096_v63  ;;  %6812 = vmatmul.mubr.f32.gmra.mxu1 %v3196_v34 }
 0x7d1   :  { %3131 = vst.msk [vmem:[#allocation3 + $0x38] sm:$0x1] %vm1624_vm14, %v3123_v2 }
 0x7d3   :  { %v3150_v61 = vpop.permute.xlu1 %3149  ;;  %v3197_v32 = vld [vmem:[#allocation3 + $0x30] sm:$0xff] }
 0x7d4   :  { %3158 = vst.msk [vmem:[#allocation3 + $0x38] sm:$0x1] %vm1675_vm15, %v3150_v61  ;;  %6814 = vmatprep.mubr.f32.mxu1 %v3197_v32 }
 0x7d7   :  { %v3376_v49 = vpop.permute.xlu1 %3375 }
 0x7db   :  { %v3198_v8 = vld [vmem:[#allocation3 + $0x38] sm:$0xff] }
 0x7dc   :  { %6815 = vmatmul.mubr.f32.gmra.mxu1 %v3198_v8 }
 0x862   :  { %v6807_v52 = vpop.f32.mrf.mxu1 }
 0x863   :  { %v8639_v35 = vadd.f32 %v6807_v52, %v8636_v60 }
 0x864   :  { %v3270_v21 = vpop.f32.mrf.mxu1 }
 0x865   :  { %v3310_v0 = vmax.f32 %v8639_v35, 0.0  ;;  %v8643_v51 = vadd.f32 %v8636_v60, %v3270_v21 }
 0x867   :  { %3320 = vst.msk [vmem:[#allocation2 + $0x9] sm:$0xff] %vm753_vm8, %v3310_v0  ;;  %v3309_v9 = vmax.f32 %v8643_v51, 0.0  ;;  %v6129_v51 = vld [vmem:[%s9431_s1 + $0x150] sm:$0xff]  }
 0x869   :  { %3319 = vst.msk [vmem:[#allocation2 + $0x1] sm:$0xff] %vm753_vm8, %v3309_v9 }
 0x86e   :  { %v3338_v53 = vld [vmem:[#allocation2 + $0x9] sm:$0xff] }
 0x86f   :  { %3347 = vrot.lane.b32.xlu1 %v3338_v53, %s7157_s13 }
 0x870   :  { %v3337_v24 = vld [vmem:[#allocation2 + $0x1] sm:$0xff] }
 0x871   :  { %v3329_v25 = vld [vmem:[#allocation2] sm:$0xff]  ;;  %v3330_v18 = vld [vmem:[#allocation2 + $0x8] sm:$0xff]  ;;  %3345 = vrot.lane.b32.xlu0 %v3337_v24, %s7157_s13 }
 0x872   :  { %3333 = vst.msk [vmem:[#allocation3] sm:$0xff] %vm753_vm8, %v3329_v25  ;;  %3334 = vst.msk [vmem:[#allocation3 + $0x8] sm:$0xff] %vm753_vm8, %v3330_v18  ;;  %v3361_v27 = vld [vmem:[#allocation2 + $0x2] sm:$0xff] }
 0x873   :  { %3623 = vst.msk [vmem:[#allocation2] sm:$0x1] %vm750_vm3, %v7154_v3 }
 0x875   :  { %v6810_v56 = vpop.f32.mrf.mxu1  ;;  %3369 = vrot.lane.b32.xlu0 %v3361_v27, %s7158_s14 }
 0x876   :  { %v8671_v6 = vadd.f32 %v6810_v56, %v8636_v60 }
 0x877   :  { %v3280_v54 = vpop.f32.mrf.mxu1 }
 0x878   :  { %v3312_v38 = vmax.f32 %v8671_v6, 0.0  ;;  %v8676_v37 = vadd.f32 %v8636_v60, %v3280_v54  ;;  %v5854_v6 = vunpack.c.l.bf16 %v6129_v51 }
 0x87a   :  { %3322 = vst.msk [vmem:[#allocation2 + $0x19] sm:$0x1] %vm750_vm3, %v3312_v38  ;;  %v3311_v23 = vmax.f32 %v8676_v37, 0.0 }
 0x87c   :  { %3321 = vst.msk [vmem:[#allocation2 + $0x11] sm:$0xff] %vm753_vm8, %v3311_v23 }
 0x881   :  { %v3340_v16 = vld [vmem:[#allocation2 + $0x19] sm:$0x1] }
 0x882   :  { %3351 = vrot.lane.b32.xlu1 %v3340_v16, %s7157_s13  ;;  %v6132_v16 = vld [vmem:[%s9431_s1 + $0x168] sm:$0xff]  }
 0x883   :  { %v3331_v17 = vld [vmem:[#allocation2 + $0x10] sm:$0xff]  ;;  %v3332_v40 = vld [vmem:[#allocation2 + $0x18] sm:$0x1] }
 0x884   :  { %v3339_v46 = vld [vmem:[#allocation2 + $0x11] sm:$0xff]  ;;  %3335 = vst.msk [vmem:[#allocation3 + $0x10] sm:$0xff] %vm753_vm8, %v3331_v17  ;;  %v5871_v17 = vunpack.c.h.bf16 %v6133_v4 }
 0x885   :  { %3349 = vrot.lane.b32.xlu0 %v3339_v46, %s7157_s13  ;;  %v3362_v14 = vld [vmem:[#allocation2 + $0xa] sm:$0xff]  ;;  %3336 = vst.msk [vmem:[#allocation3 + $0x18] sm:$0x1] %vm750_vm3, %v3332_v40  ;;  %v3363_v15 = vld [vmem:[#allocation2 + $0x12] sm:$0xff]  ;;  %v5870_v46 = vunpack.c.l.bf16 %v6133_v4  ;;  %v5867_v40 = vunpack.c.h.bf16 %v6132_v16 }
 0x886   :  { %3371 = vrot.lane.b32.xlu1 %v3362_v14, %s7158_s14  ;;  %6853 = vmatprep.subr.mxu1 %v5871_v17  ;;  %v5866_v14 = vunpack.c.l.bf16 %v6132_v16 }
 0x887   :  { %6854 = vmatpush3.msra.mxu1 %v5871_v17 }
 0x888   :  { %6855 = vmatprep.subr.mxu1 %v5870_v46 }
 0x889   :  { %3373 = vrot.lane.b32.xlu0 %v3363_v15, %s7158_s14  ;;  %6856 = vmatpush3.msra.mxu1 %v5870_v46  ;;  %v8774_v15 = vld [vmem:[%s9432_s2 + $0x6] ss:$0 sm:$0xff] }
 0x88a   :  { %6857 = vmatprep.subr.mxu1 %v5867_v40 }
 0x88b   :  { %6858 = vmatpush3.msra.mxu1 %v5867_v40 }
 0x88c   :  { %6859 = vmatprep.subr.mxu1 %v5866_v14 }
 0x88d   :  { %6860 = vmatpush3.msra.mxu1 %v5866_v14 }
 0x890   :  { %v6813_v41 = vpop.f32.mrf.mxu1 }
 0x891   :  { %v8698_v5 = vadd.f32 %v6813_v41, %v8636_v60 }
 0x892   :  { %v3290_v36 = vpop.f32.mrf.mxu1 }
 0x893   :  { %v3314_v44 = vmax.f32 %v8698_v5, 0.0  ;;  %v8702_v30 = vadd.f32 %v8636_v60, %v3290_v36 }
 0x895   :  { %3326 = vst.msk [vmem:[#allocation2 + $0x29] sm:$0xff] %vm753_vm8, %v3314_v44  ;;  %v3313_v45 = vmax.f32 %v8702_v30, 0.0 }
 0x897   :  { %3325 = vst.msk [vmem:[#allocation2 + $0x21] sm:$0xff] %vm753_vm8, %v3313_v45 }
 0x89c   :  { %v6816_v28 = vpop.f32.mrf.mxu1  ;;  %v3394_v48 = vld [vmem:[#allocation2 + $0x29] sm:$0xff] }
 0x89d   :  { %v8712_v13 = vadd.f32 %v6816_v28, %v8636_v60  ;;  %3403 = vrot.lane.b32.xlu1 %v3394_v48, %s7157_s13  ;;  %v6131_v28 = vld [vmem:[%s9431_s1 + $0x160] sm:$0xff]  }
 0x89e   :  { %v3300_v7 = vpop.f32.mrf.mxu1  ;;  %v3393_v10 = vld [vmem:[#allocation2 + $0x21] sm:$0xff] }
 0x89f   :  { %v3386_v26 = vld [vmem:[#allocation2 + $0x28] sm:$0xff]  ;;  %v3316_v2 = vmax.f32 %v8712_v13, 0.0  ;;  %v8717_v43 = vadd.f32 %v8636_v60, %v3300_v7  ;;  %3401 = vrot.lane.b32.xlu0 %v3393_v10, %s7157_s13  ;;  %v3385_v63 = vld [vmem:[#allocation2 + $0x20] sm:$0xff]  ;;  %v5863_v7 = vunpack.c.h.bf16 %v6131_v28 }
 0x8a0   :  { %3390 = vst.msk [vmem:[#allocation3 + $0x28] sm:$0xff] %vm753_vm8, %v3386_v26  ;;  %3389 = vst.msk [vmem:[#allocation3 + $0x20] sm:$0xff] %vm753_vm8, %v3385_v63  ;;  %v3417_v61 = vld [vmem:[#allocation2 + $0x22] sm:$0xff] }
 0x8a1   :  { %3629 = vst.msk [vmem:[#allocation2 + $0x20] sm:$0x1] %vm750_vm3, %v7154_v3  ;;  %3328 = vst.msk [vmem:[#allocation2 + $0x39] sm:$0x1] %vm750_vm3, %v3316_v2  ;;  %v3315_v34 = vmax.f32 %v8717_v43, 0.0  ;;  %6861 = vmatprep.subr.mxu1 %v5863_v7 }
 0x8a2   :  { %6862 = vmatpush3.msra.mxu1 %v5863_v7 }
 0x8a3   :  { %3327 = vst.msk [vmem:[#allocation2 + $0x31] sm:$0xff] %vm753_vm8, %v3315_v34  ;;  %3425 = vrot.lane.b32.xlu0 %v3417_v61, %s7158_s14  ;;  %v5862_v61 = vunpack.c.l.bf16 %v6131_v28  ;;  %v3726_v28 = vld [vmem:[#allocation2 + $0x3a] sm:$0x1] }
 0x8a5   :  { %6863 = vmatprep.subr.mxu1 %v5862_v61 }
 0x8a6   :  { %6864 = vmatpush3.msra.mxu1 %v5862_v61 }
 0x8a8   :  { %v3396_v32 = vld [vmem:[#allocation2 + $0x39] sm:$0x1] }
 0x8a9   :  { %3407 = vrot.lane.b32.xlu1 %v3396_v32, %s7157_s13 }
 0x8aa   :  { %v3395_v8 = vld [vmem:[#allocation2 + $0x31] sm:$0xff] }
 0x8ab   :  { %3405 = vrot.lane.b32.xlu0 %v3395_v8, %s7157_s13  ;;  %v3388_v55 = vld [vmem:[#allocation2 + $0x38] sm:$0x1]  ;;  %v3387_v60 = vld [vmem:[#allocation2 + $0x30] sm:$0xff] }
 0x8ac   :  { %v3418_v52 = vld [vmem:[#allocation2 + $0x2a] sm:$0xff]  ;;  %3392 = vst.msk [vmem:[#allocation3 + $0x38] sm:$0x1] %vm750_vm3, %v3388_v55  ;;  %v3419_v21 = vld [vmem:[#allocation2 + $0x32] sm:$0xff] }
 0x8ad   :  { %3391 = vst.msk [vmem:[#allocation3 + $0x30] sm:$0xff] %vm753_vm8, %v3387_v60  ;;  %3427 = vrot.lane.b32.xlu1 %v3418_v52, %s7158_s14  ;;  %v6130_v60 = vld [vmem:[%s9431_s1 + $0x158] sm:$0xff]  }
 0x8af   :  { %3429 = vrot.lane.b32.xlu0 %v3419_v21, %s7158_s14  ;;  %v5859_v21 = vunpack.c.h.bf16 %v6130_v60 }
 0x8b1   :  { %3431 = vrot.lane.b32.xlu1 %v8629_v19, %s7158_s14  ;;  %6865 = vmatprep.subr.mxu1 %v5859_v21 }
 0x8b2   :  { %6866 = vmatpush3.msra.mxu1 %v5859_v21 }
 0x8b5   :  { %3681 = vrot.lane.b32.xlu1 %v3670_v31, %s7158_s14 }
 0x8e1   :  { %v3348_v11 = vpop.permute.xlu1 %3347 }
 0x8e2   :  { %3358 = vst.msk [vmem:[#allocation3 + $0x8] sm:$0xff] %vm864_vm9, %v3348_v11  ;;  %v5858_v11 = vunpack.c.l.bf16 %v6130_v60 }
 0x8e3   :  { %v3346_v20 = vpop.permute.xlu0 %3345 }
 0x8e4   :  { %3357 = vst.msk [vmem:[#allocation3] sm:$0xff] %vm864_vm9, %v3346_v20  ;;  %6867 = vmatprep.subr.mxu1 %v5858_v11 }
 0x8e5   :  { %6868 = vmatpush3.msra.mxu1 %v5858_v11 }
 0x8e7   :  { %v3370_v58 = vpop.permute.xlu0 %3369 }
 0x8e8   :  { %3381 = vst.msk [vmem:[#allocation3] sm:$0xff] %vm937_vm10, %v3370_v58 }
 0x8ef   :  { %v3465_v1 = vld [vmem:[#allocation3] sm:$0xff] }
 0x8f0   :  { %6841 = vmatprep.mubr.msk.f32.mxu0 %vm1171_vm11, %v3465_v1 }
 0x8f4   :  { %v3352_v62 = vpop.permute.xlu1 %3351 }
 0x8f5   :  { %3360 = vst.msk [vmem:[#allocation3 + $0x18] sm:$0x1] %vm1574_vm13, %v3352_v62 }
 0x8f6   :  { %3384 = vst.msk [vmem:[#allocation3 + $0x18] sm:$0x1] %vm1624_vm14, %v3376_v49 }
 0x8f7   :  { %v3350_v57 = vpop.permute.xlu0 %3349 }
 0x8f8   :  { %3359 = vst.msk [vmem:[#allocation3 + $0x10] sm:$0xff] %vm864_vm9, %v3350_v57  ;;  %v3372_v19 = vpop.permute.xlu1 %3371 }
 0x8f9   :  { %3382 = vst.msk [vmem:[#allocation3 + $0x8] sm:$0xff] %vm937_vm10, %v3372_v19 }
 0x8fb   :  { %v3374_v53 = vpop.permute.xlu0 %3373 }
 0x8fc   :  { %3383 = vst.msk [vmem:[#allocation3 + $0x10] sm:$0xff] %vm937_vm10, %v3374_v53 }
 0x8fd   :  { %v3468_v25 = vld [vmem:[#allocation3 + $0x18] sm:$0xff] }
 0x900   :  { %v3466_v29 = vld [vmem:[#allocation3 + $0x8] sm:$0xff] }
 0x901   :  { %6842 = vmatmul.mubr.msk.f32.vlgmr.msra.gmra.mxu0 %vm1171_vm11, %v3466_v29 }
 0x903   :  { %v3467_v24 = vld [vmem:[#allocation3 + $0x10] sm:$0xff] }
 0x904   :  { %6844 = vmatprep.mubr.msk.f32.mxu0 %vm1171_vm11, %v3467_v24 }
 0x905   :  { %6845 = vmatmul.mubr.msk.f32.gmra.mxu0 %vm1171_vm11, %v3468_v25 }
 0x90f   :  { %v3404_v18 = vpop.permute.xlu1 %3403 }
 0x910   :  { %3414 = vst.msk [vmem:[#allocation3 + $0x28] sm:$0xff] %vm864_vm9, %v3404_v18 }
 0x911   :  { %v3402_v42 = vpop.permute.xlu0 %3401 }
 0x912   :  { %3413 = vst.msk [vmem:[#allocation3 + $0x20] sm:$0xff] %vm864_vm9, %v3402_v42 }
 0x915   :  { %v3426_v47 = vpop.permute.xlu0 %3425 }
 0x916   :  { %3437 = vst.msk [vmem:[#allocation3 + $0x20] sm:$0xff] %vm937_vm10, %v3426_v47 }
 0x91b   :  { %v3408_v56 = vpop.permute.xlu1 %3407 }
 0x91c   :  { %3416 = vst.msk [vmem:[#allocation3 + $0x38] sm:$0x1] %vm1574_vm13, %v3408_v56 }
 0x91d   :  { %v3406_v27 = vpop.permute.xlu0 %3405  ;;  %v3469_v50 = vld [vmem:[#allocation3 + $0x20] sm:$0xff] }
 0x91e   :  { %3415 = vst.msk [vmem:[#allocation3 + $0x30] sm:$0xff] %vm864_vm9, %v3406_v27  ;;  %6847 = vmatprep.mubr.msk.f32.mxu0 %vm1171_vm11, %v3469_v50 }
 0x91f   :  { %v3428_v54 = vpop.permute.xlu1 %3427 }
 0x920   :  { %3438 = vst.msk [vmem:[#allocation3 + $0x28] sm:$0xff] %vm937_vm10, %v3428_v54 }
 0x921   :  { %v3430_v12 = vpop.permute.xlu0 %3429 }
 0x922   :  { %3439 = vst.msk [vmem:[#allocation3 + $0x30] sm:$0xff] %vm937_vm10, %v3430_v12 }
 0x923   :  { %v3432_v22 = vpop.permute.xlu1 %3431 }
 0x924   :  { %3440 = vst.msk [vmem:[#allocation3 + $0x38] sm:$0x1] %vm1624_vm14, %v3432_v22 }
 0x927   :  { %v3470_v59 = vld [vmem:[#allocation3 + $0x28] sm:$0xff]  ;;  %v3682_v7 = vpop.permute.xlu1 %3681 }
 0x928   :  { %6848 = vmatmul.mubr.msk.f32.gmra.mxu0 %vm1171_vm11, %v3470_v59 }
 0x929   :  { %v3471_v39 = vld [vmem:[#allocation3 + $0x30] sm:$0xff] }
 0x92a   :  { %6850 = vmatprep.mubr.msk.f32.mxu0 %vm1171_vm11, %v3471_v39 }
 0x92b   :  { %v3472_v33 = vld [vmem:[#allocation3 + $0x38] sm:$0xff] }
 0x92c   :  { %6851 = vmatmul.mubr.msk.f32.gmra.mxu0 %vm1171_vm11, %v3472_v33 }
 0x9c1   :  { %v6843_v41 = vpop.f32.mrf.mxu0 }
 0x9c2   :  { %v3574_v36 = vadd.f32 %v6843_v41, %v8774_v15 }
 0x9c3   :  { %v3568_v48 = vpop.f32.mrf.mxu0 }
 0x9c4   :  { %v3608_v10 = vmax.f32 %v3574_v36, 0.0  ;;  %v3569_v26 = vadd.f32 %v8774_v15, %v3568_v48 }
 0x9c5   :  { %v6846_v63 = vpop.f32.mrf.mxu0 }
 0x9c6   :  { %v8783_v32 = vadd.f32 %v3608_v10, %v3310_v0  ;;  %v3607_v8 = vmax.f32 %v3569_v26, 0.0  ;;  %v3584_v55 = vadd.f32 %v6846_v63, %v8774_v15 }
 0x9c7   :  { %v3578_v52 = vpop.f32.mrf.mxu0 }
 0x9c8   :  { %3626 = vst.msk [vmem:[#allocation2 + $0x9] sm:$0xff] %vm753_vm8, %v8783_v32  ;;  %v8793_v49 = vadd.f32 %v3607_v8, %v3309_v9  ;;  %v3610_v35 = vmax.f32 %v3584_v55, 0.0  ;;  %v3579_v0 = vadd.f32 %v8774_v15, %v3578_v52  ;;  %v5855_v9 = vunpack.c.h.bf16 %v6129_v51 }
 0x9ca   :  { %3625 = vst.msk [vmem:[#allocation2 + $0x1] sm:$0xff] %vm753_vm8, %v8793_v49  ;;  %v8800_v20 = vadd.f32 %v3610_v35, %v3312_v38  ;;  %v3609_v58 = vmax.f32 %v3579_v0, 0.0  ;;  %6869 = vmatprep.subr.mxu1 %v5855_v9  ;;  %v6128_v38 = vld [vmem:[%s9431_s1 + $0x148] sm:$0xff]  }
 0x9cb   :  { %6870 = vmatpush3.msra.mxu1 %v5855_v9  ;;  %v5851_v57 = vunpack.c.h.bf16 %v6128_v38  ;;  %v5850_v53 = vunpack.c.l.bf16 %v6128_v38 }
 0x9cc   :  { %3628 = vst.msk [vmem:[#allocation2 + $0x19] sm:$0x1] %vm750_vm3, %v8800_v20  ;;  %v8809_v1 = vadd.f32 %v3609_v58, %v3311_v23  ;;  %6871 = vmatprep.subr.mxu1 %v5854_v6 }
 0x9cd   :  { %6872 = vmatpush3.msra.mxu1 %v5854_v6 }
 0x9ce   :  { %3627 = vst.msk [vmem:[#allocation2 + $0x11] sm:$0xff] %vm753_vm8, %v8809_v1  ;;  %6873 = vmatprep.subr.mxu1 %v5851_v57 }
 0x9cf   :  { %v3644_v62 = vld [vmem:[#allocation2 + $0x9] sm:$0xff]  ;;  %6874 = vmatpush3.msra.mxu1 %v5851_v57 }
 0x9d0   :  { %3653 = vrot.lane.b32.xlu1 %v3644_v62, %s7157_s13  ;;  %6875 = vmatprep.subr.mxu1 %v5850_v53 }
 0x9d1   :  { %v3643_v37 = vld [vmem:[#allocation2 + $0x1] sm:$0xff]  ;;  %6876 = vmatpush3.msra.mxu1 %v5850_v53 }
 0x9d2   :  { %v3635_v23 = vld [vmem:[#allocation2] sm:$0xff]  ;;  %v3636_v19 = vld [vmem:[#allocation2 + $0x8] sm:$0xff]  ;;  %3651 = vrot.lane.b32.xlu0 %v3643_v37, %s7157_s13 }
 0x9d3   :  { %3929 = vst.msk [vmem:[#allocation2] sm:$0x3] %vm1477_vm7, %v7154_v3  ;;  %v3646_v29 = vld [vmem:[#allocation2 + $0x19] sm:$0x1]  ;;  %v3667_v24 = vld [vmem:[#allocation2 + $0x2] sm:$0xff] }
 0x9d4   :  { %3639 = vst.msk [vmem:[#allocation3] sm:$0xff] %vm753_vm8, %v3635_v23  ;;  %3640 = vst.msk [vmem:[#allocation3 + $0x8] sm:$0xff] %vm753_vm8, %v3636_v19  ;;  %3657 = vrot.lane.b32.xlu1 %v3646_v29, %s7157_s13  ;;  %v6141_v29 = vld [vmem:[%s9431_s1 + $0x1b0] sm:$0xff]  }
 0x9d5   :  { %v3638_v25 = vld [vmem:[#allocation2 + $0x18] sm:$0x1]  ;;  %v3637_v18 = vld [vmem:[#allocation2 + $0x10] sm:$0xff] }
 0x9d6   :  { %3675 = vrot.lane.b32.xlu0 %v3667_v24, %s7158_s14  ;;  %v3668_v42 = vld [vmem:[#allocation2 + $0xa] sm:$0xff]  ;;  %3642 = vst.msk [vmem:[#allocation3 + $0x18] sm:$0x1] %vm750_vm3, %v3638_v25  ;;  %v3669_v56 = vld [vmem:[#allocation2 + $0x12] sm:$0xff]  ;;  %v5903_v25 = vunpack.c.h.bf16 %v6141_v29 }
 0x9d7   :  { %3641 = vst.msk [vmem:[#allocation3 + $0x10] sm:$0xff] %vm753_vm8, %v3637_v18  ;;  %v3645_v47 = vld [vmem:[#allocation2 + $0x11] sm:$0xff]  ;;  %v6140_v24 = vld [vmem:[%s9431_s1 + $0x1a8] sm:$0xff]   ;;  %v5902_v18 = vunpack.c.l.bf16 %v6141_v29 }
 0x9d8   :  { %3677 = vrot.lane.b32.xlu1 %v3668_v42, %s7158_s14  ;;  %6889 = vmatprep.subr.mxu0 %v5903_v25  ;;  %v5899_v42 = vunpack.c.h.bf16 %v6140_v24 }
 0x9d9   :  { %6890 = vmatpush3.msra.mxu0 %v5903_v25 }
 0x9da   :  { %3655 = vrot.lane.b32.xlu0 %v3645_v47, %s7157_s13  ;;  %v6139_v47 = vld [vmem:[%s9431_s1 + $0x1a0] sm:$0xff]   ;;  %6891 = vmatprep.subr.mxu0 %v5902_v18 }
 0x9db   :  { %6892 = vmatpush3.msra.mxu0 %v5902_v18 }
 0x9dc   :  { %6893 = vmatprep.subr.mxu0 %v5899_v42 }
 0x9dd   :  { %6894 = vmatpush3.msra.mxu0 %v5899_v42 }
 0x9de   :  { %3679 = vrot.lane.b32.xlu0 %v3669_v56, %s7158_s14  ;;  %v5898_v56 = vunpack.c.l.bf16 %v6140_v24 }
 0x9e0   :  { %6895 = vmatprep.subr.mxu0 %v5898_v56 }
 0x9e1   :  { %6896 = vmatpush3.msra.mxu0 %v5898_v56 }
 0x9e8   :  { %v6849_v27 = vpop.f32.mrf.mxu0 }
 0x9e9   :  { %v3594_v50 = vadd.f32 %v6849_v27, %v8774_v15  ;;  %v5895_v27 = vunpack.c.h.bf16 %v6139_v47 }
 0x9ea   :  { %v3588_v54 = vpop.f32.mrf.mxu0 }
 0x9eb   :  { %v3612_v12 = vmax.f32 %v3594_v50, 0.0  ;;  %v3589_v22 = vadd.f32 %v8774_v15, %v3588_v54  ;;  %6897 = vmatprep.subr.mxu0 %v5895_v27  ;;  %v8907_v50 = vld [vmem:[%s9432_s2 + $0x7] ss:$0 sm:$0xff] }
 0x9ec   :  { %v6852_v59 = vpop.f32.mrf.mxu0  ;;  %6898 = vmatpush3.msra.mxu0 %v5895_v27 }
 0x9ed   :  { %v8833_v39 = vadd.f32 %v3612_v12, %v3314_v44  ;;  %v3611_v33 = vmax.f32 %v3589_v22, 0.0  ;;  %v3604_v31 = vadd.f32 %v6852_v59, %v8774_v15 }
 0x9ee   :  { %v3598_v4 = vpop.f32.mrf.mxu0 }
 0x9ef   :  { %3632 = vst.msk [vmem:[#allocation2 + $0x29] sm:$0xff] %vm753_vm8, %v8833_v39  ;;  %v8840_v16 = vadd.f32 %v3611_v33, %v3313_v45  ;;  %v3614_v17 = vmax.f32 %v3604_v31, 0.0  ;;  %v3599_v46 = vadd.f32 %v8774_v15, %v3598_v4  ;;  %v5894_v31 = vunpack.c.l.bf16 %v6139_v47  ;;  %v6138_v4 = vld [vmem:[%s9431_s1 + $0x198] sm:$0xff]  }
 0x9f1   :  { %3631 = vst.msk [vmem:[#allocation2 + $0x21] sm:$0xff] %vm753_vm8, %v8840_v16  ;;  %v8847_v5 = vadd.f32 %v3614_v17, %v3316_v2  ;;  %v3613_v44 = vmax.f32 %v3599_v46, 0.0  ;;  %6899 = vmatprep.subr.mxu0 %v5894_v31 }
 0x9f2   :  { %6900 = vmatpush3.msra.mxu0 %v5894_v31 }
 0x9f3   :  { %3634 = vst.msk [vmem:[#allocation2 + $0x39] sm:$0x1] %vm750_vm3, %v8847_v5  ;;  %v8853_v40 = vadd.f32 %v3613_v44, %v3315_v34  ;;  %v5891_v44 = vunpack.c.h.bf16 %v6138_v4 }
 0x9f5   :  { %3633 = vst.msk [vmem:[#allocation2 + $0x31] sm:$0xff] %vm753_vm8, %v8853_v40  ;;  %6901 = vmatprep.subr.mxu0 %v5891_v44 }
 0x9f6   :  { %v3700_v30 = vld [vmem:[#allocation2 + $0x29] sm:$0xff]  ;;  %6902 = vmatpush3.msra.mxu0 %v5891_v44 }
 0x9f7   :  { %3709 = vrot.lane.b32.xlu1 %v3700_v30, %s7157_s13 }
 0x9f8   :  { %v3699_v45 = vld [vmem:[#allocation2 + $0x21] sm:$0xff] }
 0x9f9   :  { %v3692_v14 = vld [vmem:[#allocation2 + $0x28] sm:$0xff]  ;;  %3707 = vrot.lane.b32.xlu0 %v3699_v45, %s7157_s13  ;;  %v3691_v13 = vld [vmem:[#allocation2 + $0x20] sm:$0xff] }
 0x9fa   :  { %3696 = vst.msk [vmem:[#allocation3 + $0x28] sm:$0xff] %vm753_vm8, %v3692_v14  ;;  %v3702_v2 = vld [vmem:[#allocation2 + $0x39] sm:$0x1]  ;;  %3695 = vst.msk [vmem:[#allocation3 + $0x20] sm:$0xff] %vm753_vm8, %v3691_v13  ;;  %v3723_v43 = vld [vmem:[#allocation2 + $0x22] sm:$0xff]  ;;  %v5890_v13 = vunpack.c.l.bf16 %v6138_v4 }
 0x9fb   :  { %3935 = vst.msk [vmem:[#allocation2 + $0x20] sm:$0x3] %vm1477_vm7, %v7154_v3  ;;  %3713 = vrot.lane.b32.xlu1 %v3702_v2, %s7157_s13 }
 0x9fc   :  { %v3694_v34 = vld [vmem:[#allocation2 + $0x38] sm:$0x1]  ;;  %v3693_v15 = vld [vmem:[#allocation2 + $0x30] sm:$0xff]  ;;  %6903 = vmatprep.subr.mxu0 %v5890_v13 }
 0x9fd   :  { %3731 = vrot.lane.b32.xlu0 %v3723_v43, %s7158_s14  ;;  %v3724_v41 = vld [vmem:[#allocation2 + $0x2a] sm:$0xff]  ;;  %3698 = vst.msk [vmem:[#allocation3 + $0x38] sm:$0x1] %vm750_vm3, %v3694_v34  ;;  %v3725_v48 = vld [vmem:[#allocation2 + $0x32] sm:$0xff]  ;;  %6904 = vmatpush3.msra.mxu0 %v5890_v13 }
 0x9fe   :  { %3697 = vst.msk [vmem:[#allocation3 + $0x30] sm:$0xff] %vm753_vm8, %v3693_v15  ;;  %v3701_v36 = vld [vmem:[#allocation2 + $0x31] sm:$0xff] }
 0x9ff   :  { %3733 = vrot.lane.b32.xlu1 %v3724_v41, %s7158_s14  ;;  %v6137_v34 = vld [vmem:[%s9431_s1 + $0x190] sm:$0xff]  }
 0xa01   :  { %3711 = vrot.lane.b32.xlu0 %v3701_v36, %s7157_s13  ;;  %v5886_v36 = vunpack.c.l.bf16 %v6137_v34 }
 0xa03   :  { %3737 = vrot.lane.b32.xlu1 %v3726_v28, %s7158_s14 }
 0xa05   :  { %3735 = vrot.lane.b32.xlu0 %v3725_v48, %s7158_s14  ;;  %v6136_v48 = vld [vmem:[%s9431_s1 + $0x188] sm:$0xff]  }
 0xa42   :  { %v3654_v10 = vpop.permute.xlu1 %3653 }
 0xa43   :  { %3664 = vst.msk [vmem:[#allocation3 + $0x8] sm:$0xff] %vm864_vm9, %v3654_v10  ;;  %v5882_v10 = vunpack.c.l.bf16 %v6136_v48 }
 0xa44   :  { %v3652_v26 = vpop.permute.xlu0 %3651 }
 0xa45   :  { %3663 = vst.msk [vmem:[#allocation3] sm:$0xff] %vm864_vm9, %v3652_v26 }
 0xa46   :  { %v3658_v63 = vpop.permute.xlu1 %3657 }
 0xa47   :  { %3666 = vst.msk [vmem:[#allocation3 + $0x18] sm:$0x1] %vm1574_vm13, %v3658_v63 }
 0xa48   :  { %3690 = vst.msk [vmem:[#allocation3 + $0x18] sm:$0x1] %vm1624_vm14, %v3682_v7  ;;  %v3676_v61 = vpop.permute.xlu0 %3675  ;;  %v5883_v7 = vunpack.c.h.bf16 %v6136_v48 }
 0xa49   :  { %3687 = vst.msk [vmem:[#allocation3] sm:$0xff] %vm937_vm10, %v3676_v61 }
 0xa4a   :  { %v3678_v8 = vpop.permute.xlu1 %3677 }
 0xa4b   :  { %3688 = vst.msk [vmem:[#allocation3 + $0x8] sm:$0xff] %vm937_vm10, %v3678_v8 }
 0xa4c   :  { %v3656_v55 = vpop.permute.xlu0 %3655 }
 0xa4d   :  { %3665 = vst.msk [vmem:[#allocation3 + $0x10] sm:$0xff] %vm864_vm9, %v3656_v55  ;;  %v6134_v55 = vld [vmem:[%s9431_s1 + $0x178] sm:$0xff]  }
 0xa4f   :  { %v3774_v0 = vld [vmem:[#allocation3 + $0x18] sm:$0xff] }
 0xa50   :  { %v3680_v60 = vpop.permute.xlu0 %3679  ;;  %v3771_v52 = vld [vmem:[#allocation3] sm:$0xff] }
 0xa51   :  { %3689 = vst.msk [vmem:[#allocation3 + $0x10] sm:$0xff] %vm937_vm10, %v3680_v60  ;;  %6877 = vmatprep.mubr.msk.f32.mxu1 %vm1171_vm11, %v3771_v52  ;;  %v5875_v52 = vunpack.c.h.bf16 %v6134_v55 }
 0xa52   :  { %v3772_v21 = vld [vmem:[#allocation3 + $0x8] sm:$0xff] }
 0xa53   :  { %6878 = vmatmul.mubr.msk.f32.vlgmr.msra.gmra.mxu1 %vm1171_vm11, %v3772_v21 }
 0xa58   :  { %v3773_v35 = vld [vmem:[#allocation3 + $0x10] sm:$0xff] }
 0xa59   :  { %6880 = vmatprep.mubr.msk.f32.mxu1 %vm1171_vm11, %v3773_v35 }
 0xa5a   :  { %6881 = vmatmul.mubr.msk.f32.gmra.mxu1 %vm1171_vm11, %v3774_v0  ;;  %v5874_v0 = vunpack.c.l.bf16 %v6134_v55 }
 0xa69   :  { %v3710_v11 = vpop.permute.xlu1 %3709 }
 0xa6a   :  { %3720 = vst.msk [vmem:[#allocation3 + $0x28] sm:$0xff] %vm864_vm9, %v3710_v11 }
 0xa6b   :  { %v3708_v58 = vpop.permute.xlu0 %3707 }
 0xa6c   :  { %3719 = vst.msk [vmem:[#allocation3 + $0x20] sm:$0xff] %vm864_vm9, %v3708_v58 }
 0xa6d   :  { %v3714_v51 = vpop.permute.xlu1 %3713 }
 0xa6e   :  { %3722 = vst.msk [vmem:[#allocation3 + $0x38] sm:$0x1] %vm1574_vm13, %v3714_v51 }
 0xa6f   :  { %v3732_v9 = vpop.permute.xlu0 %3731 }
 0xa70   :  { %3743 = vst.msk [vmem:[#allocation3 + $0x20] sm:$0xff] %vm937_vm10, %v3732_v9 }
 0xa71   :  { %v3734_v6 = vpop.permute.xlu1 %3733 }
 0xa72   :  { %3744 = vst.msk [vmem:[#allocation3 + $0x28] sm:$0xff] %vm937_vm10, %v3734_v6 }
 0xa73   :  { %v3712_v38 = vpop.permute.xlu0 %3711 }
 0xa74   :  { %3721 = vst.msk [vmem:[#allocation3 + $0x30] sm:$0xff] %vm864_vm9, %v3712_v38 }
 0xa75   :  { %v3738_v62 = vpop.permute.xlu1 %3737 }
 0xa76   :  { %3746 = vst.msk [vmem:[#allocation3 + $0x38] sm:$0x1] %vm1624_vm14, %v3738_v62 }
 0xa77   :  { %v3736_v57 = vpop.permute.xlu0 %3735  ;;  %v3775_v37 = vld [vmem:[#allocation3 + $0x20] sm:$0xff] }
 0xa78   :  { %3745 = vst.msk [vmem:[#allocation3 + $0x30] sm:$0xff] %vm937_vm10, %v3736_v57  ;;  %6883 = vmatprep.mubr.msk.f32.mxu1 %vm1171_vm11, %v3775_v37 }
 0xa79   :  { %v3776_v23 = vld [vmem:[#allocation3 + $0x28] sm:$0xff] }
 0xa7a   :  { %6884 = vmatmul.mubr.msk.f32.gmra.mxu1 %vm1171_vm11, %v3776_v23 }
 0xa7d   :  { %v3778_v53 = vld [vmem:[#allocation3 + $0x38] sm:$0xff] }
 0xa7f   :  { %v3777_v19 = vld [vmem:[#allocation3 + $0x30] sm:$0xff] }
 0xa80   :  { %6886 = vmatprep.mubr.msk.f32.mxu1 %vm1171_vm11, %v3777_v19 }
 0xa81   :  { %6887 = vmatmul.mubr.msk.f32.gmra.mxu1 %vm1171_vm11, %v3778_v53 }
 0xb13   :  { %v6879_v54 = vpop.f32.mrf.mxu1 }
 0xb14   :  { %v3880_v12 = vadd.f32 %v6879_v54, %v8907_v50 }
 0xb15   :  { %v3874_v22 = vpop.f32.mrf.mxu1 }
 0xb16   :  { %v3914_v59 = vmax.f32 %v3880_v12, 0.0  ;;  %v3875_v33 = vadd.f32 %v8907_v50, %v3874_v22 }
 0xb18   :  { %v3922_v17 = vadd.f32 %v3914_v59, %v8783_v32  ;;  %v3913_v46 = vmax.f32 %v3875_v33, 0.0 }
 0xb1a   :  { %3932 = vst.msk [vmem:[#allocation2 + $0xa] sm:$0xff] %vm753_vm8, %v3922_v17  ;;  %v3921_v30 = vadd.f32 %v3913_v46, %v8793_v49  ;;  %v6882_v45 = vpop.f32.mrf.mxu1  ;;  %v5887_v49 = vunpack.c.h.bf16 %v6137_v34  ;;  %v6147_v34 = vld [vmem:[%s9431_s1 + $0x1e0] sm:$0xff]  }
 0xb1b   :  { %v3890_v14 = vadd.f32 %v6882_v45, %v8907_v50 }
 0xb1c   :  { %3931 = vst.msk [vmem:[#allocation2 + $0x2] sm:$0xff] %vm753_vm8, %v3921_v30  ;;  %v3884_v2 = vpop.f32.mrf.mxu1  ;;  %6905 = vmatprep.subr.mxu0 %v5887_v49 }
 0xb1d   :  { %v3916_v43 = vmax.f32 %v3890_v14, 0.0  ;;  %v3885_v32 = vadd.f32 %v8907_v50, %v3884_v2  ;;  %6906 = vmatpush3.msra.mxu0 %v5887_v49  ;;  %v6146_v49 = vld [vmem:[%s9431_s1 + $0x1d8] sm:$0xff]  }
 0xb1e   :  { %6907 = vmatprep.subr.mxu0 %v5886_v36  ;;  %v5922_v48 = vunpack.c.l.bf16 %v6146_v49 }
 0xb1f   :  { %v3924_v15 = vadd.f32 %v3916_v43, %v8800_v20  ;;  %v3915_v41 = vmax.f32 %v3885_v32, 0.0  ;;  %6908 = vmatpush3.msra.mxu0 %v5886_v36  ;;  %v5923_v36 = vunpack.c.h.bf16 %v6146_v49 }
 0xb20   :  { %6909 = vmatprep.subr.mxu0 %v5883_v7 }
 0xb21   :  { %3934 = vst.msk [vmem:[#allocation2 + $0x1a] sm:$0x1] %vm750_vm3, %v3924_v15  ;;  %v3923_v28 = vadd.f32 %v3915_v41, %v8809_v1  ;;  %6910 = vmatpush3.msra.mxu0 %v5883_v7  ;;  %v6135_v1 = vld [vmem:[%s9431_s1 + $0x180] sm:$0xff]   ;;  %v5927_v15 = vunpack.c.h.bf16 %v6147_v34  ;;  %v5926_v41 = vunpack.c.l.bf16 %v6147_v34  ;;  %v5658_v34 = vld [vmem:[%s9432_s2 + $0x9] ss:$0 sm:$0xff] }
 0xb22   :  { %6911 = vmatprep.subr.mxu0 %v5882_v10  ;;  %v5879_v61 = vunpack.c.h.bf16 %v6135_v1  ;;  %v5878_v8 = vunpack.c.l.bf16 %v6135_v1 }
 0xb23   :  { %3933 = vst.msk [vmem:[#allocation2 + $0x12] sm:$0xff] %vm753_vm8, %v3923_v28  ;;  %v3946_v26 = vld [vmem:[#allocation2 + $0x1] ss:$2 sm:$0xff]  ;;  %v3959_v20 = vld [vmem:[#allocation2 + $0x2] ss:$2 sm:$0xff]  ;;  %6912 = vmatpush3.msra.mxu0 %v5882_v10  ;;  %6927 = vmatprep.subr.mxu1 %v5927_v15 }
 0xb24   :  { %3950 = vrot.lane.b32.xlu0 %v3946_v26, %s7157_s13  ;;  %v3941_v63 = vld [vmem:[#allocation2] ss:$2 sm:$0xff]  ;;  %6913 = vmatprep.subr.mxu0 %v5879_v61  ;;  %v3972_v21 = vld [vmem:[#allocation2 + $0x3] ss:$2 sm:$0xff] }
 0xb25   :  { %3943 = vst.msk [vmem:[#allocation3] sm:$0xff] %vm753_vm8, %v3941_v63  ;;  %6914 = vmatpush3.msra.mxu0 %v5879_v61  ;;  %6928 = vmatpush3.msra.mxu1 %v5927_v15  ;;  %v6145_v28 = vld [vmem:[%s9431_s1 + $0x1d0] sm:$0xff]   ;;  %v5657_v10 = vld [vmem:[%s9432_s2 + $0x8] ss:$0 sm:$0xff] }
 0xb26   :  { %4155 = vst.msk [vmem:[#allocation2] sm:$0x1] %vm750_vm3, %v7154_v3  ;;  %4156 = vst.msk [vmem:[#allocation2 + $0xe] sm:$0x1] %vm750_vm3, %v7154_v3  ;;  %6915 = vmatprep.subr.mxu0 %v5878_v8  ;;  %6929 = vmatprep.subr.mxu1 %v5926_v41  ;;  %v5919_v7 = vunpack.c.h.bf16 %v6145_v28  ;;  %v6144_v61 = vld [vmem:[%s9431_s1 + $0x1c8] sm:$0xff]  }
 0xb27   :  { %6916 = vmatpush3.msra.mxu0 %v5878_v8  ;;  %6930 = vmatpush3.msra.mxu1 %v5926_v41 }
 0xb28   :  { %3963 = vrot.lane.b32.xlu0 %v3959_v20, %s7158_s14  ;;  %6917 = vmatprep.subr.mxu0 %v5875_v52  ;;  %v5918_v20 = vunpack.c.l.bf16 %v6145_v28 }
 0xb29   :  { %6918 = vmatpush3.msra.mxu0 %v5875_v52  ;;  %6931 = vmatprep.subr.mxu1 %v5923_v36 }
 0xb2a   :  { %v3947_v60 = vld [vmem:[#allocation2 + $0x11] ss:$2 sm:$0x1f]  ;;  %v3942_v35 = vld [vmem:[#allocation2 + $0x10] ss:$2 sm:$0x1f]  ;;  %6919 = vmatprep.subr.mxu0 %v5874_v0  ;;  %6932 = vmatpush3.msra.mxu1 %v5923_v36 }
 0xb2b   :  { %3952 = vrot.lane.b32.xlu1 %v3947_v60, %s7157_s13  ;;  %3945 = vst.msk [vmem:[#allocation3 + $0x8] sm:$0x1f] %vm3944_vm0, %v3942_v35  ;;  %v3960_v11 = vld [vmem:[#allocation2 + $0x12] ss:$2 sm:$0x1f]  ;;  %6920 = vmatpush3.msra.mxu0 %v5874_v0  ;;  %v5915_v60 = vunpack.c.h.bf16 %v6144_v61  ;;  %v6143_v35 = vld [vmem:[%s9431_s1 + $0x1c0] sm:$0xff]  }
 0xb2c   :  { %3976 = vrot.lane.b32.xlu0 %v3972_v21, %s7159_s27  ;;  %4159 = vst.msk [vmem:[#allocation2 + $0x10] sm:$0x1] %vm750_vm3, %v7154_v3  ;;  %v3973_v58 = vld [vmem:[#allocation2 + $0x13] ss:$2 sm:$0x1f]  ;;  %6933 = vmatprep.subr.mxu1 %v5922_v48  ;;  %v5914_v21 = vunpack.c.l.bf16 %v6144_v61  ;;  %v5911_v0 = vunpack.c.h.bf16 %v6143_v35 }
 0xb2d   :  { %6934 = vmatpush3.msra.mxu1 %v5922_v48 }
 0xb2e   :  { %6935 = vmatprep.subr.mxu1 %v5919_v7 }
 0xb2f   :  { %3965 = vrot.lane.b32.xlu1 %v3960_v11, %s7158_s14  ;;  %6936 = vmatpush3.msra.mxu1 %v5919_v7  ;;  %v5910_v11 = vunpack.c.l.bf16 %v6143_v35  ;;  %v6150_v7 = vld [vmem:[%s9431_s1 + $0x1f8] sm:$0xff]  }
 0xb30   :  { %6937 = vmatprep.subr.mxu1 %v5918_v20  ;;  %v5938_v61 = vunpack.c.l.bf16 %v6150_v7 }
 0xb31   :  { %6938 = vmatpush3.msra.mxu1 %v5918_v20  ;;  %v5939_v20 = vunpack.c.h.bf16 %v6150_v7 }
 0xb32   :  { %6939 = vmatprep.subr.mxu1 %v5915_v60 }
 0xb33   :  { %3978 = vrot.lane.b32.xlu1 %v3973_v58, %s7159_s27  ;;  %6940 = vmatpush3.msra.mxu1 %v5915_v60  ;;  %v6142_v58 = vld [vmem:[%s9431_s1 + $0x1b8] sm:$0xff]   ;;  %v6149_v60 = vld [vmem:[%s9431_s1 + $0x1f0] sm:$0xff]  }
 0xb34   :  { %6941 = vmatprep.subr.mxu1 %v5914_v21 }
 0xb35   :  { %6942 = vmatpush3.msra.mxu1 %v5914_v21 }
 0xb36   :  { %6943 = vmatprep.subr.mxu1 %v5911_v0 }
 0xb37   :  { %6944 = vmatpush3.msra.mxu1 %v5911_v0 }
 0xb38   :  { %6945 = vmatprep.subr.mxu1 %v5910_v11 }
 0xb39   :  { %6946 = vmatpush3.msra.mxu1 %v5910_v11 }
 0xb3a   :  { %v6885_v51 = vpop.f32.mrf.mxu1 }
 0xb3b   :  { %v3900_v9 = vadd.f32 %v6885_v51, %v8907_v50  ;;  %v5907_v51 = vunpack.c.h.bf16 %v6142_v58 }
 0xb3c   :  { %v3894_v6 = vpop.f32.mrf.mxu1 }
 0xb3d   :  { %v3918_v38 = vmax.f32 %v3900_v9, 0.0  ;;  %v3895_v62 = vadd.f32 %v8907_v50, %v3894_v6  ;;  %v5906_v9 = vunpack.c.l.bf16 %v6142_v58  ;;  %6947 = vmatprep.subr.mxu1 %v5907_v51 }
 0xb3e   :  { %6948 = vmatpush3.msra.mxu1 %v5907_v51 }
 0xb3f   :  { %v3926_v57 = vadd.f32 %v3918_v38, %v8833_v39  ;;  %v3917_v37 = vmax.f32 %v3895_v62, 0.0  ;;  %6949 = vmatprep.subr.mxu1 %v5906_v9 }
 0xb40   :  { %6950 = vmatpush3.msra.mxu1 %v5906_v9 }
 0xb41   :  { %3938 = vst.msk [vmem:[#allocation2 + $0x2a] sm:$0xff] %vm753_vm8, %v3926_v57  ;;  %v3925_v23 = vadd.f32 %v3917_v37, %v8840_v16  ;;  %v6888_v19 = vpop.f32.mrf.mxu1 }
 0xb42   :  { %v3910_v53 = vadd.f32 %v6888_v19, %v8907_v50 }
 0xb43   :  { %3937 = vst.msk [vmem:[#allocation2 + $0x22] sm:$0xff] %vm753_vm8, %v3925_v23  ;;  %v3904_v29 = vpop.f32.mrf.mxu1 }
 0xb44   :  { %v3920_v24 = vmax.f32 %v3910_v53, 0.0  ;;  %v3905_v25 = vadd.f32 %v8907_v50, %v3904_v29 }
 0xb46   :  { %v3928_v18 = vadd.f32 %v3920_v24, %v8847_v5  ;;  %v3919_v42 = vmax.f32 %v3905_v25, 0.0 }
 0xb48   :  { %3940 = vst.msk [vmem:[#allocation2 + $0x3a] sm:$0x1] %vm750_vm3, %v3928_v18  ;;  %v3927_v39 = vadd.f32 %v3919_v42, %v8853_v40 }
 0xb4a   :  { %3939 = vst.msk [vmem:[#allocation2 + $0x32] sm:$0xff] %vm753_vm8, %v3927_v39  ;;  %v3989_v47 = vld [vmem:[#allocation2 + $0x21] ss:$2 sm:$0xff]  ;;  %v4001_v16 = vld [vmem:[#allocation2 + $0x22] ss:$2 sm:$0xff] }
 0xb4b   :  { %3993 = vrot.lane.b32.xlu0 %v3989_v47, %s7157_s13  ;;  %v4013_v56 = vld [vmem:[#allocation2 + $0x23] ss:$2 sm:$0xff]  ;;  %v3985_v27 = vld [vmem:[#allocation2 + $0x20] ss:$2 sm:$0xff] }
 0xb4c   :  { %3987 = vst.msk [vmem:[#allocation3 + $0x10] sm:$0xff] %vm753_vm8, %v3985_v27 }
 0xb4d   :  { %4564 = vst.msk [vmem:[#allocation2 + $0x27] sm:$0x3] %vm1477_vm7, %v7154_v3 }
 0xb4f   :  { %4005 = vrot.lane.b32.xlu0 %v4001_v16, %s7158_s14 }
 0xb51   :  { %v3990_v5 = vld [vmem:[#allocation2 + $0x31] ss:$2 sm:$0x1f]  ;;  %v3986_v50 = vld [vmem:[#allocation2 + $0x30] ss:$2 sm:$0x1f] }
 0xb52   :  { %3995 = vrot.lane.b32.xlu1 %v3990_v5, %s7157_s13  ;;  %3988 = vst.msk [vmem:[#allocation3 + $0x18] sm:$0x1f] %vm3944_vm0, %v3986_v50  ;;  %v4002_v40 = vld [vmem:[#allocation2 + $0x32] ss:$2 sm:$0x1f] }
 0xb53   :  { %4017 = vrot.lane.b32.xlu0 %v4013_v56, %s7159_s27  ;;  %v4014_v54 = vld [vmem:[#allocation2 + $0x33] ss:$2 sm:$0x1f] }
 0xb56   :  { %4007 = vrot.lane.b32.xlu1 %v4002_v40, %s7158_s14 }
 0xb5a   :  { %4019 = vrot.lane.b32.xlu1 %v4014_v54, %s7159_s27 }
 0xb96   :  { %v3951_v12 = vpop.permute.xlu0 %3950 }
 0xb97   :  { %3956 = vst.msk [vmem:[#allocation3] sm:$0xff] %vm864_vm9, %v3951_v12 }
 0xb9a   :  { %v3964_v22 = vpop.permute.xlu0 %3963 }
 0xb9b   :  { %3969 = vst.msk [vmem:[#allocation3] sm:$0xff] %vm937_vm10, %v3964_v22 }
 0xb9d   :  { %v3953_v59 = vpop.permute.xlu1 %3952 }
 0xb9e   :  { %3958 = vst.msk [vmem:[#allocation3 + $0x8] sm:$0x1f] %vm3957_vm1, %v3953_v59  ;;  %v3977_v33 = vpop.permute.xlu0 %3976 }
 0xb9f   :  { %3982 = vst.msk [vmem:[#allocation3] sm:$0xff] %vm1668_vm12, %v3977_v33 }
 0xba1   :  { %v3966_v31 = vpop.permute.xlu1 %3965 }
 0xba2   :  { %3971 = vst.msk [vmem:[#allocation3 + $0x8] sm:$0x1f] %vm3970_vm2, %v3966_v31 }
 0xba5   :  { %v3979_v4 = vpop.permute.xlu1 %3978 }
 0xba6   :  { %3984 = vst.msk [vmem:[#allocation3 + $0x8] sm:$0x1f] %vm3983_vm4, %v3979_v4  ;;  %v4057_v17 = vld [vmem:[#allocation3] sm:$0xff] }
 0xba7   :  { %6921 = vmatprep.mubr.f32.mxu0 %v4057_v17 }
 0xbad   :  { %v4058_v46 = vld [vmem:[#allocation3 + $0x8] sm:$0xff] }
 0xbae   :  { %6922 = vmatmul.mubr.f32.vlgmr.msra.gmra.mxu0 %v4058_v46 }
 0xbbd   :  { %v3994_v44 = vpop.permute.xlu0 %3993 }
 0xbbe   :  { %3999 = vst.msk [vmem:[#allocation3 + $0x10] sm:$0xff] %vm864_vm9, %v3994_v44  ;;  %v6153_v44 = vld [vmem:[%s9431_s1 + $0x210] sm:$0xff]  }
 0xbc1   :  { %v4006_v30 = vpop.permute.xlu0 %4005 }
 0xbc2   :  { %4011 = vst.msk [vmem:[#allocation3 + $0x10] sm:$0xff] %vm937_vm10, %v4006_v30  ;;  %v6152_v30 = vld [vmem:[%s9431_s1 + $0x208] sm:$0xff]  }
 0xbc4   :  { %v3996_v45 = vpop.permute.xlu1 %3995 }
 0xbc5   :  { %4000 = vst.msk [vmem:[#allocation3 + $0x18] sm:$0x1f] %vm3957_vm1, %v3996_v45  ;;  %v4018_v14 = vpop.permute.xlu0 %4017  ;;  %v5951_v45 = vunpack.c.h.bf16 %v6153_v44 }
 0xbc6   :  { %4023 = vst.msk [vmem:[#allocation3 + $0x10] sm:$0xff] %vm1668_vm12, %v4018_v14  ;;  %v5950_v14 = vunpack.c.l.bf16 %v6153_v44 }
 0xbc7   :  { %6957 = vmatprep.subr.mxu0 %v5951_v45 }
 0xbc8   :  { %v4008_v13 = vpop.permute.xlu1 %4007  ;;  %6958 = vmatpush3.msra.mxu0 %v5951_v45 }
 0xbc9   :  { %4012 = vst.msk [vmem:[#allocation3 + $0x18] sm:$0x1f] %vm3970_vm2, %v4008_v13  ;;  %v5947_v13 = vunpack.c.h.bf16 %v6152_v30  ;;  %6959 = vmatprep.subr.mxu0 %v5950_v14 }
 0xbca   :  { %6960 = vmatpush3.msra.mxu0 %v5950_v14 }
 0xbcb   :  { %6961 = vmatprep.subr.mxu0 %v5947_v13 }
 0xbcc   :  { %v4020_v2 = vpop.permute.xlu1 %4019  ;;  %6962 = vmatpush3.msra.mxu0 %v5947_v13 }
 0xbcd   :  { %4024 = vst.msk [vmem:[#allocation3 + $0x18] sm:$0x1f] %vm3983_vm4, %v4020_v2  ;;  %v4059_v43 = vld [vmem:[#allocation3 + $0x10] sm:$0xff] }
 0xbce   :  { %6924 = vmatprep.mubr.f32.mxu0 %v4059_v43  ;;  %v6151_v2 = vld [vmem:[%s9431_s1 + $0x200] sm:$0xff]   ;;  %v5946_v43 = vunpack.c.l.bf16 %v6152_v30 }
 0xbcf   :  { %v5942_v36 = vunpack.c.l.bf16 %v6151_v2 }
 0xbd0   :  { %6963 = vmatprep.subr.mxu0 %v5946_v43 }
 0xbd1   :  { %6964 = vmatpush3.msra.mxu0 %v5946_v43 }
 0xbd4   :  { %v4060_v32 = vld [vmem:[#allocation3 + $0x18] sm:$0xff] }
 0xbd5   :  { %6925 = vmatmul.mubr.f32.gmra.mxu0 %v4060_v32  ;;  %v5943_v32 = vunpack.c.h.bf16 %v6151_v2 }
 0xbd7   :  { %6965 = vmatprep.subr.mxu0 %v5943_v32 }
 0xbd8   :  { %6966 = vmatpush3.msra.mxu0 %v5943_v32 }
 0xbd9   :  { %6967 = vmatprep.subr.mxu0 %v5942_v36 }
 0xbda   :  { %6968 = vmatpush3.msra.mxu0 %v5942_v36 }
 0xbdb   :  { %6969 = vmatprep.subr.mxu0 %v5939_v20 }
 0xbdc   :  { %6970 = vmatpush3.msra.mxu0 %v5939_v20 }
 0xbdd   :  { %6971 = vmatprep.subr.mxu0 %v5938_v61 }
 0xbde   :  { %6972 = vmatpush3.msra.mxu0 %v5938_v61  ;;  %v6157_v61 = vld [vmem:[%s9431_s1 + $0x230] sm:$0xff]  }
 0xc6e   :  { %v6923_v26 = vpop.f32.mrf.mxu0 }
 0xc6f   :  { %v8996_v63 = vadd.f32 %v6923_v26, %v5657_v10 }
 0xc70   :  { %v4132_v1 = vpop.f32.mrf.mxu0 }
 0xc71   :  { %v4152_v8 = vmax.f32 %v8996_v63, 0.0  ;;  %v9002_v55 = vadd.f32 %v5657_v10, %v4132_v1  ;;  %v5935_v63 = vunpack.c.h.bf16 %v6149_v60 }
 0xc73   :  { %4158 = vst.msk [vmem:[#allocation2 + $0x9] sm:$0x1f] %vm3944_vm0, %v4152_v8  ;;  %v4151_v52 = vmax.f32 %v9002_v55, 0.0  ;;  %6973 = vmatprep.subr.mxu0 %v5935_v63  ;;  %v6148_v55 = vld [vmem:[%s9431_s1 + $0x1e8] sm:$0xff]  }
 0xc74   :  { %6974 = vmatpush3.msra.mxu0 %v5935_v63  ;;  %v5930_v35 = vunpack.c.l.bf16 %v6148_v55  ;;  %v5967_v63 = vunpack.c.h.bf16 %v6157_v61 }
 0xc75   :  { %4157 = vst.msk [vmem:[#allocation2 + $0x1] sm:$0xff] %vm753_vm8, %v4151_v52 }
 0xc7a   :  { %v4168_v6 = vld [vmem:[#allocation2 + $0x9] sm:$0x1f] }
 0xc7b   :  { %v4180_v38 = vld [vmem:[#allocation2 + $0xa] sm:$0x1f]  ;;  %4173 = vrot.lane.b32.xlu1 %v4168_v6, %s7157_s13 }
 0xc7c   :  { %4358 = vst.msk [vmem:[#allocation2 + $0xe] sm:$0x1] %vm750_vm3, %v7154_v3  ;;  %v4167_v62 = vld [vmem:[#allocation2 + $0x1] sm:$0xff] }
 0xc7d   :  { %v4164_v57 = vld [vmem:[#allocation2 + $0x8] sm:$0x1f]  ;;  %4171 = vrot.lane.b32.xlu0 %v4167_v62, %s7157_s13  ;;  %v4163_v37 = vld [vmem:[#allocation2] sm:$0xff] }
 0xc7e   :  { %4166 = vst.msk [vmem:[#allocation3 + $0x8] sm:$0x1f] %vm3944_vm0, %v4164_v57  ;;  %v4179_v23 = vld [vmem:[#allocation2 + $0x2] sm:$0xff] }
 0xc7f   :  { %4165 = vst.msk [vmem:[#allocation3] sm:$0xff] %vm753_vm8, %v4163_v37  ;;  %4185 = vrot.lane.b32.xlu1 %v4180_v38, %s7158_s14 }
 0xc80   :  { %4357 = vst.msk [vmem:[#allocation2] sm:$0x1] %vm750_vm3, %v7154_v3 }
 0xc81   :  { %4183 = vrot.lane.b32.xlu0 %v4179_v23, %s7158_s14 }
 0xc95   :  { %v6926_v19 = vpop.f32.mrf.mxu0 }
 0xc96   :  { %v9027_v53 = vadd.f32 %v6926_v19, %v5657_v10 }
 0xc97   :  { %v4142_v29 = vpop.f32.mrf.mxu0 }
 0xc98   :  { %v4154_v24 = vmax.f32 %v9027_v53, 0.0  ;;  %v9030_v25 = vadd.f32 %v5657_v10, %v4142_v29 }
 0xc9a   :  { %4162 = vst.msk [vmem:[#allocation2 + $0x19] sm:$0x1f] %vm3944_vm0, %v4154_v24  ;;  %v4153_v18 = vmax.f32 %v9030_v25, 0.0 }
 0xc9c   :  { %4161 = vst.msk [vmem:[#allocation2 + $0x11] sm:$0xff] %vm753_vm8, %v4153_v18 }
 0xca1   :  { %v4196_v42 = vld [vmem:[#allocation2 + $0x19] sm:$0x1f] }
 0xca2   :  { %v4208_v39 = vld [vmem:[#allocation2 + $0x1a] sm:$0x1f]  ;;  %4201 = vrot.lane.b32.xlu1 %v4196_v42, %s7157_s13 }
 0xca3   :  { %4362 = vst.msk [vmem:[#allocation2 + $0x1e] sm:$0x1] %vm750_vm3, %v7154_v3  ;;  %v4195_v47 = vld [vmem:[#allocation2 + $0x11] sm:$0xff] }
 0xca4   :  { %v4192_v16 = vld [vmem:[#allocation2 + $0x18] sm:$0x1f]  ;;  %4199 = vrot.lane.b32.xlu0 %v4195_v47, %s7157_s13  ;;  %v4191_v56 = vld [vmem:[#allocation2 + $0x10] sm:$0xff] }
 0xca5   :  { %4194 = vst.msk [vmem:[#allocation3 + $0x18] sm:$0x1f] %vm3944_vm0, %v4192_v16  ;;  %v4207_v27 = vld [vmem:[#allocation2 + $0x12] sm:$0xff] }
 0xca6   :  { %4193 = vst.msk [vmem:[#allocation3 + $0x10] sm:$0xff] %vm753_vm8, %v4191_v56  ;;  %4213 = vrot.lane.b32.xlu1 %v4208_v39, %s7158_s14 }
 0xca7   :  { %4361 = vst.msk [vmem:[#allocation2 + $0x10] sm:$0x1] %vm750_vm3, %v7154_v3 }
 0xca8   :  { %4211 = vrot.lane.b32.xlu0 %v4207_v27, %s7158_s14 }
 0xced   :  { %v4174_v5 = vpop.permute.xlu1 %4173 }
 0xcee   :  { %4178 = vst.msk [vmem:[#allocation3 + $0x8] sm:$0x1f] %vm3957_vm1, %v4174_v5 }
 0xcef   :  { %v4172_v50 = vpop.permute.xlu0 %4171 }
 0xcf0   :  { %4177 = vst.msk [vmem:[#allocation3] sm:$0xff] %vm864_vm9, %v4172_v50 }
 0xcf1   :  { %v4186_v40 = vpop.permute.xlu1 %4185 }
 0xcf2   :  { %4190 = vst.msk [vmem:[#allocation3 + $0x8] sm:$0x1f] %vm3970_vm2, %v4186_v40 }
 0xcf3   :  { %v4184_v54 = vpop.permute.xlu0 %4183 }
 0xcf4   :  { %4189 = vst.msk [vmem:[#allocation3] sm:$0xff] %vm937_vm10, %v4184_v54 }
 0xcf9   :  { %v4244_v22 = vld [vmem:[#allocation3 + $0x8] sm:$0xff] }
 0xcfb   :  { %v4243_v12 = vld [vmem:[#allocation3] sm:$0xff] }
 0xcfc   :  { %6951 = vmatprep.mubr.msk.f32.mxu1 %vm1171_vm11, %v4243_v12 }
 0xcfd   :  { %6952 = vmatmul.mubr.msk.f32.vlgmr.msra.gmra.mxu1 %vm1171_vm11, %v4244_v22 }
 0xd14   :  { %v4202_v59 = vpop.permute.xlu1 %4201 }
 0xd15   :  { %4206 = vst.msk [vmem:[#allocation3 + $0x18] sm:$0x1f] %vm3957_vm1, %v4202_v59 }
 0xd16   :  { %v4200_v33 = vpop.permute.xlu0 %4199 }
 0xd17   :  { %4205 = vst.msk [vmem:[#allocation3 + $0x10] sm:$0xff] %vm864_vm9, %v4200_v33 }
 0xd18   :  { %v4214_v31 = vpop.permute.xlu1 %4213 }
 0xd19   :  { %4218 = vst.msk [vmem:[#allocation3 + $0x18] sm:$0x1f] %vm3970_vm2, %v4214_v31  ;;  %v5663_v31 = vld [vmem:[%s9432_s2 + $0xa] ss:$0 sm:$0xff] }
 0xd1a   :  { %v4212_v4 = vpop.permute.xlu0 %4211 }
 0xd1b   :  { %4217 = vst.msk [vmem:[#allocation3 + $0x10] sm:$0xff] %vm937_vm10, %v4212_v4 }
 0xd20   :  { %v4246_v46 = vld [vmem:[#allocation3 + $0x18] sm:$0xff] }
 0xd22   :  { %v4245_v17 = vld [vmem:[#allocation3 + $0x10] sm:$0xff] }
 0xd23   :  { %6954 = vmatprep.mubr.msk.f32.mxu1 %vm1171_vm11, %v4245_v17 }
 0xd24   :  { %6955 = vmatmul.mubr.msk.f32.gmra.mxu1 %vm1171_vm11, %v4246_v46 }
 0xdbd   :  { %v6953_v49 = vpop.f32.mrf.mxu1 }
 0xdbe   :  { %v4336_v15 = vadd.f32 %v6953_v49, %v5658_v34  ;;  %v6160_v49 = vld [vmem:[%s9431_s1 + $0x248] sm:$0xff]  }
 0xdbf   :  { %v4330_v41 = vpop.f32.mrf.mxu1  ;;  %v5978_v7 = vunpack.c.l.bf16 %v6160_v49 }
 0xdc0   :  { %v4350_v28 = vmax.f32 %v4336_v15, 0.0  ;;  %v4331_v48 = vadd.f32 %v5658_v34, %v4330_v41 }
 0xdc2   :  { %v9078_v10 = vadd.f32 %v4350_v28, %v4152_v8  ;;  %v4349_v26 = vmax.f32 %v4331_v48, 0.0  ;;  %v5934_v8 = vunpack.c.l.bf16 %v6149_v60  ;;  %v5979_v28 = vunpack.c.h.bf16 %v6160_v49  ;;  %v6159_v48 = vld [vmem:[%s9431_s1 + $0x240] sm:$0xff]  }
 0xdc3   :  { %v5974_v20 = vunpack.c.l.bf16 %v6159_v48  ;;  %v6163_v49 = vld [vmem:[%s9431_s1 + $0x260] sm:$0xff]  }
 0xdc4   :  { %4360 = vst.msk [vmem:[#allocation2 + $0x9] sm:$0x1f] %vm3944_vm0, %v9078_v10  ;;  %v9084_v1 = vadd.f32 %v4349_v26, %v4151_v52  ;;  %6975 = vmatprep.subr.mxu0 %v5934_v8  ;;  %v5931_v52 = vunpack.c.h.bf16 %v6148_v55  ;;  %v6158_v26 = vld [vmem:[%s9431_s1 + $0x238] sm:$0xff]  }
 0xdc5   :  { %6976 = vmatpush3.msra.mxu0 %v5934_v8  ;;  %v5970_v60 = vunpack.c.l.bf16 %v6158_v26  ;;  %v5966_v8 = vunpack.c.l.bf16 %v6157_v61 }
 0xdc6   :  { %4359 = vst.msk [vmem:[#allocation2 + $0x1] sm:$0xff] %vm753_vm8, %v9084_v1  ;;  %6977 = vmatprep.subr.mxu0 %v5931_v52 }
 0xdc7   :  { %6978 = vmatpush3.msra.mxu0 %v5931_v52 }
 0xdc8   :  { %6979 = vmatprep.subr.mxu0 %v5930_v35 }
 0xdc9   :  { %6980 = vmatpush3.msra.mxu0 %v5930_v35 }
 0xdcb   :  { %v4370_v21 = vld [vmem:[#allocation2 + $0x9] sm:$0x1f] }
 0xdcc   :  { %4375 = vrot.lane.b32.xlu1 %v4370_v21, %s7157_s13  ;;  %v4382_v51 = vld [vmem:[#allocation2 + $0xa] sm:$0x1f] }
 0xdcd   :  { %v4369_v0 = vld [vmem:[#allocation2 + $0x1] sm:$0xff] }
 0xdce   :  { %v4366_v11 = vld [vmem:[#allocation2 + $0x8] sm:$0x1f]  ;;  %4373 = vrot.lane.b32.xlu0 %v4369_v0, %s7157_s13  ;;  %v4365_v58 = vld [vmem:[#allocation2] sm:$0xff] }
 0xdcf   :  { %4368 = vst.msk [vmem:[#allocation3 + $0x8] sm:$0x1f] %vm3944_vm0, %v4366_v11  ;;  %v4381_v9 = vld [vmem:[#allocation2 + $0x2] sm:$0xff] }
 0xdd0   :  { %4367 = vst.msk [vmem:[#allocation3] sm:$0xff] %vm753_vm8, %v4365_v58  ;;  %4387 = vrot.lane.b32.xlu1 %v4382_v51, %s7158_s14  ;;  %v6156_v11 = vld [vmem:[%s9431_s1 + $0x228] sm:$0xff]  }
 0xdd1   :  { %4559 = vst.msk [vmem:[#allocation2] sm:$0x3] %vm1477_vm7, %v7154_v3 }
 0xdd2   :  { %4385 = vrot.lane.b32.xlu0 %v4381_v9, %s7158_s14  ;;  %v5963_v9 = vunpack.c.h.bf16 %v6156_v11 }
 0xde4   :  { %v6956_v6 = vpop.f32.mrf.mxu1 }
 0xde5   :  { %v4346_v38 = vadd.f32 %v6956_v6, %v5658_v34  ;;  %v5962_v6 = vunpack.c.l.bf16 %v6156_v11 }
 0xde6   :  { %v4340_v62 = vpop.f32.mrf.mxu1 }
 0xde7   :  { %v4352_v57 = vmax.f32 %v4346_v38, 0.0  ;;  %v4341_v37 = vadd.f32 %v5658_v34, %v4340_v62  ;;  %v6161_v34 = vld [vmem:[%s9431_s1 + $0x250] sm:$0xff]   ;;  %v6155_v62 = vld [vmem:[%s9431_s1 + $0x220] sm:$0xff]  }
 0xde8   :  { %v5983_v15 = vunpack.c.h.bf16 %v6161_v34  ;;  %v5982_v41 = vunpack.c.l.bf16 %v6161_v34 }
 0xde9   :  { %v9104_v23 = vadd.f32 %v4352_v57, %v4154_v24  ;;  %v4351_v19 = vmax.f32 %v4341_v37, 0.0  ;;  %v5959_v57 = vunpack.c.h.bf16 %v6155_v62  ;;  %v5958_v37 = vunpack.c.l.bf16 %v6155_v62 }
 0xdea   :  { %6987 = vmatprep.subr.mxu1 %v5983_v15 }
 0xdeb   :  { %4364 = vst.msk [vmem:[#allocation2 + $0x19] sm:$0x1f] %vm3944_vm0, %v9104_v23  ;;  %v9110_v29 = vadd.f32 %v4351_v19, %v4153_v18  ;;  %6988 = vmatpush3.msra.mxu1 %v5983_v15  ;;  %v5991_v15 = vunpack.c.h.bf16 %v6163_v49 }
 0xdec   :  { %6989 = vmatprep.subr.mxu1 %v5982_v41 }
 0xded   :  { %4363 = vst.msk [vmem:[#allocation2 + $0x11] sm:$0xff] %vm753_vm8, %v9110_v29  ;;  %6990 = vmatpush3.msra.mxu1 %v5982_v41  ;;  %v5990_v41 = vunpack.c.l.bf16 %v6163_v49 }
 0xdee   :  { %6991 = vmatprep.subr.mxu1 %v5979_v28 }
 0xdef   :  { %6992 = vmatpush3.msra.mxu1 %v5979_v28 }
 0xdf0   :  { %6993 = vmatprep.subr.mxu1 %v5978_v7 }
 0xdf1   :  { %6994 = vmatpush3.msra.mxu1 %v5978_v7 }
 0xdf2   :  { %v4398_v42 = vld [vmem:[#allocation2 + $0x19] sm:$0x1f] }
 0xdf3   :  { %4403 = vrot.lane.b32.xlu1 %v4398_v42, %s7157_s13  ;;  %v4410_v24 = vld [vmem:[#allocation2 + $0x1a] sm:$0x1f] }
 0xdf4   :  { %v4397_v39 = vld [vmem:[#allocation2 + $0x11] sm:$0xff] }
 0xdf5   :  { %v4409_v47 = vld [vmem:[#allocation2 + $0x12] sm:$0xff]  ;;  %4401 = vrot.lane.b32.xlu0 %v4397_v39, %s7157_s13 }
 0xdf6   :  { %v4394_v16 = vld [vmem:[#allocation2 + $0x18] sm:$0x1f]  ;;  %v4393_v53 = vld [vmem:[#allocation2 + $0x10] sm:$0xff] }
 0xdf7   :  { %4396 = vst.msk [vmem:[#allocation3 + $0x18] sm:$0x1f] %vm3944_vm0, %v4394_v16  ;;  %4415 = vrot.lane.b32.xlu1 %v4410_v24, %s7158_s14 }
 0xdf8   :  { %4563 = vst.msk [vmem:[#allocation2 + $0x18] sm:$0x3] %vm1477_vm7, %v7154_v3  ;;  %4560 = vst.msk [vmem:[#allocation2 + $0xf] sm:$0x3] %vm1477_vm7, %v7154_v3  ;;  %vm4582_vm7 = vcmask 784896  }
 0xdf9   :  { %4395 = vst.msk [vmem:[#allocation3 + $0x10] sm:$0xff] %vm753_vm8, %v4393_v53  ;;  %4413 = vrot.lane.b32.xlu0 %v4409_v47, %s7158_s14 }
 0xdfa   :  { %4734 = vst.msk [vmem:[#allocation2 + $0x10] sm:$0x1] %vm750_vm3, %v7154_v3 }
 0xe3e   :  { %v4376_v25 = vpop.permute.xlu1 %4375 }
 0xe3f   :  { %4380 = vst.msk [vmem:[#allocation3 + $0x8] sm:$0x1f] %vm3957_vm1, %v4376_v25 }
 0xe40   :  { %v4374_v18 = vpop.permute.xlu0 %4373 }
 0xe41   :  { %4379 = vst.msk [vmem:[#allocation3] sm:$0xff] %vm864_vm9, %v4374_v18 }
 0xe42   :  { %v4388_v56 = vpop.permute.xlu1 %4387 }
 0xe43   :  { %4392 = vst.msk [vmem:[#allocation3 + $0x8] sm:$0x1f] %vm3970_vm2, %v4388_v56 }
 0xe44   :  { %v4386_v27 = vpop.permute.xlu0 %4385 }
 0xe45   :  { %4391 = vst.msk [vmem:[#allocation3] sm:$0xff] %vm937_vm10, %v4386_v27 }
 0xe4a   :  { %v4446_v50 = vld [vmem:[#allocation3 + $0x8] sm:$0xff] }
 0xe4c   :  { %v4445_v5 = vld [vmem:[#allocation3] sm:$0xff] }
 0xe4d   :  { %6981 = vmatprep.mubr.msk.f32.mxu0 %vm1171_vm11, %v4445_v5 }
 0xe4e   :  { %6982 = vmatmul.mubr.msk.f32.vlgmr.msra.gmra.mxu0 %vm1171_vm11, %v4446_v50 }
 0xe65   :  { %v4404_v40 = vpop.permute.xlu1 %4403 }
 0xe66   :  { %4408 = vst.msk [vmem:[#allocation3 + $0x18] sm:$0x1f] %vm3957_vm1, %v4404_v40  ;;  %v6167_v40 = vld [vmem:[%s9431_s1 + $0x280] sm:$0xff]  }
 0xe67   :  { %v4402_v54 = vpop.permute.xlu0 %4401 }
 0xe68   :  { %4407 = vst.msk [vmem:[#allocation3 + $0x10] sm:$0xff] %vm864_vm9, %v4402_v54  ;;  %v6166_v54 = vld [vmem:[%s9431_s1 + $0x278] sm:$0xff]   ;;  %vm5180_vm9 = vcmask 129024  }
 0xe69   :  { %v4416_v12 = vpop.permute.xlu1 %4415 }
 0xe6a   :  { %4420 = vst.msk [vmem:[#allocation3 + $0x18] sm:$0x1f] %vm3970_vm2, %v4416_v12  ;;  %v6007_v12 = vunpack.c.h.bf16 %v6167_v40 }
 0xe6b   :  { %v4414_v22 = vpop.permute.xlu0 %4413 }
 0xe6c   :  { %4419 = vst.msk [vmem:[#allocation3 + $0x10] sm:$0xff] %vm937_vm10, %v4414_v22  ;;  %v6006_v22 = vunpack.c.l.bf16 %v6167_v40  ;;  %7022 = vmatprep.subr.mxu0 %v6007_v12  ;;  %vm5199_vm10 = vcmask 130048  }
 0xe6d   :  { %7023 = vmatpush3.msra.mxu0 %v6007_v12 }
 0xe6e   :  { %7024 = vmatprep.subr.mxu0 %v6006_v22 }
 0xe6f   :  { %7025 = vmatpush3.msra.mxu0 %v6006_v22 }
 0xe71   :  { %v4448_v33 = vld [vmem:[#allocation3 + $0x18] sm:$0xff] }
 0xe73   :  { %v4447_v59 = vld [vmem:[#allocation3 + $0x10] sm:$0xff] }
 0xe74   :  { %6984 = vmatprep.mubr.msk.f32.mxu0 %vm1171_vm11, %v4447_v59  ;;  %v6003_v59 = vunpack.c.h.bf16 %v6166_v54 }
 0xe75   :  { %6985 = vmatmul.mubr.msk.f32.gmra.mxu0 %vm1171_vm11, %v4448_v33  ;;  %v6165_v33 = vld [vmem:[%s9431_s1 + $0x270] sm:$0xff]  }
 0xe76   :  { %7026 = vmatprep.subr.mxu0 %v6003_v59 }
 0xe77   :  { %7027 = vmatpush3.msra.mxu0 %v6003_v59 }
 0xf0e   :  { %v6983_v4 = vpop.f32.mrf.mxu0 }
 0xf0f   :  { %v4538_v17 = vadd.f32 %v6983_v4, %v5663_v31  ;;  %v5999_v4 = vunpack.c.h.bf16 %v6165_v33 }
 0xf10   :  { %v4532_v46 = vpop.f32.mrf.mxu0 }
 0xf11   :  { %v4552_v44 = vmax.f32 %v4538_v17, 0.0  ;;  %v4533_v30 = vadd.f32 %v5663_v31, %v4532_v46  ;;  %v5998_v17 = vunpack.c.l.bf16 %v6165_v33  ;;  %v5668_v46 = vld [vmem:[%s9432_s2 + $0xb] ss:$0 sm:$0xff] }
 0xf13   :  { %v4556_v45 = vadd.f32 %v4552_v44, %v9078_v10  ;;  %v4551_v14 = vmax.f32 %v4533_v30, 0.0  ;;  %v5975_v10 = vunpack.c.h.bf16 %v6159_v48 }
 0xf15   :  { %4562 = vst.msk [vmem:[#allocation2 + $0xa] sm:$0x1f] %vm3944_vm0, %v4556_v45  ;;  %v4555_v13 = vadd.f32 %v4551_v14, %v9084_v1  ;;  %6995 = vmatprep.subr.mxu1 %v5975_v10  ;;  %v5971_v1 = vunpack.c.h.bf16 %v6158_v26  ;;  %v6164_v14 = vld [vmem:[%s9431_s1 + $0x268] sm:$0xff]  }
 0xf16   :  { %6996 = vmatpush3.msra.mxu1 %v5975_v10 }
 0xf17   :  { %4561 = vst.msk [vmem:[#allocation2 + $0x2] sm:$0xff] %vm753_vm8, %v4555_v13  ;;  %6997 = vmatprep.subr.mxu1 %v5974_v20 }
 0xf18   :  { %6998 = vmatpush3.msra.mxu1 %v5974_v20 }
 0xf19   :  { %6999 = vmatprep.subr.mxu1 %v5971_v1 }
 0xf1a   :  { %7000 = vmatpush3.msra.mxu1 %v5971_v1 }
 0xf1b   :  { %7001 = vmatprep.subr.mxu1 %v5970_v60 }
 0xf1c   :  { %7002 = vmatpush3.msra.mxu1 %v5970_v60 }
 0xf1d   :  { %7003 = vmatprep.subr.mxu1 %v5967_v63 }
 0xf1e   :  { %v4577_v2 = vld [vmem:[#allocation2 + $0x2] ss:$2 sm:$0x7f]  ;;  %v4570_v43 = vld [vmem:[#allocation2 + $0x1] ss:$2 sm:$0x7f]  ;;  %7004 = vmatpush3.msra.mxu1 %v5967_v63 }
 0xf1f   :  { %4579 = vrot.lane.b32.xlu1 %v4577_v2, %s7158_s14  ;;  %4572 = vrot.lane.b32.xlu0 %v4570_v43, %s7157_s13  ;;  %v4567_v32 = vld [vmem:[#allocation2] ss:$2 sm:$0x7f]  ;;  %v4584_v36 = vld [vmem:[#allocation2 + $0x3] ss:$2 sm:$0x7f]  ;;  %v5995_v43 = vunpack.c.h.bf16 %v6164_v14 }
 0xf20   :  { %4569 = vst.msk [vmem:[#allocation3] sm:$0x7f] %vm4568_vm5, %v4567_v32  ;;  %7005 = vmatprep.subr.mxu1 %v5966_v8  ;;  %v5994_v32 = vunpack.c.l.bf16 %v6164_v14  ;;  %v6179_v14 = vld [vmem:[%s9431_s1 + $0x2e0] sm:$0xff]  }
 0xf21   :  { %4731 = vst.msk [vmem:[#allocation2] sm:$0x1] %vm750_vm3, %v7154_v3  ;;  %4732 = vst.msk [vmem:[#allocation2 + $0x8] sm:$0x1] %vm750_vm3, %v7154_v3  ;;  %7006 = vmatpush3.msra.mxu1 %v5966_v8 }
 0xf22   :  { %7007 = vmatprep.subr.mxu1 %v5963_v9 }
 0xf23   :  { %4586 = vrot.lane.b32.xlu1 %v4584_v36, %s7159_s27  ;;  %7008 = vmatpush3.msra.mxu1 %v5963_v9  ;;  %v6162_v36 = vld [vmem:[%s9431_s1 + $0x258] sm:$0xff]   ;;  %v6171_v9 = vld [vmem:[%s9431_s1 + $0x2a0] sm:$0xff]  }
 0xf24   :  { %7009 = vmatprep.subr.mxu1 %v5962_v6  ;;  %v5987_v28 = vunpack.c.h.bf16 %v6162_v36  ;;  %v5986_v10 = vunpack.c.l.bf16 %v6162_v36  ;;  %v6022_v62 = vunpack.c.l.bf16 %v6171_v9  ;;  %v5672_v36 = vld [vmem:[%s9432_s2 + $0xd] ss:$0 sm:$0xff] }
 0xf25   :  { %7010 = vmatpush3.msra.mxu1 %v5962_v6 }
 0xf26   :  { %7011 = vmatprep.subr.mxu1 %v5959_v57 }
 0xf27   :  { %7012 = vmatpush3.msra.mxu1 %v5959_v57  ;;  %v5669_v57 = vld [vmem:[%s9432_s2 + $0xc] ss:$0 sm:$0xff] }
 0xf28   :  { %7013 = vmatprep.subr.mxu1 %v5958_v37 }
 0xf29   :  { %7014 = vmatpush3.msra.mxu1 %v5958_v37 }
 0xf35   :  { %v6986_v55 = vpop.f32.mrf.mxu0 }
 0xf36   :  { %v4548_v52 = vadd.f32 %v6986_v55, %v5663_v31 }
 0xf37   :  { %v4542_v21 = vpop.f32.mrf.mxu0 }
 0xf38   :  { %v4554_v35 = vmax.f32 %v4548_v52, 0.0  ;;  %v4543_v0 = vadd.f32 %v5663_v31, %v4542_v21  ;;  %v6002_v31 = vunpack.c.l.bf16 %v6166_v54 }
 0xf3a   :  { %v4558_v58 = vadd.f32 %v4554_v35, %v9104_v23  ;;  %v4553_v51 = vmax.f32 %v4543_v0, 0.0  ;;  %v6154_v23 = vld [vmem:[%s9431_s1 + $0x218] sm:$0xff]   ;;  %7028 = vmatprep.subr.mxu0 %v6002_v31  ;;  %v6173_v35 = vld [vmem:[%s9431_s1 + $0x2b0] sm:$0xff]   ;;  %v6172_v0 = vld [vmem:[%s9431_s1 + $0x2a8] sm:$0xff]  }
 0xf3b   :  { %v5955_v19 = vunpack.c.h.bf16 %v6154_v23  ;;  %7029 = vmatpush3.msra.mxu0 %v6002_v31  ;;  %v6031_v11 = vunpack.c.h.bf16 %v6173_v35  ;;  %v6026_v6 = vunpack.c.l.bf16 %v6172_v0 }
 0xf3c   :  { %4566 = vst.msk [vmem:[#allocation2 + $0x22] sm:$0x1f] %vm3944_vm0, %v4558_v58  ;;  %v4557_v38 = vadd.f32 %v4553_v51, %v9110_v29  ;;  %v5954_v29 = vunpack.c.l.bf16 %v6154_v23  ;;  %7030 = vmatprep.subr.mxu0 %v5999_v4  ;;  %v6030_v58 = vunpack.c.l.bf16 %v6173_v35  ;;  %v6027_v51 = vunpack.c.h.bf16 %v6172_v0 }
 0xf3d   :  { %7015 = vmatprep.subr.mxu1 %v5955_v19  ;;  %7031 = vmatpush3.msra.mxu0 %v5999_v4 }
 0xf3e   :  { %4565 = vst.msk [vmem:[#allocation2 + $0x1a] sm:$0xff] %vm753_vm8, %v4557_v38  ;;  %7016 = vmatpush3.msra.mxu1 %v5955_v19  ;;  %vm4589_vm8 = vcmask 1047296   ;;  %7032 = vmatprep.subr.mxu0 %v5998_v17  ;;  %v6023_v38 = vunpack.c.h.bf16 %v6171_v9 }
 0xf3f   :  { %7017 = vmatprep.subr.mxu1 %v5954_v29  ;;  %7033 = vmatpush3.msra.mxu0 %v5998_v17 }
 0xf40   :  { %7018 = vmatpush3.msra.mxu1 %v5954_v29  ;;  %7034 = vmatprep.subr.mxu0 %v5995_v43 }
 0xf41   :  { %7035 = vmatpush3.msra.mxu0 %v5995_v43  ;;  %7049 = vmatprep.subr.mxu1 %v6031_v11  ;;  %v6054_v43 = vunpack.c.l.bf16 %v6179_v14 }
 0xf42   :  { %7036 = vmatprep.subr.mxu0 %v5994_v32 }
 0xf43   :  { %7037 = vmatpush3.msra.mxu0 %v5994_v32 }
 0xf44   :  { %7038 = vmatprep.subr.mxu0 %v5991_v15 }
 0xf45   :  { %v4609_v42 = vld [vmem:[#allocation2 + $0x1b] ss:$2 sm:$0x7f]  ;;  %v4592_v47 = vld [vmem:[#allocation2 + $0x18] ss:$2 sm:$0x7f]  ;;  %7039 = vmatpush3.msra.mxu0 %v5991_v15 }
 0xf46   :  { %v4595_v39 = vld [vmem:[#allocation2 + $0x19] ss:$2 sm:$0x7f]  ;;  %4611 = vrot.lane.b32.xlu1 %v4609_v42, %s7159_s27  ;;  %4593 = vst.msk [vmem:[#allocation3 + $0x8] sm:$0x7f] %vm4568_vm5, %v4592_v47  ;;  %7040 = vmatprep.subr.mxu0 %v5990_v41 }
 0xf47   :  { %4597 = vrot.lane.b32.xlu0 %v4595_v39, %s7157_s13  ;;  %4735 = vst.msk [vmem:[#allocation2 + $0x18] sm:$0x1] %vm750_vm3, %v7154_v3  ;;  %v4602_v16 = vld [vmem:[#allocation2 + $0x1a] ss:$2 sm:$0x7f]  ;;  %7041 = vmatpush3.msra.mxu0 %v5990_v41 }
 0xf48   :  { %7042 = vmatprep.subr.mxu0 %v5987_v28  ;;  %v6170_v39 = vld [vmem:[%s9431_s1 + $0x298] sm:$0xff]  }
 0xf49   :  { %7043 = vmatpush3.msra.mxu0 %v5987_v28 }
 0xf4a   :  { %7044 = vmatprep.subr.mxu0 %v5986_v10 }
 0xf4b   :  { %4604 = vrot.lane.b32.xlu0 %v4602_v16, %s7158_s14  ;;  %7045 = vmatpush3.msra.mxu0 %v5986_v10 }
 0xf91   :  { %v4580_v53 = vpop.permute.xlu1 %4579  ;;  %v4573_v24 = vpop.permute.xlu0 %4572 }
 0xf92   :  { %4576 = vst.msk [vmem:[#allocation3] sm:$0x7f] %vm4575_vm6, %v4573_v24  ;;  %v6018_v24 = vunpack.c.l.bf16 %v6170_v39 }
 0xf93   :  { %4583 = vst.msk [vmem:[#allocation3] sm:$0x7f] %vm4582_vm7, %v4580_v53  ;;  %v6019_v53 = vunpack.c.h.bf16 %v6170_v39 }
 0xf95   :  { %v4587_v25 = vpop.permute.xlu1 %4586 }
 0xf96   :  { %4590 = vst.msk [vmem:[#allocation3] sm:$0x7f] %vm4589_vm8, %v4587_v25 }
 0xf9d   :  { %v4647_v18 = vld [vmem:[#allocation3] sm:$0xff] }
 0xf9e   :  { %7019 = vmatprep.mubr.f32.mxu1 %v4647_v18  ;;  %v6169_v18 = vld [vmem:[%s9431_s1 + $0x290] sm:$0xff]  }
 0xfb8   :  { %v4612_v5 = vpop.permute.xlu1 %4611 }
 0xfb9   :  { %v4598_v56 = vpop.permute.xlu0 %4597 }
 0xfba   :  { %4600 = vst.msk [vmem:[#allocation3 + $0x8] sm:$0x7f] %vm4575_vm6, %v4598_v56  ;;  %v6015_v56 = vunpack.c.h.bf16 %v6169_v18 }
 0xfbd   :  { %v4605_v27 = vpop.permute.xlu0 %4604 }
 0xfbe   :  { %4607 = vst.msk [vmem:[#allocation3 + $0x8] sm:$0x7f] %vm4582_vm7, %v4605_v27  ;;  %v6014_v27 = vunpack.c.l.bf16 %v6169_v18 }
 0xfbf   :  { %4614 = vst.msk [vmem:[#allocation3 + $0x8] sm:$0x7f] %vm4589_vm8, %v4612_v5  ;;  %v6168_v5 = vld [vmem:[%s9431_s1 + $0x288] sm:$0xff]  }
 0xfc0   :  { %v6010_v12 = vunpack.c.l.bf16 %v6168_v5 }
 0xfc6   :  { %v4648_v50 = vld [vmem:[#allocation3 + $0x8] sm:$0xff] }
 0xfc7   :  { %7020 = vmatmul.mubr.f32.vlgmr.msra.gmra.mxu1 %v4648_v50  ;;  %v6011_v50 = vunpack.c.h.bf16 %v6168_v5 }
 0xfc8   :  { %7050 = vmatpush3.msra.mxu1 %v6031_v11  ;;  %v6174_v11 = vld [vmem:[%s9431_s1 + $0x2b8] sm:$0xff]  }
 0xfc9   :  { %7051 = vmatprep.subr.mxu1 %v6030_v58 }
 0xfca   :  { %7052 = vmatpush3.msra.mxu1 %v6030_v58  ;;  %v6035_v58 = vunpack.c.h.bf16 %v6174_v11 }
 0xfcb   :  { %7053 = vmatprep.subr.mxu1 %v6027_v51 }
 0xfcc   :  { %7054 = vmatpush3.msra.mxu1 %v6027_v51 }
 0xfcd   :  { %7055 = vmatprep.subr.mxu1 %v6026_v6 }
 0xfce   :  { %7056 = vmatpush3.msra.mxu1 %v6026_v6  ;;  %v6034_v6 = vunpack.c.l.bf16 %v6174_v11 }
 0xfcf   :  { %7057 = vmatprep.subr.mxu1 %v6023_v38 }
 0xfd0   :  { %7058 = vmatpush3.msra.mxu1 %v6023_v38 }
 0xfd1   :  { %7059 = vmatprep.subr.mxu1 %v6022_v62 }
 0xfd2   :  { %7060 = vmatpush3.msra.mxu1 %v6022_v62 }
 0xfd3   :  { %7061 = vmatprep.subr.mxu1 %v6019_v53 }
 0xfd4   :  { %7062 = vmatpush3.msra.mxu1 %v6019_v53 }
 0xfd5   :  { %7063 = vmatprep.subr.mxu1 %v6018_v24 }
 0xfd6   :  { %7064 = vmatpush3.msra.mxu1 %v6018_v24 }
 0xfd7   :  { %7065 = vmatprep.subr.mxu1 %v6015_v56 }
 0xfd8   :  { %7066 = vmatpush3.msra.mxu1 %v6015_v56 }
 0xfd9   :  { %7067 = vmatprep.subr.mxu1 %v6014_v27 }
 0xfda   :  { %7068 = vmatpush3.msra.mxu1 %v6014_v27 }
 0xfdb   :  { %7069 = vmatprep.subr.mxu1 %v6011_v50 }
 0xfdc   :  { %7070 = vmatpush3.msra.mxu1 %v6011_v50 }
 0xfdd   :  { %7071 = vmatprep.subr.mxu1 %v6010_v12 }
 0xfde   :  { %7072 = vmatpush3.msra.mxu1 %v6010_v12 }
0x1087   :  { %v7021_v44 = vpop.f32.mrf.mxu1 }
0x1088   :  { %v9203_v30 = vadd.f32 %v7021_v44, %v5668_v46 }
0x1089   :  { %v4720_v45 = vpop.f32.mrf.mxu1 }
0x108a   :  { %v4730_v13 = vmax.f32 %v9203_v30, 0.0  ;;  %v9209_v2 = vadd.f32 %v5668_v46, %v4720_v45 }
0x108c   :  { %4736 = vst.msk [vmem:[#allocation2 + $0x11] sm:$0x7f] %vm4568_vm5, %v4730_v13  ;;  %v4729_v34 = vmax.f32 %v9209_v2, 0.0  ;;  %v6055_v2 = vunpack.c.h.bf16 %v6179_v14  ;;  %v5678_v14 = vld [vmem:[%s9432_s2 + $0xf] ss:$0 sm:$0xff] }
0x108e   :  { %4733 = vst.msk [vmem:[#allocation2 + $0x1] sm:$0x7f] %vm4568_vm5, %v4729_v34  ;;  %7076 = vmatprep.subr.mxu0 %v6055_v2 }
0x1093   :  { %v4759_v48 = vld [vmem:[#allocation2 + $0x12] sm:$0x7f] }
0x1094   :  { %v4751_v7 = vld [vmem:[#allocation2 + $0x10] sm:$0x7f]  ;;  %4885 = vst.msk [vmem:[#allocation2 + $0x18] sm:$0x1] %vm750_vm3, %v7154_v3 }
0x1095   :  { %4752 = vst.msk [vmem:[#allocation3 + $0x8] sm:$0x7f] %vm4568_vm5, %v4751_v7  ;;  %v4745_v26 = vld [vmem:[#allocation2 + $0x2] sm:$0x7f]  ;;  %v4753_v61 = vld [vmem:[#allocation2 + $0x11] sm:$0x7f] }
0x1096   :  { %4884 = vst.msk [vmem:[#allocation2 + $0x10] sm:$0x1] %vm750_vm3, %v7154_v3  ;;  %v4739_v20 = vld [vmem:[#allocation2 + $0x1] sm:$0x7f]  ;;  %4747 = vrot.lane.b32.xlu1 %v4745_v26, %s7158_s14  ;;  %4882 = vst.msk [vmem:[#allocation2 + $0x8] sm:$0x1] %vm750_vm3, %v7154_v3 }
0x1097   :  { %v4737_v1 = vld [vmem:[#allocation2] sm:$0x7f]  ;;  %4741 = vrot.lane.b32.xlu0 %v4739_v20, %s7157_s13 }
0x1098   :  { %4738 = vst.msk [vmem:[#allocation3] sm:$0x7f] %vm4568_vm5, %v4737_v1 }
0x1099   :  { %4881 = vst.msk [vmem:[#allocation2] sm:$0x1] %vm750_vm3, %v7154_v3 }
0x109a   :  { %4761 = vrot.lane.b32.xlu1 %v4759_v48, %s7158_s14 }
0x109b   :  { %4755 = vrot.lane.b32.xlu0 %v4753_v61, %s7157_s13  ;;  %v6176_v61 = vld [vmem:[%s9431_s1 + $0x2c8] sm:$0xff]  }
0x1108   :  { %v4748_v60 = vpop.permute.xlu1 %4747 }
0x1109   :  { %v4742_v63 = vpop.permute.xlu0 %4741 }
0x110a   :  { %4744 = vst.msk [vmem:[#allocation3] sm:$0x7f] %vm4575_vm6, %v4742_v63 }
0x110b   :  { %4750 = vst.msk [vmem:[#allocation3] sm:$0x7f] %vm4582_vm7, %v4748_v60 }
0x110c   :  { %v4762_v8 = vpop.permute.xlu1 %4761 }
0x110d   :  { %v4756_v55 = vpop.permute.xlu0 %4755 }
0x110e   :  { %4758 = vst.msk [vmem:[#allocation3 + $0x8] sm:$0x7f] %vm4575_vm6, %v4756_v55  ;;  %v6042_v55 = vunpack.c.l.bf16 %v6176_v61 }
0x110f   :  { %4764 = vst.msk [vmem:[#allocation3 + $0x8] sm:$0x7f] %vm4582_vm7, %v4762_v8  ;;  %v6043_v8 = vunpack.c.h.bf16 %v6176_v61 }
0x1112   :  { %v4789_v52 = vld [vmem:[#allocation3] sm:$0xff] }
0x1113   :  { %7046 = vmatprep.mubr.msk.f32.mxu0 %vm1171_vm11, %v4789_v52 }
0x1116   :  { %v4790_v21 = vld [vmem:[#allocation3 + $0x8] sm:$0xff] }
0x1117   :  { %7047 = vmatmul.mubr.msk.f32.vlgmr.msra.gmra.mxu0 %vm1171_vm11, %v4790_v21  ;;  %v6175_v21 = vld [vmem:[%s9431_s1 + $0x2c0] sm:$0xff]  }
0x1118   :  { %7077 = vmatpush3.msra.mxu0 %v6055_v2  ;;  %v6039_v35 = vunpack.c.h.bf16 %v6175_v21  ;;  %v6038_v0 = vunpack.c.l.bf16 %v6175_v21 }
0x1119   :  { %7078 = vmatprep.subr.mxu0 %v6054_v43 }
0x111a   :  { %7079 = vmatpush3.msra.mxu0 %v6054_v43 }
0x11d7   :  { %v7048_v37 = vpop.f32.mrf.mxu0 }
0x11d8   :  { %v4874_v23 = vadd.f32 %v7048_v37, %v5669_v57 }
0x11d9   :  { %v4868_v19 = vpop.f32.mrf.mxu0 }
0x11da   :  { %v4878_v29 = vmax.f32 %v4874_v23, 0.0  ;;  %v4869_v42 = vadd.f32 %v5669_v57, %v4868_v19 }
0x11dc   :  { %v9261_v47 = vadd.f32 %v4878_v29, %v4730_v13  ;;  %v4877_v16 = vmax.f32 %v4869_v42, 0.0  ;;  %v6178_v13 = vld [vmem:[%s9431_s1 + $0x2d8] sm:$0xff]  }
0x11dd   :  { %v6051_v32 = vunpack.c.h.bf16 %v6178_v13  ;;  %v6050_v49 = vunpack.c.l.bf16 %v6178_v13 }
0x11de   :  { %4886 = vst.msk [vmem:[#allocation2 + $0x11] sm:$0x7f] %vm4568_vm5, %v9261_v47  ;;  %v9267_v25 = vadd.f32 %v4877_v16, %v4729_v34  ;;  %v6177_v34 = vld [vmem:[%s9431_s1 + $0x2d0] sm:$0xff]   ;;  %v6180_v16 = vld [vmem:[%s9431_s1 + $0x2e8] sm:$0xff]  }
0x11df   :  { %7080 = vmatprep.subr.mxu0 %v6051_v32  ;;  %v6047_v15 = vunpack.c.h.bf16 %v6177_v34  ;;  %v6046_v41 = vunpack.c.l.bf16 %v6177_v34  ;;  %v6059_v53 = vunpack.c.h.bf16 %v6180_v16  ;;  %v6058_v24 = vunpack.c.l.bf16 %v6180_v16 }
0x11e0   :  { %4883 = vst.msk [vmem:[#allocation2 + $0x1] sm:$0x7f] %vm4568_vm5, %v9267_v25  ;;  %7081 = vmatpush3.msra.mxu0 %v6051_v32 }
0x11e1   :  { %7082 = vmatprep.subr.mxu0 %v6050_v49  ;;  %7103 = vmatprep.subr.mxu1 %v6059_v53 }
0x11e2   :  { %7083 = vmatpush3.msra.mxu0 %v6050_v49  ;;  %v6183_v49 = vld [vmem:[%s9431_s1 + $0x300] sm:$0xff]  }
0x11e3   :  { %7084 = vmatprep.subr.mxu0 %v6047_v15 }
0x11e4   :  { %7085 = vmatpush3.msra.mxu0 %v6047_v15 }
0x11e5   :  { %v4909_v40 = vld [vmem:[#allocation2 + $0x12] sm:$0x7f]  ;;  %7086 = vmatprep.subr.mxu0 %v6046_v41 }
0x11e6   :  { %v4901_v54 = vld [vmem:[#allocation2 + $0x10] sm:$0x7f]  ;;  %5037 = vst.msk [vmem:[#allocation2 + $0x18] sm:$0x1] %vm750_vm3, %v7154_v3  ;;  %7087 = vmatpush3.msra.mxu0 %v6046_v41 }
0x11e7   :  { %4902 = vst.msk [vmem:[#allocation3 + $0x8] sm:$0x7f] %vm4568_vm5, %v4901_v54  ;;  %v4895_v22 = vld [vmem:[#allocation2 + $0x2] sm:$0x7f]  ;;  %v4903_v31 = vld [vmem:[#allocation2 + $0x11] sm:$0x7f]  ;;  %7088 = vmatprep.subr.mxu0 %v6043_v8 }
0x11e8   :  { %5036 = vst.msk [vmem:[#allocation2 + $0x10] sm:$0x1] %vm750_vm3, %v7154_v3  ;;  %v4889_v59 = vld [vmem:[#allocation2 + $0x1] sm:$0x7f]  ;;  %4897 = vrot.lane.b32.xlu1 %v4895_v22, %s7158_s14  ;;  %5033 = vst.msk [vmem:[#allocation2 + $0x8] sm:$0x1] %vm750_vm3, %v7154_v3  ;;  %7089 = vmatpush3.msra.mxu0 %v6043_v8 }
0x11e9   :  { %v4887_v33 = vld [vmem:[#allocation2] sm:$0x7f]  ;;  %4891 = vrot.lane.b32.xlu0 %v4889_v59, %s7157_s13  ;;  %7090 = vmatprep.subr.mxu0 %v6042_v55 }
0x11ea   :  { %4888 = vst.msk [vmem:[#allocation3] sm:$0x7f] %vm4568_vm5, %v4887_v33  ;;  %7091 = vmatpush3.msra.mxu0 %v6042_v55  ;;  %v6186_v33 = vld [vmem:[%s9431_s1 + $0x318] sm:$0xff]  }
0x11eb   :  { %5032 = vst.msk [vmem:[#allocation2] sm:$0x1] %vm750_vm3, %v7154_v3  ;;  %7092 = vmatprep.subr.mxu0 %v6039_v35 }
0x11ec   :  { %4911 = vrot.lane.b32.xlu1 %v4909_v40, %s7158_s14  ;;  %7093 = vmatpush3.msra.mxu0 %v6039_v35 }
0x11ed   :  { %4905 = vrot.lane.b32.xlu0 %v4903_v31, %s7157_s13  ;;  %7094 = vmatprep.subr.mxu0 %v6038_v0  ;;  %v6185_v31 = vld [vmem:[%s9431_s1 + $0x310] sm:$0xff]  }
0x11ee   :  { %7095 = vmatpush3.msra.mxu0 %v6038_v0 }
0x11ef   :  { %7096 = vmatprep.subr.mxu0 %v6035_v58 }
0x11f0   :  { %7097 = vmatpush3.msra.mxu0 %v6035_v58 }
0x11f1   :  { %7098 = vmatprep.subr.mxu0 %v6034_v6 }
0x11f2   :  { %7099 = vmatpush3.msra.mxu0 %v6034_v6 }
0x125a   :  { %v4898_v4 = vpop.permute.xlu1 %4897 }
0x125b   :  { %v4892_v17 = vpop.permute.xlu0 %4891 }
0x125c   :  { %4894 = vst.msk [vmem:[#allocation3] sm:$0x7f] %vm4575_vm6, %v4892_v17  ;;  %v6082_v17 = vunpack.c.l.bf16 %v6186_v33 }
0x125d   :  { %4900 = vst.msk [vmem:[#allocation3] sm:$0x7f] %vm4582_vm7, %v4898_v4  ;;  %v6083_v4 = vunpack.c.h.bf16 %v6186_v33 }
0x125e   :  { %v4912_v46 = vpop.permute.xlu1 %4911 }
0x125f   :  { %v4906_v44 = vpop.permute.xlu0 %4905  ;;  %7110 = vmatprep.subr.mxu0 %v6083_v4 }
0x1260   :  { %4908 = vst.msk [vmem:[#allocation3 + $0x8] sm:$0x7f] %vm4575_vm6, %v4906_v44  ;;  %v6078_v44 = vunpack.c.l.bf16 %v6185_v31 }
0x1261   :  { %4914 = vst.msk [vmem:[#allocation3 + $0x8] sm:$0x7f] %vm4582_vm7, %v4912_v46  ;;  %v6079_v46 = vunpack.c.h.bf16 %v6185_v31 }
0x1264   :  { %v4939_v30 = vld [vmem:[#allocation3] sm:$0xff] }
0x1265   :  { %7073 = vmatprep.mubr.msk.f32.mxu1 %vm1171_vm11, %v4939_v30 }
0x1268   :  { %v4940_v45 = vld [vmem:[#allocation3 + $0x8] sm:$0xff] }
0x1269   :  { %7074 = vmatmul.mubr.msk.f32.vlgmr.msra.gmra.mxu1 %vm1171_vm11, %v4940_v45 }
0x126a   :  { %7104 = vmatpush3.msra.mxu1 %v6059_v53 }
0x126b   :  { %7105 = vmatprep.subr.mxu1 %v6058_v24 }
0x126c   :  { %7106 = vmatpush3.msra.mxu1 %v6058_v24 }
0x1329   :  { %v7075_v28 = vpop.f32.mrf.mxu1 }
0x132a   :  { %v5024_v48 = vadd.f32 %v7075_v28, %v5672_v36  ;;  %v6070_v28 = vunpack.c.l.bf16 %v6183_v49 }
0x132b   :  { %v5018_v7 = vpop.f32.mrf.mxu1 }
0x132c   :  { %v5028_v10 = vmax.f32 %v5024_v48, 0.0  ;;  %v5019_v26 = vadd.f32 %v5672_v36, %v5018_v7  ;;  %v6071_v36 = vunpack.c.h.bf16 %v6183_v49  ;;  %v6182_v7 = vld [vmem:[%s9431_s1 + $0x2f8] sm:$0xff]  }
0x132e   :  { %v9310_v20 = vadd.f32 %v5028_v10, %v9261_v47  ;;  %v5027_v1 = vmax.f32 %v5019_v26, 0.0  ;;  %v6067_v10 = vunpack.c.h.bf16 %v6182_v7  ;;  %v6066_v26 = vunpack.c.l.bf16 %v6182_v7 }
0x1330   :  { %v5035_v60 = vmax.f32 %v9310_v20, 0.0  ;;  %v9317_v63 = vadd.f32 %v5027_v1, %v9267_v25  ;;  %v5675_v25 = vld [vmem:[%s9432_s2 + $0xe] ss:$0 sm:$0xff]  ;;  %v6181_v1 = vld [vmem:[%s9431_s1 + $0x2f0] sm:$0xff]  }
0x1331   :  { %v6063_v61 = vunpack.c.h.bf16 %v6181_v1  ;;  %v6062_v8 = vunpack.c.l.bf16 %v6181_v1 }
0x1332   :  { %5038 = vst.msk [vmem:[#allocation2 + $0x11] sm:$0x7f] %vm4568_vm5, %v5035_v60  ;;  %v5031_v52 = vmax.f32 %v9317_v63, 0.0 }
0x1334   :  { %5034 = vst.msk [vmem:[#allocation2 + $0x1] sm:$0x7f] %vm4568_vm5, %v5031_v52 }
0x1339   :  { %v5061_v51 = vld [vmem:[#allocation2 + $0x12] sm:$0x7f] }
0x133a   :  { %v5053_v9 = vld [vmem:[#allocation2 + $0x10] sm:$0x7f]  ;;  %5289 = vst.msk [vmem:[#allocation2 + $0x18] sm:$0x1] %vm750_vm3, %v7154_v3 }
0x133b   :  { %5054 = vst.msk [vmem:[#allocation3 + $0x8] sm:$0x7f] %vm4568_vm5, %v5053_v9  ;;  %v5047_v38 = vld [vmem:[#allocation2 + $0x2] sm:$0x7f]  ;;  %v5055_v37 = vld [vmem:[#allocation2 + $0x11] sm:$0x7f] }
0x133c   :  { %5288 = vst.msk [vmem:[#allocation2 + $0x10] sm:$0x1] %vm750_vm3, %v7154_v3  ;;  %v5041_v62 = vld [vmem:[#allocation2 + $0x1] sm:$0x7f]  ;;  %5049 = vrot.lane.b32.xlu1 %v5047_v38, %s7158_s14 }
0x133d   :  { %v5039_v57 = vld [vmem:[#allocation2] sm:$0x7f]  ;;  %5043 = vrot.lane.b32.xlu0 %v5041_v62, %s7157_s13 }
0x133e   :  { %5040 = vst.msk [vmem:[#allocation3] sm:$0x7f] %vm4568_vm5, %v5039_v57  ;;  %v6187_v62 = vld [vmem:[%s9431_s1 + $0x320] sm:$0xff]  }
0x133f   :  { %v6087_v57 = vunpack.c.h.bf16 %v6187_v62 }
0x1340   :  { %5063 = vrot.lane.b32.xlu1 %v5061_v51, %s7158_s14 }
0x1341   :  { %5057 = vrot.lane.b32.xlu0 %v5055_v37, %s7157_s13  ;;  %v6086_v37 = vunpack.c.l.bf16 %v6187_v62  ;;  %7137 = vmatprep.subr.mxu1 %v6087_v57 }
0x13ae   :  { %v5050_v23 = vpop.permute.xlu1 %5049 }
0x13af   :  { %v5044_v19 = vpop.permute.xlu0 %5043 }
0x13b0   :  { %5046 = vst.msk [vmem:[#allocation3] sm:$0x7f] %vm4575_vm6, %v5044_v19 }
0x13b1   :  { %5052 = vst.msk [vmem:[#allocation3] sm:$0x7f] %vm4582_vm7, %v5050_v23  ;;  %v5681_v23 = vld [vmem:[%s9432_s2 + $0x10] ss:$0 sm:$0xff] }
0x13b2   :  { %v5064_v29 = vpop.permute.xlu1 %5063 }
0x13b3   :  { %v5058_v42 = vpop.permute.xlu0 %5057 }
0x13b4   :  { %5060 = vst.msk [vmem:[#allocation3 + $0x8] sm:$0x7f] %vm4575_vm6, %v5058_v42 }
0x13b5   :  { %5066 = vst.msk [vmem:[#allocation3 + $0x8] sm:$0x7f] %vm4582_vm7, %v5064_v29 }
0x13b8   :  { %v5091_v39 = vld [vmem:[#allocation3] sm:$0xff] }
0x13b9   :  { %7100 = vmatprep.mubr.msk.f32.mxu0 %vm1171_vm11, %v5091_v39 }
0x13bc   :  { %v5092_v47 = vld [vmem:[#allocation3 + $0x8] sm:$0xff] }
0x13bd   :  { %7101 = vmatmul.mubr.msk.f32.vlgmr.msra.gmra.mxu0 %vm1171_vm11, %v5092_v47 }
0x13be   :  { %7111 = vmatpush3.msra.mxu0 %v6083_v4 }
0x13bf   :  { %7112 = vmatprep.subr.mxu0 %v6082_v17 }
0x13c0   :  { %7113 = vmatpush3.msra.mxu0 %v6082_v17 }
0x13c1   :  { %7114 = vmatprep.subr.mxu0 %v6079_v46 }
0x13c2   :  { %7115 = vmatpush3.msra.mxu0 %v6079_v46 }
0x13c3   :  { %7116 = vmatprep.subr.mxu0 %v6078_v44 }
0x13c4   :  { %7117 = vmatpush3.msra.mxu0 %v6078_v44 }
0x147d   :  { %v7102_v18 = vpop.f32.mrf.mxu0 }
0x147e   :  { %v5176_v56 = vadd.f32 %v7102_v18, %v5675_v25 }
0x147f   :  { %v5170_v27 = vpop.f32.mrf.mxu0 }
0x1480   :  { %v5182_v5 = vmax.f32 %v5176_v56, 0.0  ;;  %v5171_v50 = vadd.f32 %v5675_v25, %v5170_v27  ;;  %v5684_v56 = vld [vmem:[%s9432_s2 + $0x11] ss:$0 sm:$0xff] }
0x1482   :  { %v5179_v40 = vmax.f32 %v5171_v50, 0.0  ;;  %5183 = vst.msk [vmem:[#allocation2 + $0x8] sm:$0x7f] %vm5180_vm9, %v5182_v5 }
0x1484   :  { %5181 = vst.msk [vmem:[#allocation2] sm:$0x7f] %vm5180_vm9, %v5179_v40 }
0x1489   :  { %v5186_v54 = vld [vmem:[#allocation2 + $0x8] sm:$0x7f] }
0x148a   :  { %5187 = vst.msk [vmem:[#allocation3 + $0x8] sm:$0x7f] %vm5180_vm9, %v5186_v54 }
0x148b   :  { %5285 = vst.msk [vmem:[#allocation2 + $0x8] sm:$0x1] %vm750_vm3, %v7154_v3  ;;  %v5184_v12 = vld [vmem:[#allocation2] sm:$0x7f] }
0x148c   :  { %5185 = vst.msk [vmem:[#allocation3] sm:$0x7f] %vm5180_vm9, %v5184_v12 }
0x148d   :  { %5284 = vst.msk [vmem:[#allocation2] sm:$0x1] %vm750_vm3, %v7154_v3  ;;  %v6184_v3 = vld [vmem:[%s9431_s1 + $0x308] sm:$0xff]  }
0x148e   :  { %v6075_v30 = vunpack.c.h.bf16 %v6184_v3  ;;  %v6074_v45 = vunpack.c.l.bf16 %v6184_v3 }
0x1490   :  { %7118 = vmatprep.subr.mxu0 %v6075_v30 }
0x1491   :  { %v5193_v59 = vld [vmem:[#allocation3 + $0x8] sm:$0xff]  ;;  %7119 = vmatpush3.msra.mxu0 %v6075_v30 }
0x1492   :  { %7120 = vmatprep.subr.mxu0 %v6074_v45 }
0x1493   :  { %v5192_v22 = vld [vmem:[#allocation3] sm:$0xff]  ;;  %7121 = vmatpush3.msra.mxu0 %v6074_v45 }
0x1494   :  { %7107 = vmatprep.mubr.msk.f32.mxu1 %vm5199_vm10, %v5192_v22  ;;  %7122 = vmatprep.subr.mxu0 %v6071_v36 }
0x1495   :  { %7108 = vmatmul.mubr.msk.f32.vlgmr.msra.gmra.mxu1 %vm5199_vm10, %v5193_v59  ;;  %7123 = vmatpush3.msra.mxu0 %v6071_v36 }
0x1496   :  { %7124 = vmatprep.subr.mxu0 %v6070_v28  ;;  %7138 = vmatpush3.msra.mxu1 %v6087_v57 }
0x1497   :  { %7125 = vmatpush3.msra.mxu0 %v6070_v28  ;;  %7139 = vmatprep.subr.mxu1 %v6086_v37 }
0x1498   :  { %7126 = vmatprep.subr.mxu0 %v6067_v10  ;;  %7140 = vmatpush3.msra.mxu1 %v6086_v37 }
0x1499   :  { %7127 = vmatpush3.msra.mxu0 %v6067_v10 }
0x149a   :  { %7128 = vmatprep.subr.mxu0 %v6066_v26 }
0x149b   :  { %7129 = vmatpush3.msra.mxu0 %v6066_v26 }
0x149c   :  { %7130 = vmatprep.subr.mxu0 %v6063_v61 }
0x149d   :  { %7131 = vmatpush3.msra.mxu0 %v6063_v61 }
0x149e   :  { %7132 = vmatprep.subr.mxu0 %v6062_v8 }
0x149f   :  { %7133 = vmatpush3.msra.mxu0 %v6062_v8 }
0x1555   :  { %v7109_v13 = vpop.f32.mrf.mxu1 }
0x1556   :  { %v5278_v2 = vadd.f32 %v7109_v13, %v5678_v14 }
0x1557   :  { %v5272_v43 = vpop.f32.mrf.mxu1 }
0x1558   :  { %v9373_v32 = vadd.f32 %v5278_v2, %v9310_v20  ;;  %v5273_v34 = vadd.f32 %v5678_v14, %v5272_v43 }
0x155a   :  { %v5287_v15 = vmax.f32 %v9373_v32, 0.0  ;;  %v9380_v41 = vadd.f32 %v5273_v34, %v9317_v63 }
0x155c   :  { %5290 = vst.msk [vmem:[#allocation2 + $0x11] sm:$0x7f] %vm4568_vm5, %v5287_v15  ;;  %v5283_v48 = vmax.f32 %v9380_v41, 0.0 }
0x155e   :  { %5286 = vst.msk [vmem:[#allocation2 + $0x1] sm:$0x7f] %vm4568_vm5, %v5283_v48 }
0x1563   :  { %v5305_v60 = vld [vmem:[#allocation2 + $0x10] sm:$0x7f] }
0x1564   :  { %5306 = vst.msk [vmem:[#allocation3 + $0x8] sm:$0x7f] %vm4568_vm5, %v5305_v60  ;;  %v5313_v35 = vld [vmem:[#allocation2 + $0x12] sm:$0x7f] }
0x1565   :  { %v5299_v55 = vld [vmem:[#allocation2 + $0x2] sm:$0x7f]  ;;  %v5307_v0 = vld [vmem:[#allocation2 + $0x11] sm:$0x7f] }
0x1566   :  { %v5293_v52 = vld [vmem:[#allocation2 + $0x1] sm:$0x7f]  ;;  %5301 = vrot.lane.b32.xlu1 %v5299_v55, %s7158_s14 }
0x1567   :  { %v5291_v21 = vld [vmem:[#allocation2] sm:$0x7f]  ;;  %5295 = vrot.lane.b32.xlu0 %v5293_v52, %s7157_s13 }
0x1568   :  { %5292 = vst.msk [vmem:[#allocation3] sm:$0x7f] %vm4568_vm5, %v5291_v21 }
0x156a   :  { %5315 = vrot.lane.b32.xlu1 %v5313_v35, %s7158_s14 }
0x156b   :  { %5309 = vrot.lane.b32.xlu0 %v5307_v0, %s7157_s13 }
0x15d8   :  { %v5302_v11 = vpop.permute.xlu1 %5301 }
0x15d9   :  { %v5296_v58 = vpop.permute.xlu0 %5295 }
0x15da   :  { %5298 = vst.msk [vmem:[#allocation3] sm:$0x7f] %vm4575_vm6, %v5296_v58 }
0x15db   :  { %5304 = vst.msk [vmem:[#allocation3] sm:$0x7f] %vm4582_vm7, %v5302_v11 }
0x15dc   :  { %v5316_v51 = vpop.permute.xlu1 %5315 }
0x15dd   :  { %v5310_v9 = vpop.permute.xlu0 %5309 }
0x15de   :  { %5312 = vst.msk [vmem:[#allocation3 + $0x8] sm:$0x7f] %vm4575_vm6, %v5310_v9 }
0x15df   :  { %5318 = vst.msk [vmem:[#allocation3 + $0x8] sm:$0x7f] %vm4582_vm7, %v5316_v51 }
0x15e2   :  { %v5343_v6 = vld [vmem:[#allocation3] sm:$0xff] }
0x15e3   :  { %7134 = vmatprep.mubr.msk.f32.mxu0 %vm1171_vm11, %v5343_v6 }
0x15e6   :  { %v5344_v38 = vld [vmem:[#allocation3 + $0x8] sm:$0xff] }
0x15e7   :  { %7135 = vmatmul.mubr.msk.f32.vlgmr.msra.gmra.mxu0 %vm1171_vm11, %v5344_v38 }
0x16a7   :  { %v7136_v19 = vpop.f32.mrf.mxu0 }
0x16a8   :  { %v5428_v29 = vadd.f32 %v7136_v19, %v5681_v23 }
0x16a9   :  { %v5422_v42 = vpop.f32.mrf.mxu0 }
0x16aa   :  { %v5433_v39 = vmax.f32 %v5428_v29, 0.0  ;;  %v5423_v47 = vadd.f32 %v5681_v23, %v5422_v42 }
0x16ac   :  { %5434 = vst.msk [vmem:[#allocation2 + $0x8] sm:$0x7f] %vm5180_vm9, %v5433_v39  ;;  %v5431_v16 = vmax.f32 %v5423_v47, 0.0 }
0x16ae   :  { %5432 = vst.msk [vmem:[#allocation2] sm:$0x7f] %vm5180_vm9, %v5431_v16 }
0x16b3   :  { %v5437_v53 = vld [vmem:[#allocation2 + $0x8] sm:$0x7f] }
0x16b4   :  { %5438 = vst.msk [vmem:[#allocation3 + $0x8] sm:$0x7f] %vm5180_vm9, %v5437_v53 }
0x16b5   :  { %v5435_v24 = vld [vmem:[#allocation2] sm:$0x7f] }
0x16b6   :  { %5436 = vst.msk [vmem:[#allocation3] sm:$0x7f] %vm5180_vm9, %v5435_v24 }
0x16bb   :  { %v5444_v18 = vld [vmem:[#allocation3 + $0x8] sm:$0xff] }
0x16bd   :  { %v5443_v25 = vld [vmem:[#allocation3] sm:$0xff] }
0x16be   :  { %7141 = vmatprep.mubr.msk.f32.mxu1 %vm5199_vm10, %v5443_v25 }
0x16bf   :  { %7142 = vmatmul.mubr.msk.f32.vlgmr.msra.gmra.mxu1 %vm5199_vm10, %v5444_v18 }
0x177f   :  { %v7143_v27 = vpop.f32.mrf.mxu1 }
0x1780   :  { %v5528_v5 = vadd.f32 %v7143_v27, %v5684_v56 }
0x1781   :  { %v5522_v50 = vpop.f32.mrf.mxu1 }
0x1782   :  { %v5532_v40 = vadd.f32 %v5528_v5, %v9373_v32  ;;  %v5523_v54 = vadd.f32 %v5684_v56, %v5522_v50 }
0x1784   :  { %v5536_v12 = vmax.f32 %v5532_v40, 0.0  ;;  %v5531_v22 = vadd.f32 %v5523_v54, %v9380_v41 }
0x1786   :  { %v5537_v59 = vadd.f32 %v5536_v12, %v9310_v20  ;;  %v5533_v33 = vmax.f32 %v5531_v22, 0.0 }
0x1788   :  { %5687 = vst.msk [vmem:[%s9433_s3 + $0x8] sm:$0x7f] %vm4568_vm5, %v5537_v59  ;;  %v5534_v31 = vadd.f32 %v5533_v33, %v9317_v63 }
0x178a   :  { %5535 = vst.msk [vmem:[%s9433_s3] sm:$0x7f] %vm4568_vm5, %v5534_v31 }

</bundles_post_ra>
